<compile_context>
chip_gen: v7x
topology: tpu7x:2x2x1
jax: 0.10.0
libtpu: 0.0.40
codegen_flags: <defaults>
</compile_context>

<pallas_src>
import functools
import math

import jax
import jax.numpy as jnp
from jax.experimental import pallas as pl
from jax.experimental.pallas import tpu as pltpu

# ----------------------------- config (small) -----------------------------
B = 2              # batch
T = 8              # sequence length
CHAR_VOCAB = 32    # len(chars)
CHAR_EMBED = 32    # orig 128
NHID = 64          # per-direction GRU hidden (orig 512); 2*NHID = 128 lane-dense
NLAYER = 2         # orig 6 (bidirectional GRU stack)
HIDDEN = 128       # bert_config.hidden_size (orig 768) — lane-dense
NHEADS = 2
DHEAD = HIDDEN // NHEADS
FFN = 256
BERT_LAYERS = 2
BERT_VOCAB = 32    # bert_config.vocab_size
VOCAB_PAD = 128    # decoder output padded to a lane-dense width, sliced at the end
MAX_POS = 64
LN_EPS = 1e-12


# ------------------------------ in-kernel helpers ------------------------------
def _ln(x, g, b, eps):
    """LayerNorm over the last dim (f32)."""
    mu = jnp.mean(x, axis=-1, keepdims=True)
    var = jnp.mean((x - mu) ** 2, axis=-1, keepdims=True)
    return (x - mu) * jax.lax.rsqrt(var + eps) * g + b


def _bf16_dot(a, w):
    """bf16 MXU matmul with f32 accumulation."""
    return jnp.dot(a.astype(jnp.bfloat16), w.astype(jnp.bfloat16),
                   preferred_element_type=jnp.float32)


# ------------------------------ Pallas kernels ------------------------------
def _bigru_layer_kernel(x_ref,
                        wih_f_ref, whh_f_ref, bih_f_ref, bhh_f_ref,
                        wih_b_ref, whh_b_ref, bih_b_ref, bhh_b_ref,
                        o_ref,
                        xg_f, xg_b, hs_f, hs_b,
                        *, H, Tn, Bn):
    """Fused bidirectional GRU layer (PyTorch gate order r, z, n).

    x_ref: (B, T, D).  Computes x @ W_ih^T + b_ih for both directions in one
    shot, then runs both time recurrences inside a single fori_loop (forward
    at step s, backward at step T-1-s), keeping hidden states as loop carries
    and per-time outputs in VMEM scratch.  Writes (B, T, 2H) lane-dense output.
    """
    x = x_ref[...]                                               # (B, T, D)
    D = x.shape[-1]
    xt = jnp.transpose(x, (1, 0, 2)).reshape(Tn * Bn, D)         # time-major rows

    # Input-gate projections for both directions (fused bf16 MXU matmuls).
    xg_f[...] = (_bf16_dot(xt, wih_f_ref[...]) + bih_f_ref[...]).reshape(Tn, Bn, 3 * H)
    xg_b[...] = (_bf16_dot(xt, wih_b_ref[...]) + bih_b_ref[...]).reshape(Tn, Bn, 3 * H)

    whh_f = whh_f_ref[...]
    whh_b = whh_b_ref[...]
    bhh_f = bhh_f_ref[...]
    bhh_b = bhh_b_ref[...]

    def cell(gx, h, whh, bhh):
        gh = _bf16_dot(h, whh) + bhh                             # (B, 3H)
        r = jax.nn.sigmoid(gx[:, :H] + gh[:, :H])
        z = jax.nn.sigmoid(gx[:, H:2 * H] + gh[:, H:2 * H])
        n = jnp.tanh(gx[:, 2 * H:] + r * gh[:, 2 * H:])
        return (1.0 - z) * n + z * h

    def step(s, carry):
        h_f, h_b = carry
        tb = Tn - 1 - s
        h_f = cell(xg_f[s], h_f, whh_f, bhh_f)
        h_b = cell(xg_b[tb], h_b, whh_b, bhh_b)
        hs_f[s] = h_f
        hs_b[tb] = h_b
        return h_f, h_b

    h0 = jnp.zeros((Bn, H), jnp.float32)
    jax.lax.fori_loop(0, Tn, step, (h0, h0), unroll=True)

    out = jnp.concatenate([hs_f[...], hs_b[...]], axis=-1)       # (T, B, 2H)
    o_ref[...] = jnp.transpose(out, (1, 0, 2))                   # (B, T, 2H)


def _embed_kernel(feat_ref, w_ref, b_ref, pos_ref, g_ref, beta_ref, o_ref, *, Bn, eps):
    """linear(2*nhid -> hidden) + positional embedding add + embedding LayerNorm."""
    x = _bf16_dot(feat_ref[...], w_ref[...]) + b_ref[...]        # (B*T, H)
    pos = pos_ref[...]                                           # (T, H)
    x = x + jnp.concatenate([pos] * Bn, axis=0)                  # broadcast over batch
    # TODO(synk): token-type embeddings omitted (all-zero segment ids assumed).
    o_ref[...] = _ln(x, g_ref[...], beta_ref[...], eps)


def _bert_layer_kernel(x_ref, wqkv_ref, bqkv_ref, wo_ref, bo_ref,
                       ln1_g_ref, ln1_b_ref, w1_ref, b1_ref, w2_ref, b2_ref,
                       ln2_g_ref, ln2_b_ref, o_ref,
                       *, Bn, Tn, nheads, dhead, eps):
    """One full BERT encoder layer as a single kernel.

    Fused QKV projection, all-heads attention (static loop over B*NHEADS),
    output projection + residual + LN1, FFN (gelu) + residual + LN2.
    x_ref / o_ref: (B*T, H).
    """
    x = x_ref[...]                                               # (B*T, H)
    H = x.shape[-1]

    qkv = _bf16_dot(x, wqkv_ref[...]) + bqkv_ref[...]            # (B*T, 3H)
    q = qkv[:, :H]
    k = qkv[:, H:2 * H]
    v = qkv[:, 2 * H:]

    scale = 1.0 / math.sqrt(dhead)
    ctx_rows = []
    for b in range(Bn):                                          # static loops (B*NHEADS small)
        rows = slice(b * Tn, (b + 1) * Tn)
        qb, kb, vb = q[rows], k[rows], v[rows]                   # (T, H)
        heads = []
        for h in range(nheads):
            cols = slice(h * dhead, (h + 1) * dhead)
            qh, kh, vh = qb[:, cols], kb[:, cols], vb[:, cols]   # (T, DH)
            s = jax.lax.dot_general(
                qh, kh, (((1,), (1,)), ((), ())),
                preferred_element_type=jnp.float32) * scale      # (T, T)
            s = s - jnp.max(s, axis=-1, keepdims=True)
            p = jnp.exp(s)
            p = p / jnp.sum(p, axis=-1, keepdims=True)
            heads.append(_bf16_dot(p, vh))                       # (T, DH)
        ctx_rows.append(jnp.concatenate(heads, axis=-1))         # (T, H)
    ctx = jnp.concatenate(ctx_rows, axis=0)                      # (B*T, H)

    attn_out = _bf16_dot(ctx, wo_ref[...]) + bo_ref[...]
    h1 = _ln(x + attn_out, ln1_g_ref[...], ln1_b_ref[...], eps)

    f = _bf16_dot(h1, w1_ref[...]) + b1_ref[...]
    f = jax.nn.gelu(f, approximate=True)                         # TODO(synk): BERT uses exact erf GELU
    f = _bf16_dot(f, w2_ref[...]) + b2_ref[...]
    o_ref[...] = _ln(h1 + f, ln2_g_ref[...], ln2_b_ref[...], eps)


def _lm_head_kernel(x_ref, wt_ref, bt_ref, g_ref, beta_ref, wd_ref, bd_ref, o_ref, *, eps):
    """BERT LM head: transform dense + gelu + LN + (lane-padded) decoder.

    Both the final and the intermediate activations are stacked along rows,
    so a single call serves both prediction-score outputs.
    """
    x = _bf16_dot(x_ref[...], wt_ref[...]) + bt_ref[...]
    x = jax.nn.gelu(x, approximate=True)
    x = _ln(x, g_ref[...], beta_ref[...], eps)
    o_ref[...] = _bf16_dot(x, wd_ref[...]) + bd_ref[...]         # (M, VOCAB_PAD)


# ------------------------------ kernel wrappers ------------------------------
def bigru_layer(x, pf, pb):
    Bn, Tn, _ = x.shape
    H = NHID
    return pl.pallas_call(
        functools.partial(_bigru_layer_kernel, H=H, Tn=Tn, Bn=Bn),
        out_shape=jax.ShapeDtypeStruct((Bn, Tn, 2 * H), jnp.float32),
        scratch_shapes=[
            pltpu.VMEM((Tn, Bn, 3 * H), jnp.float32),   # xg forward
            pltpu.VMEM((Tn, Bn, 3 * H), jnp.float32),   # xg backward
            pltpu.VMEM((Tn, Bn, H), jnp.float32),       # hidden-seq forward
            pltpu.VMEM((Tn, Bn, H), jnp.float32),       # hidden-seq backward
        ],
    )(x,
      pf["w_ih"], pf["w_hh"], pf["b_ih"], pf["b_hh"],
      pb["w_ih"], pb["w_hh"], pb["b_ih"], pb["b_hh"])


def bert_embed(feat2d, lin_w, lin_b, pos, g, b):
    M = feat2d.shape[0]
    return pl.pallas_call(
        functools.partial(_embed_kernel, Bn=B, eps=LN_EPS),
        out_shape=jax.ShapeDtypeStruct((M, HIDDEN), jnp.float32),
    )(feat2d, lin_w, lin_b, pos, g, b)


def bert_layer(x2d, p):
    M = x2d.shape[0]
    return pl.pallas_call(
        functools.partial(_bert_layer_kernel, Bn=B, Tn=T, nheads=NHEADS,
                          dhead=DHEAD, eps=LN_EPS),
        out_shape=jax.ShapeDtypeStruct((M, HIDDEN), jnp.float32),
    )(x2d, p["wqkv"], p["bqkv"], p["wo"], p["bo"],
      p["ln1_g"], p["ln1_b"], p["w1"], p["b1"], p["w2"], p["b2"],
      p["ln2_g"], p["ln2_b"])


def lm_head(x2d, hp):
    M = x2d.shape[0]
    return pl.pallas_call(
        functools.partial(_lm_head_kernel, eps=LN_EPS),
        out_shape=jax.ShapeDtypeStruct((M, VOCAB_PAD), jnp.float32),
    )(x2d, hp["w_t"], hp["b_t"], hp["ln_g"], hp["ln_b"],
      hp["w_dec_pad"], hp["b_dec_pad"])


# ------------------------------ model forward ------------------------------
def rnn_linear_bert_forward(x_batch, input_len, params):
    """RNNLinearBERT.forward with gru_stack_bert=True, intermediate_output=True."""
    del input_len  # TODO(synk): pack_padded_sequence / length masking skipped; full-length sequences.

    emb = params["char_emb"][x_batch]                            # (B, T, E)  glue gather
    x = emb
    for layer in range(NLAYER):
        x = bigru_layer(x, params["gru"][(layer, 0)], params["gru"][(layer, 1)])
    feat = x.reshape(B * T, 2 * NHID)                            # (B*T, 128)

    bp = params["bert"]
    h = bert_embed(feat, params["lin_w"], params["lin_b"],
                   bp["pos_emb"][:T], bp["emb_ln_g"], bp["emb_ln_b"])   # (B*T, H)

    intermediate = h
    for i, lp in enumerate(bp["layers"]):
        h = bert_layer(h, lp)
        if i == len(bp["layers"]) - 2:
            intermediate = h                                     # prev_prediction_score branch

    # Batched LM head over [final; intermediate]; decoder output is lane-padded.
    stacked = jnp.concatenate([h, intermediate], axis=0)         # (2*B*T, H)
    logits_pad = lm_head(stacked, bp["head"])                    # (2*B*T, VOCAB_PAD)
    logits = logits_pad[:, :BERT_VOCAB]                          # excessive_output slicing
    final = logits[:B * T].reshape(B, T, BERT_VOCAB)
    prev = logits[B * T:].reshape(B, T, BERT_VOCAB)

    # output.permute(0, 2, 1) -> (B, vocab, T)  (single wrapper-side transpose)
    return jnp.transpose(final, (0, 2, 1)), jnp.transpose(prev, (0, 2, 1))


# ------------------------------ param init ------------------------------
class Init:
    def __init__(self, key):
        self.key = key

    def normal(self, shape, scale=0.02):
        self.key, sub = jax.random.split(self.key)
        return scale * jax.random.normal(sub, shape, jnp.float32)

    def zeros(self, shape):
        return jnp.zeros(shape, jnp.float32)

    def ones(self, shape):
        return jnp.ones(shape, jnp.float32)


def make_params(key):
    ini = Init(key)
    params = {"char_emb": ini.normal((CHAR_VOCAB, CHAR_EMBED))}

    gru = {}
    for layer in range(NLAYER):
        in_size = CHAR_EMBED if layer == 0 else 2 * NHID
        for direction in range(2):
            gru[(layer, direction)] = {
                "w_ih": ini.normal((in_size, 3 * NHID)),
                "b_ih": ini.zeros((1, 3 * NHID)),
                "w_hh": ini.normal((NHID, 3 * NHID)),
                "b_hh": ini.zeros((1, 3 * NHID)),
            }
    params["gru"] = gru

    params["lin_w"] = ini.normal((2 * NHID, HIDDEN))
    params["lin_b"] = ini.zeros((1, HIDDEN))

    layers = []
    for _ in range(BERT_LAYERS):
        layers.append({
            # fused QKV projection weights
            "wqkv": ini.normal((HIDDEN, 3 * HIDDEN)), "bqkv": ini.zeros((1, 3 * HIDDEN)),
            "wo": ini.normal((HIDDEN, HIDDEN)), "bo": ini.zeros((1, HIDDEN)),
            "ln1_g": ini.ones((1, HIDDEN)), "ln1_b": ini.zeros((1, HIDDEN)),
            "w1": ini.normal((HIDDEN, FFN)), "b1": ini.zeros((1, FFN)),
            "w2": ini.normal((FFN, HIDDEN)), "b2": ini.zeros((1, HIDDEN)),
            "ln2_g": ini.ones((1, HIDDEN)), "ln2_b": ini.zeros((1, HIDDEN)),
        })

    # Decoder weight zero-padded to a lane-dense (H, 128); real vocab is columns [:BERT_VOCAB].
    w_dec = ini.normal((HIDDEN, BERT_VOCAB))
    w_dec_pad = jnp.zeros((HIDDEN, VOCAB_PAD), jnp.float32).at[:, :BERT_VOCAB].set(w_dec)
    b_dec_pad = jnp.zeros((1, VOCAB_PAD), jnp.float32)

    params["bert"] = {
        "pos_emb": ini.normal((MAX_POS, HIDDEN)),
        "emb_ln_g": ini.ones((1, HIDDEN)),
        "emb_ln_b": ini.zeros((1, HIDDEN)),
        "layers": layers,
        "head": {
            "w_t": ini.normal((HIDDEN, HIDDEN)), "b_t": ini.zeros((1, HIDDEN)),
            "ln_g": ini.ones((1, HIDDEN)), "ln_b": ini.zeros((1, HIDDEN)),
            "w_dec_pad": w_dec_pad, "b_dec_pad": b_dec_pad,
        },
    }
    return params


# ------------------------------ main ------------------------------
if __name__ == "__main__":
    key = jax.random.PRNGKey(0)
    k_data, k_params = jax.random.split(key)

    x_batch = jax.random.randint(k_data, (B, T), 0, CHAR_VOCAB, dtype=jnp.int32)
    input_len = jnp.full((B,), T, dtype=jnp.int32)
    params = make_params(k_params)

    fwd = jax.jit(rnn_linear_bert_forward)
    output, prev_prediction_score = fwd(x_batch, input_len, params)
    jax.block_until_ready((output, prev_prediction_score))

    assert output.shape == (B, BERT_VOCAB, T), output.shape
    assert prev_prediction_score.shape == (B, BERT_VOCAB, T), prev_prediction_score.shape
    assert bool(jnp.all(jnp.isfinite(output)))
    assert bool(jnp.all(jnp.isfinite(prev_prediction_score)))
    print("KERNEL_OK")
</pallas_src>

<mosaic_0001>
module attributes {stable_mosaic.version = 11 : i64} {
  func.func @_bert_layer_kernel(%arg0: memref<16x128xf32, #tpu.memory_space<vmem>>, %arg1: memref<128x384xf32, #tpu.memory_space<vmem>>, %arg2: memref<1x384xf32, #tpu.memory_space<vmem>>, %arg3: memref<128x128xf32, #tpu.memory_space<vmem>>, %arg4: memref<1x128xf32, #tpu.memory_space<vmem>>, %arg5: memref<1x128xf32, #tpu.memory_space<vmem>>, %arg6: memref<1x128xf32, #tpu.memory_space<vmem>>, %arg7: memref<128x256xf32, #tpu.memory_space<vmem>>, %arg8: memref<1x256xf32, #tpu.memory_space<vmem>>, %arg9: memref<256x128xf32, #tpu.memory_space<vmem>>, %arg10: memref<1x128xf32, #tpu.memory_space<vmem>>, %arg11: memref<1x128xf32, #tpu.memory_space<vmem>>, %arg12: memref<1x128xf32, #tpu.memory_space<vmem>>, %arg13: memref<16x128xf32, #tpu.memory_space<vmem>>) attributes {dimension_semantics = [], scalar_prefetch = 0 : i64, scratch_operands = 0 : i64, tpu.core_type = #tpu.core_type<tc>} {
    %c0 = arith.constant 0 : index
    %c0_0 = arith.constant 0 : index
    %0 = vector.load %arg0[%c0, %c0_0] : memref<16x128xf32, #tpu.memory_space<vmem>>, vector<16x128xf32>
    %c0_1 = arith.constant 0 : index
    %c0_2 = arith.constant 0 : index
    %1 = vector.load %arg1[%c0_1, %c0_2] : memref<128x384xf32, #tpu.memory_space<vmem>>, vector<128x384xf32>
    %2 = arith.truncf %0 : vector<16x128xf32> to vector<16x128xbf16>
    %3 = arith.truncf %1 : vector<128x384xf32> to vector<128x384xbf16>
    %cst = arith.constant dense<0.000000e+00> : vector<16x384xf32>
    %4 = tpu.matmul %2, %3, %cst {dimension_numbers = #tpu.dot_dimension_numbers<[1], [0], [0], [1], [0, 0, 1, 1], [], []>} : vector<16x128xbf16>, vector<128x384xbf16>, vector<16x384xf32> -> vector<16x384xf32>
    %c0_3 = arith.constant 0 : index
    %c0_4 = arith.constant 0 : index
    %5 = vector.load %arg2[%c0_3, %c0_4] : memref<1x384xf32, #tpu.memory_space<vmem>>, vector<1x384xf32>
    %6 = vector.broadcast %5 : vector<1x384xf32> to vector<16x384xf32>
    %7 = arith.addf %4, %6 : vector<16x384xf32>
    %8 = vector.extract_strided_slice %7 {offsets = [0, 0], sizes = [16, 128], strides = [1, 1]} : vector<16x384xf32> to vector<16x128xf32>
    %9 = vector.extract_strided_slice %7 {offsets = [0, 128], sizes = [16, 128], strides = [1, 1]} : vector<16x384xf32> to vector<16x128xf32>
    %10 = vector.extract_strided_slice %7 {offsets = [0, 256], sizes = [16, 128], strides = [1, 1]} : vector<16x384xf32> to vector<16x128xf32>
    %11 = vector.extract_strided_slice %8 {offsets = [0, 0], sizes = [8, 128], strides = [1, 1]} : vector<16x128xf32> to vector<8x128xf32>
    %12 = vector.extract_strided_slice %9 {offsets = [0, 0], sizes = [8, 128], strides = [1, 1]} : vector<16x128xf32> to vector<8x128xf32>
    %13 = vector.extract_strided_slice %10 {offsets = [0, 0], sizes = [8, 128], strides = [1, 1]} : vector<16x128xf32> to vector<8x128xf32>
    %14 = vector.extract_strided_slice %11 {offsets = [0, 0], sizes = [8, 64], strides = [1, 1]} : vector<8x128xf32> to vector<8x64xf32>
    %15 = vector.extract_strided_slice %12 {offsets = [0, 0], sizes = [8, 64], strides = [1, 1]} : vector<8x128xf32> to vector<8x64xf32>
    %16 = vector.extract_strided_slice %13 {offsets = [0, 0], sizes = [8, 64], strides = [1, 1]} : vector<8x128xf32> to vector<8x64xf32>
    %cst_5 = arith.constant dense<0.000000e+00> : vector<8x8xf32>
    %17 = tpu.matmul %14, %15, %cst_5 {dimension_numbers = #tpu.dot_dimension_numbers<[1], [1], [0], [0], [0, 0, 1, 0], [], []>} : vector<8x64xf32>, vector<8x64xf32>, vector<8x8xf32> -> vector<8x8xf32>
    %cst_6 = arith.constant 1.250000e-01 : f32
    %18 = vector.broadcast %cst_6 : f32 to vector<8x8xf32>
    %19 = arith.mulf %17, %18 : vector<8x8xf32>
    %cst_7 = arith.constant dense<0xFF800000> : vector<8xf32>
    %20 = vector.multi_reduction <maximumf>, %19, %cst_7 [1] : vector<8x8xf32> to vector<8xf32>
    %21 = vector.shape_cast %20 : vector<8xf32> to vector<8x1xf32>
    %22 = vector.broadcast %21 : vector<8x1xf32> to vector<8x8xf32>
    %23 = arith.subf %19, %22 : vector<8x8xf32>
    %24 = math.exp %23 : vector<8x8xf32>
    %cst_8 = arith.constant dense<0.000000e+00> : vector<8xf32>
    %25 = vector.multi_reduction <add>, %24, %cst_8 [1] : vector<8x8xf32> to vector<8xf32>
    %26 = vector.shape_cast %25 : vector<8xf32> to vector<8x1xf32>
    %27 = vector.broadcast %26 : vector<8x1xf32> to vector<8x8xf32>
    %28 = arith.divf %24, %27 : vector<8x8xf32>
    %29 = arith.truncf %28 : vector<8x8xf32> to vector<8x8xbf16>
    %30 = arith.truncf %16 : vector<8x64xf32> to vector<8x64xbf16>
    %cst_9 = arith.constant dense<0.000000e+00> : vector<8x64xf32>
    %31 = tpu.matmul %29, %30, %cst_9 {dimension_numbers = #tpu.dot_dimension_numbers<[1], [0], [0], [1], [0, 0, 1, 1], [], []>} : vector<8x8xbf16>, vector<8x64xbf16>, vector<8x64xf32> -> vector<8x64xf32>
    %32 = vector.extract_strided_slice %11 {offsets = [0, 64], sizes = [8, 64], strides = [1, 1]} : vector<8x128xf32> to vector<8x64xf32>
    %33 = vector.extract_strided_slice %12 {offsets = [0, 64], sizes = [8, 64], strides = [1, 1]} : vector<8x128xf32> to vector<8x64xf32>
    %34 = vector.extract_strided_slice %13 {offsets = [0, 64], sizes = [8, 64], strides = [1, 1]} : vector<8x128xf32> to vector<8x64xf32>
    %cst_10 = arith.constant dense<0.000000e+00> : vector<8x8xf32>
    %35 = tpu.matmul %32, %33, %cst_10 {dimension_numbers = #tpu.dot_dimension_numbers<[1], [1], [0], [0], [0, 0, 1, 0], [], []>} : vector<8x64xf32>, vector<8x64xf32>, vector<8x8xf32> -> vector<8x8xf32>
    %cst_11 = arith.constant 1.250000e-01 : f32
    %36 = vector.broadcast %cst_11 : f32 to vector<8x8xf32>
    %37 = arith.mulf %35, %36 : vector<8x8xf32>
    %cst_12 = arith.constant dense<0xFF800000> : vector<8xf32>
    %38 = vector.multi_reduction <maximumf>, %37, %cst_12 [1] : vector<8x8xf32> to vector<8xf32>
    %39 = vector.shape_cast %38 : vector<8xf32> to vector<8x1xf32>
    %40 = vector.broadcast %39 : vector<8x1xf32> to vector<8x8xf32>
    %41 = arith.subf %37, %40 : vector<8x8xf32>
    %42 = math.exp %41 : vector<8x8xf32>
    %cst_13 = arith.constant dense<0.000000e+00> : vector<8xf32>
    %43 = vector.multi_reduction <add>, %42, %cst_13 [1] : vector<8x8xf32> to vector<8xf32>
    %44 = vector.shape_cast %43 : vector<8xf32> to vector<8x1xf32>
    %45 = vector.broadcast %44 : vector<8x1xf32> to vector<8x8xf32>
    %46 = arith.divf %42, %45 : vector<8x8xf32>
    %47 = arith.truncf %46 : vector<8x8xf32> to vector<8x8xbf16>
    %48 = arith.truncf %34 : vector<8x64xf32> to vector<8x64xbf16>
    %cst_14 = arith.constant dense<0.000000e+00> : vector<8x64xf32>
    %49 = tpu.matmul %47, %48, %cst_14 {dimension_numbers = #tpu.dot_dimension_numbers<[1], [0], [0], [1], [0, 0, 1, 1], [], []>} : vector<8x8xbf16>, vector<8x64xbf16>, vector<8x64xf32> -> vector<8x64xf32>
    %50 = tpu.concatenate %31, %49 in 1 : vector<8x64xf32>, vector<8x64xf32> -> vector<8x128xf32>
    %51 = vector.extract_strided_slice %8 {offsets = [8, 0], sizes = [8, 128], strides = [1, 1]} : vector<16x128xf32> to vector<8x128xf32>
    %52 = vector.extract_strided_slice %9 {offsets = [8, 0], sizes = [8, 128], strides = [1, 1]} : vector<16x128xf32> to vector<8x128xf32>
    %53 = vector.extract_strided_slice %10 {offsets = [8, 0], sizes = [8, 128], strides = [1, 1]} : vector<16x128xf32> to vector<8x128xf32>
    %54 = vector.extract_strided_slice %51 {offsets = [0, 0], sizes = [8, 64], strides = [1, 1]} : vector<8x128xf32> to vector<8x64xf32>
    %55 = vector.extract_strided_slice %52 {offsets = [0, 0], sizes = [8, 64], strides = [1, 1]} : vector<8x128xf32> to vector<8x64xf32>
    %56 = vector.extract_strided_slice %53 {offsets = [0, 0], sizes = [8, 64], strides = [1, 1]} : vector<8x128xf32> to vector<8x64xf32>
    %cst_15 = arith.constant dense<0.000000e+00> : vector<8x8xf32>
    %57 = tpu.matmul %54, %55, %cst_15 {dimension_numbers = #tpu.dot_dimension_numbers<[1], [1], [0], [0], [0, 0, 1, 0], [], []>} : vector<8x64xf32>, vector<8x64xf32>, vector<8x8xf32> -> vector<8x8xf32>
    %cst_16 = arith.constant 1.250000e-01 : f32
    %58 = vector.broadcast %cst_16 : f32 to vector<8x8xf32>
    %59 = arith.mulf %57, %58 : vector<8x8xf32>
    %cst_17 = arith.constant dense<0xFF800000> : vector<8xf32>
    %60 = vector.multi_reduction <maximumf>, %59, %cst_17 [1] : vector<8x8xf32> to vector<8xf32>
    %61 = vector.shape_cast %60 : vector<8xf32> to vector<8x1xf32>
    %62 = vector.broadcast %61 : vector<8x1xf32> to vector<8x8xf32>
    %63 = arith.subf %59, %62 : vector<8x8xf32>
    %64 = math.exp %63 : vector<8x8xf32>
    %cst_18 = arith.constant dense<0.000000e+00> : vector<8xf32>
    %65 = vector.multi_reduction <add>, %64, %cst_18 [1] : vector<8x8xf32> to vector<8xf32>
    %66 = vector.shape_cast %65 : vector<8xf32> to vector<8x1xf32>
    %67 = vector.broadcast %66 : vector<8x1xf32> to vector<8x8xf32>
    %68 = arith.divf %64, %67 : vector<8x8xf32>
    %69 = arith.truncf %68 : vector<8x8xf32> to vector<8x8xbf16>
    %70 = arith.truncf %56 : vector<8x64xf32> to vector<8x64xbf16>
    %cst_19 = arith.constant dense<0.000000e+00> : vector<8x64xf32>
    %71 = tpu.matmul %69, %70, %cst_19 {dimension_numbers = #tpu.dot_dimension_numbers<[1], [0], [0], [1], [0, 0, 1, 1], [], []>} : vector<8x8xbf16>, vector<8x64xbf16>, vector<8x64xf32> -> vector<8x64xf32>
    %72 = vector.extract_strided_slice %51 {offsets = [0, 64], sizes = [8, 64], strides = [1, 1]} : vector<8x128xf32> to vector<8x64xf32>
    %73 = vector.extract_strided_slice %52 {offsets = [0, 64], sizes = [8, 64], strides = [1, 1]} : vector<8x128xf32> to vector<8x64xf32>
    %74 = vector.extract_strided_slice %53 {offsets = [0, 64], sizes = [8, 64], strides = [1, 1]} : vector<8x128xf32> to vector<8x64xf32>
    %cst_20 = arith.constant dense<0.000000e+00> : vector<8x8xf32>
    %75 = tpu.matmul %72, %73, %cst_20 {dimension_numbers = #tpu.dot_dimension_numbers<[1], [1], [0], [0], [0, 0, 1, 0], [], []>} : vector<8x64xf32>, vector<8x64xf32>, vector<8x8xf32> -> vector<8x8xf32>
    %cst_21 = arith.constant 1.250000e-01 : f32
    %76 = vector.broadcast %cst_21 : f32 to vector<8x8xf32>
    %77 = arith.mulf %75, %76 : vector<8x8xf32>
    %cst_22 = arith.constant dense<0xFF800000> : vector<8xf32>
    %78 = vector.multi_reduction <maximumf>, %77, %cst_22 [1] : vector<8x8xf32> to vector<8xf32>
    %79 = vector.shape_cast %78 : vector<8xf32> to vector<8x1xf32>
    %80 = vector.broadcast %79 : vector<8x1xf32> to vector<8x8xf32>
    %81 = arith.subf %77, %80 : vector<8x8xf32>
    %82 = math.exp %81 : vector<8x8xf32>
    %cst_23 = arith.constant dense<0.000000e+00> : vector<8xf32>
    %83 = vector.multi_reduction <add>, %82, %cst_23 [1] : vector<8x8xf32> to vector<8xf32>
    %84 = vector.shape_cast %83 : vector<8xf32> to vector<8x1xf32>
    %85 = vector.broadcast %84 : vector<8x1xf32> to vector<8x8xf32>
    %86 = arith.divf %82, %85 : vector<8x8xf32>
    %87 = arith.truncf %86 : vector<8x8xf32> to vector<8x8xbf16>
    %88 = arith.truncf %74 : vector<8x64xf32> to vector<8x64xbf16>
    %cst_24 = arith.constant dense<0.000000e+00> : vector<8x64xf32>
    %89 = tpu.matmul %87, %88, %cst_24 {dimension_numbers = #tpu.dot_dimension_numbers<[1], [0], [0], [1], [0, 0, 1, 1], [], []>} : vector<8x8xbf16>, vector<8x64xbf16>, vector<8x64xf32> -> vector<8x64xf32>
    %90 = tpu.concatenate %71, %89 in 1 : vector<8x64xf32>, vector<8x64xf32> -> vector<8x128xf32>
    %91 = tpu.concatenate %50, %90 in 0 : vector<8x128xf32>, vector<8x128xf32> -> vector<16x128xf32>
    %c0_25 = arith.constant 0 : index
    %c0_26 = arith.constant 0 : index
    %92 = vector.load %arg3[%c0_25, %c0_26] : memref<128x128xf32, #tpu.memory_space<vmem>>, vector<128x128xf32>
    %93 = arith.truncf %91 : vector<16x128xf32> to vector<16x128xbf16>
    %94 = arith.truncf %92 : vector<128x128xf32> to vector<128x128xbf16>
    %cst_27 = arith.constant dense<0.000000e+00> : vector<16x128xf32>
    %95 = tpu.matmul %93, %94, %cst_27 {dimension_numbers = #tpu.dot_dimension_numbers<[1], [0], [0], [1], [0, 0, 1, 1], [], []>} : vector<16x128xbf16>, vector<128x128xbf16>, vector<16x128xf32> -> vector<16x128xf32>
    %c0_28 = arith.constant 0 : index
    %c0_29 = arith.constant 0 : index
    %96 = vector.load %arg4[%c0_28, %c0_29] : memref<1x128xf32, #tpu.memory_space<vmem>>, vector<1x128xf32>
    %97 = vector.broadcast %96 : vector<1x128xf32> to vector<16x128xf32>
    %98 = arith.addf %95, %97 : vector<16x128xf32>
    %99 = arith.addf %0, %98 : vector<16x128xf32>
    %c0_30 = arith.constant 0 : index
    %c0_31 = arith.constant 0 : index
    %100 = vector.load %arg5[%c0_30, %c0_31] : memref<1x128xf32, #tpu.memory_space<vmem>>, vector<1x128xf32>
    %c0_32 = arith.constant 0 : index
    %c0_33 = arith.constant 0 : index
    %101 = vector.load %arg6[%c0_32, %c0_33] : memref<1x128xf32, #tpu.memory_space<vmem>>, vector<1x128xf32>
    %cst_34 = arith.constant dense<0.000000e+00> : vector<16xf32>
    %102 = vector.multi_reduction <add>, %99, %cst_34 [1] : vector<16x128xf32> to vector<16xf32>
    %103 = vector.shape_cast %102 : vector<16xf32> to vector<16x1xf32>
    %cst_35 = arith.constant 1.280000e+02 : f32
    %104 = vector.broadcast %cst_35 : f32 to vector<16x1xf32>
    %105 = arith.divf %103, %104 : vector<16x1xf32>
    %106 = vector.broadcast %105 : vector<16x1xf32> to vector<16x128xf32>
    %107 = arith.subf %99, %106 : vector<16x128xf32>
    %108 = arith.mulf %107, %107 : vector<16x128xf32>
    %cst_36 = arith.constant dense<0.000000e+00> : vector<16xf32>
    %109 = vector.multi_reduction <add>, %108, %cst_36 [1] : vector<16x128xf32> to vector<16xf32>
    %110 = vector.shape_cast %109 : vector<16xf32> to vector<16x1xf32>
    %cst_37 = arith.constant 1.280000e+02 : f32
    %111 = vector.broadcast %cst_37 : f32 to vector<16x1xf32>
    %112 = arith.divf %110, %111 : vector<16x1xf32>
    %113 = vector.broadcast %105 : vector<16x1xf32> to vector<16x128xf32>
    %114 = arith.subf %99, %113 : vector<16x128xf32>
    %cst_38 = arith.constant 9.99999996E-13 : f32
    %115 = vector.broadcast %cst_38 : f32 to vector<16x1xf32>
    %116 = arith.addf %112, %115 : vector<16x1xf32>
    %117 = math.rsqrt %116 : vector<16x1xf32>
    %118 = vector.broadcast %117 : vector<16x1xf32> to vector<16x128xf32>
    %119 = arith.mulf %114, %118 : vector<16x128xf32>
    %120 = vector.broadcast %100 : vector<1x128xf32> to vector<16x128xf32>
    %121 = arith.mulf %119, %120 : vector<16x128xf32>
    %122 = vector.broadcast %101 : vector<1x128xf32> to vector<16x128xf32>
    %123 = arith.addf %121, %122 : vector<16x128xf32>
    %c0_39 = arith.constant 0 : index
    %c0_40 = arith.constant 0 : index
    %124 = vector.load %arg7[%c0_39, %c0_40] : memref<128x256xf32, #tpu.memory_space<vmem>>, vector<128x256xf32>
    %125 = arith.truncf %123 : vector<16x128xf32> to vector<16x128xbf16>
    %126 = arith.truncf %124 : vector<128x256xf32> to vector<128x256xbf16>
    %cst_41 = arith.constant dense<0.000000e+00> : vector<16x256xf32>
    %127 = tpu.matmul %125, %126, %cst_41 {dimension_numbers = #tpu.dot_dimension_numbers<[1], [0], [0], [1], [0, 0, 1, 1], [], []>} : vector<16x128xbf16>, vector<128x256xbf16>, vector<16x256xf32> -> vector<16x256xf32>
    %c0_42 = arith.constant 0 : index
    %c0_43 = arith.constant 0 : index
    %128 = vector.load %arg8[%c0_42, %c0_43] : memref<1x256xf32, #tpu.memory_space<vmem>>, vector<1x256xf32>
    %129 = vector.broadcast %128 : vector<1x256xf32> to vector<16x256xf32>
    %130 = arith.addf %127, %129 : vector<16x256xf32>
    %131 = arith.mulf %130, %130 : vector<16x256xf32>
    %132 = arith.mulf %130, %131 : vector<16x256xf32>
    %cst_44 = arith.constant 4.471500e-02 : f32
    %133 = vector.broadcast %cst_44 : f32 to vector<16x256xf32>
    %134 = arith.mulf %133, %132 : vector<16x256xf32>
    %135 = arith.addf %130, %134 : vector<16x256xf32>
    %cst_45 = arith.constant 0.797884583 : f32
    %136 = vector.broadcast %cst_45 : f32 to vector<16x256xf32>
    %137 = arith.mulf %136, %135 : vector<16x256xf32>
    %138 = math.tanh %137 : vector<16x256xf32>
    %cst_46 = arith.constant 1.000000e+00 : f32
    %139 = vector.broadcast %cst_46 : f32 to vector<16x256xf32>
    %140 = arith.addf %139, %138 : vector<16x256xf32>
    %cst_47 = arith.constant 5.000000e-01 : f32
    %141 = vector.broadcast %cst_47 : f32 to vector<16x256xf32>
    %142 = arith.mulf %141, %140 : vector<16x256xf32>
    %143 = arith.mulf %130, %142 : vector<16x256xf32>
    %c0_48 = arith.constant 0 : index
    %c0_49 = arith.constant 0 : index
    %144 = vector.load %arg9[%c0_48, %c0_49] : memref<256x128xf32, #tpu.memory_space<vmem>>, vector<256x128xf32>
    %145 = arith.truncf %143 : vector<16x256xf32> to vector<16x256xbf16>
    %146 = arith.truncf %144 : vector<256x128xf32> to vector<256x128xbf16>
    %cst_50 = arith.constant dense<0.000000e+00> : vector<16x128xf32>
    %147 = tpu.matmul %145, %146, %cst_50 {dimension_numbers = #tpu.dot_dimension_numbers<[1], [0], [0], [1], [0, 0, 1, 1], [], []>} : vector<16x256xbf16>, vector<256x128xbf16>, vector<16x128xf32> -> vector<16x128xf32>
    %c0_51 = arith.constant 0 : index
    %c0_52 = arith.constant 0 : index
    %148 = vector.load %arg10[%c0_51, %c0_52] : memref<1x128xf32, #tpu.memory_space<vmem>>, vector<1x128xf32>
    %149 = vector.broadcast %148 : vector<1x128xf32> to vector<16x128xf32>
    %150 = arith.addf %147, %149 : vector<16x128xf32>
    %151 = arith.addf %123, %150 : vector<16x128xf32>
    %c0_53 = arith.constant 0 : index
    %c0_54 = arith.constant 0 : index
    %152 = vector.load %arg11[%c0_53, %c0_54] : memref<1x128xf32, #tpu.memory_space<vmem>>, vector<1x128xf32>
    %c0_55 = arith.constant 0 : index
    %c0_56 = arith.constant 0 : index
    %153 = vector.load %arg12[%c0_55, %c0_56] : memref<1x128xf32, #tpu.memory_space<vmem>>, vector<1x128xf32>
    %cst_57 = arith.constant dense<0.000000e+00> : vector<16xf32>
    %154 = vector.multi_reduction <add>, %151, %cst_57 [1] : vector<16x128xf32> to vector<16xf32>
    %155 = vector.shape_cast %154 : vector<16xf32> to vector<16x1xf32>
    %cst_58 = arith.constant 1.280000e+02 : f32
    %156 = vector.broadcast %cst_58 : f32 to vector<16x1xf32>
    %157 = arith.divf %155, %156 : vector<16x1xf32>
    %158 = vector.broadcast %157 : vector<16x1xf32> to vector<16x128xf32>
    %159 = arith.subf %151, %158 : vector<16x128xf32>
    %160 = arith.mulf %159, %159 : vector<16x128xf32>
    %cst_59 = arith.constant dense<0.000000e+00> : vector<16xf32>
    %161 = vector.multi_reduction <add>, %160, %cst_59 [1] : vector<16x128xf32> to vector<16xf32>
    %162 = vector.shape_cast %161 : vector<16xf32> to vector<16x1xf32>
    %cst_60 = arith.constant 1.280000e+02 : f32
    %163 = vector.broadcast %cst_60 : f32 to vector<16x1xf32>
    %164 = arith.divf %162, %163 : vector<16x1xf32>
    %165 = vector.broadcast %157 : vector<16x1xf32> to vector<16x128xf32>
    %166 = arith.subf %151, %165 : vector<16x128xf32>
    %cst_61 = arith.constant 9.99999996E-13 : f32
    %167 = vector.broadcast %cst_61 : f32 to vector<16x1xf32>
    %168 = arith.addf %164, %167 : vector<16x1xf32>
    %169 = math.rsqrt %168 : vector<16x1xf32>
    %170 = vector.broadcast %169 : vector<16x1xf32> to vector<16x128xf32>
    %171 = arith.mulf %166, %170 : vector<16x128xf32>
    %172 = vector.broadcast %152 : vector<1x128xf32> to vector<16x128xf32>
    %173 = arith.mulf %171, %172 : vector<16x128xf32>
    %174 = vector.broadcast %153 : vector<1x128xf32> to vector<16x128xf32>
    %175 = arith.addf %173, %174 : vector<16x128xf32>
    %c0_62 = arith.constant 0 : index
    %c0_63 = arith.constant 0 : index
    %176 = vector.load %arg13[%c0_62, %c0_63] : memref<16x128xf32, #tpu.memory_space<vmem>>, vector<16x128xf32>
    tpu.vector_store %arg13[%c0_62, %c0_63], %175 {strides = array<i32>} : memref<16x128xf32, #tpu.memory_space<vmem>>, vector<16x128xf32>,
    return
  }
}

module attributes {stable_mosaic.version = 11 : i64} {
  func.func @_embed_kernel(%arg0: memref<16x128xf32, #tpu.memory_space<vmem>>, %arg1: memref<128x128xf32, #tpu.memory_space<vmem>>, %arg2: memref<1x128xf32, #tpu.memory_space<vmem>>, %arg3: memref<8x128xf32, #tpu.memory_space<vmem>>, %arg4: memref<1x128xf32, #tpu.memory_space<vmem>>, %arg5: memref<1x128xf32, #tpu.memory_space<vmem>>, %arg6: memref<16x128xf32, #tpu.memory_space<vmem>>) attributes {dimension_semantics = [], scalar_prefetch = 0 : i64, scratch_operands = 0 : i64, tpu.core_type = #tpu.core_type<tc>} {
    %c0 = arith.constant 0 : index
    %c0_0 = arith.constant 0 : index
    %0 = vector.load %arg0[%c0, %c0_0] : memref<16x128xf32, #tpu.memory_space<vmem>>, vector<16x128xf32>
    %c0_1 = arith.constant 0 : index
    %c0_2 = arith.constant 0 : index
    %1 = vector.load %arg1[%c0_1, %c0_2] : memref<128x128xf32, #tpu.memory_space<vmem>>, vector<128x128xf32>
    %2 = arith.truncf %0 : vector<16x128xf32> to vector<16x128xbf16>
    %3 = arith.truncf %1 : vector<128x128xf32> to vector<128x128xbf16>
    %cst = arith.constant dense<0.000000e+00> : vector<16x128xf32>
    %4 = tpu.matmul %2, %3, %cst {dimension_numbers = #tpu.dot_dimension_numbers<[1], [0], [0], [1], [0, 0, 1, 1], [], []>} : vector<16x128xbf16>, vector<128x128xbf16>, vector<16x128xf32> -> vector<16x128xf32>
    %c0_3 = arith.constant 0 : index
    %c0_4 = arith.constant 0 : index
    %5 = vector.load %arg2[%c0_3, %c0_4] : memref<1x128xf32, #tpu.memory_space<vmem>>, vector<1x128xf32>
    %6 = vector.broadcast %5 : vector<1x128xf32> to vector<16x128xf32>
    %7 = arith.addf %4, %6 : vector<16x128xf32>
    %c0_5 = arith.constant 0 : index
    %c0_6 = arith.constant 0 : index
    %8 = vector.load %arg3[%c0_5, %c0_6] : memref<8x128xf32, #tpu.memory_space<vmem>>, vector<8x128xf32>
    %9 = tpu.concatenate %8, %8 in 0 : vector<8x128xf32>, vector<8x128xf32> -> vector<16x128xf32>
    %10 = arith.addf %7, %9 : vector<16x128xf32>
    %c0_7 = arith.constant 0 : index
    %c0_8 = arith.constant 0 : index
    %11 = vector.load %arg4[%c0_7, %c0_8] : memref<1x128xf32, #tpu.memory_space<vmem>>, vector<1x128xf32>
    %c0_9 = arith.constant 0 : index
    %c0_10 = arith.constant 0 : index
    %12 = vector.load %arg5[%c0_9, %c0_10] : memref<1x128xf32, #tpu.memory_space<vmem>>, vector<1x128xf32>
    %cst_11 = arith.constant dense<0.000000e+00> : vector<16xf32>
    %13 = vector.multi_reduction <add>, %10, %cst_11 [1] : vector<16x128xf32> to vector<16xf32>
    %14 = vector.shape_cast %13 : vector<16xf32> to vector<16x1xf32>
    %cst_12 = arith.constant 1.280000e+02 : f32
    %15 = vector.broadcast %cst_12 : f32 to vector<16x1xf32>
    %16 = arith.divf %14, %15 : vector<16x1xf32>
    %17 = vector.broadcast %16 : vector<16x1xf32> to vector<16x128xf32>
    %18 = arith.subf %10, %17 : vector<16x128xf32>
    %19 = arith.mulf %18, %18 : vector<16x128xf32>
    %cst_13 = arith.constant dense<0.000000e+00> : vector<16xf32>
    %20 = vector.multi_reduction <add>, %19, %cst_13 [1] : vector<16x128xf32> to vector<16xf32>
    %21 = vector.shape_cast %20 : vector<16xf32> to vector<16x1xf32>
    %cst_14 = arith.constant 1.280000e+02 : f32
    %22 = vector.broadcast %cst_14 : f32 to vector<16x1xf32>
    %23 = arith.divf %21, %22 : vector<16x1xf32>
    %24 = vector.broadcast %16 : vector<16x1xf32> to vector<16x128xf32>
    %25 = arith.subf %10, %24 : vector<16x128xf32>
    %cst_15 = arith.constant 9.99999996E-13 : f32
    %26 = vector.broadcast %cst_15 : f32 to vector<16x1xf32>
    %27 = arith.addf %23, %26 : vector<16x1xf32>
    %28 = math.rsqrt %27 : vector<16x1xf32>
    %29 = vector.broadcast %28 : vector<16x1xf32> to vector<16x128xf32>
    %30 = arith.mulf %25, %29 : vector<16x128xf32>
    %31 = vector.broadcast %11 : vector<1x128xf32> to vector<16x128xf32>
    %32 = arith.mulf %30, %31 : vector<16x128xf32>
    %33 = vector.broadcast %12 : vector<1x128xf32> to vector<16x128xf32>
    %34 = arith.addf %32, %33 : vector<16x128xf32>
    %c0_16 = arith.constant 0 : index
    %c0_17 = arith.constant 0 : index
    %35 = vector.load %arg6[%c0_16, %c0_17] : memref<16x128xf32, #tpu.memory_space<vmem>>, vector<16x128xf32>
    tpu.vector_store %arg6[%c0_16, %c0_17], %34 {strides = array<i32>} : memref<16x128xf32, #tpu.memory_space<vmem>>, vector<16x128xf32>,
    return
  }
}

module attributes {stable_mosaic.version = 11 : i64} {
  func.func @_bigru_layer_kernel(%arg0: memref<2x8x128xf32, #tpu.memory_space<vmem>>, %arg1: memref<128x192xf32, #tpu.memory_space<vmem>>, %arg2: memref<64x192xf32, #tpu.memory_space<vmem>>, %arg3: memref<1x192xf32, #tpu.memory_space<vmem>>, %arg4: memref<1x192xf32, #tpu.memory_space<vmem>>, %arg5: memref<128x192xf32, #tpu.memory_space<vmem>>, %arg6: memref<64x192xf32, #tpu.memory_space<vmem>>, %arg7: memref<1x192xf32, #tpu.memory_space<vmem>>, %arg8: memref<1x192xf32, #tpu.memory_space<vmem>>, %arg9: memref<2x8x128xf32, #tpu.memory_space<vmem>>, %arg10: memref<8x2x192xf32, #tpu.memory_space<vmem>>, %arg11: memref<8x2x192xf32, #tpu.memory_space<vmem>>, %arg12: memref<8x2x64xf32, #tpu.memory_space<vmem>>, %arg13: memref<8x2x64xf32, #tpu.memory_space<vmem>>) attributes {dimension_semantics = [], scalar_prefetch = 0 : i64, scratch_operands = 4 : i64, tpu.core_type = #tpu.core_type<tc>} {
    %c0 = arith.constant 0 : index
    %c0_0 = arith.constant 0 : index
    %c0_1 = arith.constant 0 : index
    %0 = vector.load %arg0[%c0, %c0_0, %c0_1] : memref<2x8x128xf32, #tpu.memory_space<vmem>>, vector<2x8x128xf32>
    %1 = tpu.transpose %0, [1, 0, 2] : vector<2x8x128xf32> -> vector<8x2x128xf32>
    %2 = vector.shape_cast %1 : vector<8x2x128xf32> to vector<16x128xf32>
    %c0_2 = arith.constant 0 : index
    %c0_3 = arith.constant 0 : index
    %3 = vector.load %arg1[%c0_2, %c0_3] : memref<128x192xf32, #tpu.memory_space<vmem>>, vector<128x192xf32>
    %4 = arith.truncf %2 : vector<16x128xf32> to vector<16x128xbf16>
    %5 = arith.truncf %3 : vector<128x192xf32> to vector<128x192xbf16>
    %cst = arith.constant dense<0.000000e+00> : vector<16x192xf32>
    %6 = tpu.matmul %4, %5, %cst {dimension_numbers = #tpu.dot_dimension_numbers<[1], [0], [0], [1], [0, 0, 1, 1], [], []>} : vector<16x128xbf16>, vector<128x192xbf16>, vector<16x192xf32> -> vector<16x192xf32>
    %c0_4 = arith.constant 0 : index
    %c0_5 = arith.constant 0 : index
    %7 = vector.load %arg3[%c0_4, %c0_5] : memref<1x192xf32, #tpu.memory_space<vmem>>, vector<1x192xf32>
    %8 = vector.broadcast %7 : vector<1x192xf32> to vector<16x192xf32>
    %9 = arith.addf %6, %8 : vector<16x192xf32>
    %10 = vector.shape_cast %9 : vector<16x192xf32> to vector<8x2x192xf32>
    %c0_6 = arith.constant 0 : index
    %c0_7 = arith.constant 0 : index
    %c0_8 = arith.constant 0 : index
    %11 = vector.load %arg10[%c0_6, %c0_7, %c0_8] : memref<8x2x192xf32, #tpu.memory_space<vmem>>, vector<8x2x192xf32>
    tpu.vector_store %arg10[%c0_6, %c0_7, %c0_8], %10 {strides = array<i32>} : memref<8x2x192xf32, #tpu.memory_space<vmem>>, vector<8x2x192xf32>,
    %c0_9 = arith.constant 0 : index
    %c0_10 = arith.constant 0 : index
    %12 = vector.load %arg5[%c0_9, %c0_10] : memref<128x192xf32, #tpu.memory_space<vmem>>, vector<128x192xf32>
    %13 = arith.truncf %2 : vector<16x128xf32> to vector<16x128xbf16>
    %14 = arith.truncf %12 : vector<128x192xf32> to vector<128x192xbf16>
    %cst_11 = arith.constant dense<0.000000e+00> : vector<16x192xf32>
    %15 = tpu.matmul %13, %14, %cst_11 {dimension_numbers = #tpu.dot_dimension_numbers<[1], [0], [0], [1], [0, 0, 1, 1], [], []>} : vector<16x128xbf16>, vector<128x192xbf16>, vector<16x192xf32> -> vector<16x192xf32>
    %c0_12 = arith.constant 0 : index
    %c0_13 = arith.constant 0 : index
    %16 = vector.load %arg7[%c0_12, %c0_13] : memref<1x192xf32, #tpu.memory_space<vmem>>, vector<1x192xf32>
    %17 = vector.broadcast %16 : vector<1x192xf32> to vector<16x192xf32>
    %18 = arith.addf %15, %17 : vector<16x192xf32>
    %19 = vector.shape_cast %18 : vector<16x192xf32> to vector<8x2x192xf32>
    %c0_14 = arith.constant 0 : index
    %c0_15 = arith.constant 0 : index
    %c0_16 = arith.constant 0 : index
    %20 = vector.load %arg11[%c0_14, %c0_15, %c0_16] : memref<8x2x192xf32, #tpu.memory_space<vmem>>, vector<8x2x192xf32>
    tpu.vector_store %arg11[%c0_14, %c0_15, %c0_16], %19 {strides = array<i32>} : memref<8x2x192xf32, #tpu.memory_space<vmem>>, vector<8x2x192xf32>,
    %c0_17 = arith.constant 0 : index
    %c0_18 = arith.constant 0 : index
    %21 = vector.load %arg2[%c0_17, %c0_18] : memref<64x192xf32, #tpu.memory_space<vmem>>, vector<64x192xf32>
    %c0_19 = arith.constant 0 : index
    %c0_20 = arith.constant 0 : index
    %22 = vector.load %arg6[%c0_19, %c0_20] : memref<64x192xf32, #tpu.memory_space<vmem>>, vector<64x192xf32>
    %c0_21 = arith.constant 0 : index
    %c0_22 = arith.constant 0 : index
    %23 = vector.load %arg4[%c0_21, %c0_22] : memref<1x192xf32, #tpu.memory_space<vmem>>, vector<1x192xf32>
    %c0_23 = arith.constant 0 : index
    %c0_24 = arith.constant 0 : index
    %24 = vector.load %arg8[%c0_23, %c0_24] : memref<1x192xf32, #tpu.memory_space<vmem>>, vector<1x192xf32>
    %cst_25 = arith.constant 0.000000e+00 : f32
    %25 = vector.broadcast %cst_25 : f32 to vector<2x64xf32>
    %c0_i32 = arith.constant 0 : i32
    %c7_i32 = arith.constant 7 : i32
    %26 = arith.subi %c7_i32, %c0_i32 : i32
    %27 = arith.index_cast %c0_i32 : i32 to index
    %c0_26 = arith.constant 0 : index
    %c0_27 = arith.constant 0 : index
    %28 = vector.load %arg10[%27, %c0_26, %c0_27] : memref<8x2x192xf32, #tpu.memory_space<vmem>>, vector<1x2x192xf32>
    %29 = vector.shape_cast %28 : vector<1x2x192xf32> to vector<2x192xf32>
    %30 = arith.truncf %25 : vector<2x64xf32> to vector<2x64xbf16>
    %31 = arith.truncf %21 : vector<64x192xf32> to vector<64x192xbf16>
    %cst_28 = arith.constant dense<0.000000e+00> : vector<2x192xf32>
    %32 = tpu.matmul %30, %31, %cst_28 {dimension_numbers = #tpu.dot_dimension_numbers<[1], [0], [0], [1], [0, 0, 1, 1], [], []>} : vector<2x64xbf16>, vector<64x192xbf16>, vector<2x192xf32> -> vector<2x192xf32>
    %33 = vector.broadcast %23 : vector<1x192xf32> to vector<2x192xf32>
    %34 = arith.addf %32, %33 : vector<2x192xf32>
    %35 = vector.extract_strided_slice %29 {offsets = [0, 0], sizes = [2, 64], strides = [1, 1]} : vector<2x192xf32> to vector<2x64xf32>
    %36 = vector.extract_strided_slice %34 {offsets = [0, 0], sizes = [2, 64], strides = [1, 1]} : vector<2x192xf32> to vector<2x64xf32>
    %37 = arith.addf %35, %36 : vector<2x64xf32>
    %38 = arith.negf %37 : vector<2x64xf32>
    %39 = math.exp %38 : vector<2x64xf32>
    %cst_29 = arith.constant 1.000000e+00 : f32
    %40 = vector.broadcast %cst_29 : f32 to vector<2x64xf32>
    %41 = arith.addf %40, %39 : vector<2x64xf32>
    %42 = arith.divf %40, %41 : vector<2x64xf32>
    %43 = vector.extract_strided_slice %29 {offsets = [0, 64], sizes = [2, 64], strides = [1, 1]} : vector<2x192xf32> to vector<2x64xf32>
    %44 = vector.extract_strided_slice %34 {offsets = [0, 64], sizes = [2, 64], strides = [1, 1]} : vector<2x192xf32> to vector<2x64xf32>
    %45 = arith.addf %43, %44 : vector<2x64xf32>
    %46 = arith.negf %45 : vector<2x64xf32>
    %47 = math.exp %46 : vector<2x64xf32>
    %cst_30 = arith.constant 1.000000e+00 : f32
    %48 = vector.broadcast %cst_30 : f32 to vector<2x64xf32>
    %49 = arith.addf %48, %47 : vector<2x64xf32>
    %50 = arith.divf %48, %49 : vector<2x64xf32>
    %51 = vector.extract_strided_slice %29 {offsets = [0, 128], sizes = [2, 64], strides = [1, 1]} : vector<2x192xf32> to vector<2x64xf32>
    %52 = vector.extract_strided_slice %34 {offsets = [0, 128], sizes = [2, 64], strides = [1, 1]} : vector<2x192xf32> to vector<2x64xf32>
    %53 = arith.mulf %42, %52 : vector<2x64xf32>
    %54 = arith.addf %51, %53 : vector<2x64xf32>
    %55 = math.tanh %54 : vector<2x64xf32>
    %cst_31 = arith.constant 1.000000e+00 : f32
    %56 = vector.broadcast %cst_31 : f32 to vector<2x64xf32>
    %57 = arith.subf %56, %50 : vector<2x64xf32>
    %58 = arith.mulf %57, %55 : vector<2x64xf32>
    %59 = arith.mulf %50, %25 : vector<2x64xf32>
    %60 = arith.addf %58, %59 : vector<2x64xf32>
    %61 = arith.index_cast %26 : i32 to index
    %c0_32 = arith.constant 0 : index
    %c0_33 = arith.constant 0 : index
    %62 = vector.load %arg11[%61, %c0_32, %c0_33] : memref<8x2x192xf32, #tpu.memory_space<vmem>>, vector<1x2x192xf32>
    %63 = vector.shape_cast %62 : vector<1x2x192xf32> to vector<2x192xf32>
    %64 = arith.truncf %25 : vector<2x64xf32> to vector<2x64xbf16>
    %65 = arith.truncf %22 : vector<64x192xf32> to vector<64x192xbf16>
    %cst_34 = arith.constant dense<0.000000e+00> : vector<2x192xf32>
    %66 = tpu.matmul %64, %65, %cst_34 {dimension_numbers = #tpu.dot_dimension_numbers<[1], [0], [0], [1], [0, 0, 1, 1], [], []>} : vector<2x64xbf16>, vector<64x192xbf16>, vector<2x192xf32> -> vector<2x192xf32>
    %67 = vector.broadcast %24 : vector<1x192xf32> to vector<2x192xf32>
    %68 = arith.addf %66, %67 : vector<2x192xf32>
    %69 = vector.extract_strided_slice %63 {offsets = [0, 0], sizes = [2, 64], strides = [1, 1]} : vector<2x192xf32> to vector<2x64xf32>
    %70 = vector.extract_strided_slice %68 {offsets = [0, 0], sizes = [2, 64], strides = [1, 1]} : vector<2x192xf32> to vector<2x64xf32>
    %71 = arith.addf %69, %70 : vector<2x64xf32>
    %72 = arith.negf %71 : vector<2x64xf32>
    %73 = math.exp %72 : vector<2x64xf32>
    %cst_35 = arith.constant 1.000000e+00 : f32
    %74 = vector.broadcast %cst_35 : f32 to vector<2x64xf32>
    %75 = arith.addf %74, %73 : vector<2x64xf32>
    %76 = arith.divf %74, %75 : vector<2x64xf32>
    %77 = vector.extract_strided_slice %63 {offsets = [0, 64], sizes = [2, 64], strides = [1, 1]} : vector<2x192xf32> to vector<2x64xf32>
    %78 = vector.extract_strided_slice %68 {offsets = [0, 64], sizes = [2, 64], strides = [1, 1]} : vector<2x192xf32> to vector<2x64xf32>
    %79 = arith.addf %77, %78 : vector<2x64xf32>
    %80 = arith.negf %79 : vector<2x64xf32>
    %81 = math.exp %80 : vector<2x64xf32>
    %cst_36 = arith.constant 1.000000e+00 : f32
    %82 = vector.broadcast %cst_36 : f32 to vector<2x64xf32>
    %83 = arith.addf %82, %81 : vector<2x64xf32>
    %84 = arith.divf %82, %83 : vector<2x64xf32>
    %85 = vector.extract_strided_slice %63 {offsets = [0, 128], sizes = [2, 64], strides = [1, 1]} : vector<2x192xf32> to vector<2x64xf32>
    %86 = vector.extract_strided_slice %68 {offsets = [0, 128], sizes = [2, 64], strides = [1, 1]} : vector<2x192xf32> to vector<2x64xf32>
    %87 = arith.mulf %76, %86 : vector<2x64xf32>
    %88 = arith.addf %85, %87 : vector<2x64xf32>
    %89 = math.tanh %88 : vector<2x64xf32>
    %cst_37 = arith.constant 1.000000e+00 : f32
    %90 = vector.broadcast %cst_37 : f32 to vector<2x64xf32>
    %91 = arith.subf %90, %84 : vector<2x64xf32>
    %92 = arith.mulf %91, %89 : vector<2x64xf32>
    %93 = arith.mulf %84, %25 : vector<2x64xf32>
    %94 = arith.addf %92, %93 : vector<2x64xf32>
    %95 = arith.index_cast %c0_i32 : i32 to index
    %c0_38 = arith.constant 0 : index
    %c0_39 = arith.constant 0 : index
    %96 = vector.load %arg12[%95, %c0_38, %c0_39] : memref<8x2x64xf32, #tpu.memory_space<vmem>>, vector<1x2x64xf32>
    %97 = vector.shape_cast %96 : vector<1x2x64xf32> to vector<2x64xf32>
    %98 = vector.shape_cast %60 : vector<2x64xf32> to vector<1x2x64xf32>
    tpu.vector_store %arg12[%95, %c0_38, %c0_39], %98 {strides = array<i32>} : memref<8x2x64xf32, #tpu.memory_space<vmem>>, vector<1x2x64xf32>,
    %99 = arith.index_cast %26 : i32 to index
    %c0_40 = arith.constant 0 : index
    %c0_41 = arith.constant 0 : index
    %100 = vector.load %arg13[%99, %c0_40, %c0_41] : memref<8x2x64xf32, #tpu.memory_space<vmem>>, vector<1x2x64xf32>
    %101 = vector.shape_cast %100 : vector<1x2x64xf32> to vector<2x64xf32>
    %102 = vector.shape_cast %94 : vector<2x64xf32> to vector<1x2x64xf32>
    tpu.vector_store %arg13[%99, %c0_40, %c0_41], %102 {strides = array<i32>} : memref<8x2x64xf32, #tpu.memory_space<vmem>>, vector<1x2x64xf32>,
    %c1_i32 = arith.constant 1 : i32
    %c7_i32_42 = arith.constant 7 : i32
    %103 = arith.subi %c7_i32_42, %c1_i32 : i32
    %104 = arith.index_cast %c1_i32 : i32 to index
    %c0_43 = arith.constant 0 : index
    %c0_44 = arith.constant 0 : index
    %105 = vector.load %arg10[%104, %c0_43, %c0_44] : memref<8x2x192xf32, #tpu.memory_space<vmem>>, vector<1x2x192xf32>
    %106 = vector.shape_cast %105 : vector<1x2x192xf32> to vector<2x192xf32>
    %107 = arith.truncf %60 : vector<2x64xf32> to vector<2x64xbf16>
    %108 = arith.truncf %21 : vector<64x192xf32> to vector<64x192xbf16>
    %cst_45 = arith.constant dense<0.000000e+00> : vector<2x192xf32>
    %109 = tpu.matmul %107, %108, %cst_45 {dimension_numbers = #tpu.dot_dimension_numbers<[1], [0], [0], [1], [0, 0, 1, 1], [], []>} : vector<2x64xbf16>, vector<64x192xbf16>, vector<2x192xf32> -> vector<2x192xf32>
    %110 = vector.broadcast %23 : vector<1x192xf32> to vector<2x192xf32>
    %111 = arith.addf %109, %110 : vector<2x192xf32>
    %112 = vector.extract_strided_slice %106 {offsets = [0, 0], sizes = [2, 64], strides = [1, 1]} : vector<2x192xf32> to vector<2x64xf32>
    %113 = vector.extract_strided_slice %111 {offsets = [0, 0], sizes = [2, 64], strides = [1, 1]} : vector<2x192xf32> to vector<2x64xf32>
    %114 = arith.addf %112, %113 : vector<2x64xf32>
    %115 = arith.negf %114 : vector<2x64xf32>
    %116 = math.exp %115 : vector<2x64xf32>
    %cst_46 = arith.constant 1.000000e+00 : f32
    %117 = vector.broadcast %cst_46 : f32 to vector<2x64xf32>
    %118 = arith.addf %117, %116 : vector<2x64xf32>
    %119 = arith.divf %117, %118 : vector<2x64xf32>
    %120 = vector.extract_strided_slice %106 {offsets = [0, 64], sizes = [2, 64], strides = [1, 1]} : vector<2x192xf32> to vector<2x64xf32>
    %121 = vector.extract_strided_slice %111 {offsets = [0, 64], sizes = [2, 64], strides = [1, 1]} : vector<2x192xf32> to vector<2x64xf32>
    %122 = arith.addf %120, %121 : vector<2x64xf32>
    %123 = arith.negf %122 : vector<2x64xf32>
    %124 = math.exp %123 : vector<2x64xf32>
    %cst_47 = arith.constant 1.000000e+00 : f32
    %125 = vector.broadcast %cst_47 : f32 to vector<2x64xf32>
    %126 = arith.addf %125, %124 : vector<2x64xf32>
    %127 = arith.divf %125, %126 : vector<2x64xf32>
    %128 = vector.extract_strided_slice %106 {offsets = [0, 128], sizes = [2, 64], strides = [1, 1]} : vector<2x192xf32> to vector<2x64xf32>
    %129 = vector.extract_strided_slice %111 {offsets = [0, 128], sizes = [2, 64], strides = [1, 1]} : vector<2x192xf32> to vector<2x64xf32>
    %130 = arith.mulf %119, %129 : vector<2x64xf32>
    %131 = arith.addf %128, %130 : vector<2x64xf32>
    %132 = math.tanh %131 : vector<2x64xf32>
    %cst_48 = arith.constant 1.000000e+00 : f32
    %133 = vector.broadcast %cst_48 : f32 to vector<2x64xf32>
    %134 = arith.subf %133, %127 : vector<2x64xf32>
    %135 = arith.mulf %134, %132 : vector<2x64xf32>
    %136 = arith.mulf %127, %60 : vector<2x64xf32>
    %137 = arith.addf %135, %136 : vector<2x64xf32>
    %138 = arith.index_cast %103 : i32 to index
    %c0_49 = arith.constant 0 : index
    %c0_50 = arith.constant 0 : index
    %139 = vector.load %arg11[%138, %c0_49, %c0_50] : memref<8x2x192xf32, #tpu.memory_space<vmem>>, vector<1x2x192xf32>
    %140 = vector.shape_cast %139 : vector<1x2x192xf32> to vector<2x192xf32>
    %141 = arith.truncf %94 : vector<2x64xf32> to vector<2x64xbf16>
    %142 = arith.truncf %22 : vector<64x192xf32> to vector<64x192xbf16>
    %cst_51 = arith.constant dense<0.000000e+00> : vector<2x192xf32>
    %143 = tpu.matmul %141, %142, %cst_51 {dimension_numbers = #tpu.dot_dimension_numbers<[1], [0], [0], [1], [0, 0, 1, 1], [], []>} : vector<2x64xbf16>, vector<64x192xbf16>, vector<2x192xf32> -> vector<2x192xf32>
    %144 = vector.broadcast %24 : vector<1x192xf32> to vector<2x192xf32>
    %145 = arith.addf %143, %144 : vector<2x192xf32>
    %146 = vector.extract_strided_slice %140 {offsets = [0, 0], sizes = [2, 64], strides = [1, 1]} : vector<2x192xf32> to vector<2x64xf32>
    %147 = vector.extract_strided_slice %145 {offsets = [0, 0], sizes = [2, 64], strides = [1, 1]} : vector<2x192xf32> to vector<2x64xf32>
    %148 = arith.addf %146, %147 : vector<2x64xf32>
    %149 = arith.negf %148 : vector<2x64xf32>
    %150 = math.exp %149 : vector<2x64xf32>
    %cst_52 = arith.constant 1.000000e+00 : f32
    %151 = vector.broadcast %cst_52 : f32 to vector<2x64xf32>
    %152 = arith.addf %151, %150 : vector<2x64xf32>
    %153 = arith.divf %151, %152 : vector<2x64xf32>
    %154 = vector.extract_strided_slice %140 {offsets = [0, 64], sizes = [2, 64], strides = [1, 1]} : vector<2x192xf32> to vector<2x64xf32>
    %155 = vector.extract_strided_slice %145 {offsets = [0, 64], sizes = [2, 64], strides = [1, 1]} : vector<2x192xf32> to vector<2x64xf32>
    %156 = arith.addf %154, %155 : vector<2x64xf32>
    %157 = arith.negf %156 : vector<2x64xf32>
    %158 = math.exp %157 : vector<2x64xf32>
    %cst_53 = arith.constant 1.000000e+00 : f32
    %159 = vector.broadcast %cst_53 : f32 to vector<2x64xf32>
    %160 = arith.addf %159, %158 : vector<2x64xf32>
    %161 = arith.divf %159, %160 : vector<2x64xf32>
    %162 = vector.extract_strided_slice %140 {offsets = [0, 128], sizes = [2, 64], strides = [1, 1]} : vector<2x192xf32> to vector<2x64xf32>
    %163 = vector.extract_strided_slice %145 {offsets = [0, 128], sizes = [2, 64], strides = [1, 1]} : vector<2x192xf32> to vector<2x64xf32>
    %164 = arith.mulf %153, %163 : vector<2x64xf32>
    %165 = arith.addf %162, %164 : vector<2x64xf32>
    %166 = math.tanh %165 : vector<2x64xf32>
    %cst_54 = arith.constant 1.000000e+00 : f32
    %167 = vector.broadcast %cst_54 : f32 to vector<2x64xf32>
    %168 = arith.subf %167, %161 : vector<2x64xf32>
    %169 = arith.mulf %168, %166 : vector<2x64xf32>
    %170 = arith.mulf %161, %94 : vector<2x64xf32>
    %171 = arith.addf %169, %170 : vector<2x64xf32>
    %172 = arith.index_cast %c1_i32 : i32 to index
    %c0_55 = arith.constant 0 : index
    %c0_56 = arith.constant 0 : index
    %173 = vector.load %arg12[%172, %c0_55, %c0_56] : memref<8x2x64xf32, #tpu.memory_space<vmem>>, vector<1x2x64xf32>
    %174 = vector.shape_cast %173 : vector<1x2x64xf32> to vector<2x64xf32>
    %175 = vector.shape_cast %137 : vector<2x64xf32> to vector<1x2x64xf32>
    tpu.vector_store %arg12[%172, %c0_55, %c0_56], %175 {strides = array<i32>} : memref<8x2x64xf32, #tpu.memory_space<vmem>>, vector<1x2x64xf32>,
    %176 = arith.index_cast %103 : i32 to index
    %c0_57 = arith.constant 0 : index
    %c0_58 = arith.constant 0 : index
    %177 = vector.load %arg13[%176, %c0_57, %c0_58] : memref<8x2x64xf32, #tpu.memory_space<vmem>>, vector<1x2x64xf32>
    %178 = vector.shape_cast %177 : vector<1x2x64xf32> to vector<2x64xf32>
    %179 = vector.shape_cast %171 : vector<2x64xf32> to vector<1x2x64xf32>
    tpu.vector_store %arg13[%176, %c0_57, %c0_58], %179 {strides = array<i32>} : memref<8x2x64xf32, #tpu.memory_space<vmem>>, vector<1x2x64xf32>,
    %c2_i32 = arith.constant 2 : i32
    %c7_i32_59 = arith.constant 7 : i32
    %180 = arith.subi %c7_i32_59, %c2_i32 : i32
    %181 = arith.index_cast %c2_i32 : i32 to index
    %c0_60 = arith.constant 0 : index
    %c0_61 = arith.constant 0 : index
    %182 = vector.load %arg10[%181, %c0_60, %c0_61] : memref<8x2x192xf32, #tpu.memory_space<vmem>>, vector<1x2x192xf32>
    %183 = vector.shape_cast %182 : vector<1x2x192xf32> to vector<2x192xf32>
    %184 = arith.truncf %137 : vector<2x64xf32> to vector<2x64xbf16>
    %185 = arith.truncf %21 : vector<64x192xf32> to vector<64x192xbf16>
    %cst_62 = arith.constant dense<0.000000e+00> : vector<2x192xf32>
    %186 = tpu.matmul %184, %185, %cst_62 {dimension_numbers = #tpu.dot_dimension_numbers<[1], [0], [0], [1], [0, 0, 1, 1], [], []>} : vector<2x64xbf16>, vector<64x192xbf16>, vector<2x192xf32> -> vector<2x192xf32>
    %187 = vector.broadcast %23 : vector<1x192xf32> to vector<2x192xf32>
    %188 = arith.addf %186, %187 : vector<2x192xf32>
    %189 = vector.extract_strided_slice %183 {offsets = [0, 0], sizes = [2, 64], strides = [1, 1]} : vector<2x192xf32> to vector<2x64xf32>
    %190 = vector.extract_strided_slice %188 {offsets = [0, 0], sizes = [2, 64], strides = [1, 1]} : vector<2x192xf32> to vector<2x64xf32>
    %191 = arith.addf %189, %190 : vector<2x64xf32>
    %192 = arith.negf %191 : vector<2x64xf32>
    %193 = math.exp %192 : vector<2x64xf32>
    %cst_63 = arith.constant 1.000000e+00 : f32
    %194 = vector.broadcast %cst_63 : f32 to vector<2x64xf32>
    %195 = arith.addf %194, %193 : vector<2x64xf32>
    %196 = arith.divf %194, %195 : vector<2x64xf32>
    %197 = vector.extract_strided_slice %183 {offsets = [0, 64], sizes = [2, 64], strides = [1, 1]} : vector<2x192xf32> to vector<2x64xf32>
    %198 = vector.extract_strided_slice %188 {offsets = [0, 64], sizes = [2, 64], strides = [1, 1]} : vector<2x192xf32> to vector<2x64xf32>
    %199 = arith.addf %197, %198 : vector<2x64xf32>
    %200 = arith.negf %199 : vector<2x64xf32>
    %201 = math.exp %200 : vector<2x64xf32>
    %cst_64 = arith.constant 1.000000e+00 : f32
    %202 = vector.broadcast %cst_64 : f32 to vector<2x64xf32>
    %203 = arith.addf %202, %201 : vector<2x64xf32>
    %204 = arith.divf %202, %203 : vector<2x64xf32>
    %205 = vector.extract_strided_slice %183 {offsets = [0, 128], sizes = [2, 64], strides = [1, 1]} : vector<2x192xf32> to vector<2x64xf32>
    %206 = vector.extract_strided_slice %188 {offsets = [0, 128], sizes = [2, 64], strides = [1, 1]} : vector<2x192xf32> to vector<2x64xf32>
    %207 = arith.mulf %196, %206 : vector<2x64xf32>
    %208 = arith.addf %205, %207 : vector<2x64xf32>
    %209 = math.tanh %208 : vector<2x64xf32>
    %cst_65 = arith.constant 1.000000e+00 : f32
    %210 = vector.broadcast %cst_65 : f32 to vector<2x64xf32>
    %211 = arith.subf %210, %204 : vector<2x64xf32>
    %212 = arith.mulf %211, %209 : vector<2x64xf32>
    %213 = arith.mulf %204, %137 : vector<2x64xf32>
    %214 = arith.addf %212, %213 : vector<2x64xf32>
    %215 = arith.index_cast %180 : i32 to index
    %c0_66 = arith.constant 0 : index
    %c0_67 = arith.constant 0 : index
    %216 = vector.load %arg11[%215, %c0_66, %c0_67] : memref<8x2x192xf32, #tpu.memory_space<vmem>>, vector<1x2x192xf32>
    %217 = vector.shape_cast %216 : vector<1x2x192xf32> to vector<2x192xf32>
    %218 = arith.truncf %171 : vector<2x64xf32> to vector<2x64xbf16>
    %219 = arith.truncf %22 : vector<64x192xf32> to vector<64x192xbf16>
    %cst_68 = arith.constant dense<0.000000e+00> : vector<2x192xf32>
    %220 = tpu.matmul %218, %219, %cst_68 {dimension_numbers = #tpu.dot_dimension_numbers<[1], [0], [0], [1], [0, 0, 1, 1], [], []>} : vector<2x64xbf16>, vector<64x192xbf16>, vector<2x192xf32> -> vector<2x192xf32>
    %221 = vector.broadcast %24 : vector<1x192xf32> to vector<2x192xf32>
    %222 = arith.addf %220, %221 : vector<2x192xf32>
    %223 = vector.extract_strided_slice %217 {offsets = [0, 0], sizes = [2, 64], strides = [1, 1]} : vector<2x192xf32> to vector<2x64xf32>
    %224 = vector.extract_strided_slice %222 {offsets = [0, 0], sizes = [2, 64], strides = [1, 1]} : vector<2x192xf32> to vector<2x64xf32>
    %225 = arith.addf %223, %224 : vector<2x64xf32>
    %226 = arith.negf %225 : vector<2x64xf32>
    %227 = math.exp %226 : vector<2x64xf32>
    %cst_69 = arith.constant 1.000000e+00 : f32
    %228 = vector.broadcast %cst_69 : f32 to vector<2x64xf32>
    %229 = arith.addf %228, %227 : vector<2x64xf32>
    %230 = arith.divf %228, %229 : vector<2x64xf32>
    %231 = vector.extract_strided_slice %217 {offsets = [0, 64], sizes = [2, 64], strides = [1, 1]} : vector<2x192xf32> to vector<2x64xf32>
    %232 = vector.extract_strided_slice %222 {offsets = [0, 64], sizes = [2, 64], strides = [1, 1]} : vector<2x192xf32> to vector<2x64xf32>
    %233 = arith.addf %231, %232 : vector<2x64xf32>
    %234 = arith.negf %233 : vector<2x64xf32>
    %235 = math.exp %234 : vector<2x64xf32>
    %cst_70 = arith.constant 1.000000e+00 : f32
    %236 = vector.broadcast %cst_70 : f32 to vector<2x64xf32>
    %237 = arith.addf %236, %235 : vector<2x64xf32>
    %238 = arith.divf %236, %237 : vector<2x64xf32>
    %239 = vector.extract_strided_slice %217 {offsets = [0, 128], sizes = [2, 64], strides = [1, 1]} : vector<2x192xf32> to vector<2x64xf32>
    %240 = vector.extract_strided_slice %222 {offsets = [0, 128], sizes = [2, 64], strides = [1, 1]} : vector<2x192xf32> to vector<2x64xf32>
    %241 = arith.mulf %230, %240 : vector<2x64xf32>
    %242 = arith.addf %239, %241 : vector<2x64xf32>
    %243 = math.tanh %242 : vector<2x64xf32>
    %cst_71 = arith.constant 1.000000e+00 : f32
    %244 = vector.broadcast %cst_71 : f32 to vector<2x64xf32>
    %245 = arith.subf %244, %238 : vector<2x64xf32>
    %246 = arith.mulf %245, %243 : vector<2x64xf32>
    %247 = arith.mulf %238, %171 : vector<2x64xf32>
    %248 = arith.addf %246, %247 : vector<2x64xf32>
    %249 = arith.index_cast %c2_i32 : i32 to index
    %c0_72 = arith.constant 0 : index
    %c0_73 = arith.constant 0 : index
    %250 = vector.load %arg12[%249, %c0_72, %c0_73] : memref<8x2x64xf32, #tpu.memory_space<vmem>>, vector<1x2x64xf32>
    %251 = vector.shape_cast %250 : vector<1x2x64xf32> to vector<2x64xf32>
    %252 = vector.shape_cast %214 : vector<2x64xf32> to vector<1x2x64xf32>
    tpu.vector_store %arg12[%249, %c0_72, %c0_73], %252 {strides = array<i32>} : memref<8x2x64xf32, #tpu.memory_space<vmem>>, vector<1x2x64xf32>,
    %253 = arith.index_cast %180 : i32 to index
    %c0_74 = arith.constant 0 : index
    %c0_75 = arith.constant 0 : index
    %254 = vector.load %arg13[%253, %c0_74, %c0_75] : memref<8x2x64xf32, #tpu.memory_space<vmem>>, vector<1x2x64xf32>
    %255 = vector.shape_cast %254 : vector<1x2x64xf32> to vector<2x64xf32>
    %256 = vector.shape_cast %248 : vector<2x64xf32> to vector<1x2x64xf32>
    tpu.vector_store %arg13[%253, %c0_74, %c0_75], %256 {strides = array<i32>} : memref<8x2x64xf32, #tpu.memory_space<vmem>>, vector<1x2x64xf32>,
    %c3_i32 = arith.constant 3 : i32
    %c7_i32_76 = arith.constant 7 : i32
    %257 = arith.subi %c7_i32_76, %c3_i32 : i32
    %258 = arith.index_cast %c3_i32 : i32 to index
    %c0_77 = arith.constant 0 : index
    %c0_78 = arith.constant 0 : index
    %259 = vector.load %arg10[%258, %c0_77, %c0_78] : memref<8x2x192xf32, #tpu.memory_space<vmem>>, vector<1x2x192xf32>
    %260 = vector.shape_cast %259 : vector<1x2x192xf32> to vector<2x192xf32>
    %261 = arith.truncf %214 : vector<2x64xf32> to vector<2x64xbf16>
    %262 = arith.truncf %21 : vector<64x192xf32> to vector<64x192xbf16>
    %cst_79 = arith.constant dense<0.000000e+00> : vector<2x192xf32>
    %263 = tpu.matmul %261, %262, %cst_79 {dimension_numbers = #tpu.dot_dimension_numbers<[1], [0], [0], [1], [0, 0, 1, 1], [], []>} : vector<2x64xbf16>, vector<64x192xbf16>, vector<2x192xf32> -> vector<2x192xf32>
    %264 = vector.broadcast %23 : vector<1x192xf32> to vector<2x192xf32>
    %265 = arith.addf %263, %264 : vector<2x192xf32>
    %266 = vector.extract_strided_slice %260 {offsets = [0, 0], sizes = [2, 64], strides = [1, 1]} : vector<2x192xf32> to vector<2x64xf32>
    %267 = vector.extract_strided_slice %265 {offsets = [0, 0], sizes = [2, 64], strides = [1, 1]} : vector<2x192xf32> to vector<2x64xf32>
    %268 = arith.addf %266, %267 : vector<2x64xf32>
    %269 = arith.negf %268 : vector<2x64xf32>
    %270 = math.exp %269 : vector<2x64xf32>
    %cst_80 = arith.constant 1.000000e+00 : f32
    %271 = vector.broadcast %cst_80 : f32 to vector<2x64xf32>
    %272 = arith.addf %271, %270 : vector<2x64xf32>
    %273 = arith.divf %271, %272 : vector<2x64xf32>
    %274 = vector.extract_strided_slice %260 {offsets = [0, 64], sizes = [2, 64], strides = [1, 1]} : vector<2x192xf32> to vector<2x64xf32>
    %275 = vector.extract_strided_slice %265 {offsets = [0, 64], sizes = [2, 64], strides = [1, 1]} : vector<2x192xf32> to vector<2x64xf32>
    %276 = arith.addf %274, %275 : vector<2x64xf32>
    %277 = arith.negf %276 : vector<2x64xf32>
    %278 = math.exp %277 : vector<2x64xf32>
    %cst_81 = arith.constant 1.000000e+00 : f32
    %279 = vector.broadcast %cst_81 : f32 to vector<2x64xf32>
    %280 = arith.addf %279, %278 : vector<2x64xf32>
    %281 = arith.divf %279, %280 : vector<2x64xf32>
    %282 = vector.extract_strided_slice %260 {offsets = [0, 128], sizes = [2, 64], strides = [1, 1]} : vector<2x192xf32> to vector<2x64xf32>
    %283 = vector.extract_strided_slice %265 {offsets = [0, 128], sizes = [2, 64], strides = [1, 1]} : vector<2x192xf32> to vector<2x64xf32>
    %284 = arith.mulf %273, %283 : vector<2x64xf32>
    %285 = arith.addf %282, %284 : vector<2x64xf32>
    %286 = math.tanh %285 : vector<2x64xf32>
    %cst_82 = arith.constant 1.000000e+00 : f32
    %287 = vector.broadcast %cst_82 : f32 to vector<2x64xf32>
    %288 = arith.subf %287, %281 : vector<2x64xf32>
    %289 = arith.mulf %288, %286 : vector<2x64xf32>
    %290 = arith.mulf %281, %214 : vector<2x64xf32>
    %291 = arith.addf %289, %290 : vector<2x64xf32>
    %292 = arith.index_cast %257 : i32 to index
    %c0_83 = arith.constant 0 : index
    %c0_84 = arith.constant 0 : index
    %293 = vector.load %arg11[%292, %c0_83, %c0_84] : memref<8x2x192xf32, #tpu.memory_space<vmem>>, vector<1x2x192xf32>
    %294 = vector.shape_cast %293 : vector<1x2x192xf32> to vector<2x192xf32>
    %295 = arith.truncf %248 : vector<2x64xf32> to vector<2x64xbf16>
    %296 = arith.truncf %22 : vector<64x192xf32> to vector<64x192xbf16>
    %cst_85 = arith.constant dense<0.000000e+00> : vector<2x192xf32>
    %297 = tpu.matmul %295, %296, %cst_85 {dimension_numbers = #tpu.dot_dimension_numbers<[1], [0], [0], [1], [0, 0, 1, 1], [], []>} : vector<2x64xbf16>, vector<64x192xbf16>, vector<2x192xf32> -> vector<2x192xf32>
    %298 = vector.broadcast %24 : vector<1x192xf32> to vector<2x192xf32>
    %299 = arith.addf %297, %298 : vector<2x192xf32>
    %300 = vector.extract_strided_slice %294 {offsets = [0, 0], sizes = [2, 64], strides = [1, 1]} : vector<2x192xf32> to vector<2x64xf32>
    %301 = vector.extract_strided_slice %299 {offsets = [0, 0], sizes = [2, 64], strides = [1, 1]} : vector<2x192xf32> to vector<2x64xf32>
    %302 = arith.addf %300, %301 : vector<2x64xf32>
    %303 = arith.negf %302 : vector<2x64xf32>
    %304 = math.exp %303 : vector<2x64xf32>
    %cst_86 = arith.constant 1.000000e+00 : f32
    %305 = vector.broadcast %cst_86 : f32 to vector<2x64xf32>
    %306 = arith.addf %305, %304 : vector<2x64xf32>
    %307 = arith.divf %305, %306 : vector<2x64xf32>
    %308 = vector.extract_strided_slice %294 {offsets = [0, 64], sizes = [2, 64], strides = [1, 1]} : vector<2x192xf32> to vector<2x64xf32>
    %309 = vector.extract_strided_slice %299 {offsets = [0, 64], sizes = [2, 64], strides = [1, 1]} : vector<2x192xf32> to vector<2x64xf32>
    %310 = arith.addf %308, %309 : vector<2x64xf32>
    %311 = arith.negf %310 : vector<2x64xf32>
    %312 = math.exp %311 : vector<2x64xf32>
    %cst_87 = arith.constant 1.000000e+00 : f32
    %313 = vector.broadcast %cst_87 : f32 to vector<2x64xf32>
    %314 = arith.addf %313, %312 : vector<2x64xf32>
    %315 = arith.divf %313, %314 : vector<2x64xf32>
    %316 = vector.extract_strided_slice %294 {offsets = [0, 128], sizes = [2, 64], strides = [1, 1]} : vector<2x192xf32> to vector<2x64xf32>
    %317 = vector.extract_strided_slice %299 {offsets = [0, 128], sizes = [2, 64], strides = [1, 1]} : vector<2x192xf32> to vector<2x64xf32>
    %318 = arith.mulf %307, %317 : vector<2x64xf32>
    %319 = arith.addf %316, %318 : vector<2x64xf32>
    %320 = math.tanh %319 : vector<2x64xf32>
    %cst_88 = arith.constant 1.000000e+00 : f32
    %321 = vector.broadcast %cst_88 : f32 to vector<2x64xf32>
    %322 = arith.subf %321, %315 : vector<2x64xf32>
    %323 = arith.mulf %322, %320 : vector<2x64xf32>
    %324 = arith.mulf %315, %248 : vector<2x64xf32>
    %325 = arith.addf %323, %324 : vector<2x64xf32>
    %326 = arith.index_cast %c3_i32 : i32 to index
    %c0_89 = arith.constant 0 : index
    %c0_90 = arith.constant 0 : index
    %327 = vector.load %arg12[%326, %c0_89, %c0_90] : memref<8x2x64xf32, #tpu.memory_space<vmem>>, vector<1x2x64xf32>
    %328 = vector.shape_cast %327 : vector<1x2x64xf32> to vector<2x64xf32>
    %329 = vector.shape_cast %291 : vector<2x64xf32> to vector<1x2x64xf32>
    tpu.vector_store %arg12[%326, %c0_89, %c0_90], %329 {strides = array<i32>} : memref<8x2x64xf32, #tpu.memory_space<vmem>>, vector<1x2x64xf32>,
    %330 = arith.index_cast %257 : i32 to index
    %c0_91 = arith.constant 0 : index
    %c0_92 = arith.constant 0 : index
    %331 = vector.load %arg13[%330, %c0_91, %c0_92] : memref<8x2x64xf32, #tpu.memory_space<vmem>>, vector<1x2x64xf32>
    %332 = vector.shape_cast %331 : vector<1x2x64xf32> to vector<2x64xf32>
    %333 = vector.shape_cast %325 : vector<2x64xf32> to vector<1x2x64xf32>
    tpu.vector_store %arg13[%330, %c0_91, %c0_92], %333 {strides = array<i32>} : memref<8x2x64xf32, #tpu.memory_space<vmem>>, vector<1x2x64xf32>,
    %c4_i32 = arith.constant 4 : i32
    %c7_i32_93 = arith.constant 7 : i32
    %334 = arith.subi %c7_i32_93, %c4_i32 : i32
    %335 = arith.index_cast %c4_i32 : i32 to index
    %c0_94 = arith.constant 0 : index
    %c0_95 = arith.constant 0 : index
    %336 = vector.load %arg10[%335, %c0_94, %c0_95] : memref<8x2x192xf32, #tpu.memory_space<vmem>>, vector<1x2x192xf32>
    %337 = vector.shape_cast %336 : vector<1x2x192xf32> to vector<2x192xf32>
    %338 = arith.truncf %291 : vector<2x64xf32> to vector<2x64xbf16>
    %339 = arith.truncf %21 : vector<64x192xf32> to vector<64x192xbf16>
    %cst_96 = arith.constant dense<0.000000e+00> : vector<2x192xf32>
    %340 = tpu.matmul %338, %339, %cst_96 {dimension_numbers = #tpu.dot_dimension_numbers<[1], [0], [0], [1], [0, 0, 1, 1], [], []>} : vector<2x64xbf16>, vector<64x192xbf16>, vector<2x192xf32> -> vector<2x192xf32>
    %341 = vector.broadcast %23 : vector<1x192xf32> to vector<2x192xf32>
    %342 = arith.addf %340, %341 : vector<2x192xf32>
    %343 = vector.extract_strided_slice %337 {offsets = [0, 0], sizes = [2, 64], strides = [1, 1]} : vector<2x192xf32> to vector<2x64xf32>
    %344 = vector.extract_strided_slice %342 {offsets = [0, 0], sizes = [2, 64], strides = [1, 1]} : vector<2x192xf32> to vector<2x64xf32>
    %345 = arith.addf %343, %344 : vector<2x64xf32>
    %346 = arith.negf %345 : vector<2x64xf32>
    %347 = math.exp %346 : vector<2x64xf32>
    %cst_97 = arith.constant 1.000000e+00 : f32
    %348 = vector.broadcast %cst_97 : f32 to vector<2x64xf32>
    %349 = arith.addf %348, %347 : vector<2x64xf32>
    %350 = arith.divf %348, %349 : vector<2x64xf32>
    %351 = vector.extract_strided_slice %337 {offsets = [0, 64], sizes = [2, 64], strides = [1, 1]} : vector<2x192xf32> to vector<2x64xf32>
    %352 = vector.extract_strided_slice %342 {offsets = [0, 64], sizes = [2, 64], strides = [1, 1]} : vector<2x192xf32> to vector<2x64xf32>
    %353 = arith.addf %351, %352 : vector<2x64xf32>
    %354 = arith.negf %353 : vector<2x64xf32>
    %355 = math.exp %354 : vector<2x64xf32>
    %cst_98 = arith.constant 1.000000e+00 : f32
    %356 = vector.broadcast %cst_98 : f32 to vector<2x64xf32>
    %357 = arith.addf %356, %355 : vector<2x64xf32>
    %358 = arith.divf %356, %357 : vector<2x64xf32>
    %359 = vector.extract_strided_slice %337 {offsets = [0, 128], sizes = [2, 64], strides = [1, 1]} : vector<2x192xf32> to vector<2x64xf32>
    %360 = vector.extract_strided_slice %342 {offsets = [0, 128], sizes = [2, 64], strides = [1, 1]} : vector<2x192xf32> to vector<2x64xf32>
    %361 = arith.mulf %350, %360 : vector<2x64xf32>
    %362 = arith.addf %359, %361 : vector<2x64xf32>
    %363 = math.tanh %362 : vector<2x64xf32>
    %cst_99 = arith.constant 1.000000e+00 : f32
    %364 = vector.broadcast %cst_99 : f32 to vector<2x64xf32>
    %365 = arith.subf %364, %358 : vector<2x64xf32>
    %366 = arith.mulf %365, %363 : vector<2x64xf32>
    %367 = arith.mulf %358, %291 : vector<2x64xf32>
    %368 = arith.addf %366, %367 : vector<2x64xf32>
    %369 = arith.index_cast %334 : i32 to index
    %c0_100 = arith.constant 0 : index
    %c0_101 = arith.constant 0 : index
    %370 = vector.load %arg11[%369, %c0_100, %c0_101] : memref<8x2x192xf32, #tpu.memory_space<vmem>>, vector<1x2x192xf32>
    %371 = vector.shape_cast %370 : vector<1x2x192xf32> to vector<2x192xf32>
    %372 = arith.truncf %325 : vector<2x64xf32> to vector<2x64xbf16>
    %373 = arith.truncf %22 : vector<64x192xf32> to vector<64x192xbf16>
    %cst_102 = arith.constant dense<0.000000e+00> : vector<2x192xf32>
    %374 = tpu.matmul %372, %373, %cst_102 {dimension_numbers = #tpu.dot_dimension_numbers<[1], [0], [0], [1], [0, 0, 1, 1], [], []>} : vector<2x64xbf16>, vector<64x192xbf16>, vector<2x192xf32> -> vector<2x192xf32>
    %375 = vector.broadcast %24 : vector<1x192xf32> to vector<2x192xf32>
    %376 = arith.addf %374, %375 : vector<2x192xf32>
    %377 = vector.extract_strided_slice %371 {offsets = [0, 0], sizes = [2, 64], strides = [1, 1]} : vector<2x192xf32> to vector<2x64xf32>
    %378 = vector.extract_strided_slice %376 {offsets = [0, 0], sizes = [2, 64], strides = [1, 1]} : vector<2x192xf32> to vector<2x64xf32>
    %379 = arith.addf %377, %378 : vector<2x64xf32>
    %380 = arith.negf %379 : vector<2x64xf32>
    %381 = math.exp %380 : vector<2x64xf32>
    %cst_103 = arith.constant 1.000000e+00 : f32
    %382 = vector.broadcast %cst_103 : f32 to vector<2x64xf32>
    %383 = arith.addf %382, %381 : vector<2x64xf32>
    %384 = arith.divf %382, %383 : vector<2x64xf32>
    %385 = vector.extract_strided_slice %371 {offsets = [0, 64], sizes = [2, 64], strides = [1, 1]} : vector<2x192xf32> to vector<2x64xf32>
    %386 = vector.extract_strided_slice %376 {offsets = [0, 64], sizes = [2, 64], strides = [1, 1]} : vector<2x192xf32> to vector<2x64xf32>
    %387 = arith.addf %385, %386 : vector<2x64xf32>
    %388 = arith.negf %387 : vector<2x64xf32>
    %389 = math.exp %388 : vector<2x64xf32>
    %cst_104 = arith.constant 1.000000e+00 : f32
    %390 = vector.broadcast %cst_104 : f32 to vector<2x64xf32>
    %391 = arith.addf %390, %389 : vector<2x64xf32>
    %392 = arith.divf %390, %391 : vector<2x64xf32>
    %393 = vector.extract_strided_slice %371 {offsets = [0, 128], sizes = [2, 64], strides = [1, 1]} : vector<2x192xf32> to vector<2x64xf32>
    %394 = vector.extract_strided_slice %376 {offsets = [0, 128], sizes = [2, 64], strides = [1, 1]} : vector<2x192xf32> to vector<2x64xf32>
    %395 = arith.mulf %384, %394 : vector<2x64xf32>
    %396 = arith.addf %393, %395 : vector<2x64xf32>
    %397 = math.tanh %396 : vector<2x64xf32>
    %cst_105 = arith.constant 1.000000e+00 : f32
    %398 = vector.broadcast %cst_105 : f32 to vector<2x64xf32>
    %399 = arith.subf %398, %392 : vector<2x64xf32>
    %400 = arith.mulf %399, %397 : vector<2x64xf32>
    %401 = arith.mulf %392, %325 : vector<2x64xf32>
    %402 = arith.addf %400, %401 : vector<2x64xf32>
    %403 = arith.index_cast %c4_i32 : i32 to index
    %c0_106 = arith.constant 0 : index
    %c0_107 = arith.constant 0 : index
    %404 = vector.load %arg12[%403, %c0_106, %c0_107] : memref<8x2x64xf32, #tpu.memory_space<vmem>>, vector<1x2x64xf32>
    %405 = vector.shape_cast %404 : vector<1x2x64xf32> to vector<2x64xf32>
    %406 = vector.shape_cast %368 : vector<2x64xf32> to vector<1x2x64xf32>
    tpu.vector_store %arg12[%403, %c0_106, %c0_107], %406 {strides = array<i32>} : memref<8x2x64xf32, #tpu.memory_space<vmem>>, vector<1x2x64xf32>,
    %407 = arith.index_cast %334 : i32 to index
    %c0_108 = arith.constant 0 : index
    %c0_109 = arith.constant 0 : index
    %408 = vector.load %arg13[%407, %c0_108, %c0_109] : memref<8x2x64xf32, #tpu.memory_space<vmem>>, vector<1x2x64xf32>
    %409 = vector.shape_cast %408 : vector<1x2x64xf32> to vector<2x64xf32>
    %410 = vector.shape_cast %402 : vector<2x64xf32> to vector<1x2x64xf32>
    tpu.vector_store %arg13[%407, %c0_108, %c0_109], %410 {strides = array<i32>} : memref<8x2x64xf32, #tpu.memory_space<vmem>>, vector<1x2x64xf32>,
    %c5_i32 = arith.constant 5 : i32
    %c7_i32_110 = arith.constant 7 : i32
    %411 = arith.subi %c7_i32_110, %c5_i32 : i32
    %412 = arith.index_cast %c5_i32 : i32 to index
    %c0_111 = arith.constant 0 : index
    %c0_112 = arith.constant 0 : index
    %413 = vector.load %arg10[%412, %c0_111, %c0_112] : memref<8x2x192xf32, #tpu.memory_space<vmem>>, vector<1x2x192xf32>
    %414 = vector.shape_cast %413 : vector<1x2x192xf32> to vector<2x192xf32>
    %415 = arith.truncf %368 : vector<2x64xf32> to vector<2x64xbf16>
    %416 = arith.truncf %21 : vector<64x192xf32> to vector<64x192xbf16>
    %cst_113 = arith.constant dense<0.000000e+00> : vector<2x192xf32>
    %417 = tpu.matmul %415, %416, %cst_113 {dimension_numbers = #tpu.dot_dimension_numbers<[1], [0], [0], [1], [0, 0, 1, 1], [], []>} : vector<2x64xbf16>, vector<64x192xbf16>, vector<2x192xf32> -> vector<2x192xf32>
    %418 = vector.broadcast %23 : vector<1x192xf32> to vector<2x192xf32>
    %419 = arith.addf %417, %418 : vector<2x192xf32>
    %420 = vector.extract_strided_slice %414 {offsets = [0, 0], sizes = [2, 64], strides = [1, 1]} : vector<2x192xf32> to vector<2x64xf32>
    %421 = vector.extract_strided_slice %419 {offsets = [0, 0], sizes = [2, 64], strides = [1, 1]} : vector<2x192xf32> to vector<2x64xf32>
    %422 = arith.addf %420, %421 : vector<2x64xf32>
    %423 = arith.negf %422 : vector<2x64xf32>
    %424 = math.exp %423 : vector<2x64xf32>
    %cst_114 = arith.constant 1.000000e+00 : f32
    %425 = vector.broadcast %cst_114 : f32 to vector<2x64xf32>
    %426 = arith.addf %425, %424 : vector<2x64xf32>
    %427 = arith.divf %425, %426 : vector<2x64xf32>
    %428 = vector.extract_strided_slice %414 {offsets = [0, 64], sizes = [2, 64], strides = [1, 1]} : vector<2x192xf32> to vector<2x64xf32>
    %429 = vector.extract_strided_slice %419 {offsets = [0, 64], sizes = [2, 64], strides = [1, 1]} : vector<2x192xf32> to vector<2x64xf32>
    %430 = arith.addf %428, %429 : vector<2x64xf32>
    %431 = arith.negf %430 : vector<2x64xf32>
    %432 = math.exp %431 : vector<2x64xf32>
    %cst_115 = arith.constant 1.000000e+00 : f32
    %433 = vector.broadcast %cst_115 : f32 to vector<2x64xf32>
    %434 = arith.addf %433, %432 : vector<2x64xf32>
    %435 = arith.divf %433, %434 : vector<2x64xf32>
    %436 = vector.extract_strided_slice %414 {offsets = [0, 128], sizes = [2, 64], strides = [1, 1]} : vector<2x192xf32> to vector<2x64xf32>
    %437 = vector.extract_strided_slice %419 {offsets = [0, 128], sizes = [2, 64], strides = [1, 1]} : vector<2x192xf32> to vector<2x64xf32>
    %438 = arith.mulf %427, %437 : vector<2x64xf32>
    %439 = arith.addf %436, %438 : vector<2x64xf32>
    %440 = math.tanh %439 : vector<2x64xf32>
    %cst_116 = arith.constant 1.000000e+00 : f32
    %441 = vector.broadcast %cst_116 : f32 to vector<2x64xf32>
    %442 = arith.subf %441, %435 : vector<2x64xf32>
    %443 = arith.mulf %442, %440 : vector<2x64xf32>
    %444 = arith.mulf %435, %368 : vector<2x64xf32>
    %445 = arith.addf %443, %444 : vector<2x64xf32>
    %446 = arith.index_cast %411 : i32 to index
    %c0_117 = arith.constant 0 : index
    %c0_118 = arith.constant 0 : index
    %447 = vector.load %arg11[%446, %c0_117, %c0_118] : memref<8x2x192xf32, #tpu.memory_space<vmem>>, vector<1x2x192xf32>
    %448 = vector.shape_cast %447 : vector<1x2x192xf32> to vector<2x192xf32>
    %449 = arith.truncf %402 : vector<2x64xf32> to vector<2x64xbf16>
    %450 = arith.truncf %22 : vector<64x192xf32> to vector<64x192xbf16>
    %cst_119 = arith.constant dense<0.000000e+00> : vector<2x192xf32>
    %451 = tpu.matmul %449, %450, %cst_119 {dimension_numbers = #tpu.dot_dimension_numbers<[1], [0], [0], [1], [0, 0, 1, 1], [], []>} : vector<2x64xbf16>, vector<64x192xbf16>, vector<2x192xf32> -> vector<2x192xf32>
    %452 = vector.broadcast %24 : vector<1x192xf32> to vector<2x192xf32>
    %453 = arith.addf %451, %452 : vector<2x192xf32>
    %454 = vector.extract_strided_slice %448 {offsets = [0, 0], sizes = [2, 64], strides = [1, 1]} : vector<2x192xf32> to vector<2x64xf32>
    %455 = vector.extract_strided_slice %453 {offsets = [0, 0], sizes = [2, 64], strides = [1, 1]} : vector<2x192xf32> to vector<2x64xf32>
    %456 = arith.addf %454, %455 : vector<2x64xf32>
    %457 = arith.negf %456 : vector<2x64xf32>
    %458 = math.exp %457 : vector<2x64xf32>
    %cst_120 = arith.constant 1.000000e+00 : f32
    %459 = vector.broadcast %cst_120 : f32 to vector<2x64xf32>
    %460 = arith.addf %459, %458 : vector<2x64xf32>
    %461 = arith.divf %459, %460 : vector<2x64xf32>
    %462 = vector.extract_strided_slice %448 {offsets = [0, 64], sizes = [2, 64], strides = [1, 1]} : vector<2x192xf32> to vector<2x64xf32>
    %463 = vector.extract_strided_slice %453 {offsets = [0, 64], sizes = [2, 64], strides = [1, 1]} : vector<2x192xf32> to vector<2x64xf32>
    %464 = arith.addf %462, %463 : vector<2x64xf32>
    %465 = arith.negf %464 : vector<2x64xf32>
    %466 = math.exp %465 : vector<2x64xf32>
    %cst_121 = arith.constant 1.000000e+00 : f32
    %467 = vector.broadcast %cst_121 : f32 to vector<2x64xf32>
    %468 = arith.addf %467, %466 : vector<2x64xf32>
    %469 = arith.divf %467, %468 : vector<2x64xf32>
    %470 = vector.extract_strided_slice %448 {offsets = [0, 128], sizes = [2, 64], strides = [1, 1]} : vector<2x192xf32> to vector<2x64xf32>
    %471 = vector.extract_strided_slice %453 {offsets = [0, 128], sizes = [2, 64], strides = [1, 1]} : vector<2x192xf32> to vector<2x64xf32>
    %472 = arith.mulf %461, %471 : vector<2x64xf32>
    %473 = arith.addf %470, %472 : vector<2x64xf32>
    %474 = math.tanh %473 : vector<2x64xf32>
    %cst_122 = arith.constant 1.000000e+00 : f32
    %475 = vector.broadcast %cst_122 : f32 to vector<2x64xf32>
    %476 = arith.subf %475, %469 : vector<2x64xf32>
    %477 = arith.mulf %476, %474 : vector<2x64xf32>
    %478 = arith.mulf %469, %402 : vector<2x64xf32>
    %479 = arith.addf %477, %478 : vector<2x64xf32>
    %480 = arith.index_cast %c5_i32 : i32 to index
    %c0_123 = arith.constant 0 : index
    %c0_124 = arith.constant 0 : index
    %481 = vector.load %arg12[%480, %c0_123, %c0_124] : memref<8x2x64xf32, #tpu.memory_space<vmem>>, vector<1x2x64xf32>
    %482 = vector.shape_cast %481 : vector<1x2x64xf32> to vector<2x64xf32>
    %483 = vector.shape_cast %445 : vector<2x64xf32> to vector<1x2x64xf32>
    tpu.vector_store %arg12[%480, %c0_123, %c0_124], %483 {strides = array<i32>} : memref<8x2x64xf32, #tpu.memory_space<vmem>>, vector<1x2x64xf32>,
    %484 = arith.index_cast %411 : i32 to index
    %c0_125 = arith.constant 0 : index
    %c0_126 = arith.constant 0 : index
    %485 = vector.load %arg13[%484, %c0_125, %c0_126] : memref<8x2x64xf32, #tpu.memory_space<vmem>>, vector<1x2x64xf32>
    %486 = vector.shape_cast %485 : vector<1x2x64xf32> to vector<2x64xf32>
    %487 = vector.shape_cast %479 : vector<2x64xf32> to vector<1x2x64xf32>
    tpu.vector_store %arg13[%484, %c0_125, %c0_126], %487 {strides = array<i32>} : memref<8x2x64xf32, #tpu.memory_space<vmem>>, vector<1x2x64xf32>,
    %c6_i32 = arith.constant 6 : i32
    %c7_i32_127 = arith.constant 7 : i32
    %488 = arith.subi %c7_i32_127, %c6_i32 : i32
    %489 = arith.index_cast %c6_i32 : i32 to index
    %c0_128 = arith.constant 0 : index
    %c0_129 = arith.constant 0 : index
    %490 = vector.load %arg10[%489, %c0_128, %c0_129] : memref<8x2x192xf32, #tpu.memory_space<vmem>>, vector<1x2x192xf32>
    %491 = vector.shape_cast %490 : vector<1x2x192xf32> to vector<2x192xf32>
    %492 = arith.truncf %445 : vector<2x64xf32> to vector<2x64xbf16>
    %493 = arith.truncf %21 : vector<64x192xf32> to vector<64x192xbf16>
    %cst_130 = arith.constant dense<0.000000e+00> : vector<2x192xf32>
    %494 = tpu.matmul %492, %493, %cst_130 {dimension_numbers = #tpu.dot_dimension_numbers<[1], [0], [0], [1], [0, 0, 1, 1], [], []>} : vector<2x64xbf16>, vector<64x192xbf16>, vector<2x192xf32> -> vector<2x192xf32>
    %495 = vector.broadcast %23 : vector<1x192xf32> to vector<2x192xf32>
    %496 = arith.addf %494, %495 : vector<2x192xf32>
    %497 = vector.extract_strided_slice %491 {offsets = [0, 0], sizes = [2, 64], strides = [1, 1]} : vector<2x192xf32> to vector<2x64xf32>
    %498 = vector.extract_strided_slice %496 {offsets = [0, 0], sizes = [2, 64], strides = [1, 1]} : vector<2x192xf32> to vector<2x64xf32>
    %499 = arith.addf %497, %498 : vector<2x64xf32>
    %500 = arith.negf %499 : vector<2x64xf32>
    %501 = math.exp %500 : vector<2x64xf32>
    %cst_131 = arith.constant 1.000000e+00 : f32
    %502 = vector.broadcast %cst_131 : f32 to vector<2x64xf32>
    %503 = arith.addf %502, %501 : vector<2x64xf32>
    %504 = arith.divf %502, %503 : vector<2x64xf32>
    %505 = vector.extract_strided_slice %491 {offsets = [0, 64], sizes = [2, 64], strides = [1, 1]} : vector<2x192xf32> to vector<2x64xf32>
    %506 = vector.extract_strided_slice %496 {offsets = [0, 64], sizes = [2, 64], strides = [1, 1]} : vector<2x192xf32> to vector<2x64xf32>
    %507 = arith.addf %505, %506 : vector<2x64xf32>
    %508 = arith.negf %507 : vector<2x64xf32>
    %509 = math.exp %508 : vector<2x64xf32>
    %cst_132 = arith.constant 1.000000e+00 : f32
    %510 = vector.broadcast %cst_132 : f32 to vector<2x64xf32>
    %511 = arith.addf %510, %509 : vector<2x64xf32>
    %512 = arith.divf %510, %511 : vector<2x64xf32>
    %513 = vector.extract_strided_slice %491 {offsets = [0, 128], sizes = [2, 64], strides = [1, 1]} : vector<2x192xf32> to vector<2x64xf32>
    %514 = vector.extract_strided_slice %496 {offsets = [0, 128], sizes = [2, 64], strides = [1, 1]} : vector<2x192xf32> to vector<2x64xf32>
    %515 = arith.mulf %504, %514 : vector<2x64xf32>
    %516 = arith.addf %513, %515 : vector<2x64xf32>
    %517 = math.tanh %516 : vector<2x64xf32>
    %cst_133 = arith.constant 1.000000e+00 : f32
    %518 = vector.broadcast %cst_133 : f32 to vector<2x64xf32>
    %519 = arith.subf %518, %512 : vector<2x64xf32>
    %520 = arith.mulf %519, %517 : vector<2x64xf32>
    %521 = arith.mulf %512, %445 : vector<2x64xf32>
    %522 = arith.addf %520, %521 : vector<2x64xf32>
    %523 = arith.index_cast %488 : i32 to index
    %c0_134 = arith.constant 0 : index
    %c0_135 = arith.constant 0 : index
    %524 = vector.load %arg11[%523, %c0_134, %c0_135] : memref<8x2x192xf32, #tpu.memory_space<vmem>>, vector<1x2x192xf32>
    %525 = vector.shape_cast %524 : vector<1x2x192xf32> to vector<2x192xf32>
    %526 = arith.truncf %479 : vector<2x64xf32> to vector<2x64xbf16>
    %527 = arith.truncf %22 : vector<64x192xf32> to vector<64x192xbf16>
    %cst_136 = arith.constant dense<0.000000e+00> : vector<2x192xf32>
    %528 = tpu.matmul %526, %527, %cst_136 {dimension_numbers = #tpu.dot_dimension_numbers<[1], [0], [0], [1], [0, 0, 1, 1], [], []>} : vector<2x64xbf16>, vector<64x192xbf16>, vector<2x192xf32> -> vector<2x192xf32>
    %529 = vector.broadcast %24 : vector<1x192xf32> to vector<2x192xf32>
    %530 = arith.addf %528, %529 : vector<2x192xf32>
    %531 = vector.extract_strided_slice %525 {offsets = [0, 0], sizes = [2, 64], strides = [1, 1]} : vector<2x192xf32> to vector<2x64xf32>
    %532 = vector.extract_strided_slice %530 {offsets = [0, 0], sizes = [2, 64], strides = [1, 1]} : vector<2x192xf32> to vector<2x64xf32>
    %533 = arith.addf %531, %532 : vector<2x64xf32>
    %534 = arith.negf %533 : vector<2x64xf32>
    %535 = math.exp %534 : vector<2x64xf32>
    %cst_137 = arith.constant 1.000000e+00 : f32
    %536 = vector.broadcast %cst_137 : f32 to vector<2x64xf32>
    %537 = arith.addf %536, %535 : vector<2x64xf32>
    %538 = arith.divf %536, %537 : vector<2x64xf32>
    %539 = vector.extract_strided_slice %525 {offsets = [0, 64], sizes = [2, 64], strides = [1, 1]} : vector<2x192xf32> to vector<2x64xf32>
    %540 = vector.extract_strided_slice %530 {offsets = [0, 64], sizes = [2, 64], strides = [1, 1]} : vector<2x192xf32> to vector<2x64xf32>
    %541 = arith.addf %539, %540 : vector<2x64xf32>
    %542 = arith.negf %541 : vector<2x64xf32>
    %543 = math.exp %542 : vector<2x64xf32>
    %cst_138 = arith.constant 1.000000e+00 : f32
    %544 = vector.broadcast %cst_138 : f32 to vector<2x64xf32>
    %545 = arith.addf %544, %543 : vector<2x64xf32>
    %546 = arith.divf %544, %545 : vector<2x64xf32>
    %547 = vector.extract_strided_slice %525 {offsets = [0, 128], sizes = [2, 64], strides = [1, 1]} : vector<2x192xf32> to vector<2x64xf32>
    %548 = vector.extract_strided_slice %530 {offsets = [0, 128], sizes = [2, 64], strides = [1, 1]} : vector<2x192xf32> to vector<2x64xf32>
    %549 = arith.mulf %538, %548 : vector<2x64xf32>
    %550 = arith.addf %547, %549 : vector<2x64xf32>
    %551 = math.tanh %550 : vector<2x64xf32>
    %cst_139 = arith.constant 1.000000e+00 : f32
    %552 = vector.broadcast %cst_139 : f32 to vector<2x64xf32>
    %553 = arith.subf %552, %546 : vector<2x64xf32>
    %554 = arith.mulf %553, %551 : vector<2x64xf32>
    %555 = arith.mulf %546, %479 : vector<2x64xf32>
    %556 = arith.addf %554, %555 : vector<2x64xf32>
    %557 = arith.index_cast %c6_i32 : i32 to index
    %c0_140 = arith.constant 0 : index
    %c0_141 = arith.constant 0 : index
    %558 = vector.load %arg12[%557, %c0_140, %c0_141] : memref<8x2x64xf32, #tpu.memory_space<vmem>>, vector<1x2x64xf32>
    %559 = vector.shape_cast %558 : vector<1x2x64xf32> to vector<2x64xf32>
    %560 = vector.shape_cast %522 : vector<2x64xf32> to vector<1x2x64xf32>
    tpu.vector_store %arg12[%557, %c0_140, %c0_141], %560 {strides = array<i32>} : memref<8x2x64xf32, #tpu.memory_space<vmem>>, vector<1x2x64xf32>,
    %561 = arith.index_cast %488 : i32 to index
    %c0_142 = arith.constant 0 : index
    %c0_143 = arith.constant 0 : index
    %562 = vector.load %arg13[%561, %c0_142, %c0_143] : memref<8x2x64xf32, #tpu.memory_space<vmem>>, vector<1x2x64xf32>
    %563 = vector.shape_cast %562 : vector<1x2x64xf32> to vector<2x64xf32>
    %564 = vector.shape_cast %556 : vector<2x64xf32> to vector<1x2x64xf32>
    tpu.vector_store %arg13[%561, %c0_142, %c0_143], %564 {strides = array<i32>} : memref<8x2x64xf32, #tpu.memory_space<vmem>>, vector<1x2x64xf32>,
    %c7_i32_144 = arith.constant 7 : i32
    %c7_i32_145 = arith.constant 7 : i32
    %565 = arith.subi %c7_i32_145, %c7_i32_144 : i32
    %566 = arith.index_cast %c7_i32_144 : i32 to index
    %c0_146 = arith.constant 0 : index
    %c0_147 = arith.constant 0 : index
    %567 = vector.load %arg10[%566, %c0_146, %c0_147] : memref<8x2x192xf32, #tpu.memory_space<vmem>>, vector<1x2x192xf32>
    %568 = vector.shape_cast %567 : vector<1x2x192xf32> to vector<2x192xf32>
    %569 = arith.truncf %522 : vector<2x64xf32> to vector<2x64xbf16>
    %570 = arith.truncf %21 : vector<64x192xf32> to vector<64x192xbf16>
    %cst_148 = arith.constant dense<0.000000e+00> : vector<2x192xf32>
    %571 = tpu.matmul %569, %570, %cst_148 {dimension_numbers = #tpu.dot_dimension_numbers<[1], [0], [0], [1], [0, 0, 1, 1], [], []>} : vector<2x64xbf16>, vector<64x192xbf16>, vector<2x192xf32> -> vector<2x192xf32>
    %572 = vector.broadcast %23 : vector<1x192xf32> to vector<2x192xf32>
    %573 = arith.addf %571, %572 : vector<2x192xf32>
    %574 = vector.extract_strided_slice %568 {offsets = [0, 0], sizes = [2, 64], strides = [1, 1]} : vector<2x192xf32> to vector<2x64xf32>
    %575 = vector.extract_strided_slice %573 {offsets = [0, 0], sizes = [2, 64], strides = [1, 1]} : vector<2x192xf32> to vector<2x64xf32>
    %576 = arith.addf %574, %575 : vector<2x64xf32>
    %577 = arith.negf %576 : vector<2x64xf32>
    %578 = math.exp %577 : vector<2x64xf32>
    %cst_149 = arith.constant 1.000000e+00 : f32
    %579 = vector.broadcast %cst_149 : f32 to vector<2x64xf32>
    %580 = arith.addf %579, %578 : vector<2x64xf32>
    %581 = arith.divf %579, %580 : vector<2x64xf32>
    %582 = vector.extract_strided_slice %568 {offsets = [0, 64], sizes = [2, 64], strides = [1, 1]} : vector<2x192xf32> to vector<2x64xf32>
    %583 = vector.extract_strided_slice %573 {offsets = [0, 64], sizes = [2, 64], strides = [1, 1]} : vector<2x192xf32> to vector<2x64xf32>
    %584 = arith.addf %582, %583 : vector<2x64xf32>
    %585 = arith.negf %584 : vector<2x64xf32>
    %586 = math.exp %585 : vector<2x64xf32>
    %cst_150 = arith.constant 1.000000e+00 : f32
    %587 = vector.broadcast %cst_150 : f32 to vector<2x64xf32>
    %588 = arith.addf %587, %586 : vector<2x64xf32>
    %589 = arith.divf %587, %588 : vector<2x64xf32>
    %590 = vector.extract_strided_slice %568 {offsets = [0, 128], sizes = [2, 64], strides = [1, 1]} : vector<2x192xf32> to vector<2x64xf32>
    %591 = vector.extract_strided_slice %573 {offsets = [0, 128], sizes = [2, 64], strides = [1, 1]} : vector<2x192xf32> to vector<2x64xf32>
    %592 = arith.mulf %581, %591 : vector<2x64xf32>
    %593 = arith.addf %590, %592 : vector<2x64xf32>
    %594 = math.tanh %593 : vector<2x64xf32>
    %cst_151 = arith.constant 1.000000e+00 : f32
    %595 = vector.broadcast %cst_151 : f32 to vector<2x64xf32>
    %596 = arith.subf %595, %589 : vector<2x64xf32>
    %597 = arith.mulf %596, %594 : vector<2x64xf32>
    %598 = arith.mulf %589, %522 : vector<2x64xf32>
    %599 = arith.addf %597, %598 : vector<2x64xf32>
    %600 = arith.index_cast %565 : i32 to index
    %c0_152 = arith.constant 0 : index
    %c0_153 = arith.constant 0 : index
    %601 = vector.load %arg11[%600, %c0_152, %c0_153] : memref<8x2x192xf32, #tpu.memory_space<vmem>>, vector<1x2x192xf32>
    %602 = vector.shape_cast %601 : vector<1x2x192xf32> to vector<2x192xf32>
    %603 = arith.truncf %556 : vector<2x64xf32> to vector<2x64xbf16>
    %604 = arith.truncf %22 : vector<64x192xf32> to vector<64x192xbf16>
    %cst_154 = arith.constant dense<0.000000e+00> : vector<2x192xf32>
    %605 = tpu.matmul %603, %604, %cst_154 {dimension_numbers = #tpu.dot_dimension_numbers<[1], [0], [0], [1], [0, 0, 1, 1], [], []>} : vector<2x64xbf16>, vector<64x192xbf16>, vector<2x192xf32> -> vector<2x192xf32>
    %606 = vector.broadcast %24 : vector<1x192xf32> to vector<2x192xf32>
    %607 = arith.addf %605, %606 : vector<2x192xf32>
    %608 = vector.extract_strided_slice %602 {offsets = [0, 0], sizes = [2, 64], strides = [1, 1]} : vector<2x192xf32> to vector<2x64xf32>
    %609 = vector.extract_strided_slice %607 {offsets = [0, 0], sizes = [2, 64], strides = [1, 1]} : vector<2x192xf32> to vector<2x64xf32>
    %610 = arith.addf %608, %609 : vector<2x64xf32>
    %611 = arith.negf %610 : vector<2x64xf32>
    %612 = math.exp %611 : vector<2x64xf32>
    %cst_155 = arith.constant 1.000000e+00 : f32
    %613 = vector.broadcast %cst_155 : f32 to vector<2x64xf32>
    %614 = arith.addf %613, %612 : vector<2x64xf32>
    %615 = arith.divf %613, %614 : vector<2x64xf32>
    %616 = vector.extract_strided_slice %602 {offsets = [0, 64], sizes = [2, 64], strides = [1, 1]} : vector<2x192xf32> to vector<2x64xf32>
    %617 = vector.extract_strided_slice %607 {offsets = [0, 64], sizes = [2, 64], strides = [1, 1]} : vector<2x192xf32> to vector<2x64xf32>
    %618 = arith.addf %616, %617 : vector<2x64xf32>
    %619 = arith.negf %618 : vector<2x64xf32>
    %620 = math.exp %619 : vector<2x64xf32>
    %cst_156 = arith.constant 1.000000e+00 : f32
    %621 = vector.broadcast %cst_156 : f32 to vector<2x64xf32>
    %622 = arith.addf %621, %620 : vector<2x64xf32>
    %623 = arith.divf %621, %622 : vector<2x64xf32>
    %624 = vector.extract_strided_slice %602 {offsets = [0, 128], sizes = [2, 64], strides = [1, 1]} : vector<2x192xf32> to vector<2x64xf32>
    %625 = vector.extract_strided_slice %607 {offsets = [0, 128], sizes = [2, 64], strides = [1, 1]} : vector<2x192xf32> to vector<2x64xf32>
    %626 = arith.mulf %615, %625 : vector<2x64xf32>
    %627 = arith.addf %624, %626 : vector<2x64xf32>
    %628 = math.tanh %627 : vector<2x64xf32>
    %cst_157 = arith.constant 1.000000e+00 : f32
    %629 = vector.broadcast %cst_157 : f32 to vector<2x64xf32>
    %630 = arith.subf %629, %623 : vector<2x64xf32>
    %631 = arith.mulf %630, %628 : vector<2x64xf32>
    %632 = arith.mulf %623, %556 : vector<2x64xf32>
    %633 = arith.addf %631, %632 : vector<2x64xf32>
    %634 = arith.index_cast %c7_i32_144 : i32 to index
    %c0_158 = arith.constant 0 : index
    %c0_159 = arith.constant 0 : index
    %635 = vector.load %arg12[%634, %c0_158, %c0_159] : memref<8x2x64xf32, #tpu.memory_space<vmem>>, vector<1x2x64xf32>
    %636 = vector.shape_cast %635 : vector<1x2x64xf32> to vector<2x64xf32>
    %637 = vector.shape_cast %599 : vector<2x64xf32> to vector<1x2x64xf32>
    tpu.vector_store %arg12[%634, %c0_158, %c0_159], %637 {strides = array<i32>} : memref<8x2x64xf32, #tpu.memory_space<vmem>>, vector<1x2x64xf32>,
    %638 = arith.index_cast %565 : i32 to index
    %c0_160 = arith.constant 0 : index
    %c0_161 = arith.constant 0 : index
    %639 = vector.load %arg13[%638, %c0_160, %c0_161] : memref<8x2x64xf32, #tpu.memory_space<vmem>>, vector<1x2x64xf32>
    %640 = vector.shape_cast %639 : vector<1x2x64xf32> to vector<2x64xf32>
    %641 = vector.shape_cast %633 : vector<2x64xf32> to vector<1x2x64xf32>
    tpu.vector_store %arg13[%638, %c0_160, %c0_161], %641 {strides = array<i32>} : memref<8x2x64xf32, #tpu.memory_space<vmem>>, vector<1x2x64xf32>,
    %c8_i32 = arith.constant 8 : i32
    %c0_162 = arith.constant 0 : index
    %c0_163 = arith.constant 0 : index
    %c0_164 = arith.constant 0 : index
    %642 = vector.load %arg12[%c0_162, %c0_163, %c0_164] : memref<8x2x64xf32, #tpu.memory_space<vmem>>, vector<8x2x64xf32>
    %c0_165 = arith.constant 0 : index
    %c0_166 = arith.constant 0 : index
    %c0_167 = arith.constant 0 : index
    %643 = vector.load %arg13[%c0_165, %c0_166, %c0_167] : memref<8x2x64xf32, #tpu.memory_space<vmem>>, vector<8x2x64xf32>
    %644 = tpu.concatenate %642, %643 in 2 : vector<8x2x64xf32>, vector<8x2x64xf32> -> vector<8x2x128xf32>
    %645 = tpu.transpose %644, [1, 0, 2] : vector<8x2x128xf32> -> vector<2x8x128xf32>
    %c0_168 = arith.constant 0 : index
    %c0_169 = arith.constant 0 : index
    %c0_170 = arith.constant 0 : index
    %646 = vector.load %arg9[%c0_168, %c0_169, %c0_170] : memref<2x8x128xf32, #tpu.memory_space<vmem>>, vector<2x8x128xf32>
    tpu.vector_store %arg9[%c0_168, %c0_169, %c0_170], %645 {strides = array<i32>} : memref<2x8x128xf32, #tpu.memory_space<vmem>>, vector<2x8x128xf32>,
    return
  }
}

module attributes {stable_mosaic.version = 11 : i64} {
  func.func @_bigru_layer_kernel(%arg0: memref<2x8x32xf32, #tpu.memory_space<vmem>>, %arg1: memref<32x192xf32, #tpu.memory_space<vmem>>, %arg2: memref<64x192xf32, #tpu.memory_space<vmem>>, %arg3: memref<1x192xf32, #tpu.memory_space<vmem>>, %arg4: memref<1x192xf32, #tpu.memory_space<vmem>>, %arg5: memref<32x192xf32, #tpu.memory_space<vmem>>, %arg6: memref<64x192xf32, #tpu.memory_space<vmem>>, %arg7: memref<1x192xf32, #tpu.memory_space<vmem>>, %arg8: memref<1x192xf32, #tpu.memory_space<vmem>>, %arg9: memref<2x8x128xf32, #tpu.memory_space<vmem>>, %arg10: memref<8x2x192xf32, #tpu.memory_space<vmem>>, %arg11: memref<8x2x192xf32, #tpu.memory_space<vmem>>, %arg12: memref<8x2x64xf32, #tpu.memory_space<vmem>>, %arg13: memref<8x2x64xf32, #tpu.memory_space<vmem>>) attributes {dimension_semantics = [], scalar_prefetch = 0 : i64, scratch_operands = 4 : i64, tpu.core_type = #tpu.core_type<tc>} {
    %c0 = arith.constant 0 : index
    %c0_0 = arith.constant 0 : index
    %c0_1 = arith.constant 0 : index
    %0 = vector.load %arg0[%c0, %c0_0, %c0_1] : memref<2x8x32xf32, #tpu.memory_space<vmem>>, vector<2x8x32xf32>
    %1 = tpu.transpose %0, [1, 0, 2] : vector<2x8x32xf32> -> vector<8x2x32xf32>
    %2 = vector.shape_cast %1 : vector<8x2x32xf32> to vector<16x32xf32>
    %c0_2 = arith.constant 0 : index
    %c0_3 = arith.constant 0 : index
    %3 = vector.load %arg1[%c0_2, %c0_3] : memref<32x192xf32, #tpu.memory_space<vmem>>, vector<32x192xf32>
    %4 = arith.truncf %2 : vector<16x32xf32> to vector<16x32xbf16>
    %5 = arith.truncf %3 : vector<32x192xf32> to vector<32x192xbf16>
    %cst = arith.constant dense<0.000000e+00> : vector<16x192xf32>
    %6 = tpu.matmul %4, %5, %cst {dimension_numbers = #tpu.dot_dimension_numbers<[1], [0], [0], [1], [0, 0, 1, 1], [], []>} : vector<16x32xbf16>, vector<32x192xbf16>, vector<16x192xf32> -> vector<16x192xf32>
    %c0_4 = arith.constant 0 : index
    %c0_5 = arith.constant 0 : index
    %7 = vector.load %arg3[%c0_4, %c0_5] : memref<1x192xf32, #tpu.memory_space<vmem>>, vector<1x192xf32>
    %8 = vector.broadcast %7 : vector<1x192xf32> to vector<16x192xf32>
    %9 = arith.addf %6, %8 : vector<16x192xf32>
    %10 = vector.shape_cast %9 : vector<16x192xf32> to vector<8x2x192xf32>
    %c0_6 = arith.constant 0 : index
    %c0_7 = arith.constant 0 : index
    %c0_8 = arith.constant 0 : index
    %11 = vector.load %arg10[%c0_6, %c0_7, %c0_8] : memref<8x2x192xf32, #tpu.memory_space<vmem>>, vector<8x2x192xf32>
    tpu.vector_store %arg10[%c0_6, %c0_7, %c0_8], %10 {strides = array<i32>} : memref<8x2x192xf32, #tpu.memory_space<vmem>>, vector<8x2x192xf32>,
    %c0_9 = arith.constant 0 : index
    %c0_10 = arith.constant 0 : index
    %12 = vector.load %arg5[%c0_9, %c0_10] : memref<32x192xf32, #tpu.memory_space<vmem>>, vector<32x192xf32>
    %13 = arith.truncf %2 : vector<16x32xf32> to vector<16x32xbf16>
    %14 = arith.truncf %12 : vector<32x192xf32> to vector<32x192xbf16>
    %cst_11 = arith.constant dense<0.000000e+00> : vector<16x192xf32>
    %15 = tpu.matmul %13, %14, %cst_11 {dimension_numbers = #tpu.dot_dimension_numbers<[1], [0], [0], [1], [0, 0, 1, 1], [], []>} : vector<16x32xbf16>, vector<32x192xbf16>, vector<16x192xf32> -> vector<16x192xf32>
    %c0_12 = arith.constant 0 : index
    %c0_13 = arith.constant 0 : index
    %16 = vector.load %arg7[%c0_12, %c0_13] : memref<1x192xf32, #tpu.memory_space<vmem>>, vector<1x192xf32>
    %17 = vector.broadcast %16 : vector<1x192xf32> to vector<16x192xf32>
    %18 = arith.addf %15, %17 : vector<16x192xf32>
    %19 = vector.shape_cast %18 : vector<16x192xf32> to vector<8x2x192xf32>
    %c0_14 = arith.constant 0 : index
    %c0_15 = arith.constant 0 : index
    %c0_16 = arith.constant 0 : index
    %20 = vector.load %arg11[%c0_14, %c0_15, %c0_16] : memref<8x2x192xf32, #tpu.memory_space<vmem>>, vector<8x2x192xf32>
    tpu.vector_store %arg11[%c0_14, %c0_15, %c0_16], %19 {strides = array<i32>} : memref<8x2x192xf32, #tpu.memory_space<vmem>>, vector<8x2x192xf32>,
    %c0_17 = arith.constant 0 : index
    %c0_18 = arith.constant 0 : index
    %21 = vector.load %arg2[%c0_17, %c0_18] : memref<64x192xf32, #tpu.memory_space<vmem>>, vector<64x192xf32>
    %c0_19 = arith.constant 0 : index
    %c0_20 = arith.constant 0 : index
    %22 = vector.load %arg6[%c0_19, %c0_20] : memref<64x192xf32, #tpu.memory_space<vmem>>, vector<64x192xf32>
    %c0_21 = arith.constant 0 : index
    %c0_22 = arith.constant 0 : index
    %23 = vector.load %arg4[%c0_21, %c0_22] : memref<1x192xf32, #tpu.memory_space<vmem>>, vector<1x192xf32>
    %c0_23 = arith.constant 0 : index
    %c0_24 = arith.constant 0 : index
    %24 = vector.load %arg8[%c0_23, %c0_24] : memref<1x192xf32, #tpu.memory_space<vmem>>, vector<1x192xf32>
    %cst_25 = arith.constant 0.000000e+00 : f32
    %25 = vector.broadcast %cst_25 : f32 to vector<2x64xf32>
    %c0_i32 = arith.constant 0 : i32
    %c7_i32 = arith.constant 7 : i32
    %26 = arith.subi %c7_i32, %c0_i32 : i32
    %27 = arith.index_cast %c0_i32 : i32 to index
    %c0_26 = arith.constant 0 : index
    %c0_27 = arith.constant 0 : index
    %28 = vector.load %arg10[%27, %c0_26, %c0_27] : memref<8x2x192xf32, #tpu.memory_space<vmem>>, vector<1x2x192xf32>
    %29 = vector.shape_cast %28 : vector<1x2x192xf32> to vector<2x192xf32>
    %30 = arith.truncf %25 : vector<2x64xf32> to vector<2x64xbf16>
    %31 = arith.truncf %21 : vector<64x192xf32> to vector<64x192xbf16>
    %cst_28 = arith.constant dense<0.000000e+00> : vector<2x192xf32>
    %32 = tpu.matmul %30, %31, %cst_28 {dimension_numbers = #tpu.dot_dimension_numbers<[1], [0], [0], [1], [0, 0, 1, 1], [], []>} : vector<2x64xbf16>, vector<64x192xbf16>, vector<2x192xf32> -> vector<2x192xf32>
    %33 = vector.broadcast %23 : vector<1x192xf32> to vector<2x192xf32>
    %34 = arith.addf %32, %33 : vector<2x192xf32>
    %35 = vector.extract_strided_slice %29 {offsets = [0, 0], sizes = [2, 64], strides = [1, 1]} : vector<2x192xf32> to vector<2x64xf32>
    %36 = vector.extract_strided_slice %34 {offsets = [0, 0], sizes = [2, 64], strides = [1, 1]} : vector<2x192xf32> to vector<2x64xf32>
    %37 = arith.addf %35, %36 : vector<2x64xf32>
    %38 = arith.negf %37 : vector<2x64xf32>
    %39 = math.exp %38 : vector<2x64xf32>
    %cst_29 = arith.constant 1.000000e+00 : f32
    %40 = vector.broadcast %cst_29 : f32 to vector<2x64xf32>
    %41 = arith.addf %40, %39 : vector<2x64xf32>
    %42 = arith.divf %40, %41 : vector<2x64xf32>
    %43 = vector.extract_strided_slice %29 {offsets = [0, 64], sizes = [2, 64], strides = [1, 1]} : vector<2x192xf32> to vector<2x64xf32>
    %44 = vector.extract_strided_slice %34 {offsets = [0, 64], sizes = [2, 64], strides = [1, 1]} : vector<2x192xf32> to vector<2x64xf32>
    %45 = arith.addf %43, %44 : vector<2x64xf32>
    %46 = arith.negf %45 : vector<2x64xf32>
    %47 = math.exp %46 : vector<2x64xf32>
    %cst_30 = arith.constant 1.000000e+00 : f32
    %48 = vector.broadcast %cst_30 : f32 to vector<2x64xf32>
    %49 = arith.addf %48, %47 : vector<2x64xf32>
    %50 = arith.divf %48, %49 : vector<2x64xf32>
    %51 = vector.extract_strided_slice %29 {offsets = [0, 128], sizes = [2, 64], strides = [1, 1]} : vector<2x192xf32> to vector<2x64xf32>
    %52 = vector.extract_strided_slice %34 {offsets = [0, 128], sizes = [2, 64], strides = [1, 1]} : vector<2x192xf32> to vector<2x64xf32>
    %53 = arith.mulf %42, %52 : vector<2x64xf32>
    %54 = arith.addf %51, %53 : vector<2x64xf32>
    %55 = math.tanh %54 : vector<2x64xf32>
    %cst_31 = arith.constant 1.000000e+00 : f32
    %56 = vector.broadcast %cst_31 : f32 to vector<2x64xf32>
    %57 = arith.subf %56, %50 : vector<2x64xf32>
    %58 = arith.mulf %57, %55 : vector<2x64xf32>
    %59 = arith.mulf %50, %25 : vector<2x64xf32>
    %60 = arith.addf %58, %59 : vector<2x64xf32>
    %61 = arith.index_cast %26 : i32 to index
    %c0_32 = arith.constant 0 : index
    %c0_33 = arith.constant 0 : index
    %62 = vector.load %arg11[%61, %c0_32, %c0_33] : memref<8x2x192xf32, #tpu.memory_space<vmem>>, vector<1x2x192xf32>
    %63 = vector.shape_cast %62 : vector<1x2x192xf32> to vector<2x192xf32>
    %64 = arith.truncf %25 : vector<2x64xf32> to vector<2x64xbf16>
    %65 = arith.truncf %22 : vector<64x192xf32> to vector<64x192xbf16>
    %cst_34 = arith.constant dense<0.000000e+00> : vector<2x192xf32>
    %66 = tpu.matmul %64, %65, %cst_34 {dimension_numbers = #tpu.dot_dimension_numbers<[1], [0], [0], [1], [0, 0, 1, 1], [], []>} : vector<2x64xbf16>, vector<64x192xbf16>, vector<2x192xf32> -> vector<2x192xf32>
    %67 = vector.broadcast %24 : vector<1x192xf32> to vector<2x192xf32>
    %68 = arith.addf %66, %67 : vector<2x192xf32>
    %69 = vector.extract_strided_slice %63 {offsets = [0, 0], sizes = [2, 64], strides = [1, 1]} : vector<2x192xf32> to vector<2x64xf32>
    %70 = vector.extract_strided_slice %68 {offsets = [0, 0], sizes = [2, 64], strides = [1, 1]} : vector<2x192xf32> to vector<2x64xf32>
    %71 = arith.addf %69, %70 : vector<2x64xf32>
    %72 = arith.negf %71 : vector<2x64xf32>
    %73 = math.exp %72 : vector<2x64xf32>
    %cst_35 = arith.constant 1.000000e+00 : f32
    %74 = vector.broadcast %cst_35 : f32 to vector<2x64xf32>
    %75 = arith.addf %74, %73 : vector<2x64xf32>
    %76 = arith.divf %74, %75 : vector<2x64xf32>
    %77 = vector.extract_strided_slice %63 {offsets = [0, 64], sizes = [2, 64], strides = [1, 1]} : vector<2x192xf32> to vector<2x64xf32>
    %78 = vector.extract_strided_slice %68 {offsets = [0, 64], sizes = [2, 64], strides = [1, 1]} : vector<2x192xf32> to vector<2x64xf32>
    %79 = arith.addf %77, %78 : vector<2x64xf32>
    %80 = arith.negf %79 : vector<2x64xf32>
    %81 = math.exp %80 : vector<2x64xf32>
    %cst_36 = arith.constant 1.000000e+00 : f32
    %82 = vector.broadcast %cst_36 : f32 to vector<2x64xf32>
    %83 = arith.addf %82, %81 : vector<2x64xf32>
    %84 = arith.divf %82, %83 : vector<2x64xf32>
    %85 = vector.extract_strided_slice %63 {offsets = [0, 128], sizes = [2, 64], strides = [1, 1]} : vector<2x192xf32> to vector<2x64xf32>
    %86 = vector.extract_strided_slice %68 {offsets = [0, 128], sizes = [2, 64], strides = [1, 1]} : vector<2x192xf32> to vector<2x64xf32>
    %87 = arith.mulf %76, %86 : vector<2x64xf32>
    %88 = arith.addf %85, %87 : vector<2x64xf32>
    %89 = math.tanh %88 : vector<2x64xf32>
    %cst_37 = arith.constant 1.000000e+00 : f32
    %90 = vector.broadcast %cst_37 : f32 to vector<2x64xf32>
    %91 = arith.subf %90, %84 : vector<2x64xf32>
    %92 = arith.mulf %91, %89 : vector<2x64xf32>
    %93 = arith.mulf %84, %25 : vector<2x64xf32>
    %94 = arith.addf %92, %93 : vector<2x64xf32>
    %95 = arith.index_cast %c0_i32 : i32 to index
    %c0_38 = arith.constant 0 : index
    %c0_39 = arith.constant 0 : index
    %96 = vector.load %arg12[%95, %c0_38, %c0_39] : memref<8x2x64xf32, #tpu.memory_space<vmem>>, vector<1x2x64xf32>
    %97 = vector.shape_cast %96 : vector<1x2x64xf32> to vector<2x64xf32>
    %98 = vector.shape_cast %60 : vector<2x64xf32> to vector<1x2x64xf32>
    tpu.vector_store %arg12[%95, %c0_38, %c0_39], %98 {strides = array<i32>} : memref<8x2x64xf32, #tpu.memory_space<vmem>>, vector<1x2x64xf32>,
    %99 = arith.index_cast %26 : i32 to index
    %c0_40 = arith.constant 0 : index
    %c0_41 = arith.constant 0 : index
    %100 = vector.load %arg13[%99, %c0_40, %c0_41] : memref<8x2x64xf32, #tpu.memory_space<vmem>>, vector<1x2x64xf32>
    %101 = vector.shape_cast %100 : vector<1x2x64xf32> to vector<2x64xf32>
    %102 = vector.shape_cast %94 : vector<2x64xf32> to vector<1x2x64xf32>
    tpu.vector_store %arg13[%99, %c0_40, %c0_41], %102 {strides = array<i32>} : memref<8x2x64xf32, #tpu.memory_space<vmem>>, vector<1x2x64xf32>,
    %c1_i32 = arith.constant 1 : i32
    %c7_i32_42 = arith.constant 7 : i32
    %103 = arith.subi %c7_i32_42, %c1_i32 : i32
    %104 = arith.index_cast %c1_i32 : i32 to index
    %c0_43 = arith.constant 0 : index
    %c0_44 = arith.constant 0 : index
    %105 = vector.load %arg10[%104, %c0_43, %c0_44] : memref<8x2x192xf32, #tpu.memory_space<vmem>>, vector<1x2x192xf32>
    %106 = vector.shape_cast %105 : vector<1x2x192xf32> to vector<2x192xf32>
    %107 = arith.truncf %60 : vector<2x64xf32> to vector<2x64xbf16>
    %108 = arith.truncf %21 : vector<64x192xf32> to vector<64x192xbf16>
    %cst_45 = arith.constant dense<0.000000e+00> : vector<2x192xf32>
    %109 = tpu.matmul %107, %108, %cst_45 {dimension_numbers = #tpu.dot_dimension_numbers<[1], [0], [0], [1], [0, 0, 1, 1], [], []>} : vector<2x64xbf16>, vector<64x192xbf16>, vector<2x192xf32> -> vector<2x192xf32>
    %110 = vector.broadcast %23 : vector<1x192xf32> to vector<2x192xf32>
    %111 = arith.addf %109, %110 : vector<2x192xf32>
    %112 = vector.extract_strided_slice %106 {offsets = [0, 0], sizes = [2, 64], strides = [1, 1]} : vector<2x192xf32> to vector<2x64xf32>
    %113 = vector.extract_strided_slice %111 {offsets = [0, 0], sizes = [2, 64], strides = [1, 1]} : vector<2x192xf32> to vector<2x64xf32>
    %114 = arith.addf %112, %113 : vector<2x64xf32>
    %115 = arith.negf %114 : vector<2x64xf32>
    %116 = math.exp %115 : vector<2x64xf32>
    %cst_46 = arith.constant 1.000000e+00 : f32
    %117 = vector.broadcast %cst_46 : f32 to vector<2x64xf32>
    %118 = arith.addf %117, %116 : vector<2x64xf32>
    %119 = arith.divf %117, %118 : vector<2x64xf32>
    %120 = vector.extract_strided_slice %106 {offsets = [0, 64], sizes = [2, 64], strides = [1, 1]} : vector<2x192xf32> to vector<2x64xf32>
    %121 = vector.extract_strided_slice %111 {offsets = [0, 64], sizes = [2, 64], strides = [1, 1]} : vector<2x192xf32> to vector<2x64xf32>
    %122 = arith.addf %120, %121 : vector<2x64xf32>
    %123 = arith.negf %122 : vector<2x64xf32>
    %124 = math.exp %123 : vector<2x64xf32>
    %cst_47 = arith.constant 1.000000e+00 : f32
    %125 = vector.broadcast %cst_47 : f32 to vector<2x64xf32>
    %126 = arith.addf %125, %124 : vector<2x64xf32>
    %127 = arith.divf %125, %126 : vector<2x64xf32>
    %128 = vector.extract_strided_slice %106 {offsets = [0, 128], sizes = [2, 64], strides = [1, 1]} : vector<2x192xf32> to vector<2x64xf32>
    %129 = vector.extract_strided_slice %111 {offsets = [0, 128], sizes = [2, 64], strides = [1, 1]} : vector<2x192xf32> to vector<2x64xf32>
    %130 = arith.mulf %119, %129 : vector<2x64xf32>
    %131 = arith.addf %128, %130 : vector<2x64xf32>
    %132 = math.tanh %131 : vector<2x64xf32>
    %cst_48 = arith.constant 1.000000e+00 : f32
    %133 = vector.broadcast %cst_48 : f32 to vector<2x64xf32>
    %134 = arith.subf %133, %127 : vector<2x64xf32>
    %135 = arith.mulf %134, %132 : vector<2x64xf32>
    %136 = arith.mulf %127, %60 : vector<2x64xf32>
    %137 = arith.addf %135, %136 : vector<2x64xf32>
    %138 = arith.index_cast %103 : i32 to index
    %c0_49 = arith.constant 0 : index
    %c0_50 = arith.constant 0 : index
    %139 = vector.load %arg11[%138, %c0_49, %c0_50] : memref<8x2x192xf32, #tpu.memory_space<vmem>>, vector<1x2x192xf32>
    %140 = vector.shape_cast %139 : vector<1x2x192xf32> to vector<2x192xf32>
    %141 = arith.truncf %94 : vector<2x64xf32> to vector<2x64xbf16>
    %142 = arith.truncf %22 : vector<64x192xf32> to vector<64x192xbf16>
    %cst_51 = arith.constant dense<0.000000e+00> : vector<2x192xf32>
    %143 = tpu.matmul %141, %142, %cst_51 {dimension_numbers = #tpu.dot_dimension_numbers<[1], [0], [0], [1], [0, 0, 1, 1], [], []>} : vector<2x64xbf16>, vector<64x192xbf16>, vector<2x192xf32> -> vector<2x192xf32>
    %144 = vector.broadcast %24 : vector<1x192xf32> to vector<2x192xf32>
    %145 = arith.addf %143, %144 : vector<2x192xf32>
    %146 = vector.extract_strided_slice %140 {offsets = [0, 0], sizes = [2, 64], strides = [1, 1]} : vector<2x192xf32> to vector<2x64xf32>
    %147 = vector.extract_strided_slice %145 {offsets = [0, 0], sizes = [2, 64], strides = [1, 1]} : vector<2x192xf32> to vector<2x64xf32>
    %148 = arith.addf %146, %147 : vector<2x64xf32>
    %149 = arith.negf %148 : vector<2x64xf32>
    %150 = math.exp %149 : vector<2x64xf32>
    %cst_52 = arith.constant 1.000000e+00 : f32
    %151 = vector.broadcast %cst_52 : f32 to vector<2x64xf32>
    %152 = arith.addf %151, %150 : vector<2x64xf32>
    %153 = arith.divf %151, %152 : vector<2x64xf32>
    %154 = vector.extract_strided_slice %140 {offsets = [0, 64], sizes = [2, 64], strides = [1, 1]} : vector<2x192xf32> to vector<2x64xf32>
    %155 = vector.extract_strided_slice %145 {offsets = [0, 64], sizes = [2, 64], strides = [1, 1]} : vector<2x192xf32> to vector<2x64xf32>
    %156 = arith.addf %154, %155 : vector<2x64xf32>
    %157 = arith.negf %156 : vector<2x64xf32>
    %158 = math.exp %157 : vector<2x64xf32>
    %cst_53 = arith.constant 1.000000e+00 : f32
    %159 = vector.broadcast %cst_53 : f32 to vector<2x64xf32>
    %160 = arith.addf %159, %158 : vector<2x64xf32>
    %161 = arith.divf %159, %160 : vector<2x64xf32>
    %162 = vector.extract_strided_slice %140 {offsets = [0, 128], sizes = [2, 64], strides = [1, 1]} : vector<2x192xf32> to vector<2x64xf32>
    %163 = vector.extract_strided_slice %145 {offsets = [0, 128], sizes = [2, 64], strides = [1, 1]} : vector<2x192xf32> to vector<2x64xf32>
    %164 = arith.mulf %153, %163 : vector<2x64xf32>
    %165 = arith.addf %162, %164 : vector<2x64xf32>
    %166 = math.tanh %165 : vector<2x64xf32>
    %cst_54 = arith.constant 1.000000e+00 : f32
    %167 = vector.broadcast %cst_54 : f32 to vector<2x64xf32>
    %168 = arith.subf %167, %161 : vector<2x64xf32>
    %169 = arith.mulf %168, %166 : vector<2x64xf32>
    %170 = arith.mulf %161, %94 : vector<2x64xf32>
    %171 = arith.addf %169, %170 : vector<2x64xf32>
    %172 = arith.index_cast %c1_i32 : i32 to index
    %c0_55 = arith.constant 0 : index
    %c0_56 = arith.constant 0 : index
    %173 = vector.load %arg12[%172, %c0_55, %c0_56] : memref<8x2x64xf32, #tpu.memory_space<vmem>>, vector<1x2x64xf32>
    %174 = vector.shape_cast %173 : vector<1x2x64xf32> to vector<2x64xf32>
    %175 = vector.shape_cast %137 : vector<2x64xf32> to vector<1x2x64xf32>
    tpu.vector_store %arg12[%172, %c0_55, %c0_56], %175 {strides = array<i32>} : memref<8x2x64xf32, #tpu.memory_space<vmem>>, vector<1x2x64xf32>,
    %176 = arith.index_cast %103 : i32 to index
    %c0_57 = arith.constant 0 : index
    %c0_58 = arith.constant 0 : index
    %177 = vector.load %arg13[%176, %c0_57, %c0_58] : memref<8x2x64xf32, #tpu.memory_space<vmem>>, vector<1x2x64xf32>
    %178 = vector.shape_cast %177 : vector<1x2x64xf32> to vector<2x64xf32>
    %179 = vector.shape_cast %171 : vector<2x64xf32> to vector<1x2x64xf32>
    tpu.vector_store %arg13[%176, %c0_57, %c0_58], %179 {strides = array<i32>} : memref<8x2x64xf32, #tpu.memory_space<vmem>>, vector<1x2x64xf32>,
    %c2_i32 = arith.constant 2 : i32
    %c7_i32_59 = arith.constant 7 : i32
    %180 = arith.subi %c7_i32_59, %c2_i32 : i32
    %181 = arith.index_cast %c2_i32 : i32 to index
    %c0_60 = arith.constant 0 : index
    %c0_61 = arith.constant 0 : index
    %182 = vector.load %arg10[%181, %c0_60, %c0_61] : memref<8x2x192xf32, #tpu.memory_space<vmem>>, vector<1x2x192xf32>
    %183 = vector.shape_cast %182 : vector<1x2x192xf32> to vector<2x192xf32>
    %184 = arith.truncf %137 : vector<2x64xf32> to vector<2x64xbf16>
    %185 = arith.truncf %21 : vector<64x192xf32> to vector<64x192xbf16>
    %cst_62 = arith.constant dense<0.000000e+00> : vector<2x192xf32>
    %186 = tpu.matmul %184, %185, %cst_62 {dimension_numbers = #tpu.dot_dimension_numbers<[1], [0], [0], [1], [0, 0, 1, 1], [], []>} : vector<2x64xbf16>, vector<64x192xbf16>, vector<2x192xf32> -> vector<2x192xf32>
    %187 = vector.broadcast %23 : vector<1x192xf32> to vector<2x192xf32>
    %188 = arith.addf %186, %187 : vector<2x192xf32>
    %189 = vector.extract_strided_slice %183 {offsets = [0, 0], sizes = [2, 64], strides = [1, 1]} : vector<2x192xf32> to vector<2x64xf32>
    %190 = vector.extract_strided_slice %188 {offsets = [0, 0], sizes = [2, 64], strides = [1, 1]} : vector<2x192xf32> to vector<2x64xf32>
    %191 = arith.addf %189, %190 : vector<2x64xf32>
    %192 = arith.negf %191 : vector<2x64xf32>
    %193 = math.exp %192 : vector<2x64xf32>
    %cst_63 = arith.constant 1.000000e+00 : f32
    %194 = vector.broadcast %cst_63 : f32 to vector<2x64xf32>
    %195 = arith.addf %194, %193 : vector<2x64xf32>
    %196 = arith.divf %194, %195 : vector<2x64xf32>
    %197 = vector.extract_strided_slice %183 {offsets = [0, 64], sizes = [2, 64], strides = [1, 1]} : vector<2x192xf32> to vector<2x64xf32>
    %198 = vector.extract_strided_slice %188 {offsets = [0, 64], sizes = [2, 64], strides = [1, 1]} : vector<2x192xf32> to vector<2x64xf32>
    %199 = arith.addf %197, %198 : vector<2x64xf32>
    %200 = arith.negf %199 : vector<2x64xf32>
    %201 = math.exp %200 : vector<2x64xf32>
    %cst_64 = arith.constant 1.000000e+00 : f32
    %202 = vector.broadcast %cst_64 : f32 to vector<2x64xf32>
    %203 = arith.addf %202, %201 : vector<2x64xf32>
    %204 = arith.divf %202, %203 : vector<2x64xf32>
    %205 = vector.extract_strided_slice %183 {offsets = [0, 128], sizes = [2, 64], strides = [1, 1]} : vector<2x192xf32> to vector<2x64xf32>
    %206 = vector.extract_strided_slice %188 {offsets = [0, 128], sizes = [2, 64], strides = [1, 1]} : vector<2x192xf32> to vector<2x64xf32>
    %207 = arith.mulf %196, %206 : vector<2x64xf32>
    %208 = arith.addf %205, %207 : vector<2x64xf32>
    %209 = math.tanh %208 : vector<2x64xf32>
    %cst_65 = arith.constant 1.000000e+00 : f32
    %210 = vector.broadcast %cst_65 : f32 to vector<2x64xf32>
    %211 = arith.subf %210, %204 : vector<2x64xf32>
    %212 = arith.mulf %211, %209 : vector<2x64xf32>
    %213 = arith.mulf %204, %137 : vector<2x64xf32>
    %214 = arith.addf %212, %213 : vector<2x64xf32>
    %215 = arith.index_cast %180 : i32 to index
    %c0_66 = arith.constant 0 : index
    %c0_67 = arith.constant 0 : index
    %216 = vector.load %arg11[%215, %c0_66, %c0_67] : memref<8x2x192xf32, #tpu.memory_space<vmem>>, vector<1x2x192xf32>
    %217 = vector.shape_cast %216 : vector<1x2x192xf32> to vector<2x192xf32>
    %218 = arith.truncf %171 : vector<2x64xf32> to vector<2x64xbf16>
    %219 = arith.truncf %22 : vector<64x192xf32> to vector<64x192xbf16>
    %cst_68 = arith.constant dense<0.000000e+00> : vector<2x192xf32>
    %220 = tpu.matmul %218, %219, %cst_68 {dimension_numbers = #tpu.dot_dimension_numbers<[1], [0], [0], [1], [0, 0, 1, 1], [], []>} : vector<2x64xbf16>, vector<64x192xbf16>, vector<2x192xf32> -> vector<2x192xf32>
    %221 = vector.broadcast %24 : vector<1x192xf32> to vector<2x192xf32>
    %222 = arith.addf %220, %221 : vector<2x192xf32>
    %223 = vector.extract_strided_slice %217 {offsets = [0, 0], sizes = [2, 64], strides = [1, 1]} : vector<2x192xf32> to vector<2x64xf32>
    %224 = vector.extract_strided_slice %222 {offsets = [0, 0], sizes = [2, 64], strides = [1, 1]} : vector<2x192xf32> to vector<2x64xf32>
    %225 = arith.addf %223, %224 : vector<2x64xf32>
    %226 = arith.negf %225 : vector<2x64xf32>
    %227 = math.exp %226 : vector<2x64xf32>
    %cst_69 = arith.constant 1.000000e+00 : f32
    %228 = vector.broadcast %cst_69 : f32 to vector<2x64xf32>
    %229 = arith.addf %228, %227 : vector<2x64xf32>
    %230 = arith.divf %228, %229 : vector<2x64xf32>
    %231 = vector.extract_strided_slice %217 {offsets = [0, 64], sizes = [2, 64], strides = [1, 1]} : vector<2x192xf32> to vector<2x64xf32>
    %232 = vector.extract_strided_slice %222 {offsets = [0, 64], sizes = [2, 64], strides = [1, 1]} : vector<2x192xf32> to vector<2x64xf32>
    %233 = arith.addf %231, %232 : vector<2x64xf32>
    %234 = arith.negf %233 : vector<2x64xf32>
    %235 = math.exp %234 : vector<2x64xf32>
    %cst_70 = arith.constant 1.000000e+00 : f32
    %236 = vector.broadcast %cst_70 : f32 to vector<2x64xf32>
    %237 = arith.addf %236, %235 : vector<2x64xf32>
    %238 = arith.divf %236, %237 : vector<2x64xf32>
    %239 = vector.extract_strided_slice %217 {offsets = [0, 128], sizes = [2, 64], strides = [1, 1]} : vector<2x192xf32> to vector<2x64xf32>
    %240 = vector.extract_strided_slice %222 {offsets = [0, 128], sizes = [2, 64], strides = [1, 1]} : vector<2x192xf32> to vector<2x64xf32>
    %241 = arith.mulf %230, %240 : vector<2x64xf32>
    %242 = arith.addf %239, %241 : vector<2x64xf32>
    %243 = math.tanh %242 : vector<2x64xf32>
    %cst_71 = arith.constant 1.000000e+00 : f32
    %244 = vector.broadcast %cst_71 : f32 to vector<2x64xf32>
    %245 = arith.subf %244, %238 : vector<2x64xf32>
    %246 = arith.mulf %245, %243 : vector<2x64xf32>
    %247 = arith.mulf %238, %171 : vector<2x64xf32>
    %248 = arith.addf %246, %247 : vector<2x64xf32>
    %249 = arith.index_cast %c2_i32 : i32 to index
    %c0_72 = arith.constant 0 : index
    %c0_73 = arith.constant 0 : index
    %250 = vector.load %arg12[%249, %c0_72, %c0_73] : memref<8x2x64xf32, #tpu.memory_space<vmem>>, vector<1x2x64xf32>
    %251 = vector.shape_cast %250 : vector<1x2x64xf32> to vector<2x64xf32>
    %252 = vector.shape_cast %214 : vector<2x64xf32> to vector<1x2x64xf32>
    tpu.vector_store %arg12[%249, %c0_72, %c0_73], %252 {strides = array<i32>} : memref<8x2x64xf32, #tpu.memory_space<vmem>>, vector<1x2x64xf32>,
    %253 = arith.index_cast %180 : i32 to index
    %c0_74 = arith.constant 0 : index
    %c0_75 = arith.constant 0 : index
    %254 = vector.load %arg13[%253, %c0_74, %c0_75] : memref<8x2x64xf32, #tpu.memory_space<vmem>>, vector<1x2x64xf32>
    %255 = vector.shape_cast %254 : vector<1x2x64xf32> to vector<2x64xf32>
    %256 = vector.shape_cast %248 : vector<2x64xf32> to vector<1x2x64xf32>
    tpu.vector_store %arg13[%253, %c0_74, %c0_75], %256 {strides = array<i32>} : memref<8x2x64xf32, #tpu.memory_space<vmem>>, vector<1x2x64xf32>,
    %c3_i32 = arith.constant 3 : i32
    %c7_i32_76 = arith.constant 7 : i32
    %257 = arith.subi %c7_i32_76, %c3_i32 : i32
    %258 = arith.index_cast %c3_i32 : i32 to index
    %c0_77 = arith.constant 0 : index
    %c0_78 = arith.constant 0 : index
    %259 = vector.load %arg10[%258, %c0_77, %c0_78] : memref<8x2x192xf32, #tpu.memory_space<vmem>>, vector<1x2x192xf32>
    %260 = vector.shape_cast %259 : vector<1x2x192xf32> to vector<2x192xf32>
    %261 = arith.truncf %214 : vector<2x64xf32> to vector<2x64xbf16>
    %262 = arith.truncf %21 : vector<64x192xf32> to vector<64x192xbf16>
    %cst_79 = arith.constant dense<0.000000e+00> : vector<2x192xf32>
    %263 = tpu.matmul %261, %262, %cst_79 {dimension_numbers = #tpu.dot_dimension_numbers<[1], [0], [0], [1], [0, 0, 1, 1], [], []>} : vector<2x64xbf16>, vector<64x192xbf16>, vector<2x192xf32> -> vector<2x192xf32>
    %264 = vector.broadcast %23 : vector<1x192xf32> to vector<2x192xf32>
    %265 = arith.addf %263, %264 : vector<2x192xf32>
    %266 = vector.extract_strided_slice %260 {offsets = [0, 0], sizes = [2, 64], strides = [1, 1]} : vector<2x192xf32> to vector<2x64xf32>
    %267 = vector.extract_strided_slice %265 {offsets = [0, 0], sizes = [2, 64], strides = [1, 1]} : vector<2x192xf32> to vector<2x64xf32>
    %268 = arith.addf %266, %267 : vector<2x64xf32>
    %269 = arith.negf %268 : vector<2x64xf32>
    %270 = math.exp %269 : vector<2x64xf32>
    %cst_80 = arith.constant 1.000000e+00 : f32
    %271 = vector.broadcast %cst_80 : f32 to vector<2x64xf32>
    %272 = arith.addf %271, %270 : vector<2x64xf32>
    %273 = arith.divf %271, %272 : vector<2x64xf32>
    %274 = vector.extract_strided_slice %260 {offsets = [0, 64], sizes = [2, 64], strides = [1, 1]} : vector<2x192xf32> to vector<2x64xf32>
    %275 = vector.extract_strided_slice %265 {offsets = [0, 64], sizes = [2, 64], strides = [1, 1]} : vector<2x192xf32> to vector<2x64xf32>
    %276 = arith.addf %274, %275 : vector<2x64xf32>
    %277 = arith.negf %276 : vector<2x64xf32>
    %278 = math.exp %277 : vector<2x64xf32>
    %cst_81 = arith.constant 1.000000e+00 : f32
    %279 = vector.broadcast %cst_81 : f32 to vector<2x64xf32>
    %280 = arith.addf %279, %278 : vector<2x64xf32>
    %281 = arith.divf %279, %280 : vector<2x64xf32>
    %282 = vector.extract_strided_slice %260 {offsets = [0, 128], sizes = [2, 64], strides = [1, 1]} : vector<2x192xf32> to vector<2x64xf32>
    %283 = vector.extract_strided_slice %265 {offsets = [0, 128], sizes = [2, 64], strides = [1, 1]} : vector<2x192xf32> to vector<2x64xf32>
    %284 = arith.mulf %273, %283 : vector<2x64xf32>
    %285 = arith.addf %282, %284 : vector<2x64xf32>
    %286 = math.tanh %285 : vector<2x64xf32>
    %cst_82 = arith.constant 1.000000e+00 : f32
    %287 = vector.broadcast %cst_82 : f32 to vector<2x64xf32>
    %288 = arith.subf %287, %281 : vector<2x64xf32>
    %289 = arith.mulf %288, %286 : vector<2x64xf32>
    %290 = arith.mulf %281, %214 : vector<2x64xf32>
    %291 = arith.addf %289, %290 : vector<2x64xf32>
    %292 = arith.index_cast %257 : i32 to index
    %c0_83 = arith.constant 0 : index
    %c0_84 = arith.constant 0 : index
    %293 = vector.load %arg11[%292, %c0_83, %c0_84] : memref<8x2x192xf32, #tpu.memory_space<vmem>>, vector<1x2x192xf32>
    %294 = vector.shape_cast %293 : vector<1x2x192xf32> to vector<2x192xf32>
    %295 = arith.truncf %248 : vector<2x64xf32> to vector<2x64xbf16>
    %296 = arith.truncf %22 : vector<64x192xf32> to vector<64x192xbf16>
    %cst_85 = arith.constant dense<0.000000e+00> : vector<2x192xf32>
    %297 = tpu.matmul %295, %296, %cst_85 {dimension_numbers = #tpu.dot_dimension_numbers<[1], [0], [0], [1], [0, 0, 1, 1], [], []>} : vector<2x64xbf16>, vector<64x192xbf16>, vector<2x192xf32> -> vector<2x192xf32>
    %298 = vector.broadcast %24 : vector<1x192xf32> to vector<2x192xf32>
    %299 = arith.addf %297, %298 : vector<2x192xf32>
    %300 = vector.extract_strided_slice %294 {offsets = [0, 0], sizes = [2, 64], strides = [1, 1]} : vector<2x192xf32> to vector<2x64xf32>
    %301 = vector.extract_strided_slice %299 {offsets = [0, 0], sizes = [2, 64], strides = [1, 1]} : vector<2x192xf32> to vector<2x64xf32>
    %302 = arith.addf %300, %301 : vector<2x64xf32>
    %303 = arith.negf %302 : vector<2x64xf32>
    %304 = math.exp %303 : vector<2x64xf32>
    %cst_86 = arith.constant 1.000000e+00 : f32
    %305 = vector.broadcast %cst_86 : f32 to vector<2x64xf32>
    %306 = arith.addf %305, %304 : vector<2x64xf32>
    %307 = arith.divf %305, %306 : vector<2x64xf32>
    %308 = vector.extract_strided_slice %294 {offsets = [0, 64], sizes = [2, 64], strides = [1, 1]} : vector<2x192xf32> to vector<2x64xf32>
    %309 = vector.extract_strided_slice %299 {offsets = [0, 64], sizes = [2, 64], strides = [1, 1]} : vector<2x192xf32> to vector<2x64xf32>
    %310 = arith.addf %308, %309 : vector<2x64xf32>
    %311 = arith.negf %310 : vector<2x64xf32>
    %312 = math.exp %311 : vector<2x64xf32>
    %cst_87 = arith.constant 1.000000e+00 : f32
    %313 = vector.broadcast %cst_87 : f32 to vector<2x64xf32>
    %314 = arith.addf %313, %312 : vector<2x64xf32>
    %315 = arith.divf %313, %314 : vector<2x64xf32>
    %316 = vector.extract_strided_slice %294 {offsets = [0, 128], sizes = [2, 64], strides = [1, 1]} : vector<2x192xf32> to vector<2x64xf32>
    %317 = vector.extract_strided_slice %299 {offsets = [0, 128], sizes = [2, 64], strides = [1, 1]} : vector<2x192xf32> to vector<2x64xf32>
    %318 = arith.mulf %307, %317 : vector<2x64xf32>
    %319 = arith.addf %316, %318 : vector<2x64xf32>
    %320 = math.tanh %319 : vector<2x64xf32>
    %cst_88 = arith.constant 1.000000e+00 : f32
    %321 = vector.broadcast %cst_88 : f32 to vector<2x64xf32>
    %322 = arith.subf %321, %315 : vector<2x64xf32>
    %323 = arith.mulf %322, %320 : vector<2x64xf32>
    %324 = arith.mulf %315, %248 : vector<2x64xf32>
    %325 = arith.addf %323, %324 : vector<2x64xf32>
    %326 = arith.index_cast %c3_i32 : i32 to index
    %c0_89 = arith.constant 0 : index
    %c0_90 = arith.constant 0 : index
    %327 = vector.load %arg12[%326, %c0_89, %c0_90] : memref<8x2x64xf32, #tpu.memory_space<vmem>>, vector<1x2x64xf32>
    %328 = vector.shape_cast %327 : vector<1x2x64xf32> to vector<2x64xf32>
    %329 = vector.shape_cast %291 : vector<2x64xf32> to vector<1x2x64xf32>
    tpu.vector_store %arg12[%326, %c0_89, %c0_90], %329 {strides = array<i32>} : memref<8x2x64xf32, #tpu.memory_space<vmem>>, vector<1x2x64xf32>,
    %330 = arith.index_cast %257 : i32 to index
    %c0_91 = arith.constant 0 : index
    %c0_92 = arith.constant 0 : index
    %331 = vector.load %arg13[%330, %c0_91, %c0_92] : memref<8x2x64xf32, #tpu.memory_space<vmem>>, vector<1x2x64xf32>
    %332 = vector.shape_cast %331 : vector<1x2x64xf32> to vector<2x64xf32>
    %333 = vector.shape_cast %325 : vector<2x64xf32> to vector<1x2x64xf32>
    tpu.vector_store %arg13[%330, %c0_91, %c0_92], %333 {strides = array<i32>} : memref<8x2x64xf32, #tpu.memory_space<vmem>>, vector<1x2x64xf32>,
    %c4_i32 = arith.constant 4 : i32
    %c7_i32_93 = arith.constant 7 : i32
    %334 = arith.subi %c7_i32_93, %c4_i32 : i32
    %335 = arith.index_cast %c4_i32 : i32 to index
    %c0_94 = arith.constant 0 : index
    %c0_95 = arith.constant 0 : index
    %336 = vector.load %arg10[%335, %c0_94, %c0_95] : memref<8x2x192xf32, #tpu.memory_space<vmem>>, vector<1x2x192xf32>
    %337 = vector.shape_cast %336 : vector<1x2x192xf32> to vector<2x192xf32>
    %338 = arith.truncf %291 : vector<2x64xf32> to vector<2x64xbf16>
    %339 = arith.truncf %21 : vector<64x192xf32> to vector<64x192xbf16>
    %cst_96 = arith.constant dense<0.000000e+00> : vector<2x192xf32>
    %340 = tpu.matmul %338, %339, %cst_96 {dimension_numbers = #tpu.dot_dimension_numbers<[1], [0], [0], [1], [0, 0, 1, 1], [], []>} : vector<2x64xbf16>, vector<64x192xbf16>, vector<2x192xf32> -> vector<2x192xf32>
    %341 = vector.broadcast %23 : vector<1x192xf32> to vector<2x192xf32>
    %342 = arith.addf %340, %341 : vector<2x192xf32>
    %343 = vector.extract_strided_slice %337 {offsets = [0, 0], sizes = [2, 64], strides = [1, 1]} : vector<2x192xf32> to vector<2x64xf32>
    %344 = vector.extract_strided_slice %342 {offsets = [0, 0], sizes = [2, 64], strides = [1, 1]} : vector<2x192xf32> to vector<2x64xf32>
    %345 = arith.addf %343, %344 : vector<2x64xf32>
    %346 = arith.negf %345 : vector<2x64xf32>
    %347 = math.exp %346 : vector<2x64xf32>
    %cst_97 = arith.constant 1.000000e+00 : f32
    %348 = vector.broadcast %cst_97 : f32 to vector<2x64xf32>
    %349 = arith.addf %348, %347 : vector<2x64xf32>
    %350 = arith.divf %348, %349 : vector<2x64xf32>
    %351 = vector.extract_strided_slice %337 {offsets = [0, 64], sizes = [2, 64], strides = [1, 1]} : vector<2x192xf32> to vector<2x64xf32>
    %352 = vector.extract_strided_slice %342 {offsets = [0, 64], sizes = [2, 64], strides = [1, 1]} : vector<2x192xf32> to vector<2x64xf32>
    %353 = arith.addf %351, %352 : vector<2x64xf32>
    %354 = arith.negf %353 : vector<2x64xf32>
    %355 = math.exp %354 : vector<2x64xf32>
    %cst_98 = arith.constant 1.000000e+00 : f32
    %356 = vector.broadcast %cst_98 : f32 to vector<2x64xf32>
    %357 = arith.addf %356, %355 : vector<2x64xf32>
    %358 = arith.divf %356, %357 : vector<2x64xf32>
    %359 = vector.extract_strided_slice %337 {offsets = [0, 128], sizes = [2, 64], strides = [1, 1]} : vector<2x192xf32> to vector<2x64xf32>
    %360 = vector.extract_strided_slice %342 {offsets = [0, 128], sizes = [2, 64], strides = [1, 1]} : vector<2x192xf32> to vector<2x64xf32>
    %361 = arith.mulf %350, %360 : vector<2x64xf32>
    %362 = arith.addf %359, %361 : vector<2x64xf32>
    %363 = math.tanh %362 : vector<2x64xf32>
    %cst_99 = arith.constant 1.000000e+00 : f32
    %364 = vector.broadcast %cst_99 : f32 to vector<2x64xf32>
    %365 = arith.subf %364, %358 : vector<2x64xf32>
    %366 = arith.mulf %365, %363 : vector<2x64xf32>
    %367 = arith.mulf %358, %291 : vector<2x64xf32>
    %368 = arith.addf %366, %367 : vector<2x64xf32>
    %369 = arith.index_cast %334 : i32 to index
    %c0_100 = arith.constant 0 : index
    %c0_101 = arith.constant 0 : index
    %370 = vector.load %arg11[%369, %c0_100, %c0_101] : memref<8x2x192xf32, #tpu.memory_space<vmem>>, vector<1x2x192xf32>
    %371 = vector.shape_cast %370 : vector<1x2x192xf32> to vector<2x192xf32>
    %372 = arith.truncf %325 : vector<2x64xf32> to vector<2x64xbf16>
    %373 = arith.truncf %22 : vector<64x192xf32> to vector<64x192xbf16>
    %cst_102 = arith.constant dense<0.000000e+00> : vector<2x192xf32>
    %374 = tpu.matmul %372, %373, %cst_102 {dimension_numbers = #tpu.dot_dimension_numbers<[1], [0], [0], [1], [0, 0, 1, 1], [], []>} : vector<2x64xbf16>, vector<64x192xbf16>, vector<2x192xf32> -> vector<2x192xf32>
    %375 = vector.broadcast %24 : vector<1x192xf32> to vector<2x192xf32>
    %376 = arith.addf %374, %375 : vector<2x192xf32>
    %377 = vector.extract_strided_slice %371 {offsets = [0, 0], sizes = [2, 64], strides = [1, 1]} : vector<2x192xf32> to vector<2x64xf32>
    %378 = vector.extract_strided_slice %376 {offsets = [0, 0], sizes = [2, 64], strides = [1, 1]} : vector<2x192xf32> to vector<2x64xf32>
    %379 = arith.addf %377, %378 : vector<2x64xf32>
    %380 = arith.negf %379 : vector<2x64xf32>
    %381 = math.exp %380 : vector<2x64xf32>
    %cst_103 = arith.constant 1.000000e+00 : f32
    %382 = vector.broadcast %cst_103 : f32 to vector<2x64xf32>
    %383 = arith.addf %382, %381 : vector<2x64xf32>
    %384 = arith.divf %382, %383 : vector<2x64xf32>
    %385 = vector.extract_strided_slice %371 {offsets = [0, 64], sizes = [2, 64], strides = [1, 1]} : vector<2x192xf32> to vector<2x64xf32>
    %386 = vector.extract_strided_slice %376 {offsets = [0, 64], sizes = [2, 64], strides = [1, 1]} : vector<2x192xf32> to vector<2x64xf32>
    %387 = arith.addf %385, %386 : vector<2x64xf32>
    %388 = arith.negf %387 : vector<2x64xf32>
    %389 = math.exp %388 : vector<2x64xf32>
    %cst_104 = arith.constant 1.000000e+00 : f32
    %390 = vector.broadcast %cst_104 : f32 to vector<2x64xf32>
    %391 = arith.addf %390, %389 : vector<2x64xf32>
    %392 = arith.divf %390, %391 : vector<2x64xf32>
    %393 = vector.extract_strided_slice %371 {offsets = [0, 128], sizes = [2, 64], strides = [1, 1]} : vector<2x192xf32> to vector<2x64xf32>
    %394 = vector.extract_strided_slice %376 {offsets = [0, 128], sizes = [2, 64], strides = [1, 1]} : vector<2x192xf32> to vector<2x64xf32>
    %395 = arith.mulf %384, %394 : vector<2x64xf32>
    %396 = arith.addf %393, %395 : vector<2x64xf32>
    %397 = math.tanh %396 : vector<2x64xf32>
    %cst_105 = arith.constant 1.000000e+00 : f32
    %398 = vector.broadcast %cst_105 : f32 to vector<2x64xf32>
    %399 = arith.subf %398, %392 : vector<2x64xf32>
    %400 = arith.mulf %399, %397 : vector<2x64xf32>
    %401 = arith.mulf %392, %325 : vector<2x64xf32>
    %402 = arith.addf %400, %401 : vector<2x64xf32>
    %403 = arith.index_cast %c4_i32 : i32 to index
    %c0_106 = arith.constant 0 : index
    %c0_107 = arith.constant 0 : index
    %404 = vector.load %arg12[%403, %c0_106, %c0_107] : memref<8x2x64xf32, #tpu.memory_space<vmem>>, vector<1x2x64xf32>
    %405 = vector.shape_cast %404 : vector<1x2x64xf32> to vector<2x64xf32>
    %406 = vector.shape_cast %368 : vector<2x64xf32> to vector<1x2x64xf32>
    tpu.vector_store %arg12[%403, %c0_106, %c0_107], %406 {strides = array<i32>} : memref<8x2x64xf32, #tpu.memory_space<vmem>>, vector<1x2x64xf32>,
    %407 = arith.index_cast %334 : i32 to index
    %c0_108 = arith.constant 0 : index
    %c0_109 = arith.constant 0 : index
    %408 = vector.load %arg13[%407, %c0_108, %c0_109] : memref<8x2x64xf32, #tpu.memory_space<vmem>>, vector<1x2x64xf32>
    %409 = vector.shape_cast %408 : vector<1x2x64xf32> to vector<2x64xf32>
    %410 = vector.shape_cast %402 : vector<2x64xf32> to vector<1x2x64xf32>
    tpu.vector_store %arg13[%407, %c0_108, %c0_109], %410 {strides = array<i32>} : memref<8x2x64xf32, #tpu.memory_space<vmem>>, vector<1x2x64xf32>,
    %c5_i32 = arith.constant 5 : i32
    %c7_i32_110 = arith.constant 7 : i32
    %411 = arith.subi %c7_i32_110, %c5_i32 : i32
    %412 = arith.index_cast %c5_i32 : i32 to index
    %c0_111 = arith.constant 0 : index
    %c0_112 = arith.constant 0 : index
    %413 = vector.load %arg10[%412, %c0_111, %c0_112] : memref<8x2x192xf32, #tpu.memory_space<vmem>>, vector<1x2x192xf32>
    %414 = vector.shape_cast %413 : vector<1x2x192xf32> to vector<2x192xf32>
    %415 = arith.truncf %368 : vector<2x64xf32> to vector<2x64xbf16>
    %416 = arith.truncf %21 : vector<64x192xf32> to vector<64x192xbf16>
    %cst_113 = arith.constant dense<0.000000e+00> : vector<2x192xf32>
    %417 = tpu.matmul %415, %416, %cst_113 {dimension_numbers = #tpu.dot_dimension_numbers<[1], [0], [0], [1], [0, 0, 1, 1], [], []>} : vector<2x64xbf16>, vector<64x192xbf16>, vector<2x192xf32> -> vector<2x192xf32>
    %418 = vector.broadcast %23 : vector<1x192xf32> to vector<2x192xf32>
    %419 = arith.addf %417, %418 : vector<2x192xf32>
    %420 = vector.extract_strided_slice %414 {offsets = [0, 0], sizes = [2, 64], strides = [1, 1]} : vector<2x192xf32> to vector<2x64xf32>
    %421 = vector.extract_strided_slice %419 {offsets = [0, 0], sizes = [2, 64], strides = [1, 1]} : vector<2x192xf32> to vector<2x64xf32>
    %422 = arith.addf %420, %421 : vector<2x64xf32>
    %423 = arith.negf %422 : vector<2x64xf32>
    %424 = math.exp %423 : vector<2x64xf32>
    %cst_114 = arith.constant 1.000000e+00 : f32
    %425 = vector.broadcast %cst_114 : f32 to vector<2x64xf32>
    %426 = arith.addf %425, %424 : vector<2x64xf32>
    %427 = arith.divf %425, %426 : vector<2x64xf32>
    %428 = vector.extract_strided_slice %414 {offsets = [0, 64], sizes = [2, 64], strides = [1, 1]} : vector<2x192xf32> to vector<2x64xf32>
    %429 = vector.extract_strided_slice %419 {offsets = [0, 64], sizes = [2, 64], strides = [1, 1]} : vector<2x192xf32> to vector<2x64xf32>
    %430 = arith.addf %428, %429 : vector<2x64xf32>
    %431 = arith.negf %430 : vector<2x64xf32>
    %432 = math.exp %431 : vector<2x64xf32>
    %cst_115 = arith.constant 1.000000e+00 : f32
    %433 = vector.broadcast %cst_115 : f32 to vector<2x64xf32>
    %434 = arith.addf %433, %432 : vector<2x64xf32>
    %435 = arith.divf %433, %434 : vector<2x64xf32>
    %436 = vector.extract_strided_slice %414 {offsets = [0, 128], sizes = [2, 64], strides = [1, 1]} : vector<2x192xf32> to vector<2x64xf32>
    %437 = vector.extract_strided_slice %419 {offsets = [0, 128], sizes = [2, 64], strides = [1, 1]} : vector<2x192xf32> to vector<2x64xf32>
    %438 = arith.mulf %427, %437 : vector<2x64xf32>
    %439 = arith.addf %436, %438 : vector<2x64xf32>
    %440 = math.tanh %439 : vector<2x64xf32>
    %cst_116 = arith.constant 1.000000e+00 : f32
    %441 = vector.broadcast %cst_116 : f32 to vector<2x64xf32>
    %442 = arith.subf %441, %435 : vector<2x64xf32>
    %443 = arith.mulf %442, %440 : vector<2x64xf32>
    %444 = arith.mulf %435, %368 : vector<2x64xf32>
    %445 = arith.addf %443, %444 : vector<2x64xf32>
    %446 = arith.index_cast %411 : i32 to index
    %c0_117 = arith.constant 0 : index
    %c0_118 = arith.constant 0 : index
    %447 = vector.load %arg11[%446, %c0_117, %c0_118] : memref<8x2x192xf32, #tpu.memory_space<vmem>>, vector<1x2x192xf32>
    %448 = vector.shape_cast %447 : vector<1x2x192xf32> to vector<2x192xf32>
    %449 = arith.truncf %402 : vector<2x64xf32> to vector<2x64xbf16>
    %450 = arith.truncf %22 : vector<64x192xf32> to vector<64x192xbf16>
    %cst_119 = arith.constant dense<0.000000e+00> : vector<2x192xf32>
    %451 = tpu.matmul %449, %450, %cst_119 {dimension_numbers = #tpu.dot_dimension_numbers<[1], [0], [0], [1], [0, 0, 1, 1], [], []>} : vector<2x64xbf16>, vector<64x192xbf16>, vector<2x192xf32> -> vector<2x192xf32>
    %452 = vector.broadcast %24 : vector<1x192xf32> to vector<2x192xf32>
    %453 = arith.addf %451, %452 : vector<2x192xf32>
    %454 = vector.extract_strided_slice %448 {offsets = [0, 0], sizes = [2, 64], strides = [1, 1]} : vector<2x192xf32> to vector<2x64xf32>
    %455 = vector.extract_strided_slice %453 {offsets = [0, 0], sizes = [2, 64], strides = [1, 1]} : vector<2x192xf32> to vector<2x64xf32>
    %456 = arith.addf %454, %455 : vector<2x64xf32>
    %457 = arith.negf %456 : vector<2x64xf32>
    %458 = math.exp %457 : vector<2x64xf32>
    %cst_120 = arith.constant 1.000000e+00 : f32
    %459 = vector.broadcast %cst_120 : f32 to vector<2x64xf32>
    %460 = arith.addf %459, %458 : vector<2x64xf32>
    %461 = arith.divf %459, %460 : vector<2x64xf32>
    %462 = vector.extract_strided_slice %448 {offsets = [0, 64], sizes = [2, 64], strides = [1, 1]} : vector<2x192xf32> to vector<2x64xf32>
    %463 = vector.extract_strided_slice %453 {offsets = [0, 64], sizes = [2, 64], strides = [1, 1]} : vector<2x192xf32> to vector<2x64xf32>
    %464 = arith.addf %462, %463 : vector<2x64xf32>
    %465 = arith.negf %464 : vector<2x64xf32>
    %466 = math.exp %465 : vector<2x64xf32>
    %cst_121 = arith.constant 1.000000e+00 : f32
    %467 = vector.broadcast %cst_121 : f32 to vector<2x64xf32>
    %468 = arith.addf %467, %466 : vector<2x64xf32>
    %469 = arith.divf %467, %468 : vector<2x64xf32>
    %470 = vector.extract_strided_slice %448 {offsets = [0, 128], sizes = [2, 64], strides = [1, 1]} : vector<2x192xf32> to vector<2x64xf32>
    %471 = vector.extract_strided_slice %453 {offsets = [0, 128], sizes = [2, 64], strides = [1, 1]} : vector<2x192xf32> to vector<2x64xf32>
    %472 = arith.mulf %461, %471 : vector<2x64xf32>
    %473 = arith.addf %470, %472 : vector<2x64xf32>
    %474 = math.tanh %473 : vector<2x64xf32>
    %cst_122 = arith.constant 1.000000e+00 : f32
    %475 = vector.broadcast %cst_122 : f32 to vector<2x64xf32>
    %476 = arith.subf %475, %469 : vector<2x64xf32>
    %477 = arith.mulf %476, %474 : vector<2x64xf32>
    %478 = arith.mulf %469, %402 : vector<2x64xf32>
    %479 = arith.addf %477, %478 : vector<2x64xf32>
    %480 = arith.index_cast %c5_i32 : i32 to index
    %c0_123 = arith.constant 0 : index
    %c0_124 = arith.constant 0 : index
    %481 = vector.load %arg12[%480, %c0_123, %c0_124] : memref<8x2x64xf32, #tpu.memory_space<vmem>>, vector<1x2x64xf32>
    %482 = vector.shape_cast %481 : vector<1x2x64xf32> to vector<2x64xf32>
    %483 = vector.shape_cast %445 : vector<2x64xf32> to vector<1x2x64xf32>
    tpu.vector_store %arg12[%480, %c0_123, %c0_124], %483 {strides = array<i32>} : memref<8x2x64xf32, #tpu.memory_space<vmem>>, vector<1x2x64xf32>,
    %484 = arith.index_cast %411 : i32 to index
    %c0_125 = arith.constant 0 : index
    %c0_126 = arith.constant 0 : index
    %485 = vector.load %arg13[%484, %c0_125, %c0_126] : memref<8x2x64xf32, #tpu.memory_space<vmem>>, vector<1x2x64xf32>
    %486 = vector.shape_cast %485 : vector<1x2x64xf32> to vector<2x64xf32>
    %487 = vector.shape_cast %479 : vector<2x64xf32> to vector<1x2x64xf32>
    tpu.vector_store %arg13[%484, %c0_125, %c0_126], %487 {strides = array<i32>} : memref<8x2x64xf32, #tpu.memory_space<vmem>>, vector<1x2x64xf32>,
    %c6_i32 = arith.constant 6 : i32
    %c7_i32_127 = arith.constant 7 : i32
    %488 = arith.subi %c7_i32_127, %c6_i32 : i32
    %489 = arith.index_cast %c6_i32 : i32 to index
    %c0_128 = arith.constant 0 : index
    %c0_129 = arith.constant 0 : index
    %490 = vector.load %arg10[%489, %c0_128, %c0_129] : memref<8x2x192xf32, #tpu.memory_space<vmem>>, vector<1x2x192xf32>
    %491 = vector.shape_cast %490 : vector<1x2x192xf32> to vector<2x192xf32>
    %492 = arith.truncf %445 : vector<2x64xf32> to vector<2x64xbf16>
    %493 = arith.truncf %21 : vector<64x192xf32> to vector<64x192xbf16>
    %cst_130 = arith.constant dense<0.000000e+00> : vector<2x192xf32>
    %494 = tpu.matmul %492, %493, %cst_130 {dimension_numbers = #tpu.dot_dimension_numbers<[1], [0], [0], [1], [0, 0, 1, 1], [], []>} : vector<2x64xbf16>, vector<64x192xbf16>, vector<2x192xf32> -> vector<2x192xf32>
    %495 = vector.broadcast %23 : vector<1x192xf32> to vector<2x192xf32>
    %496 = arith.addf %494, %495 : vector<2x192xf32>
    %497 = vector.extract_strided_slice %491 {offsets = [0, 0], sizes = [2, 64], strides = [1, 1]} : vector<2x192xf32> to vector<2x64xf32>
    %498 = vector.extract_strided_slice %496 {offsets = [0, 0], sizes = [2, 64], strides = [1, 1]} : vector<2x192xf32> to vector<2x64xf32>
    %499 = arith.addf %497, %498 : vector<2x64xf32>
    %500 = arith.negf %499 : vector<2x64xf32>
    %501 = math.exp %500 : vector<2x64xf32>
    %cst_131 = arith.constant 1.000000e+00 : f32
    %502 = vector.broadcast %cst_131 : f32 to vector<2x64xf32>
    %503 = arith.addf %502, %501 : vector<2x64xf32>
    %504 = arith.divf %502, %503 : vector<2x64xf32>
    %505 = vector.extract_strided_slice %491 {offsets = [0, 64], sizes = [2, 64], strides = [1, 1]} : vector<2x192xf32> to vector<2x64xf32>
    %506 = vector.extract_strided_slice %496 {offsets = [0, 64], sizes = [2, 64], strides = [1, 1]} : vector<2x192xf32> to vector<2x64xf32>
    %507 = arith.addf %505, %506 : vector<2x64xf32>
    %508 = arith.negf %507 : vector<2x64xf32>
    %509 = math.exp %508 : vector<2x64xf32>
    %cst_132 = arith.constant 1.000000e+00 : f32
    %510 = vector.broadcast %cst_132 : f32 to vector<2x64xf32>
    %511 = arith.addf %510, %509 : vector<2x64xf32>
    %512 = arith.divf %510, %511 : vector<2x64xf32>
    %513 = vector.extract_strided_slice %491 {offsets = [0, 128], sizes = [2, 64], strides = [1, 1]} : vector<2x192xf32> to vector<2x64xf32>
    %514 = vector.extract_strided_slice %496 {offsets = [0, 128], sizes = [2, 64], strides = [1, 1]} : vector<2x192xf32> to vector<2x64xf32>
    %515 = arith.mulf %504, %514 : vector<2x64xf32>
    %516 = arith.addf %513, %515 : vector<2x64xf32>
    %517 = math.tanh %516 : vector<2x64xf32>
    %cst_133 = arith.constant 1.000000e+00 : f32
    %518 = vector.broadcast %cst_133 : f32 to vector<2x64xf32>
    %519 = arith.subf %518, %512 : vector<2x64xf32>
    %520 = arith.mulf %519, %517 : vector<2x64xf32>
    %521 = arith.mulf %512, %445 : vector<2x64xf32>
    %522 = arith.addf %520, %521 : vector<2x64xf32>
    %523 = arith.index_cast %488 : i32 to index
    %c0_134 = arith.constant 0 : index
    %c0_135 = arith.constant 0 : index
    %524 = vector.load %arg11[%523, %c0_134, %c0_135] : memref<8x2x192xf32, #tpu.memory_space<vmem>>, vector<1x2x192xf32>
    %525 = vector.shape_cast %524 : vector<1x2x192xf32> to vector<2x192xf32>
    %526 = arith.truncf %479 : vector<2x64xf32> to vector<2x64xbf16>
    %527 = arith.truncf %22 : vector<64x192xf32> to vector<64x192xbf16>
    %cst_136 = arith.constant dense<0.000000e+00> : vector<2x192xf32>
    %528 = tpu.matmul %526, %527, %cst_136 {dimension_numbers = #tpu.dot_dimension_numbers<[1], [0], [0], [1], [0, 0, 1, 1], [], []>} : vector<2x64xbf16>, vector<64x192xbf16>, vector<2x192xf32> -> vector<2x192xf32>
    %529 = vector.broadcast %24 : vector<1x192xf32> to vector<2x192xf32>
    %530 = arith.addf %528, %529 : vector<2x192xf32>
    %531 = vector.extract_strided_slice %525 {offsets = [0, 0], sizes = [2, 64], strides = [1, 1]} : vector<2x192xf32> to vector<2x64xf32>
    %532 = vector.extract_strided_slice %530 {offsets = [0, 0], sizes = [2, 64], strides = [1, 1]} : vector<2x192xf32> to vector<2x64xf32>
    %533 = arith.addf %531, %532 : vector<2x64xf32>
    %534 = arith.negf %533 : vector<2x64xf32>
    %535 = math.exp %534 : vector<2x64xf32>
    %cst_137 = arith.constant 1.000000e+00 : f32
    %536 = vector.broadcast %cst_137 : f32 to vector<2x64xf32>
    %537 = arith.addf %536, %535 : vector<2x64xf32>
    %538 = arith.divf %536, %537 : vector<2x64xf32>
    %539 = vector.extract_strided_slice %525 {offsets = [0, 64], sizes = [2, 64], strides = [1, 1]} : vector<2x192xf32> to vector<2x64xf32>
    %540 = vector.extract_strided_slice %530 {offsets = [0, 64], sizes = [2, 64], strides = [1, 1]} : vector<2x192xf32> to vector<2x64xf32>
    %541 = arith.addf %539, %540 : vector<2x64xf32>
    %542 = arith.negf %541 : vector<2x64xf32>
    %543 = math.exp %542 : vector<2x64xf32>
    %cst_138 = arith.constant 1.000000e+00 : f32
    %544 = vector.broadcast %cst_138 : f32 to vector<2x64xf32>
    %545 = arith.addf %544, %543 : vector<2x64xf32>
    %546 = arith.divf %544, %545 : vector<2x64xf32>
    %547 = vector.extract_strided_slice %525 {offsets = [0, 128], sizes = [2, 64], strides = [1, 1]} : vector<2x192xf32> to vector<2x64xf32>
    %548 = vector.extract_strided_slice %530 {offsets = [0, 128], sizes = [2, 64], strides = [1, 1]} : vector<2x192xf32> to vector<2x64xf32>
    %549 = arith.mulf %538, %548 : vector<2x64xf32>
    %550 = arith.addf %547, %549 : vector<2x64xf32>
    %551 = math.tanh %550 : vector<2x64xf32>
    %cst_139 = arith.constant 1.000000e+00 : f32
    %552 = vector.broadcast %cst_139 : f32 to vector<2x64xf32>
    %553 = arith.subf %552, %546 : vector<2x64xf32>
    %554 = arith.mulf %553, %551 : vector<2x64xf32>
    %555 = arith.mulf %546, %479 : vector<2x64xf32>
    %556 = arith.addf %554, %555 : vector<2x64xf32>
    %557 = arith.index_cast %c6_i32 : i32 to index
    %c0_140 = arith.constant 0 : index
    %c0_141 = arith.constant 0 : index
    %558 = vector.load %arg12[%557, %c0_140, %c0_141] : memref<8x2x64xf32, #tpu.memory_space<vmem>>, vector<1x2x64xf32>
    %559 = vector.shape_cast %558 : vector<1x2x64xf32> to vector<2x64xf32>
    %560 = vector.shape_cast %522 : vector<2x64xf32> to vector<1x2x64xf32>
    tpu.vector_store %arg12[%557, %c0_140, %c0_141], %560 {strides = array<i32>} : memref<8x2x64xf32, #tpu.memory_space<vmem>>, vector<1x2x64xf32>,
    %561 = arith.index_cast %488 : i32 to index
    %c0_142 = arith.constant 0 : index
    %c0_143 = arith.constant 0 : index
    %562 = vector.load %arg13[%561, %c0_142, %c0_143] : memref<8x2x64xf32, #tpu.memory_space<vmem>>, vector<1x2x64xf32>
    %563 = vector.shape_cast %562 : vector<1x2x64xf32> to vector<2x64xf32>
    %564 = vector.shape_cast %556 : vector<2x64xf32> to vector<1x2x64xf32>
    tpu.vector_store %arg13[%561, %c0_142, %c0_143], %564 {strides = array<i32>} : memref<8x2x64xf32, #tpu.memory_space<vmem>>, vector<1x2x64xf32>,
    %c7_i32_144 = arith.constant 7 : i32
    %c7_i32_145 = arith.constant 7 : i32
    %565 = arith.subi %c7_i32_145, %c7_i32_144 : i32
    %566 = arith.index_cast %c7_i32_144 : i32 to index
    %c0_146 = arith.constant 0 : index
    %c0_147 = arith.constant 0 : index
    %567 = vector.load %arg10[%566, %c0_146, %c0_147] : memref<8x2x192xf32, #tpu.memory_space<vmem>>, vector<1x2x192xf32>
    %568 = vector.shape_cast %567 : vector<1x2x192xf32> to vector<2x192xf32>
    %569 = arith.truncf %522 : vector<2x64xf32> to vector<2x64xbf16>
    %570 = arith.truncf %21 : vector<64x192xf32> to vector<64x192xbf16>
    %cst_148 = arith.constant dense<0.000000e+00> : vector<2x192xf32>
    %571 = tpu.matmul %569, %570, %cst_148 {dimension_numbers = #tpu.dot_dimension_numbers<[1], [0], [0], [1], [0, 0, 1, 1], [], []>} : vector<2x64xbf16>, vector<64x192xbf16>, vector<2x192xf32> -> vector<2x192xf32>
    %572 = vector.broadcast %23 : vector<1x192xf32> to vector<2x192xf32>
    %573 = arith.addf %571, %572 : vector<2x192xf32>
    %574 = vector.extract_strided_slice %568 {offsets = [0, 0], sizes = [2, 64], strides = [1, 1]} : vector<2x192xf32> to vector<2x64xf32>
    %575 = vector.extract_strided_slice %573 {offsets = [0, 0], sizes = [2, 64], strides = [1, 1]} : vector<2x192xf32> to vector<2x64xf32>
    %576 = arith.addf %574, %575 : vector<2x64xf32>
    %577 = arith.negf %576 : vector<2x64xf32>
    %578 = math.exp %577 : vector<2x64xf32>
    %cst_149 = arith.constant 1.000000e+00 : f32
    %579 = vector.broadcast %cst_149 : f32 to vector<2x64xf32>
    %580 = arith.addf %579, %578 : vector<2x64xf32>
    %581 = arith.divf %579, %580 : vector<2x64xf32>
    %582 = vector.extract_strided_slice %568 {offsets = [0, 64], sizes = [2, 64], strides = [1, 1]} : vector<2x192xf32> to vector<2x64xf32>
    %583 = vector.extract_strided_slice %573 {offsets = [0, 64], sizes = [2, 64], strides = [1, 1]} : vector<2x192xf32> to vector<2x64xf32>
    %584 = arith.addf %582, %583 : vector<2x64xf32>
    %585 = arith.negf %584 : vector<2x64xf32>
    %586 = math.exp %585 : vector<2x64xf32>
    %cst_150 = arith.constant 1.000000e+00 : f32
    %587 = vector.broadcast %cst_150 : f32 to vector<2x64xf32>
    %588 = arith.addf %587, %586 : vector<2x64xf32>
    %589 = arith.divf %587, %588 : vector<2x64xf32>
    %590 = vector.extract_strided_slice %568 {offsets = [0, 128], sizes = [2, 64], strides = [1, 1]} : vector<2x192xf32> to vector<2x64xf32>
    %591 = vector.extract_strided_slice %573 {offsets = [0, 128], sizes = [2, 64], strides = [1, 1]} : vector<2x192xf32> to vector<2x64xf32>
    %592 = arith.mulf %581, %591 : vector<2x64xf32>
    %593 = arith.addf %590, %592 : vector<2x64xf32>
    %594 = math.tanh %593 : vector<2x64xf32>
    %cst_151 = arith.constant 1.000000e+00 : f32
    %595 = vector.broadcast %cst_151 : f32 to vector<2x64xf32>
    %596 = arith.subf %595, %589 : vector<2x64xf32>
    %597 = arith.mulf %596, %594 : vector<2x64xf32>
    %598 = arith.mulf %589, %522 : vector<2x64xf32>
    %599 = arith.addf %597, %598 : vector<2x64xf32>
    %600 = arith.index_cast %565 : i32 to index
    %c0_152 = arith.constant 0 : index
    %c0_153 = arith.constant 0 : index
    %601 = vector.load %arg11[%600, %c0_152, %c0_153] : memref<8x2x192xf32, #tpu.memory_space<vmem>>, vector<1x2x192xf32>
    %602 = vector.shape_cast %601 : vector<1x2x192xf32> to vector<2x192xf32>
    %603 = arith.truncf %556 : vector<2x64xf32> to vector<2x64xbf16>
    %604 = arith.truncf %22 : vector<64x192xf32> to vector<64x192xbf16>
    %cst_154 = arith.constant dense<0.000000e+00> : vector<2x192xf32>
    %605 = tpu.matmul %603, %604, %cst_154 {dimension_numbers = #tpu.dot_dimension_numbers<[1], [0], [0], [1], [0, 0, 1, 1], [], []>} : vector<2x64xbf16>, vector<64x192xbf16>, vector<2x192xf32> -> vector<2x192xf32>
    %606 = vector.broadcast %24 : vector<1x192xf32> to vector<2x192xf32>
    %607 = arith.addf %605, %606 : vector<2x192xf32>
    %608 = vector.extract_strided_slice %602 {offsets = [0, 0], sizes = [2, 64], strides = [1, 1]} : vector<2x192xf32> to vector<2x64xf32>
    %609 = vector.extract_strided_slice %607 {offsets = [0, 0], sizes = [2, 64], strides = [1, 1]} : vector<2x192xf32> to vector<2x64xf32>
    %610 = arith.addf %608, %609 : vector<2x64xf32>
    %611 = arith.negf %610 : vector<2x64xf32>
    %612 = math.exp %611 : vector<2x64xf32>
    %cst_155 = arith.constant 1.000000e+00 : f32
    %613 = vector.broadcast %cst_155 : f32 to vector<2x64xf32>
    %614 = arith.addf %613, %612 : vector<2x64xf32>
    %615 = arith.divf %613, %614 : vector<2x64xf32>
    %616 = vector.extract_strided_slice %602 {offsets = [0, 64], sizes = [2, 64], strides = [1, 1]} : vector<2x192xf32> to vector<2x64xf32>
    %617 = vector.extract_strided_slice %607 {offsets = [0, 64], sizes = [2, 64], strides = [1, 1]} : vector<2x192xf32> to vector<2x64xf32>
    %618 = arith.addf %616, %617 : vector<2x64xf32>
    %619 = arith.negf %618 : vector<2x64xf32>
    %620 = math.exp %619 : vector<2x64xf32>
    %cst_156 = arith.constant 1.000000e+00 : f32
    %621 = vector.broadcast %cst_156 : f32 to vector<2x64xf32>
    %622 = arith.addf %621, %620 : vector<2x64xf32>
    %623 = arith.divf %621, %622 : vector<2x64xf32>
    %624 = vector.extract_strided_slice %602 {offsets = [0, 128], sizes = [2, 64], strides = [1, 1]} : vector<2x192xf32> to vector<2x64xf32>
    %625 = vector.extract_strided_slice %607 {offsets = [0, 128], sizes = [2, 64], strides = [1, 1]} : vector<2x192xf32> to vector<2x64xf32>
    %626 = arith.mulf %615, %625 : vector<2x64xf32>
    %627 = arith.addf %624, %626 : vector<2x64xf32>
    %628 = math.tanh %627 : vector<2x64xf32>
    %cst_157 = arith.constant 1.000000e+00 : f32
    %629 = vector.broadcast %cst_157 : f32 to vector<2x64xf32>
    %630 = arith.subf %629, %623 : vector<2x64xf32>
    %631 = arith.mulf %630, %628 : vector<2x64xf32>
    %632 = arith.mulf %623, %556 : vector<2x64xf32>
    %633 = arith.addf %631, %632 : vector<2x64xf32>
    %634 = arith.index_cast %c7_i32_144 : i32 to index
    %c0_158 = arith.constant 0 : index
    %c0_159 = arith.constant 0 : index
    %635 = vector.load %arg12[%634, %c0_158, %c0_159] : memref<8x2x64xf32, #tpu.memory_space<vmem>>, vector<1x2x64xf32>
    %636 = vector.shape_cast %635 : vector<1x2x64xf32> to vector<2x64xf32>
    %637 = vector.shape_cast %599 : vector<2x64xf32> to vector<1x2x64xf32>
    tpu.vector_store %arg12[%634, %c0_158, %c0_159], %637 {strides = array<i32>} : memref<8x2x64xf32, #tpu.memory_space<vmem>>, vector<1x2x64xf32>,
    %638 = arith.index_cast %565 : i32 to index
    %c0_160 = arith.constant 0 : index
    %c0_161 = arith.constant 0 : index
    %639 = vector.load %arg13[%638, %c0_160, %c0_161] : memref<8x2x64xf32, #tpu.memory_space<vmem>>, vector<1x2x64xf32>
    %640 = vector.shape_cast %639 : vector<1x2x64xf32> to vector<2x64xf32>
    %641 = vector.shape_cast %633 : vector<2x64xf32> to vector<1x2x64xf32>
    tpu.vector_store %arg13[%638, %c0_160, %c0_161], %641 {strides = array<i32>} : memref<8x2x64xf32, #tpu.memory_space<vmem>>, vector<1x2x64xf32>,
    %c8_i32 = arith.constant 8 : i32
    %c0_162 = arith.constant 0 : index
    %c0_163 = arith.constant 0 : index
    %c0_164 = arith.constant 0 : index
    %642 = vector.load %arg12[%c0_162, %c0_163, %c0_164] : memref<8x2x64xf32, #tpu.memory_space<vmem>>, vector<8x2x64xf32>
    %c0_165 = arith.constant 0 : index
    %c0_166 = arith.constant 0 : index
    %c0_167 = arith.constant 0 : index
    %643 = vector.load %arg13[%c0_165, %c0_166, %c0_167] : memref<8x2x64xf32, #tpu.memory_space<vmem>>, vector<8x2x64xf32>
    %644 = tpu.concatenate %642, %643 in 2 : vector<8x2x64xf32>, vector<8x2x64xf32> -> vector<8x2x128xf32>
    %645 = tpu.transpose %644, [1, 0, 2] : vector<8x2x128xf32> -> vector<2x8x128xf32>
    %c0_168 = arith.constant 0 : index
    %c0_169 = arith.constant 0 : index
    %c0_170 = arith.constant 0 : index
    %646 = vector.load %arg9[%c0_168, %c0_169, %c0_170] : memref<2x8x128xf32, #tpu.memory_space<vmem>>, vector<2x8x128xf32>
    tpu.vector_store %arg9[%c0_168, %c0_169, %c0_170], %645 {strides = array<i32>} : memref<2x8x128xf32, #tpu.memory_space<vmem>>, vector<2x8x128xf32>,
    return
  }
}

module attributes {stable_mosaic.version = 11 : i64} {
  func.func @_lm_head_kernel(%arg0: memref<32x128xf32, #tpu.memory_space<vmem>>, %arg1: memref<128x128xf32, #tpu.memory_space<vmem>>, %arg2: memref<1x128xf32, #tpu.memory_space<vmem>>, %arg3: memref<1x128xf32, #tpu.memory_space<vmem>>, %arg4: memref<1x128xf32, #tpu.memory_space<vmem>>, %arg5: memref<128x128xf32, #tpu.memory_space<vmem>>, %arg6: memref<1x128xf32, #tpu.memory_space<vmem>>, %arg7: memref<32x128xf32, #tpu.memory_space<vmem>>) attributes {dimension_semantics = [], scalar_prefetch = 0 : i64, scratch_operands = 0 : i64, tpu.core_type = #tpu.core_type<tc>} {
    %c0 = arith.constant 0 : index
    %c0_0 = arith.constant 0 : index
    %0 = vector.load %arg0[%c0, %c0_0] : memref<32x128xf32, #tpu.memory_space<vmem>>, vector<32x128xf32>
    %c0_1 = arith.constant 0 : index
    %c0_2 = arith.constant 0 : index
    %1 = vector.load %arg1[%c0_1, %c0_2] : memref<128x128xf32, #tpu.memory_space<vmem>>, vector<128x128xf32>
    %2 = arith.truncf %0 : vector<32x128xf32> to vector<32x128xbf16>
    %3 = arith.truncf %1 : vector<128x128xf32> to vector<128x128xbf16>
    %cst = arith.constant dense<0.000000e+00> : vector<32x128xf32>
    %4 = tpu.matmul %2, %3, %cst {dimension_numbers = #tpu.dot_dimension_numbers<[1], [0], [0], [1], [0, 0, 1, 1], [], []>} : vector<32x128xbf16>, vector<128x128xbf16>, vector<32x128xf32> -> vector<32x128xf32>
    %c0_3 = arith.constant 0 : index
    %c0_4 = arith.constant 0 : index
    %5 = vector.load %arg2[%c0_3, %c0_4] : memref<1x128xf32, #tpu.memory_space<vmem>>, vector<1x128xf32>
    %6 = vector.broadcast %5 : vector<1x128xf32> to vector<32x128xf32>
    %7 = arith.addf %4, %6 : vector<32x128xf32>
    %8 = arith.mulf %7, %7 : vector<32x128xf32>
    %9 = arith.mulf %7, %8 : vector<32x128xf32>
    %cst_5 = arith.constant 4.471500e-02 : f32
    %10 = vector.broadcast %cst_5 : f32 to vector<32x128xf32>
    %11 = arith.mulf %10, %9 : vector<32x128xf32>
    %12 = arith.addf %7, %11 : vector<32x128xf32>
    %cst_6 = arith.constant 0.797884583 : f32
    %13 = vector.broadcast %cst_6 : f32 to vector<32x128xf32>
    %14 = arith.mulf %13, %12 : vector<32x128xf32>
    %15 = math.tanh %14 : vector<32x128xf32>
    %cst_7 = arith.constant 1.000000e+00 : f32
    %16 = vector.broadcast %cst_7 : f32 to vector<32x128xf32>
    %17 = arith.addf %16, %15 : vector<32x128xf32>
    %cst_8 = arith.constant 5.000000e-01 : f32
    %18 = vector.broadcast %cst_8 : f32 to vector<32x128xf32>
    %19 = arith.mulf %18, %17 : vector<32x128xf32>
    %20 = arith.mulf %7, %19 : vector<32x128xf32>
    %c0_9 = arith.constant 0 : index
    %c0_10 = arith.constant 0 : index
    %21 = vector.load %arg3[%c0_9, %c0_10] : memref<1x128xf32, #tpu.memory_space<vmem>>, vector<1x128xf32>
    %c0_11 = arith.constant 0 : index
    %c0_12 = arith.constant 0 : index
    %22 = vector.load %arg4[%c0_11, %c0_12] : memref<1x128xf32, #tpu.memory_space<vmem>>, vector<1x128xf32>
    %cst_13 = arith.constant dense<0.000000e+00> : vector<32xf32>
    %23 = vector.multi_reduction <add>, %20, %cst_13 [1] : vector<32x128xf32> to vector<32xf32>
    %24 = vector.shape_cast %23 : vector<32xf32> to vector<32x1xf32>
    %cst_14 = arith.constant 1.280000e+02 : f32
    %25 = vector.broadcast %cst_14 : f32 to vector<32x1xf32>
    %26 = arith.divf %24, %25 : vector<32x1xf32>
    %27 = vector.broadcast %26 : vector<32x1xf32> to vector<32x128xf32>
    %28 = arith.subf %20, %27 : vector<32x128xf32>
    %29 = arith.mulf %28, %28 : vector<32x128xf32>
    %cst_15 = arith.constant dense<0.000000e+00> : vector<32xf32>
    %30 = vector.multi_reduction <add>, %29, %cst_15 [1] : vector<32x128xf32> to vector<32xf32>
    %31 = vector.shape_cast %30 : vector<32xf32> to vector<32x1xf32>
    %cst_16 = arith.constant 1.280000e+02 : f32
    %32 = vector.broadcast %cst_16 : f32 to vector<32x1xf32>
    %33 = arith.divf %31, %32 : vector<32x1xf32>
    %34 = vector.broadcast %26 : vector<32x1xf32> to vector<32x128xf32>
    %35 = arith.subf %20, %34 : vector<32x128xf32>
    %cst_17 = arith.constant 9.99999996E-13 : f32
    %36 = vector.broadcast %cst_17 : f32 to vector<32x1xf32>
    %37 = arith.addf %33, %36 : vector<32x1xf32>
    %38 = math.rsqrt %37 : vector<32x1xf32>
    %39 = vector.broadcast %38 : vector<32x1xf32> to vector<32x128xf32>
    %40 = arith.mulf %35, %39 : vector<32x128xf32>
    %41 = vector.broadcast %21 : vector<1x128xf32> to vector<32x128xf32>
    %42 = arith.mulf %40, %41 : vector<32x128xf32>
    %43 = vector.broadcast %22 : vector<1x128xf32> to vector<32x128xf32>
    %44 = arith.addf %42, %43 : vector<32x128xf32>
    %c0_18 = arith.constant 0 : index
    %c0_19 = arith.constant 0 : index
    %45 = vector.load %arg5[%c0_18, %c0_19] : memref<128x128xf32, #tpu.memory_space<vmem>>, vector<128x128xf32>
    %46 = arith.truncf %44 : vector<32x128xf32> to vector<32x128xbf16>
    %47 = arith.truncf %45 : vector<128x128xf32> to vector<128x128xbf16>
    %cst_20 = arith.constant dense<0.000000e+00> : vector<32x128xf32>
    %48 = tpu.matmul %46, %47, %cst_20 {dimension_numbers = #tpu.dot_dimension_numbers<[1], [0], [0], [1], [0, 0, 1, 1], [], []>} : vector<32x128xbf16>, vector<128x128xbf16>, vector<32x128xf32> -> vector<32x128xf32>
    %c0_21 = arith.constant 0 : index
    %c0_22 = arith.constant 0 : index
    %49 = vector.load %arg6[%c0_21, %c0_22] : memref<1x128xf32, #tpu.memory_space<vmem>>, vector<1x128xf32>
    %50 = vector.broadcast %49 : vector<1x128xf32> to vector<32x128xf32>
    %51 = arith.addf %48, %50 : vector<32x128xf32>
    %c0_23 = arith.constant 0 : index
    %c0_24 = arith.constant 0 : index
    %52 = vector.load %arg7[%c0_23, %c0_24] : memref<32x128xf32, #tpu.memory_space<vmem>>, vector<32x128xf32>
    tpu.vector_store %arg7[%c0_23, %c0_24], %51 {strides = array<i32>} : memref<32x128xf32, #tpu.memory_space<vmem>>, vector<32x128xf32>,
    return
  }
}

</mosaic_0001>

<bundles_post_ra>
// kernel: rnn_linear_bert_forward.8
= control target key start
LH: loop header
LB: loop body
LE: loop exit
PB: predicated region body
PF: predicated region fallthrough
CT: control target
= control target key end

     0   :  { %v187_v0 = vmov 0.0   ;;  %vm188_vm0 = vmmov 0   ;;  %s296_s1 = inlined_call_operand.vmem [shape: f32[128,128], index: 1, kind: input, shape index: {}]   ;;  %s297_s0 = inlined_call_operand.vmem [shape: f32[16,128], index: 0, kind: input, shape index: {}]   ;;  %s298_s2 = inlined_call_operand.vmem [shape: f32[1,128], index: 2, kind: input, shape index: {}]   ;;  %s299_s3 = inlined_call_operand.vmem [shape: f32[8,128], index: 3, kind: input, shape index: {}]   ;;  %s300_s4 = inlined_call_operand.vmem [shape: f32[1,128], index: 4, kind: input, shape index: {}]   ;;  %s301_s5 = inlined_call_operand.vmem [shape: f32[1,128], index: 5, kind: input, shape index: {}]   ;;  %s302_s6 = inlined_call_operand.vmem [shape: f32[16,128], index: 6, kind: output, shape index: {}]  }
   0x1   :  { %161 = vmatprep.subr.bf16.mxu0 %v187_v0  ;;  %v26_v1 = vld [vmem:[%s296_s1] sm:$0xff]  ;;  %v27_v2 = vld [vmem:[%s296_s1 + $0x8] sm:$0xff]  ;;  %v28_v3 = vld [vmem:[%s296_s1 + $0x10] sm:$0xff]  ;;  %177 = vmatprep.mubr.msk.bf16.mxu0 %vm188_vm0, %v187_v0 }
   0x2   :  { %v43_v4 = vpack.c.bf16 %v27_v2, %v26_v1  ;;  %v29_v5 = vld [vmem:[%s296_s1 + $0x18] sm:$0xff]  ;;  %v30_v7 = vld [vmem:[%s296_s1 + $0x20] sm:$0xff]  ;;  %v31_v8 = vld [vmem:[%s296_s1 + $0x28] sm:$0xff] }
   0x3   :  { %v44_v6 = vpack.c.bf16 %v29_v5, %v28_v3  ;;  %v45_v9 = vpack.c.bf16 %v31_v8, %v30_v7  ;;  %v32_v10 = vld [vmem:[%s296_s1 + $0x30] sm:$0xff]  ;;  %v33_v11 = vld [vmem:[%s296_s1 + $0x38] sm:$0xff]  ;;  %v34_v13 = vld [vmem:[%s296_s1 + $0x40] sm:$0xff] }
   0x4   :  { %162 = vmatpush3.bf16.msra.mxu0 %v43_v4  ;;  %v46_v12 = vpack.c.bf16 %v33_v11, %v32_v10  ;;  %v35_v14 = vld [vmem:[%s296_s1 + $0x48] sm:$0xff]  ;;  %v36_v16 = vld [vmem:[%s296_s1 + $0x50] sm:$0xff]  ;;  %v37_v17 = vld [vmem:[%s296_s1 + $0x58] sm:$0xff] }
   0x5   :  { %163 = vmatprep.subr.bf16.mxu0 %v187_v0  ;;  %v47_v15 = vpack.c.bf16 %v35_v14, %v34_v13  ;;  %v48_v18 = vpack.c.bf16 %v37_v17, %v36_v16  ;;  %v38_v19 = vld [vmem:[%s296_s1 + $0x60] sm:$0xff]  ;;  %v39_v20 = vld [vmem:[%s296_s1 + $0x68] sm:$0xff]  ;;  %v40_v22 = vld [vmem:[%s296_s1 + $0x70] sm:$0xff] }
   0x6   :  { %v49_v21 = vpack.c.bf16 %v39_v20, %v38_v19  ;;  %v41_v23 = vld [vmem:[%s296_s1 + $0x78] sm:$0xff]  ;;  %v24_v25 = vld [vmem:[%s297_s0] sm:$0xff]  ;;  %v25_v26 = vld [vmem:[%s297_s0 + $0x8] sm:$0xff] }
   0x7   :  { %v50_v24 = vpack.c.bf16 %v41_v23, %v40_v22  ;;  %v42_v27 = vpack.c.bf16 %v25_v26, %v24_v25  ;;  %v149_v28 = vld [vmem:[%s298_s2] ss:$0 sm:$0xff] }
   0x8   :  { %164 = vmatpush3.bf16.msra.mxu0 %v44_v6  ;;  %v99_v30 = vld [vmem:[%s299_s3] sm:$0xff] }
   0x9   :  { %165 = vmatprep.subr.bf16.mxu0 %v187_v0  ;;  %v150_v53 = vld [vmem:[%s300_s4] ss:$0 sm:$0xff] }
   0xa   :  { %v151_v55 = vld [vmem:[%s301_s5] ss:$0 sm:$0xff] }
   0xc   :  { %166 = vmatpush3.bf16.msra.mxu0 %v45_v9 }
   0xd   :  { %167 = vmatprep.subr.bf16.mxu0 %v187_v0 }
  0x10   :  { %168 = vmatpush3.bf16.msra.mxu0 %v46_v12 }
  0x11   :  { %169 = vmatprep.subr.bf16.mxu0 %v187_v0 }
  0x14   :  { %170 = vmatpush3.bf16.msra.mxu0 %v47_v15 }
  0x15   :  { %171 = vmatprep.subr.bf16.mxu0 %v187_v0 }
  0x18   :  { %172 = vmatpush3.bf16.msra.mxu0 %v48_v18 }
  0x19   :  { %173 = vmatprep.subr.bf16.mxu0 %v187_v0 }
  0x1c   :  { %174 = vmatpush3.bf16.msra.mxu0 %v49_v21 }
  0x1d   :  { %175 = vmatprep.subr.bf16.mxu0 %v187_v0 }
  0x20   :  { %176 = vmatpush3.bf16.msra.mxu0 %v50_v24 }
  0x23   :  { %178 = vmatmul.mubr.bf16.vlgmr.msra.gmra.mrb[0].mxu0 %v42_v27 }
  0xf6   :  { %v92_v29 = vpop.f32.mrb[0].mxu0 }
  0xf7   :  { %v93_v31 = vadd.f32 %v149_v28, %v92_v29  ;;  %v179_v32 = vpop.f32.mrb[1].mxu0 }
  0xf8   :  { %v95_v33 = vpop.f32.mrb[2].mxu0 }
  0xf9   :  { %v96_v34 = vadd.f32 %v149_v28, %v95_v33  ;;  %v180_v35 = vpop.f32.mrb[3].mxu0  ;;  %v100_v36 = vadd.f32 %v99_v30, %v93_v31 }
  0xfb   :  { %104 = vadd.xlane.f32.xlu0 %v100_v36  ;;  %v101_v37 = vadd.f32 %v99_v30, %v96_v34 }
  0xff   :  { %106 = vadd.xlane.f32.xlu0 %v101_v37 }
 0x188   :  { %v105_v38 = vpop.xlane.xlu0 %104 }
 0x189   :  { %v109_v39 = vmul.f32 0.0078125, %v105_v38 }
 0x18b   :  { %v111_v40 = vsub.f32 %v100_v36, %v109_v39 }
 0x18c   :  { %v107_v41 = vpop.xlane.xlu0 %106 }
 0x18d   :  { %v110_v42 = vmul.f32 0.0078125, %v107_v41  ;;  %v113_v43 = vmul.f32 %v111_v40, %v111_v40 }
 0x18f   :  { %v112_v44 = vsub.f32 %v101_v37, %v110_v42  ;;  %115 = vadd.xlane.f32.xlu1 %v113_v43 }
 0x191   :  { %v114_v45 = vmul.f32 %v112_v44, %v112_v44 }
 0x193   :  { %117 = vadd.xlane.f32.xlu1 %v114_v45 }
 0x21c   :  { %v116_v46 = vpop.xlane.xlu1 %115 }
 0x21d   :  { %v119_v47 = vmul.f32 0.0078125, %v116_v46 }
 0x21f   :  { %v121_v48 = vadd.f32 1e-12, %v119_v47 }
 0x220   :  { %v118_v49 = vpop.xlane.xlu1 %117 }
 0x221   :  { %183 = vrsqrt.f32 %v121_v48  ;;  %v120_v50 = vmul.f32 0.0078125, %v118_v49 }
 0x223   :  { %v122_v51 = vadd.f32 1e-12, %v120_v50 }
 0x225   :  { %185 = vrsqrt.f32 %v122_v51 }
 0x22b   :  { %v184_v52 = vpop.eup %183 }
 0x22c   :  { %v125_v54 = vmul.f32 %v184_v52, %v111_v40 }
 0x22e   :  { %v133_v56 = vmul.f32 %v150_v53, %v125_v54 }
 0x22f   :  { %v186_v57 = vpop.eup %185 }
 0x230   :  { %v141_v58 = vadd.f32 %v151_v55, %v133_v56  ;;  %v126_v59 = vmul.f32 %v186_v57, %v112_v44 }
 0x232   :  { %143 = vst [vmem:[%s302_s6] sm:$0xff] %v141_v58  ;;  %v134_v60 = vmul.f32 %v150_v53, %v126_v59 }
 0x234   :  { %v142_v61 = vadd.f32 %v151_v55, %v134_v60 }
 0x236   :  { %144 = vst [vmem:[%s302_s6 + $0x8] sm:$0xff] %v142_v61 }

// kernel: rnn_linear_bert_forward.9
= control target key start
LH: loop header
LB: loop body
LE: loop exit
PB: predicated region body
PF: predicated region fallthrough
CT: control target
= control target key end

     0   :  { %v1387_v3 = vmov 0   ;;  %v1388_v52 = vmov 0.0   ;;  %vm1389_vm0 = vmmov 0   ;;  %v122_v53 = vlaneseq  ;;  %s2026_s1 = inlined_call_operand.vmem [shape: f32[128,384], index: 1, kind: input, shape index: {}]   ;;  %s2027_s0 = inlined_call_operand.vmem [shape: f32[16,128], index: 0, kind: input, shape index: {}]   ;;  %s2028_s2 = inlined_call_operand.vmem [shape: f32[1,384], index: 2, kind: input, shape index: {}]   ;;  %s2029_s3 = inlined_call_operand.vmem [shape: f32[128,128], index: 3, kind: input, shape index: {}]   ;;  %s2030_s4 = inlined_call_operand.vmem [shape: f32[1,128], index: 4, kind: input, shape index: {}]   ;;  %s2031_s7 = inlined_call_operand.vmem [shape: f32[128,256], index: 7, kind: input, shape index: {}]   ;;  %s2032_s5 = inlined_call_operand.vmem [shape: f32[1,128], index: 5, kind: input, shape index: {}]   ;;  %s2033_s6 = inlined_call_operand.vmem [shape: f32[1,128], index: 6, kind: input, shape index: {}]   ;;  %s2034_s9 = inlined_call_operand.vmem [shape: f32[256,128], index: 9, kind: input, shape index: {}]   ;;  %s2035_s8 = inlined_call_operand.vmem [shape: f32[1,256], index: 8, kind: input, shape index: {}]   ;;  %s2036_s10 = inlined_call_operand.vmem [shape: f32[1,128], index: 10, kind: input, shape index: {}]   ;;  %s2037_s11 = inlined_call_operand.vmem [shape: f32[1,128], index: 11, kind: input, shape index: {}]   ;;  %s2038_s12 = inlined_call_operand.vmem [shape: f32[1,128], index: 12, kind: input, shape index: {}]   ;;  %s2039_s13 = inlined_call_operand.vmem [shape: f32[16,128], index: 13, kind: output, shape index: {}]  }
   0x1   :  { %v48_v0 = vld [vmem:[%s2026_s1 + $0x8] sm:$0xff]  ;;  %v51_v1 = vld [vmem:[%s2026_s1 + $0x20] sm:$0xff]  ;;  %169 = vmatprep.mubr.bf16.mxu0 %v1387_v3  ;;  %v50_v5 = vld [vmem:[%s2026_s1 + $0x18] sm:$0xff]  ;;  %1262 = vmatprep.subr.bf16.mxu1 %v1388_v52  ;;  %vm221_vm1 = vcmask 523264   ;;  %vm299_vm2 = vcmask 64512   ;;  %vm316_vm3 = vcmask 1043456  }
   0x2   :  { %v47_v2 = vld [vmem:[%s2026_s1] sm:$0xff]  ;;  %v97_v4 = vpack.c.bf16 %v51_v1, %v48_v0  ;;  %v54_v6 = vld [vmem:[%s2026_s1 + $0x38] sm:$0xff]  ;;  %v57_v7 = vld [vmem:[%s2026_s1 + $0x50] sm:$0xff]  ;;  %1278 = vmatprep.mubr.msk.bf16.mxu1 %vm1389_vm0, %v1388_v52  ;;  %v1579_v54 = vshrl.u32 %v122_v53, 7 }
   0x3   :  { %v96_v8 = vpack.c.bf16 %v50_v5, %v47_v2  ;;  %v100_v9 = vpack.c.bf16 %v57_v7, %v54_v6  ;;  %v53_v10 = vld [vmem:[%s2026_s1 + $0x30] sm:$0xff]  ;;  %v56_v11 = vld [vmem:[%s2026_s1 + $0x48] sm:$0xff]  ;;  %v63_v13 = vld [vmem:[%s2026_s1 + $0x80] sm:$0xff] }
   0x4   :  { %v60_v12 = vld [vmem:[%s2026_s1 + $0x68] sm:$0xff]  ;;  %137 = vmatprep.subr.bf16.mxu0 %v97_v4  ;;  %v99_v14 = vpack.c.bf16 %v56_v11, %v53_v10  ;;  %v59_v16 = vld [vmem:[%s2026_s1 + $0x60] sm:$0xff]  ;;  %v62_v17 = vld [vmem:[%s2026_s1 + $0x78] sm:$0xff]  ;;  %v128_v55 = vsub.s32 1, %v1579_v54  ;;  %v124_v57 = vsub.s32 0, %v1579_v54 }
   0x5   :  { %138 = vmatpush1.bf16.msra.mxu0 %v96_v8  ;;  %v103_v15 = vpack.c.bf16 %v63_v13, %v60_v12  ;;  %v66_v18 = vld [vmem:[%s2026_s1 + $0x98] sm:$0xff]  ;;  %v69_v19 = vld [vmem:[%s2026_s1 + $0xb0] sm:$0xff]  ;;  %v102_v20 = vpack.c.bf16 %v62_v17, %v59_v16  ;;  %v68_v23 = vld [vmem:[%s2026_s1 + $0xa8] sm:$0xff] }
   0x6   :  { %139 = vmatprep.subr.bf16.mxu0 %v100_v9  ;;  %v106_v21 = vpack.c.bf16 %v69_v19, %v66_v18  ;;  %v65_v22 = vld [vmem:[%s2026_s1 + $0x90] sm:$0xff]  ;;  %v72_v24 = vld [vmem:[%s2026_s1 + $0xc8] sm:$0xff]  ;;  %v75_v25 = vld [vmem:[%s2026_s1 + $0xe0] sm:$0xff] }
   0x7   :  { %v105_v26 = vpack.c.bf16 %v68_v23, %v65_v22  ;;  %v109_v27 = vpack.c.bf16 %v75_v25, %v72_v24  ;;  %v71_v28 = vld [vmem:[%s2026_s1 + $0xc0] sm:$0xff]  ;;  %v74_v29 = vld [vmem:[%s2026_s1 + $0xd8] sm:$0xff]  ;;  %v81_v31 = vld [vmem:[%s2026_s1 + $0x110] sm:$0xff] }
   0x8   :  { %v78_v30 = vld [vmem:[%s2026_s1 + $0xf8] sm:$0xff]  ;;  %v108_v32 = vpack.c.bf16 %v74_v29, %v71_v28  ;;  %v77_v34 = vld [vmem:[%s2026_s1 + $0xf0] sm:$0xff]  ;;  %v80_v35 = vld [vmem:[%s2026_s1 + $0x108] sm:$0xff] }
   0x9   :  { %140 = vmatpush1.bf16.msra.mxu0 %v99_v14  ;;  %v112_v33 = vpack.c.bf16 %v81_v31, %v78_v30  ;;  %v84_v36 = vld [vmem:[%s2026_s1 + $0x128] sm:$0xff]  ;;  %v87_v37 = vld [vmem:[%s2026_s1 + $0x140] sm:$0xff]  ;;  %v111_v38 = vpack.c.bf16 %v80_v35, %v77_v34  ;;  %v86_v41 = vld [vmem:[%s2026_s1 + $0x138] sm:$0xff] }
   0xa   :  { %141 = vmatprep.subr.bf16.mxu0 %v103_v15  ;;  %v115_v39 = vpack.c.bf16 %v87_v37, %v84_v36  ;;  %v83_v40 = vld [vmem:[%s2026_s1 + $0x120] sm:$0xff]  ;;  %v90_v42 = vld [vmem:[%s2026_s1 + $0x158] sm:$0xff]  ;;  %v93_v43 = vld [vmem:[%s2026_s1 + $0x170] sm:$0xff] }
   0xb   :  { %v114_v44 = vpack.c.bf16 %v86_v41, %v83_v40  ;;  %v118_v45 = vpack.c.bf16 %v93_v43, %v90_v42  ;;  %v89_v46 = vld [vmem:[%s2026_s1 + $0x150] sm:$0xff]  ;;  %v92_v47 = vld [vmem:[%s2026_s1 + $0x168] sm:$0xff]  ;;  %v1561_v49 = vld [vmem:[%s2027_s0] sm:$0xff] }
   0xc   :  { %v117_v48 = vpack.c.bf16 %v92_v47, %v89_v46  ;;  %v1566_v50 = vld [vmem:[%s2027_s0 + $0x8] sm:$0xff]  ;;  %v1585_v56 = vld [vmem:[%s2028_s2] sm:$0x7]  ;;  %s1390_s2 = smov 64   ;;  %v49_v5 = vld [vmem:[%s2026_s1 + $0x10] sm:$0xff] }
   0xd   :  { %142 = vmatpush1.bf16.msra.mxu0 %v102_v20  ;;  %v1570_v51 = vpack.c.bf16 %v1566_v50, %v1561_v49  ;;  %v129_v58 = vrot.slane %v1585_v56, %v128_v55  ;;  %v125_v60 = vrot.slane %v1585_v56, %v124_v57  ;;  %v52_v6 = vld [vmem:[%s2026_s1 + $0x28] sm:$0xff]  ;;  %v55_v7 = vld [vmem:[%s2026_s1 + $0x40] sm:$0xff]  ;;  %v58_v9 = vld [vmem:[%s2026_s1 + $0x58] sm:$0xff] }
   0xe   :  { %143 = vmatprep.subr.bf16.mxu0 %v106_v21  ;;  %v98_v8 = vpack.c.bf16 %v52_v6, %v49_v5  ;;  %v101_v10 = vpack.c.bf16 %v58_v9, %v55_v7  ;;  %v61_v11 = vld [vmem:[%s2026_s1 + $0x70] sm:$0xff]  ;;  %v64_v12 = vld [vmem:[%s2026_s1 + $0x88] sm:$0xff]  ;;  %v67_v14 = vld [vmem:[%s2026_s1 + $0xa0] sm:$0xff] }
   0xf   :  { %v104_v13 = vpack.c.bf16 %v64_v12, %v61_v11  ;;  %v70_v15 = vld [vmem:[%s2026_s1 + $0xb8] sm:$0xff]  ;;  %v73_v17 = vld [vmem:[%s2026_s1 + $0xd0] sm:$0xff]  ;;  %v76_v18 = vld [vmem:[%s2026_s1 + $0xe8] sm:$0xff] }
  0x10   :  { %1263 = vmatpush3.bf16.msra.mxu1 %v98_v8  ;;  %v107_v16 = vpack.c.bf16 %v70_v15, %v67_v14  ;;  %v110_v19 = vpack.c.bf16 %v76_v18, %v73_v17  ;;  %v79_v20 = vld [vmem:[%s2026_s1 + $0x100] sm:$0xff]  ;;  %v82_v21 = vld [vmem:[%s2026_s1 + $0x118] sm:$0xff]  ;;  %v85_v23 = vld [vmem:[%s2026_s1 + $0x130] sm:$0xff] }
  0x11   :  { %144 = vmatpush1.bf16.msra.mxu0 %v105_v26  ;;  %1264 = vmatprep.subr.bf16.mxu1 %v1388_v52  ;;  %v113_v22 = vpack.c.bf16 %v82_v21, %v79_v20  ;;  %v88_v24 = vld [vmem:[%s2026_s1 + $0x148] sm:$0xff]  ;;  %v91_v26 = vld [vmem:[%s2026_s1 + $0x160] sm:$0xff] }
  0x12   :  { %145 = vmatprep.subr.bf16.mxu0 %v109_v27  ;;  %v116_v25 = vpack.c.bf16 %v88_v24, %v85_v23  ;;  %v94_v27 = vld [vmem:[%s2026_s1 + $0x178] sm:$0xff] }
  0x13   :  { %v119_v28 = vpack.c.bf16 %v94_v27, %v91_v26 }
  0x14   :  { %1265 = vmatpush3.bf16.msra.mxu1 %v101_v10 }
  0x15   :  { %146 = vmatpush1.bf16.msra.mxu0 %v108_v32  ;;  %1266 = vmatprep.subr.bf16.mxu1 %v1388_v52 }
  0x16   :  { %147 = vmatprep.subr.bf16.mxu0 %v112_v33 }
  0x18   :  { %1267 = vmatpush3.bf16.msra.mxu1 %v104_v13 }
  0x19   :  { %148 = vmatpush1.bf16.msra.mxu0 %v111_v38  ;;  %1268 = vmatprep.subr.bf16.mxu1 %v1388_v52  ;;  %v132_v38 = vsub.s32 2, %v1579_v54 }
  0x1a   :  { %149 = vmatprep.subr.bf16.mxu0 %v115_v39 }
  0x1b   :  { %v133_v39 = vrot.slane %v1585_v56, %v132_v38 }
  0x1c   :  { %1269 = vmatpush3.bf16.msra.mxu1 %v107_v16 }
  0x1d   :  { %150 = vmatpush1.bf16.msra.mxu0 %v114_v44  ;;  %1270 = vmatprep.subr.bf16.mxu1 %v1388_v52 }
  0x1e   :  { %151 = vmatprep.subr.bf16.mxu0 %v118_v45 }
  0x20   :  { %1271 = vmatpush3.bf16.msra.mxu1 %v110_v19 }
  0x21   :  { %152 = vmatpush1.bf16.msra.mxu0 %v117_v48  ;;  %1272 = vmatprep.subr.bf16.mxu1 %v1388_v52 }
  0x22   :  { %1282 = vmatprep.subr.mxu0 %v1388_v52 }
  0x24   :  { %170 = vmatmul.mubr.bf16.vlgmr.msra.gmra.mrb[0].mxu0 %v1570_v51  ;;  %1273 = vmatpush3.bf16.msra.mxu1 %v113_v22 }
  0x25   :  { %1284 = vmatprep.mubr.msk.f32.mxu0 %vm1389_vm0, %v1388_v52  ;;  %1274 = vmatprep.subr.bf16.mxu1 %v1388_v52 }
  0x28   :  { %1275 = vmatpush3.bf16.msra.mxu1 %v116_v25 }
  0x29   :  { %1276 = vmatprep.subr.bf16.mxu1 %v1388_v52 }
  0x2c   :  { %1277 = vmatpush3.bf16.msra.mxu1 %v119_v28 }
  0x2d   :  { %1309 = vmatprep.subr.bf16.mxu1 %v1388_v52 }
  0x2f   :  { %1279 = vmatmul.mubr.bf16.vlgmr.msra.gmra.mrb[0].mxu1 %v1570_v51 }
  0x30   :  { %1311 = vmatprep.mubr.msk.bf16.mxu1 %vm1389_vm0, %v1388_v52 }
  0xf7   :  { %v171_v59 = vpop.f32.mrb[0].mxu0 }
  0xf8   :  { %v173_v61 = vpop.f32.mrb[1].mxu0  ;;  %v172_v4 = vadd.f32 %v171_v59, %v125_v60 }
  0xf9   :  { %v174_v62 = vadd.f32 %v173_v61, %v129_v58  ;;  %v175_v63 = vpop.f32.mrb[2].mxu0 }
  0xfa   :  { %v1594_v0 = vadd.f32 %v175_v63, %v125_v60  ;;  %v177_v1 = vpop.f32.mrb[3].mxu0 }
  0xfb   :  { %v1596_v2 = vadd.f32 %v177_v1, %v129_v58  ;;  %362 = vrot.lane.b32.xlu1 %v174_v62, %s1390_s2  ;;  %1283 = vmatpush3.xpose.msk.msra.mxu0 %vm221_vm1, %v174_v62 }
  0xfc   :  { %1287 = vmatprep.subr.bf16.mxu0 %v1388_v52 }
  0xfe   :  { %1285 = vmatmul.mubr.msk.f32.vlgmr.msra.gmra.mrb[4].mxu0 %vm221_vm1, %v172_v4 }
  0xff   :  { %360 = vrot.lane.b32.xlu1 %v172_v4, %s1390_s2  ;;  %1289 = vmatprep.mubr.msk.bf16.mxu0 %vm1389_vm0, %v1388_v52 }
 0x102   :  { %v214_v40 = vpop.f32.mrb[0].mxu1 }
 0x103   :  { %v215_v41 = vadd.f32 %v214_v40, %v133_v39  ;;  %v1280_v42 = vpop.f32.mrb[1].mxu1 }
 0x104   :  { %v217_v44 = vpop.f32.mrb[2].mxu1 }
 0x105   :  { %v312_v43 = vpack.c.bf16 %v215_v41, %v215_v41  ;;  %v1281_v46 = vpop.f32.mrb[3].mxu1  ;;  %v218_v47 = vadd.f32 %v217_v44, %v133_v39 }
 0x107   :  { %v318_v45 = vsel %vm316_vm3, %v312_v43, 0  ;;  %v1670_v48 = vpack.c.bf16 %v218_v47, %v218_v47 }
 0x108   :  { %1288 = vmatpush3.bf16.msra.mxu0 %v318_v45 }
 0x109   :  { %1293 = vmatprep.subr.mxu0 %v1388_v52  ;;  %v599_v51 = vsel %vm316_vm3, %v1670_v48, 0 }
 0x10a   :  { %1310 = vmatpush3.bf16.msra.mxu1 %v599_v51 }
 0x10b   :  { %1326 = vmatprep.subr.bf16.mxu1 %v1388_v52 }
 0x16d   :  { %v363_v60 = vpop.permute.xlu1 %362 }
 0x171   :  { %v361_v61 = vpop.permute.xlu1 %360 }
 0x1d1   :  { %v294_v29 = vpop.f32.mrb[4].mxu0 }
 0x1d2   :  { %v298_v30 = vmul.f32 0.125, %v294_v29  ;;  %v1286_v31 = vpop.f32.mrb[5].mxu0 }
 0x1d4   :  { %v300_v32 = vsel %vm299_vm2, %v298_v30, -inf }
 0x1d5   :  { %301 = vmax.xlane.f32.xlu0 %v300_v32 }
 0x262   :  { %v302_v33 = vpop.xlane.xlu0 %301 }
 0x263   :  { %v303_v34 = vsub.f32 %v298_v30, %v302_v33 }
 0x265   :  { %v304_v35 = vmul.f32 1.442695, %v303_v34 }
 0x267   :  { %1355 = vpow2.f32 %v304_v35 }
 0x271   :  { %v1356_v36 = vpop.eup %1355 }
 0x272   :  { %v306_v37 = vsel %vm299_vm2, %v1356_v36, 0.0 }
 0x273   :  { %307 = vadd.xlane.f32.xlu0 %v306_v37 }
 0x300   :  { %v308_v53 = vpop.xlane.xlu0 %307 }
 0x301   :  { %1357 = vrcp.f32 %v308_v53 }
 0x30b   :  { %v1358_v56 = vpop.eup %1357 }
 0x30c   :  { %v310_v58 = vmul.f32 %v1358_v56, %v1356_v36 }
 0x30e   :  { %v311_v59 = vpack.c.bf16 %v310_v58, %v310_v58  ;;  %v786_v58 = vld [vmem:[%s2029_s3] sm:$0xff] }
 0x310   :  { %1290 = vmatmul.mubr.msk.bf16.vlgmr.msra.gmra.mrb[8].mxu0 %vm299_vm2, %v311_v59  ;;  %v787_v59 = vld [vmem:[%s2029_s3 + $0x8] sm:$0xff] }
 0x311   :  { %1294 = vmatpush3.xpose.msk.msra.mxu0 %vm221_vm1, %v363_v60  ;;  %1295 = vmatprep.mubr.msk.f32.mxu0 %vm1389_vm0, %v1388_v52  ;;  %v803_v60 = vpack.c.bf16 %v787_v59, %v786_v58 }
 0x312   :  { %1298 = vmatprep.subr.bf16.mxu0 %v1388_v52 }
 0x318   :  { %1296 = vmatmul.mubr.msk.f32.vlgmr.msra.gmra.mrb[6].mxu0 %vm221_vm1, %v361_v61  ;;  %v789_v61 = vld [vmem:[%s2029_s3 + $0x18] sm:$0xff] }
 0x319   :  { %1300 = vmatprep.mubr.msk.bf16.mxu0 %vm1389_vm0, %v1388_v52 }
 0x3e3   :  { %v1683_v62 = vpop.f32.mrb[8].mxu0 }
 0x3e4   :  { %v1291_v63 = vpop.f32.mrb[9].mxu0 }
 0x3e5   :  { %v357_v1 = vpop.f32.mrb[10].mxu0 }
 0x3e6   :  { %v1292_v4 = vpop.f32.mrb[11].mxu0  ;;  %v790_v1 = vld [vmem:[%s2029_s3 + $0x20] sm:$0xff] }
 0x3e7   :  { %v791_v4 = vld [vmem:[%s2029_s3 + $0x28] sm:$0xff] }
 0x3eb   :  { %v434_v5 = vpop.f32.mrb[6].mxu0 }
 0x3ec   :  { %v438_v6 = vmul.f32 0.125, %v434_v5  ;;  %v1297_v7 = vpop.f32.mrb[7].mxu0  ;;  %v805_v5 = vpack.c.bf16 %v791_v4, %v790_v1  ;;  %v911_v4 = vld [vmem:[%s2031_s7 + $0x48] sm:$0xff] }
 0x3ed   :  { %v793_v7 = vld [vmem:[%s2029_s3 + $0x38] sm:$0xff] }
 0x3ee   :  { %v439_v8 = vsel %vm299_vm2, %v438_v6, -inf }
 0x3ef   :  { %440 = vmax.xlane.f32.xlu0 %v439_v8 }
 0x405   :  { %452 = vrot.lane.b32.xlu0 %v312_v43, %s1390_s2 }
 0x409   :  { %643 = vrot.lane.b32.xlu0 %v1596_v2, %s1390_s2 }
 0x40d   :  { %641 = vrot.lane.b32.xlu0 %v1594_v0, %s1390_s2 }
 0x47c   :  { %v441_v9 = vpop.xlane.xlu0 %440 }
 0x47d   :  { %v442_v10 = vsub.f32 %v438_v6, %v441_v9  ;;  %v792_v6 = vld [vmem:[%s2029_s3 + $0x30] sm:$0xff]  ;;  %v794_v9 = vld [vmem:[%s2029_s3 + $0x40] sm:$0xff] }
 0x47e   :  { %v806_v8 = vpack.c.bf16 %v793_v7, %v792_v6  ;;  %v910_v7 = vld [vmem:[%s2031_s7 + $0x40] sm:$0xff] }
 0x47f   :  { %v443_v11 = vmul.f32 1.442695, %v442_v10  ;;  %v795_v10 = vld [vmem:[%s2029_s3 + $0x48] sm:$0xff] }
 0x480   :  { %v453_v12 = vpop.permute.xlu0 %452 }
 0x481   :  { %1359 = vpow2.f32 %v443_v11  ;;  %v458_v13 = vsel %vm316_vm3, %v453_v12, 0  ;;  %v807_v11 = vpack.c.bf16 %v795_v10, %v794_v9  ;;  %v796_v12 = vld [vmem:[%s2029_s3 + $0x50] sm:$0xff]  ;;  %v915_v10 = vld [vmem:[%s2031_s7 + $0x68] sm:$0xff] }
 0x482   :  { %1299 = vmatpush3.bf16.msra.mxu0 %v458_v13  ;;  %v797_v13 = vld [vmem:[%s2029_s3 + $0x58] sm:$0xff] }
 0x483   :  { %1304 = vmatprep.subr.mxu0 %v1388_v52 }
 0x484   :  { %v644_v20 = vpop.permute.xlu0 %643 }
 0x488   :  { %v642_v21 = vpop.permute.xlu0 %641 }
 0x48b   :  { %v1360_v14 = vpop.eup %1359 }
 0x48c   :  { %v445_v15 = vsel %vm299_vm2, %v1360_v14, 0.0 }
 0x48d   :  { %446 = vadd.xlane.f32.xlu1 %v445_v15  ;;  %v798_v15 = vld [vmem:[%s2029_s3 + $0x60] sm:$0xff] }
 0x51a   :  { %v447_v16 = vpop.xlane.xlu1 %446 }
 0x51b   :  { %1361 = vrcp.f32 %v447_v16  ;;  %v799_v16 = vld [vmem:[%s2029_s3 + $0x68] sm:$0xff] }
 0x525   :  { %v1362_v17 = vpop.eup %1361 }
 0x526   :  { %v449_v18 = vmul.f32 %v1362_v17, %v1360_v14  ;;  %v808_v14 = vpack.c.bf16 %v797_v13, %v796_v12  ;;  %v809_v17 = vpack.c.bf16 %v799_v16, %v798_v15  ;;  %v914_v13 = vld [vmem:[%s2031_s7 + $0x60] sm:$0xff]  ;;  %v919_v16 = vld [vmem:[%s2031_s7 + $0x88] sm:$0xff] }
 0x528   :  { %v450_v19 = vpack.c.bf16 %v449_v18, %v449_v18  ;;  %v800_v18 = vld [vmem:[%s2029_s3 + $0x70] sm:$0xff] }
 0x52a   :  { %1301 = vmatmul.mubr.msk.bf16.vlgmr.msra.gmra.mrb[12].mxu0 %vm299_vm2, %v450_v19  ;;  %v801_v19 = vld [vmem:[%s2029_s3 + $0x78] sm:$0xff] }
 0x52b   :  { %1305 = vmatpush3.xpose.msk.msra.mxu0 %vm221_vm1, %v1596_v2  ;;  %1306 = vmatprep.mubr.msk.f32.mxu0 %vm1389_vm0, %v1388_v52 }
 0x52c   :  { %1315 = vmatprep.subr.mxu0 %v1388_v52 }
 0x532   :  { %1307 = vmatmul.mubr.msk.f32.vlgmr.msra.gmra.mrb[16].mxu0 %vm221_vm1, %v1594_v0 }
 0x533   :  { %1316 = vmatpush3.xpose.msk.msra.mxu0 %vm221_vm1, %v644_v20  ;;  %1317 = vmatprep.mubr.msk.f32.mxu0 %vm1389_vm0, %v1388_v52  ;;  %v810_v20 = vpack.c.bf16 %v801_v19, %v800_v18  ;;  %v918_v19 = vld [vmem:[%s2031_s7 + $0x80] sm:$0xff] }
 0x534   :  { %1320 = vmatprep.subr.bf16.mxu0 %v1388_v52 }
 0x536   :  { %1318 = vmatmul.mubr.msk.f32.vlgmr.msra.gmra.mrb[18].mxu0 %vm221_vm1, %v642_v21 }
 0x537   :  { %1322 = vmatprep.mubr.msk.bf16.mxu0 %vm1389_vm0, %v1388_v52 }
 0x5fd   :  { %v1709_v2 = vpop.f32.mrb[12].mxu0 }
 0x5fe   :  { %v1302_v22 = vpop.f32.mrb[13].mxu0 }
 0x5ff   :  { %v497_v23 = vpop.f32.mrb[14].mxu0 }
 0x600   :  { %v1303_v24 = vpop.f32.mrb[15].mxu0 }
 0x605   :  { %v577_v25 = vpop.f32.mrb[16].mxu0 }
 0x606   :  { %v581_v0 = vmul.f32 0.125, %v577_v25  ;;  %v1308_v26 = vpop.f32.mrb[17].mxu0 }
 0x608   :  { %v582_v27 = vsel %vm299_vm2, %v581_v0, -inf }
 0x609   :  { %583 = vmax.xlane.f32.xlu1 %v582_v27  ;;  %v715_v28 = vpop.f32.mrb[18].mxu0 }
 0x60a   :  { %v719_v29 = vmul.f32 0.125, %v715_v28  ;;  %v1319_v30 = vpop.f32.mrb[19].mxu0 }
 0x60c   :  { %v720_v31 = vsel %vm299_vm2, %v719_v29, -inf }
 0x60d   :  { %721 = vmax.xlane.f32.xlu0 %v720_v31 }
 0x696   :  { %v584_v37 = vpop.xlane.xlu1 %583 }
 0x697   :  { %v585_v38 = vsub.f32 %v581_v0, %v584_v37 }
 0x699   :  { %v586_v39 = vmul.f32 1.442695, %v585_v38 }
 0x69a   :  { %v722_v32 = vpop.xlane.xlu0 %721 }
 0x69b   :  { %v723_v33 = vsub.f32 %v719_v29, %v722_v32 }
 0x69d   :  { %v724_v34 = vmul.f32 1.442695, %v723_v33 }
 0x69f   :  { %1363 = vpow2.f32 %v724_v34 }
 0x6a0   :  { %1365 = vpow2.f32 %v586_v39 }
 0x6a9   :  { %v1364_v35 = vpop.eup %1363 }
 0x6aa   :  { %v726_v36 = vsel %vm299_vm2, %v1364_v35, 0.0  ;;  %v1366_v40 = vpop.eup %1365 }
 0x6ab   :  { %727 = vadd.xlane.f32.xlu1 %v726_v36  ;;  %v588_v41 = vsel %vm299_vm2, %v1366_v40, 0.0 }
 0x6bc   :  { %733 = vrot.lane.b32.xlu1 %v1670_v48, %s1390_s2 }
 0x6e0   :  { %589 = vadd.xlane.f32.xlu1 %v588_v41 }
 0x738   :  { %v728_v42 = vpop.xlane.xlu1 %727 }
 0x739   :  { %1367 = vrcp.f32 %v728_v42  ;;  %v905_v42 = vld [vmem:[%s2031_s7 + $0x18] sm:$0xff] }
 0x73c   :  { %v734_v43 = vpop.permute.xlu1 %733 }
 0x73d   :  { %v739_v44 = vsel %vm316_vm3, %v734_v43, 0  ;;  %v902_v43 = vld [vmem:[%s2031_s7] sm:$0xff] }
 0x73e   :  { %1321 = vmatpush3.bf16.msra.mxu0 %v739_v44 }
 0x743   :  { %v1368_v45 = vpop.eup %1367 }
 0x744   :  { %v730_v46 = vmul.f32 %v1368_v45, %v1364_v35  ;;  %v909_v45 = vld [vmem:[%s2031_s7 + $0x38] sm:$0xff] }
 0x746   :  { %v731_v47 = vpack.c.bf16 %v730_v46, %v730_v46 }
 0x748   :  { %1323 = vmatmul.mubr.msk.bf16.vlgmr.msra.gmra.mrb[20].mxu0 %vm299_vm2, %v731_v47 }
 0x749   :  { %995 = vmatprep.mubr.bf16.mxu0 %v1387_v3  ;;  %v788_v3 = vld [vmem:[%s2029_s3 + $0x10] sm:$0xff] }
 0x74a   :  { %v804_v63 = vpack.c.bf16 %v789_v61, %v788_v3  ;;  %v906_v61 = vld [vmem:[%s2031_s7 + $0x20] sm:$0xff] }
 0x76d   :  { %v590_v48 = vpop.xlane.xlu1 %589 }
 0x76e   :  { %1369 = vrcp.f32 %v590_v48 }
 0x778   :  { %v1370_v51 = vpop.eup %1369 }
 0x779   :  { %v592_v53 = vmul.f32 %v1370_v51, %v1366_v40 }
 0x77b   :  { %v593_v56 = vpack.c.bf16 %v592_v53, %v592_v53 }
 0x77d   :  { %1312 = vmatmul.mubr.msk.bf16.vlgmr.msra.gmra.mrb[4].mxu1 %vm299_vm2, %v593_v56 }
 0x77e   :  { %1342 = vmatprep.mubr.msk.bf16.mxu1 %vm1389_vm0, %v1388_v52  ;;  %1327 = vmatpush3.bf16.msra.mxu1 %v803_v60 }
 0x77f   :  { %1328 = vmatprep.subr.bf16.mxu1 %v1388_v52 }
 0x782   :  { %1329 = vmatpush3.bf16.msra.mxu1 %v804_v63  ;;  %v908_v63 = vld [vmem:[%s2031_s7 + $0x30] sm:$0xff] }
 0x783   :  { %1330 = vmatprep.subr.bf16.mxu1 %v1388_v52  ;;  %v937_v1 = vpack.c.bf16 %v908_v63, %v906_v61  ;;  %v1060_v63 = vld [vmem:[%s2034_s9 + $0x90] sm:$0xff] }
 0x786   :  { %1331 = vmatpush3.bf16.msra.mxu1 %v805_v5  ;;  %v913_v5 = vld [vmem:[%s2031_s7 + $0x58] sm:$0xff] }
 0x787   :  { %1332 = vmatprep.subr.bf16.mxu1 %v1388_v52  ;;  %v940_v6 = vpack.c.bf16 %v913_v5, %v911_v4  ;;  %v1044_v5 = vld [vmem:[%s2034_s9 + $0x10] sm:$0xff] }
 0x78a   :  { %1333 = vmatpush3.bf16.msra.mxu1 %v806_v8  ;;  %v912_v8 = vld [vmem:[%s2031_s7 + $0x50] sm:$0xff] }
 0x78b   :  { %1334 = vmatprep.subr.bf16.mxu1 %v1388_v52  ;;  %v939_v9 = vpack.c.bf16 %v912_v8, %v910_v7  ;;  %v1062_v8 = vld [vmem:[%s2034_s9 + $0xa0] sm:$0xff] }
 0x78e   :  { %1335 = vmatpush3.bf16.msra.mxu1 %v807_v11  ;;  %v917_v11 = vld [vmem:[%s2031_s7 + $0x78] sm:$0xff] }
 0x78f   :  { %1336 = vmatprep.subr.bf16.mxu1 %v1388_v52  ;;  %v942_v12 = vpack.c.bf16 %v917_v11, %v915_v10  ;;  %v1046_v11 = vld [vmem:[%s2034_s9 + $0x20] sm:$0xff] }
 0x792   :  { %1337 = vmatpush3.bf16.msra.mxu1 %v808_v14  ;;  %v916_v14 = vld [vmem:[%s2031_s7 + $0x70] sm:$0xff] }
 0x793   :  { %1338 = vmatprep.subr.bf16.mxu1 %v1388_v52  ;;  %v941_v15 = vpack.c.bf16 %v916_v14, %v914_v13  ;;  %v1064_v14 = vld [vmem:[%s2034_s9 + $0xb0] sm:$0xff] }
 0x796   :  { %1339 = vmatpush3.bf16.msra.mxu1 %v809_v17  ;;  %v921_v17 = vld [vmem:[%s2031_s7 + $0x98] sm:$0xff] }
 0x797   :  { %1340 = vmatprep.subr.bf16.mxu1 %v1388_v52  ;;  %v944_v18 = vpack.c.bf16 %v921_v17, %v919_v16  ;;  %v1048_v17 = vld [vmem:[%s2034_s9 + $0x30] sm:$0xff] }
 0x79a   :  { %1341 = vmatpush3.bf16.msra.mxu1 %v810_v20  ;;  %v920_v20 = vld [vmem:[%s2031_s7 + $0x90] sm:$0xff] }
 0x81b   :  { %v775_v21 = vpop.f32.mrb[20].mxu0 }
 0x81c   :  { %v1350_v22 = vpack.i.bf16 %v775_v21, %v1709_v2  ;;  %v1324_v23 = vpop.f32.mrb[21].mxu0  ;;  %v1200_v2 = vld [vmem:[%s2030_s4] ss:$0 sm:$0xff]  ;;  %v943_v21 = vpack.c.bf16 %v920_v20, %v918_v19 }
 0x81d   :  { %v778_v24 = vpop.f32.mrb[22].mxu0  ;;  %v925_v23 = vld [vmem:[%s2031_s7 + $0xb8] sm:$0xff]  ;;  %v1066_v20 = vld [vmem:[%s2034_s9 + $0xc0] sm:$0xff] }
 0x81e   :  { %1351 = vrot.lane.b32.xlu0 %v1350_v22, %s1390_s2  ;;  %v1325_v25 = vpop.f32.mrb[23].mxu0  ;;  %v923_v22 = vld [vmem:[%s2031_s7 + $0xa8] sm:$0xff] }
 0x81f   :  { %v946_v24 = vpack.c.bf16 %v925_v23, %v923_v22  ;;  %v922_v25 = vld [vmem:[%s2031_s7 + $0xa0] sm:$0xff] }
 0x820   :  { %v1050_v23 = vld [vmem:[%s2034_s9 + $0x40] sm:$0xff] }
 0x850   :  { %v635_v0 = vpop.f32.mrb[4].mxu1 }
 0x851   :  { %v1313_v52 = vpop.f32.mrb[5].mxu1 }
 0x852   :  { %v638_v26 = vpop.f32.mrb[6].mxu1 }
 0x853   :  { %v1314_v27 = vpop.f32.mrb[7].mxu1  ;;  %v927_v26 = vld [vmem:[%s2031_s7 + $0xc8] sm:$0xff] }
 0x854   :  { %v929_v27 = vld [vmem:[%s2031_s7 + $0xd8] sm:$0xff] }
 0x890   :  { %v1352_v28 = vpop.permute.xlu0 %1351 }
 0x891   :  { %v1354_v29 = vunpack.i.h.bf16 %v1352_v28  ;;  %v1353_v30 = vunpack.i.l.bf16 %v1352_v28  ;;  %v948_v28 = vpack.c.bf16 %v929_v27, %v927_v26  ;;  %v1052_v27 = vld [vmem:[%s2034_s9 + $0x50] sm:$0xff] }
 0x893   :  { %v785_v31 = vsel %vm221_vm1, %v635_v0, %v1354_v29  ;;  %v504_v32 = vsel %vm221_vm1, %v1683_v62, %v1353_v30  ;;  %v903_v62 = vld [vmem:[%s2031_s7 + $0x8] sm:$0xff]  ;;  %v924_v0 = vld [vmem:[%s2031_s7 + $0xb0] sm:$0xff]  ;;  %v926_v29 = vld [vmem:[%s2031_s7 + $0xc0] sm:$0xff] }
 0x894   :  { %v802_v33 = vpack.c.bf16 %v785_v31, %v504_v32  ;;  %v936_v44 = vpack.c.bf16 %v905_v42, %v903_v62  ;;  %v945_v52 = vpack.c.bf16 %v924_v0, %v922_v25  ;;  %v928_v30 = vld [vmem:[%s2031_s7 + $0xd0] sm:$0xff]  ;;  %v931_v32 = vld [vmem:[%s2031_s7 + $0xe8] sm:$0xff] }
 0x895   :  { %v947_v31 = vpack.c.bf16 %v928_v30, %v926_v29  ;;  %v1068_v0 = vld [vmem:[%s2034_s9 + $0xd0] sm:$0xff]  ;;  %v1070_v30 = vld [vmem:[%s2034_s9 + $0xe0] sm:$0xff] }
 0x896   :  { %1343 = vmatmul.mubr.bf16.vlgmr.msra.gmra.mrb[8].mxu1 %v802_v33  ;;  %963 = vmatprep.subr.bf16.mxu0 %v936_v44  ;;  %v933_v33 = vld [vmem:[%s2031_s7 + $0xf8] sm:$0xff]  ;;  %v1201_v44 = vld [vmem:[%s2032_s5] ss:$0 sm:$0xff] }
 0x969   :  { %v852_v34 = vpop.f32.mrb[8].mxu1 }
 0x96a   :  { %v853_v35 = vadd.f32 %v1200_v2, %v852_v34  ;;  %v1344_v36 = vpop.f32.mrb[9].mxu1  ;;  %v950_v34 = vpack.c.bf16 %v933_v33, %v931_v32  ;;  %v1054_v33 = vld [vmem:[%s2034_s9 + $0x60] sm:$0xff] }
 0x96b   :  { %v855_v37 = vpop.f32.mrb[10].mxu1 }
 0x96c   :  { %v856_v38 = vadd.f32 %v1200_v2, %v855_v37  ;;  %v1345_v39 = vpop.f32.mrb[11].mxu1  ;;  %v859_v40 = vadd.f32 %v853_v35, %v1561_v49  ;;  %v904_v49 = vld [vmem:[%s2031_s7 + $0x10] sm:$0xff]  ;;  %v930_v2 = vld [vmem:[%s2031_s7 + $0xe0] sm:$0xff] }
 0x96d   :  { %v935_v46 = vpack.c.bf16 %v904_v49, %v902_v43  ;;  %v932_v35 = vld [vmem:[%s2031_s7 + $0xf0] sm:$0xff] }
 0x96e   :  { %863 = vadd.xlane.f32.xlu0 %v859_v40  ;;  %v860_v41 = vadd.f32 %v856_v38, %v1566_v50  ;;  %v907_v50 = vld [vmem:[%s2031_s7 + $0x28] sm:$0xff]  ;;  %v949_v36 = vpack.c.bf16 %v932_v35, %v930_v2  ;;  %v1072_v35 = vld [vmem:[%s2034_s9 + $0xf0] sm:$0xff] }
 0x96f   :  { %v938_v47 = vpack.c.bf16 %v909_v45, %v907_v50  ;;  %964 = vmatpush1.bf16.msra.mxu0 %v935_v46  ;;  %v1202_v46 = vld [vmem:[%s2033_s6] ss:$0 sm:$0xff]  ;;  %v1055_v2 = vld [vmem:[%s2034_s9 + $0x68] sm:$0xff] }
 0x970   :  { %865 = vadd.xlane.f32.xlu1 %v860_v41 }
 0x971   :  { %965 = vmatprep.subr.bf16.mxu0 %v938_v47 }
 0x973   :  { %966 = vmatpush1.bf16.msra.mxu0 %v937_v1  ;;  %v1061_v1 = vld [vmem:[%s2034_s9 + $0x98] sm:$0xff] }
 0x974   :  { %967 = vmatprep.subr.bf16.mxu0 %v940_v6  ;;  %v1085_v4 = vpack.c.bf16 %v1061_v1, %v1060_v63  ;;  %v1045_v6 = vld [vmem:[%s2034_s9 + $0x18] sm:$0xff] }
 0x975   :  { %v1077_v7 = vpack.c.bf16 %v1045_v6, %v1044_v5 }
 0x977   :  { %968 = vmatpush1.bf16.msra.mxu0 %v939_v9  ;;  %v1063_v9 = vld [vmem:[%s2034_s9 + $0xa8] sm:$0xff] }
 0x978   :  { %969 = vmatprep.subr.bf16.mxu0 %v942_v12  ;;  %v1086_v10 = vpack.c.bf16 %v1063_v9, %v1062_v8  ;;  %v1047_v12 = vld [vmem:[%s2034_s9 + $0x28] sm:$0xff] }
 0x979   :  { %v1078_v13 = vpack.c.bf16 %v1047_v12, %v1046_v11 }
 0x97b   :  { %970 = vmatpush1.bf16.msra.mxu0 %v941_v15  ;;  %v1065_v15 = vld [vmem:[%s2034_s9 + $0xb8] sm:$0xff] }
 0x97c   :  { %971 = vmatprep.subr.bf16.mxu0 %v944_v18  ;;  %v1087_v16 = vpack.c.bf16 %v1065_v15, %v1064_v14  ;;  %v1049_v18 = vld [vmem:[%s2034_s9 + $0x38] sm:$0xff] }
 0x97d   :  { %v1079_v19 = vpack.c.bf16 %v1049_v18, %v1048_v17 }
 0x97f   :  { %972 = vmatpush1.bf16.msra.mxu0 %v943_v21  ;;  %v1067_v21 = vld [vmem:[%s2034_s9 + $0xc8] sm:$0xff] }
 0x980   :  { %973 = vmatprep.subr.bf16.mxu0 %v946_v24  ;;  %v1088_v22 = vpack.c.bf16 %v1067_v21, %v1066_v20  ;;  %v1051_v24 = vld [vmem:[%s2034_s9 + $0x48] sm:$0xff] }
 0x981   :  { %v1080_v25 = vpack.c.bf16 %v1051_v24, %v1050_v23 }
 0x983   :  { %974 = vmatpush1.bf16.msra.mxu0 %v945_v52  ;;  %v1069_v52 = vld [vmem:[%s2034_s9 + $0xd8] sm:$0xff] }
 0x984   :  { %975 = vmatprep.subr.bf16.mxu0 %v948_v28  ;;  %v1089_v26 = vpack.c.bf16 %v1069_v52, %v1068_v0  ;;  %v1053_v28 = vld [vmem:[%s2034_s9 + $0x58] sm:$0xff] }
 0x985   :  { %v1081_v29 = vpack.c.bf16 %v1053_v28, %v1052_v27 }
 0x987   :  { %976 = vmatpush1.bf16.msra.mxu0 %v947_v31  ;;  %v1071_v31 = vld [vmem:[%s2034_s9 + $0xe8] sm:$0xff] }
 0x988   :  { %977 = vmatprep.subr.bf16.mxu0 %v950_v34  ;;  %v1090_v32 = vpack.c.bf16 %v1071_v31, %v1070_v30  ;;  %v1082_v34 = vpack.c.bf16 %v1055_v2, %v1054_v33  ;;  %v1203_v30 = vld [vmem:[%s2036_s10] ss:$0 sm:$0xff] }
 0x98b   :  { %978 = vmatpush1.bf16.msra.mxu0 %v949_v36  ;;  %v1073_v36 = vld [vmem:[%s2034_s9 + $0xf8] sm:$0xff] }
 0x9fb   :  { %v864_v48 = vpop.xlane.xlu0 %863 }
 0x9fc   :  { %v868_v51 = vmul.f32 0.0078125, %v864_v48 }
 0x9fd   :  { %v866_v53 = vpop.xlane.xlu1 %865 }
 0x9fe   :  { %v1806_v56 = vsub.f32 %v859_v40, %v868_v51  ;;  %v869_v58 = vmul.f32 0.0078125, %v866_v53 }
 0xa00   :  { %v1808_v59 = vsub.f32 %v860_v41, %v869_v58  ;;  %v872_v3 = vmul.f32 %v1806_v56, %v1806_v56  ;;  %v1059_v58 = vld [vmem:[%s2034_s9 + $0x88] sm:$0xff] }
 0xa02   :  { %874 = vadd.xlane.f32.xlu1 %v872_v3  ;;  %v873_v60 = vmul.f32 %v1808_v59, %v1808_v59  ;;  %v1042_v3 = vld [vmem:[%s2034_s9] sm:$0xff] }
 0xa06   :  { %876 = vadd.xlane.f32.xlu1 %v873_v60  ;;  %v1043_v60 = vld [vmem:[%s2034_s9 + $0x8] sm:$0xff] }
 0xa07   :  { %v1076_v61 = vpack.c.bf16 %v1043_v60, %v1042_v3 }
 0xa8f   :  { %v875_v37 = vpop.xlane.xlu1 %874 }
 0xa90   :  { %v878_v38 = vmul.f32 0.0078125, %v875_v37  ;;  %v1056_v37 = vld [vmem:[%s2034_s9 + $0x70] sm:$0xff] }
 0xa92   :  { %v880_v39 = vadd.f32 1e-12, %v878_v38  ;;  %v1091_v38 = vpack.c.bf16 %v1073_v36, %v1072_v35 }
 0xa93   :  { %v877_v40 = vpop.xlane.xlu1 %876 }
 0xa94   :  { %1371 = vrsqrt.f32 %v880_v39  ;;  %v879_v41 = vmul.f32 0.0078125, %v877_v40  ;;  %v1057_v39 = vld [vmem:[%s2034_s9 + $0x78] sm:$0xff] }
 0xa95   :  { %v1083_v40 = vpack.c.bf16 %v1057_v39, %v1056_v37 }
 0xa96   :  { %v881_v62 = vadd.f32 1e-12, %v879_v41  ;;  %v951_v41 = vld [vmem:[%s2035_s8] sm:$0x3] }
 0xa98   :  { %1373 = vrsqrt.f32 %v881_v62  ;;  %v956_v62 = vrot.slane %v951_v41, %v124_v57 }
 0xa9e   :  { %v1372_v42 = vpop.eup %1371 }
 0xa9f   :  { %v884_v43 = vmul.f32 %v1372_v42, %v1806_v56  ;;  %v1058_v56 = vld [vmem:[%s2034_s9 + $0x80] sm:$0xff]  ;;  %v960_v42 = vrot.slane %v951_v41, %v128_v55 }
 0xaa1   :  { %v892_v45 = vmul.f32 %v1201_v44, %v884_v43 }
 0xaa2   :  { %v1374_v49 = vpop.eup %1373 }
 0xaa3   :  { %v885_v50 = vmul.f32 %v1374_v49, %v1808_v59  ;;  %v1900_v48 = vadd.f32 %v1202_v46, %v892_v45  ;;  %v1084_v59 = vpack.c.bf16 %v1059_v58, %v1058_v56 }
 0xaa5   :  { %v893_v47 = vmul.f32 %v1201_v44, %v885_v50  ;;  %1240 = vmatprep.subr.bf16.mxu1 %v1084_v59 }
 0xaa6   :  { %1241 = vmatpush3.bf16.msra.mxu1 %v1076_v61 }
 0xaa7   :  { %v1902_v51 = vadd.f32 %v1202_v46, %v893_v47  ;;  %1242 = vmatprep.subr.bf16.mxu1 %v1085_v4 }
 0xaa9   :  { %v934_v53 = vpack.c.bf16 %v1902_v51, %v1900_v48 }
 0xaaa   :  { %1243 = vmatpush3.bf16.msra.mxu1 %v1077_v7 }
 0xaab   :  { %996 = vmatmul.mubr.bf16.vlgmr.msra.gmra.mrb[24].mxu0 %v934_v53  ;;  %1244 = vmatprep.subr.bf16.mxu1 %v1086_v10 }
 0xaae   :  { %1245 = vmatpush3.bf16.msra.mxu1 %v1078_v13 }
 0xaaf   :  { %1246 = vmatprep.subr.bf16.mxu1 %v1087_v16 }
 0xab2   :  { %1247 = vmatpush3.bf16.msra.mxu1 %v1079_v19 }
 0xab3   :  { %1248 = vmatprep.subr.bf16.mxu1 %v1088_v22 }
 0xab6   :  { %1249 = vmatpush3.bf16.msra.mxu1 %v1080_v25 }
 0xab7   :  { %1250 = vmatprep.subr.bf16.mxu1 %v1089_v26 }
 0xaba   :  { %1251 = vmatpush3.bf16.msra.mxu1 %v1081_v29 }
 0xabb   :  { %1252 = vmatprep.subr.bf16.mxu1 %v1090_v32 }
 0xabe   :  { %1253 = vmatpush3.bf16.msra.mxu1 %v1082_v34 }
 0xabf   :  { %1254 = vmatprep.subr.bf16.mxu1 %v1091_v38 }
 0xac2   :  { %1255 = vmatpush3.bf16.msra.mxu1 %v1083_v40 }
 0xb7e   :  { %v997_v43 = vpop.f32.mrb[24].mxu0 }
 0xb7f   :  { %v998_v44 = vadd.f32 %v997_v43, %v956_v62  ;;  %v999_v49 = vpop.f32.mrb[25].mxu0 }
 0xb80   :  { %v1000_v50 = vadd.f32 %v999_v49, %v960_v42  ;;  %v1001_v45 = vpop.f32.mrb[26].mxu0 }
 0xb81   :  { %v1006_v46 = vmul.f32 %v998_v44, %v998_v44  ;;  %v1002_v47 = vadd.f32 %v1001_v45, %v956_v62  ;;  %v1003_v53 = vpop.f32.mrb[27].mxu0 }
 0xb82   :  { %v1007_v56 = vmul.f32 %v1000_v50, %v1000_v50  ;;  %v1004_v58 = vadd.f32 %v1003_v53, %v960_v42 }
 0xb83   :  { %v1010_v59 = vmul.f32 %v1006_v46, %v998_v44  ;;  %v1008_v3 = vmul.f32 %v1002_v47, %v1002_v47 }
 0xb84   :  { %v1011_v60 = vmul.f32 %v1007_v56, %v1000_v50  ;;  %v1009_v61 = vmul.f32 %v1004_v58, %v1004_v58  ;;  %v1204_v56 = vld [vmem:[%s2037_s11] ss:$0 sm:$0xff] }
 0xb85   :  { %v1014_v63 = vmul.f32 0.044715, %v1010_v59  ;;  %v1012_v1 = vmul.f32 %v1008_v3, %v1002_v47  ;;  %v1205_v59 = vld [vmem:[%s2038_s12] ss:$0 sm:$0xff] }
 0xb86   :  { %v1015_v57 = vmul.f32 0.044715, %v1011_v60  ;;  %v1013_v4 = vmul.f32 %v1009_v61, %v1004_v58 }
 0xb87   :  { %v1018_v54 = vadd.f32 %v1014_v63, %v998_v44  ;;  %v1016_v55 = vmul.f32 0.044715, %v1012_v1 }
 0xb88   :  { %v1019_v5 = vadd.f32 %v1015_v57, %v1000_v50  ;;  %v1017_v6 = vmul.f32 0.044715, %v1013_v4 }
 0xb89   :  { %v1022_v7 = vmul.f32 0.7978846, %v1018_v54  ;;  %v1020_v8 = vadd.f32 %v1016_v55, %v1002_v47 }
 0xb8a   :  { %v1023_v9 = vmul.f32 0.7978846, %v1019_v5  ;;  %v1021_v10 = vadd.f32 %v1017_v6, %v1004_v58 }
 0xb8b   :  { %1375 = vtanh.f32 %v1022_v7  ;;  %v1024_v11 = vmul.f32 0.7978846, %v1020_v8 }
 0xb8c   :  { %1377 = vtanh.f32 %v1023_v9  ;;  %v1025_v12 = vmul.f32 0.7978846, %v1021_v10 }
 0xb8d   :  { %1379 = vtanh.f32 %v1024_v11 }
 0xb8e   :  { %1381 = vtanh.f32 %v1025_v12 }
 0xb95   :  { %v1376_v13 = vpop.eup %1375 }
 0xb96   :  { %v1378_v14 = vpop.eup %1377  ;;  %v1030_v15 = vadd.f32 1.0, %v1376_v13 }
 0xb97   :  { %v1380_v16 = vpop.eup %1379  ;;  %v1031_v17 = vadd.f32 1.0, %v1378_v14 }
 0xb98   :  { %v1382_v18 = vpop.eup %1381  ;;  %v1034_v19 = vmul.f32 0.5, %v1030_v15  ;;  %v1032_v20 = vadd.f32 1.0, %v1380_v16 }
 0xb99   :  { %v1033_v21 = vadd.f32 1.0, %v1382_v18  ;;  %v1035_v22 = vmul.f32 0.5, %v1031_v17 }
 0xb9a   :  { %v1036_v23 = vmul.f32 0.5, %v1032_v20  ;;  %v1038_v25 = vmul.f32 %v1034_v19, %v998_v44 }
 0xb9b   :  { %v1037_v24 = vmul.f32 0.5, %v1033_v21  ;;  %v1039_v52 = vmul.f32 %v1035_v22, %v1000_v50 }
 0xb9c   :  { %v1040_v0 = vmul.f32 %v1036_v23, %v1002_v47 }
 0xb9d   :  { %v1041_v26 = vmul.f32 %v1037_v24, %v1004_v58 }
 0xb9e   :  { %v1074_v27 = vpack.c.bf16 %v1040_v0, %v1038_v25 }
 0xb9f   :  { %v1075_v28 = vpack.c.bf16 %v1041_v26, %v1039_v52 }
 0xba1   :  { %1131 = vmatprep.mubr.bf16.mxu1 %v1075_v28 }
 0xba2   :  { %1132 = vmatmul.mubr.bf16.vlgmr.msra.gmra.mrb[12].mxu1 %v1074_v27 }
 0xc75   :  { %v1256_v29 = vpop.f32.mrb[12].mxu1 }
 0xc76   :  { %v1257_v31 = vpop.f32.mrb[13].mxu1 }
 0xc77   :  { %v1258_v32 = vadd.f32 %v1257_v31, %v1256_v29  ;;  %v1259_v33 = vpop.f32.mrb[14].mxu1 }
 0xc78   :  { %v1260_v2 = vpop.f32.mrb[15].mxu1 }
 0xc79   :  { %v1134_v34 = vadd.f32 %v1258_v32, %v1203_v30  ;;  %v1261_v35 = vadd.f32 %v1260_v2, %v1259_v33 }
 0xc7b   :  { %v1137_v36 = vadd.f32 %v1261_v35, %v1203_v30  ;;  %v1140_v37 = vadd.f32 %v1134_v34, %v1900_v48 }
 0xc7d   :  { %1144 = vadd.xlane.f32.xlu1 %v1140_v37  ;;  %v1141_v38 = vadd.f32 %v1137_v36, %v1902_v51 }
 0xc81   :  { %1146 = vadd.xlane.f32.xlu1 %v1141_v38 }
 0xd0a   :  { %v1145_v39 = vpop.xlane.xlu1 %1144 }
 0xd0b   :  { %v1148_v40 = vmul.f32 0.0078125, %v1145_v39 }
 0xd0d   :  { %v1150_v41 = vsub.f32 %v1140_v37, %v1148_v40 }
 0xd0e   :  { %v1147_v62 = vpop.xlane.xlu1 %1146 }
 0xd0f   :  { %v1149_v42 = vmul.f32 0.0078125, %v1147_v62  ;;  %v1152_v43 = vmul.f32 %v1150_v41, %v1150_v41 }
 0xd11   :  { %v1151_v44 = vsub.f32 %v1141_v38, %v1149_v42  ;;  %1154 = vadd.xlane.f32.xlu1 %v1152_v43 }
 0xd13   :  { %v1153_v49 = vmul.f32 %v1151_v44, %v1151_v44 }
 0xd15   :  { %1156 = vadd.xlane.f32.xlu0 %v1153_v49 }
 0xd9e   :  { %v1155_v50 = vpop.xlane.xlu1 %1154 }
 0xd9f   :  { %v1158_v45 = vmul.f32 0.0078125, %v1155_v50 }
 0xda1   :  { %v1160_v46 = vadd.f32 1e-12, %v1158_v45 }
 0xda2   :  { %v1157_v47 = vpop.xlane.xlu0 %1156 }
 0xda3   :  { %1383 = vrsqrt.f32 %v1160_v46  ;;  %v1159_v48 = vmul.f32 0.0078125, %v1157_v47 }
 0xda5   :  { %v1161_v53 = vadd.f32 1e-12, %v1159_v48 }
 0xda7   :  { %1385 = vrsqrt.f32 %v1161_v53 }
 0xdad   :  { %v1384_v51 = vpop.eup %1383 }
 0xdae   :  { %v1164_v58 = vmul.f32 %v1384_v51, %v1150_v41 }
 0xdb0   :  { %v1172_v3 = vmul.f32 %v1204_v56, %v1164_v58 }
 0xdb1   :  { %v1386_v60 = vpop.eup %1385 }
 0xdb2   :  { %v1180_v61 = vadd.f32 %v1205_v59, %v1172_v3  ;;  %v1165_v63 = vmul.f32 %v1386_v60, %v1151_v44 }
 0xdb4   :  { %1182 = vst [vmem:[%s2039_s13] sm:$0xff] %v1180_v61  ;;  %v1173_v1 = vmul.f32 %v1204_v56, %v1165_v63 }
 0xdb6   :  { %v1181_v57 = vadd.f32 %v1205_v59, %v1173_v1 }
 0xdb8   :  { %1183 = vst [vmem:[%s2039_s13 + $0x8] sm:$0xff] %v1181_v57 }

// kernel: rnn_linear_bert_forward.11
= control target key start
LH: loop header
LB: loop body
LE: loop exit
PB: predicated region body
PF: predicated region fallthrough
CT: control target
= control target key end

     0   :  { %s578_s1 = inlined_call_operand.vmem [shape: f32[128,128], index: 1, kind: input, shape index: {}]   ;;  %s579_s0 = inlined_call_operand.vmem [shape: f32[32,128], index: 0, kind: input, shape index: {}]   ;;  %s580_s2 = inlined_call_operand.vmem [shape: f32[1,128], index: 2, kind: input, shape index: {}]   ;;  %s581_s5 = inlined_call_operand.vmem [shape: f32[128,128], index: 5, kind: input, shape index: {}]   ;;  %s582_s3 = inlined_call_operand.vmem [shape: f32[1,128], index: 3, kind: input, shape index: {}]   ;;  %s583_s4 = inlined_call_operand.vmem [shape: f32[1,128], index: 4, kind: input, shape index: {}]   ;;  %s584_s6 = inlined_call_operand.vmem [shape: f32[1,128], index: 6, kind: input, shape index: {}]   ;;  %s585_s7 = inlined_call_operand.vmem [shape: f32[32,128], index: 7, kind: output, shape index: {}]  }
   0x1   :  { %v31_v0 = vld [vmem:[%s578_s1] sm:$0xff]  ;;  %v32_v1 = vld [vmem:[%s578_s1 + $0x8] sm:$0xff]  ;;  %v33_v2 = vld [vmem:[%s578_s1 + $0x10] sm:$0xff] }
   0x2   :  { %v49_v3 = vpack.c.bf16 %v32_v1, %v31_v0  ;;  %v34_v4 = vld [vmem:[%s578_s1 + $0x18] sm:$0xff]  ;;  %v35_v6 = vld [vmem:[%s578_s1 + $0x20] sm:$0xff]  ;;  %v36_v7 = vld [vmem:[%s578_s1 + $0x28] sm:$0xff] }
   0x3   :  { %v50_v5 = vpack.c.bf16 %v34_v4, %v33_v2  ;;  %v51_v8 = vpack.c.bf16 %v36_v7, %v35_v6  ;;  %v27_v9 = vld [vmem:[%s579_s0] sm:$0xff]  ;;  %v28_v10 = vld [vmem:[%s579_s0 + $0x8] sm:$0xff]  ;;  %v37_v11 = vld [vmem:[%s578_s1 + $0x30] sm:$0xff] }
   0x4   :  { %330 = vmatprep.subr.bf16.mxu0 %v49_v3  ;;  %v38_v12 = vld [vmem:[%s578_s1 + $0x38] sm:$0xff]  ;;  %v47_v13 = vpack.c.bf16 %v28_v10, %v27_v9  ;;  %v39_v15 = vld [vmem:[%s578_s1 + $0x40] sm:$0xff]  ;;  %v40_v16 = vld [vmem:[%s578_s1 + $0x48] sm:$0xff] }
   0x5   :  { %331 = vmatpush3.bf16.msra.mxu0 %v49_v3  ;;  %v52_v14 = vpack.c.bf16 %v38_v12, %v37_v11  ;;  %v53_v17 = vpack.c.bf16 %v40_v16, %v39_v15  ;;  %v41_v18 = vld [vmem:[%s578_s1 + $0x50] sm:$0xff]  ;;  %v42_v19 = vld [vmem:[%s578_s1 + $0x58] sm:$0xff]  ;;  %v43_v21 = vld [vmem:[%s578_s1 + $0x60] sm:$0xff] }
   0x6   :  { %332 = vmatprep.subr.bf16.mxu0 %v50_v5  ;;  %346 = vmatprep.mubr.bf16.mxu0 %v47_v13  ;;  %v54_v20 = vpack.c.bf16 %v42_v19, %v41_v18  ;;  %v44_v22 = vld [vmem:[%s578_s1 + $0x68] sm:$0xff]  ;;  %v45_v24 = vld [vmem:[%s578_s1 + $0x70] sm:$0xff]  ;;  %v46_v25 = vld [vmem:[%s578_s1 + $0x78] sm:$0xff] }
   0x7   :  { %v55_v23 = vpack.c.bf16 %v44_v22, %v43_v21  ;;  %v56_v26 = vpack.c.bf16 %v46_v25, %v45_v24  ;;  %v29_v27 = vld [vmem:[%s579_s0 + $0x10] sm:$0xff]  ;;  %v30_v28 = vld [vmem:[%s579_s0 + $0x18] sm:$0xff]  ;;  %v306_v30 = vld [vmem:[%s580_s2] ss:$0 sm:$0xff] }
   0x8   :  { %v48_v29 = vpack.c.bf16 %v30_v28, %v29_v27  ;;  %v216_v11 = vld [vmem:[%s581_s5] sm:$0xff]  ;;  %v217_v12 = vld [vmem:[%s581_s5 + $0x8] sm:$0xff] }
   0x9   :  { %333 = vmatpush3.bf16.msra.mxu0 %v50_v5  ;;  %v234_v13 = vpack.c.bf16 %v217_v12, %v216_v11 }
   0xa   :  { %334 = vmatprep.subr.bf16.mxu0 %v51_v8 }
   0xb   :  { %350 = vmatprep.subr.bf16.mxu1 %v234_v13 }
   0xc   :  { %351 = vmatpush3.bf16.msra.mxu1 %v234_v13 }
   0xd   :  { %335 = vmatpush3.bf16.msra.mxu0 %v51_v8 }
   0xe   :  { %336 = vmatprep.subr.bf16.mxu0 %v52_v14 }
  0x11   :  { %337 = vmatpush3.bf16.msra.mxu0 %v52_v14 }
  0x12   :  { %338 = vmatprep.subr.bf16.mxu0 %v53_v17 }
  0x15   :  { %339 = vmatpush3.bf16.msra.mxu0 %v53_v17 }
  0x16   :  { %340 = vmatprep.subr.bf16.mxu0 %v54_v20 }
  0x19   :  { %341 = vmatpush3.bf16.msra.mxu0 %v54_v20 }
  0x1a   :  { %342 = vmatprep.subr.bf16.mxu0 %v55_v23 }
  0x1d   :  { %343 = vmatpush3.bf16.msra.mxu0 %v55_v23 }
  0x1e   :  { %344 = vmatprep.subr.bf16.mxu0 %v56_v26 }
  0x21   :  { %345 = vmatpush3.bf16.msra.mxu0 %v56_v26 }
  0x24   :  { %347 = vmatmul.mubr.bf16.vlgmr.msra.gmra.mrb[0].mxu0 %v48_v29 }
  0xf7   :  { %v348_v31 = vpop.f32.mrb[0].mxu0 }
  0xf8   :  { %v107_v32 = vadd.f32 %v348_v31, %v306_v30  ;;  %v98_v33 = vpop.f32.mrb[1].mxu0  ;;  %v219_v31 = vld [vmem:[%s581_s5 + $0x18] sm:$0xff] }
  0xf9   :  { %v99_v34 = vadd.f32 %v306_v30, %v98_v33  ;;  %v349_v35 = vpop.f32.mrb[2].mxu0  ;;  %v220_v33 = vld [vmem:[%s581_s5 + $0x20] sm:$0xff] }
  0xfa   :  { %v115_v36 = vmul.f32 %v107_v32, %v107_v32  ;;  %v110_v37 = vadd.f32 %v349_v35, %v306_v30  ;;  %v101_v38 = vpop.f32.mrb[3].mxu0 }
  0xfb   :  { %v113_v39 = vmul.f32 %v99_v34, %v99_v34  ;;  %v102_v40 = vadd.f32 %v306_v30, %v101_v38  ;;  %v218_v30 = vld [vmem:[%s581_s5 + $0x10] sm:$0xff] }
  0xfc   :  { %v119_v41 = vmul.f32 %v115_v36, %v107_v32  ;;  %v116_v42 = vmul.f32 %v110_v37, %v110_v37  ;;  %v222_v36 = vld [vmem:[%s581_s5 + $0x30] sm:$0xff] }
  0xfd   :  { %v117_v43 = vmul.f32 %v113_v39, %v99_v34  ;;  %v114_v44 = vmul.f32 %v102_v40, %v102_v40  ;;  %v224_v39 = vld [vmem:[%s581_s5 + $0x40] sm:$0xff] }
  0xfe   :  { %v123_v45 = vmul.f32 0.044715, %v119_v41  ;;  %v120_v46 = vmul.f32 %v116_v42, %v110_v37  ;;  %v226_v41 = vld [vmem:[%s581_s5 + $0x50] sm:$0xff] }
  0xff   :  { %v121_v47 = vmul.f32 0.044715, %v117_v43  ;;  %v118_v48 = vmul.f32 %v114_v44, %v102_v40  ;;  %v227_v43 = vld [vmem:[%s581_s5 + $0x58] sm:$0xff] }
 0x100   :  { %v124_v49 = vmul.f32 0.044715, %v120_v46  ;;  %v127_v50 = vadd.f32 %v123_v45, %v107_v32  ;;  %v239_v44 = vpack.c.bf16 %v227_v43, %v226_v41  ;;  %v228_v45 = vld [vmem:[%s581_s5 + $0x60] sm:$0xff]  ;;  %v229_v46 = vld [vmem:[%s581_s5 + $0x68] sm:$0xff] }
 0x101   :  { %v122_v51 = vmul.f32 0.044715, %v118_v48  ;;  %v125_v52 = vadd.f32 %v121_v47, %v99_v34  ;;  %v240_v47 = vpack.c.bf16 %v229_v46, %v228_v45  ;;  %v230_v48 = vld [vmem:[%s581_s5 + $0x70] sm:$0xff] }
 0x102   :  { %v131_v53 = vmul.f32 0.7978846, %v127_v50  ;;  %v128_v54 = vadd.f32 %v124_v49, %v110_v37  ;;  %v231_v49 = vld [vmem:[%s581_s5 + $0x78] sm:$0xff] }
 0x103   :  { %v129_v55 = vmul.f32 0.7978846, %v125_v52  ;;  %v126_v56 = vadd.f32 %v122_v51, %v102_v40  ;;  %v241_v50 = vpack.c.bf16 %v231_v49, %v230_v48 }
 0x104   :  { %370 = vtanh.f32 %v131_v53  ;;  %v132_v57 = vmul.f32 0.7978846, %v128_v54 }
 0x105   :  { %372 = vtanh.f32 %v129_v55  ;;  %v130_v58 = vmul.f32 0.7978846, %v126_v56 }
 0x106   :  { %374 = vtanh.f32 %v132_v57 }
 0x107   :  { %376 = vtanh.f32 %v130_v58 }
 0x10e   :  { %v371_v59 = vpop.eup %370 }
 0x10f   :  { %v373_v60 = vpop.eup %372  ;;  %v139_v61 = vadd.f32 1.0, %v371_v59 }
 0x110   :  { %v375_v62 = vpop.eup %374  ;;  %v137_v63 = vadd.f32 1.0, %v373_v60 }
 0x111   :  { %v377_v0 = vpop.eup %376  ;;  %v143_v1 = vmul.f32 0.5, %v139_v61  ;;  %v140_v2 = vadd.f32 1.0, %v375_v62 }
 0x112   :  { %v141_v3 = vmul.f32 0.5, %v137_v63  ;;  %v138_v4 = vadd.f32 1.0, %v377_v0 }
 0x113   :  { %v147_v5 = vmul.f32 %v143_v1, %v107_v32  ;;  %v144_v6 = vmul.f32 0.5, %v140_v2  ;;  %v235_v32 = vpack.c.bf16 %v219_v31, %v218_v30  ;;  %v307_v1 = vld [vmem:[%s582_s3] ss:$0 sm:$0xff] }
 0x114   :  { %v145_v7 = vmul.f32 %v141_v3, %v99_v34  ;;  %v142_v8 = vmul.f32 0.5, %v138_v4  ;;  %v221_v34 = vld [vmem:[%s581_s5 + $0x28] sm:$0xff] }
 0x115   :  { %155 = vadd.xlane.f32.xlu1 %v147_v5  ;;  %v148_v9 = vmul.f32 %v144_v6, %v110_v37  ;;  %352 = vmatprep.subr.bf16.mxu1 %v235_v32  ;;  %v236_v35 = vpack.c.bf16 %v221_v34, %v220_v33  ;;  %v223_v37 = vld [vmem:[%s581_s5 + $0x38] sm:$0xff]  ;;  %v308_v6 = vld [vmem:[%s583_s4] ss:$0 sm:$0xff] }
 0x116   :  { %151 = vadd.xlane.f32.xlu0 %v145_v7  ;;  %v146_v10 = vmul.f32 %v142_v8, %v102_v40  ;;  %353 = vmatpush3.bf16.msra.mxu1 %v235_v32  ;;  %v237_v38 = vpack.c.bf16 %v223_v37, %v222_v36  ;;  %v225_v40 = vld [vmem:[%s581_s5 + $0x48] sm:$0xff] }
 0x117   :  { %354 = vmatprep.subr.bf16.mxu1 %v236_v35  ;;  %v238_v42 = vpack.c.bf16 %v225_v40, %v224_v39 }
 0x119   :  { %157 = vadd.xlane.f32.xlu1 %v148_v9 }
 0x11a   :  { %153 = vadd.xlane.f32.xlu0 %v146_v10  ;;  %355 = vmatpush3.bf16.msra.mxu1 %v236_v35 }
 0x11b   :  { %356 = vmatprep.subr.bf16.mxu1 %v237_v38 }
 0x11e   :  { %357 = vmatpush3.bf16.msra.mxu1 %v237_v38 }
 0x11f   :  { %358 = vmatprep.subr.bf16.mxu1 %v238_v42 }
 0x122   :  { %359 = vmatpush3.bf16.msra.mxu1 %v238_v42 }
 0x123   :  { %360 = vmatprep.subr.bf16.mxu1 %v239_v44 }
 0x126   :  { %361 = vmatpush3.bf16.msra.mxu1 %v239_v44 }
 0x127   :  { %362 = vmatprep.subr.bf16.mxu1 %v240_v47 }
 0x12a   :  { %363 = vmatpush3.bf16.msra.mxu1 %v240_v47 }
 0x12b   :  { %364 = vmatprep.subr.bf16.mxu1 %v241_v50 }
 0x12e   :  { %365 = vmatpush3.bf16.msra.mxu1 %v241_v50 }
 0x1a2   :  { %v156_v14 = vpop.xlane.xlu1 %155 }
 0x1a3   :  { %v152_v15 = vpop.xlane.xlu0 %151  ;;  %v162_v16 = vmul.f32 0.0078125, %v156_v14 }
 0x1a4   :  { %v160_v17 = vmul.f32 0.0078125, %v152_v15 }
 0x1a5   :  { %v497_v21 = vsub.f32 %v147_v5, %v162_v16 }
 0x1a6   :  { %v495_v18 = vsub.f32 %v145_v7, %v160_v17  ;;  %v158_v19 = vpop.xlane.xlu1 %157 }
 0x1a7   :  { %v154_v20 = vpop.xlane.xlu0 %153  ;;  %v163_v22 = vmul.f32 0.0078125, %v158_v19  ;;  %v170_v27 = vmul.f32 %v497_v21, %v497_v21  ;;  %v309_v19 = vld [vmem:[%s584_s6] ss:$0 sm:$0xff] }
 0x1a8   :  { %v161_v23 = vmul.f32 0.0078125, %v154_v20  ;;  %v168_v24 = vmul.f32 %v495_v18, %v495_v18 }
 0x1a9   :  { %v503_v26 = vsub.f32 %v148_v9, %v163_v22 }
 0x1aa   :  { %v501_v25 = vsub.f32 %v146_v10, %v161_v23  ;;  %172 = vadd.xlane.f32.xlu0 %v168_v24 }
 0x1ab   :  { %v171_v29 = vmul.f32 %v503_v26, %v503_v26 }
 0x1ac   :  { %v169_v28 = vmul.f32 %v501_v25, %v501_v25 }
 0x1ae   :  { %176 = vadd.xlane.f32.xlu0 %v170_v27  ;;  %174 = vadd.xlane.f32.xlu1 %v169_v28 }
 0x1b2   :  { %178 = vadd.xlane.f32.xlu1 %v171_v29 }
 0x237   :  { %v173_v51 = vpop.xlane.xlu0 %172 }
 0x238   :  { %v180_v52 = vmul.f32 0.0078125, %v173_v51 }
 0x23a   :  { %v184_v53 = vadd.f32 1e-12, %v180_v52 }
 0x23b   :  { %v175_v54 = vpop.xlane.xlu1 %174  ;;  %v177_v55 = vpop.xlane.xlu0 %176 }
 0x23c   :  { %378 = vrsqrt.f32 %v184_v53  ;;  %v181_v56 = vmul.f32 0.0078125, %v175_v54  ;;  %v182_v57 = vmul.f32 0.0078125, %v177_v55 }
 0x23e   :  { %v185_v58 = vadd.f32 1e-12, %v181_v56  ;;  %v186_v59 = vadd.f32 1e-12, %v182_v57 }
 0x23f   :  { %v179_v60 = vpop.xlane.xlu1 %178 }
 0x240   :  { %380 = vrsqrt.f32 %v185_v58  ;;  %v183_v61 = vmul.f32 0.0078125, %v179_v60 }
 0x241   :  { %382 = vrsqrt.f32 %v186_v59 }
 0x242   :  { %v187_v62 = vadd.f32 1e-12, %v183_v61 }
 0x244   :  { %384 = vrsqrt.f32 %v187_v62 }
 0x246   :  { %v379_v63 = vpop.eup %378 }
 0x247   :  { %v192_v0 = vmul.f32 %v379_v63, %v495_v18 }
 0x249   :  { %v202_v5 = vmul.f32 %v307_v1, %v192_v0 }
 0x24a   :  { %v381_v2 = vpop.eup %380 }
 0x24b   :  { %v383_v3 = vpop.eup %382  ;;  %v193_v4 = vmul.f32 %v381_v2, %v501_v25  ;;  %v212_v10 = vadd.f32 %v308_v6, %v202_v5 }
 0x24c   :  { %v194_v7 = vmul.f32 %v383_v3, %v497_v21 }
 0x24d   :  { %v203_v8 = vmul.f32 %v307_v1, %v193_v4 }
 0x24e   :  { %v385_v9 = vpop.eup %384  ;;  %v204_v13 = vmul.f32 %v307_v1, %v194_v7 }
 0x24f   :  { %v213_v11 = vadd.f32 %v308_v6, %v203_v8  ;;  %v195_v12 = vmul.f32 %v385_v9, %v503_v26 }
 0x250   :  { %v214_v16 = vadd.f32 %v308_v6, %v204_v13 }
 0x251   :  { %v232_v14 = vpack.c.bf16 %v213_v11, %v212_v10  ;;  %v205_v15 = vmul.f32 %v307_v1, %v195_v12 }
 0x253   :  { %366 = vmatprep.mubr.bf16.mxu1 %v232_v14  ;;  %v215_v17 = vadd.f32 %v308_v6, %v205_v15 }
 0x255   :  { %v233_v18 = vpack.c.bf16 %v215_v17, %v214_v16 }
 0x257   :  { %367 = vmatmul.mubr.bf16.vlgmr.msra.gmra.mrb[0].mxu1 %v233_v18 }
 0x32a   :  { %v368_v20 = vpop.f32.mrb[0].mxu1 }
 0x32b   :  { %v292_v21 = vadd.f32 %v368_v20, %v309_v19  ;;  %v283_v22 = vpop.f32.mrb[1].mxu1 }
 0x32c   :  { %v284_v23 = vadd.f32 %v309_v19, %v283_v22  ;;  %v369_v24 = vpop.f32.mrb[2].mxu1 }
 0x32d   :  { %300 = vst [vmem:[%s585_s7 + $0x10] sm:$0xff] %v292_v21  ;;  %v295_v25 = vadd.f32 %v369_v24, %v309_v19  ;;  %v286_v26 = vpop.f32.mrb[3].mxu1 }
 0x32e   :  { %298 = vst [vmem:[%s585_s7] sm:$0xff] %v284_v23  ;;  %v287_v27 = vadd.f32 %v309_v19, %v286_v26 }
 0x32f   :  { %301 = vst [vmem:[%s585_s7 + $0x18] sm:$0xff] %v295_v25 }
 0x330   :  { %299 = vst [vmem:[%s585_s7 + $0x8] sm:$0xff] %v287_v27 }

// kernel: rnn_linear_bert_forward.7
= control target key start
LH: loop header
LB: loop body
LE: loop exit
PB: predicated region body
PF: predicated region fallthrough
CT: control target
= control target key end

     0   :  { %v2113_v3 = vmov 0   ;;  %v2114_v42 = vmov 1983009808   ;;  %v39_v44 = vlaneseq  ;;  %v2115_v54 = vmov 1934713408   ;;  %s2976_s5 = inlined_call_operand.vmem [shape: f32[128,192], index: 5, kind: input, shape index: {}]   ;;  %s2977_s1 = inlined_call_operand.vmem [shape: f32[128,192], index: 1, kind: input, shape index: {}]   ;;  %s2978_s0 = inlined_call_operand.vmem [shape: f32[2,8,128], index: 0, kind: input, shape index: {}]   ;;  %s2979_s6 = inlined_call_operand.vmem [shape: f32[64,192], index: 6, kind: input, shape index: {}]   ;;  %s2980_s2 = inlined_call_operand.vmem [shape: f32[64,192], index: 2, kind: input, shape index: {}]   ;;  %s2981_s7 = inlined_call_operand.vmem [shape: f32[1,192], index: 7, kind: input, shape index: {}]   ;;  %s2982_s3 = inlined_call_operand.vmem [shape: f32[1,192], index: 3, kind: input, shape index: {}]   ;;  %s2983_s4 = inlined_call_operand.vmem [shape: f32[1,192], index: 4, kind: input, shape index: {}]   ;;  %s2984_s8 = inlined_call_operand.vmem [shape: f32[1,192], index: 8, kind: input, shape index: {}]   ;;  %s2985_s9 = inlined_call_operand.vmem [shape: f32[2,8,128], index: 9, kind: output, shape index: {}]  }
   0x1   :  { %v309_v0 = vld [vmem:[%s2976_s5 + $0x8] sm:$0xff]  ;;  %v311_v1 = vld [vmem:[%s2976_s5 + $0x18] sm:$0xff]  ;;  %v308_v2 = vld [vmem:[%s2976_s5] sm:$0xff]  ;;  %400 = vmatprep.mubr.bf16.mxu1 %v2113_v3  ;;  %238 = vmatprep.mubr.bf16.mxu0 %v2113_v3  ;;  %v37_v43 = vunpack.c.l.s4 %v2114_v42  ;;  %v68_v55 = vunpack.c.l.s4 %v2115_v54  ;;  %vm297_vm0 = vcmask 1041408   ;;  %vm298_vm1 = vcmask 519170  }
   0x2   :  { %v341_v4 = vpack.c.bf16 %v311_v1, %v309_v0  ;;  %v310_v5 = vld [vmem:[%s2976_s5 + $0x10] sm:$0xff]  ;;  %v313_v6 = vld [vmem:[%s2976_s5 + $0x28] sm:$0xff]  ;;  %v315_v7 = vld [vmem:[%s2976_s5 + $0x38] sm:$0xff]  ;;  %v2284_v61 = vshrl.u32 %v39_v44, 7  ;;  %vm521_vm3 = vcmask 523264   ;;  %vm681_vm4 = vcmask 517120  }
   0x3   :  { %v340_v8 = vpack.c.bf16 %v310_v5, %v308_v2  ;;  %v343_v9 = vpack.c.bf16 %v315_v7, %v313_v6  ;;  %v102_v10 = vld [vmem:[%s2977_s1 + $0x8] sm:$0xff]  ;;  %v104_v11 = vld [vmem:[%s2977_s1 + $0x18] sm:$0xff]  ;;  %v312_v12 = vld [vmem:[%s2976_s5 + $0x20] sm:$0xff]  ;;  %v38_v60 = vunpack.c.0.s8 %v37_v43 }
   0x4   :  { %368 = vmatprep.subr.bf16.mxu1 %v341_v4  ;;  %v179_v13 = vpack.c.bf16 %v104_v11, %v102_v10  ;;  %v314_v14 = vld [vmem:[%s2976_s5 + $0x30] sm:$0xff]  ;;  %v101_v15 = vld [vmem:[%s2977_s1] sm:$0xff]  ;;  %v317_v19 = vld [vmem:[%s2976_s5 + $0x48] sm:$0xff] }
   0x5   :  { %v103_v16 = vld [vmem:[%s2977_s1 + $0x10] sm:$0xff]  ;;  %369 = vmatpush1.bf16.msra.mxu1 %v340_v8  ;;  %v342_v17 = vpack.c.bf16 %v314_v14, %v312_v12  ;;  %v319_v20 = vld [vmem:[%s2976_s5 + $0x58] sm:$0xff]  ;;  %v106_v21 = vld [vmem:[%s2977_s1 + $0x28] sm:$0xff]  ;;  %v2317_v14 = vsub.s32 %v38_v60, %v2284_v61 }
   0x6   :  { %v178_v18 = vpack.c.bf16 %v103_v16, %v101_v15  ;;  %370 = vmatprep.subr.bf16.mxu1 %v343_v9  ;;  %206 = vmatprep.subr.bf16.mxu0 %v179_v13  ;;  %v345_v22 = vpack.c.bf16 %v319_v20, %v317_v19  ;;  %v108_v23 = vld [vmem:[%s2977_s1 + $0x38] sm:$0xff]  ;;  %v316_v24 = vld [vmem:[%s2976_s5 + $0x40] sm:$0xff]  ;;  %v318_v25 = vld [vmem:[%s2976_s5 + $0x50] sm:$0xff]  ;;  %v69_v9 = vunpack.c.0.s8 %v68_v55 }
   0x7   :  { %v181_v26 = vpack.c.bf16 %v108_v23, %v106_v21  ;;  %v105_v27 = vld [vmem:[%s2977_s1 + $0x20] sm:$0xff]  ;;  %v107_v28 = vld [vmem:[%s2977_s1 + $0x30] sm:$0xff]  ;;  %v321_v29 = vld [vmem:[%s2976_s5 + $0x68] sm:$0xff]  ;;  %v344_v34 = vpack.c.bf16 %v318_v25, %v316_v24 }
   0x8   :  { %207 = vmatpush1.bf16.msra.mxu0 %v178_v18  ;;  %v180_v30 = vpack.c.bf16 %v107_v28, %v105_v27  ;;  %v323_v31 = vld [vmem:[%s2976_s5 + $0x78] sm:$0xff]  ;;  %v110_v32 = vld [vmem:[%s2977_s1 + $0x48] sm:$0xff]  ;;  %v320_v36 = vld [vmem:[%s2976_s5 + $0x60] sm:$0xff] }
   0x9   :  { %v112_v33 = vld [vmem:[%s2977_s1 + $0x58] sm:$0xff]  ;;  %371 = vmatpush1.bf16.msra.mxu1 %v342_v17  ;;  %208 = vmatprep.subr.bf16.mxu0 %v181_v26  ;;  %v109_v37 = vld [vmem:[%s2977_s1 + $0x40] sm:$0xff]  ;;  %v347_v38 = vpack.c.bf16 %v323_v31, %v321_v29  ;;  %v322_v39 = vld [vmem:[%s2976_s5 + $0x70] sm:$0xff]  ;;  %v2341_v26 = vsub.s32 %v69_v9, %v2284_v61 }
   0xa   :  { %v183_v35 = vpack.c.bf16 %v112_v33, %v110_v32  ;;  %372 = vmatprep.subr.bf16.mxu1 %v345_v22  ;;  %v111_v40 = vld [vmem:[%s2977_s1 + $0x50] sm:$0xff]  ;;  %v325_v41 = vld [vmem:[%s2976_s5 + $0x88] sm:$0xff]  ;;  %v327_v46 = vld [vmem:[%s2976_s5 + $0x98] sm:$0xff]  ;;  %v346_v52 = vpack.c.bf16 %v322_v39, %v320_v36 }
   0xb   :  { %v182_v45 = vpack.c.bf16 %v111_v40, %v109_v37  ;;  %v114_v47 = vld [vmem:[%s2977_s1 + $0x68] sm:$0xff]  ;;  %v116_v48 = vld [vmem:[%s2977_s1 + $0x78] sm:$0xff]  ;;  %v113_v50 = vld [vmem:[%s2977_s1 + $0x60] sm:$0xff]  ;;  %v349_v56 = vpack.c.bf16 %v327_v46, %v325_v41 }
   0xc   :  { %209 = vmatpush1.bf16.msra.mxu0 %v180_v30  ;;  %v185_v49 = vpack.c.bf16 %v116_v48, %v114_v47  ;;  %v115_v51 = vld [vmem:[%s2977_s1 + $0x70] sm:$0xff]  ;;  %v118_v53 = vld [vmem:[%s2977_s1 + $0x88] sm:$0xff]  ;;  %v324_v57 = vld [vmem:[%s2976_s5 + $0x80] sm:$0xff]  ;;  %v2116_v30 = vmov 0.0  }
   0xd   :  { %210 = vmatprep.subr.bf16.mxu0 %v183_v35  ;;  %373 = vmatpush1.bf16.msra.mxu1 %v344_v34  ;;  %v326_v58 = vld [vmem:[%s2976_s5 + $0x90] sm:$0xff]  ;;  %v120_v59 = vld [vmem:[%s2977_s1 + $0x98] sm:$0xff]  ;;  %v184_v62 = vpack.c.bf16 %v115_v51, %v113_v50  ;;  %v329_v63 = vld [vmem:[%s2976_s5 + $0xa8] sm:$0xff] }
   0xe   :  { %374 = vmatprep.subr.bf16.mxu1 %v347_v38  ;;  %v331_v0 = vld [vmem:[%s2976_s5 + $0xb8] sm:$0xff]  ;;  %v187_v1 = vpack.c.bf16 %v120_v59, %v118_v53  ;;  %v117_v2 = vld [vmem:[%s2977_s1 + $0x80] sm:$0xff]  ;;  %v119_v4 = vld [vmem:[%s2977_s1 + $0x90] sm:$0xff]  ;;  %v348_v5 = vpack.c.bf16 %v326_v58, %v324_v57 }
   0xf   :  { %v328_v6 = vld [vmem:[%s2976_s5 + $0xa0] sm:$0xff]  ;;  %v122_v7 = vld [vmem:[%s2977_s1 + $0xa8] sm:$0xff]  ;;  %v124_v8 = vld [vmem:[%s2977_s1 + $0xb8] sm:$0xff]  ;;  %v351_v10 = vpack.c.bf16 %v331_v0, %v329_v63  ;;  %v186_v15 = vpack.c.bf16 %v119_v4, %v117_v2 }
  0x10   :  { %211 = vmatpush1.bf16.msra.mxu0 %v182_v45  ;;  %v330_v11 = vld [vmem:[%s2976_s5 + $0xb0] sm:$0xff]  ;;  %v333_v12 = vld [vmem:[%s2976_s5 + $0xc8] sm:$0xff]  ;;  %v335_v13 = vld [vmem:[%s2976_s5 + $0xd8] sm:$0xff]  ;;  %v189_v17 = vpack.c.bf16 %v124_v8, %v122_v7 }
  0x11   :  { %212 = vmatprep.subr.bf16.mxu0 %v185_v49  ;;  %375 = vmatpush1.bf16.msra.mxu1 %v346_v52  ;;  %v121_v16 = vld [vmem:[%s2977_s1 + $0xa0] sm:$0xff]  ;;  %v123_v18 = vld [vmem:[%s2977_s1 + $0xb0] sm:$0xff]  ;;  %v126_v19 = vld [vmem:[%s2977_s1 + $0xc8] sm:$0xff]  ;;  %v350_v21 = vpack.c.bf16 %v330_v11, %v328_v6  ;;  %v353_v22 = vpack.c.bf16 %v335_v13, %v333_v12 }
  0x12   :  { %376 = vmatprep.subr.bf16.mxu1 %v349_v56  ;;  %v128_v20 = vld [vmem:[%s2977_s1 + $0xd8] sm:$0xff]  ;;  %v332_v23 = vld [vmem:[%s2976_s5 + $0xc0] sm:$0xff]  ;;  %v34_v25 = vld [vmem:[%s2978_s0 + $0x8] sm:$0xff]  ;;  %v188_v35 = vpack.c.bf16 %v123_v18, %v121_v16 }
  0x13   :  { %v33_v24 = vld [vmem:[%s2978_s0] sm:$0xff]  ;;  %v334_v27 = vld [vmem:[%s2976_s5 + $0xd0] sm:$0xff]  ;;  %v337_v28 = vld [vmem:[%s2976_s5 + $0xe8] sm:$0xff]  ;;  %v50_v33 = vcombine.high %v34_v25, %v2116_v30  ;;  %v57_v34 = vrot.slane %v34_v25, %v2317_v14  ;;  %v191_v36 = vpack.c.bf16 %v128_v20, %v126_v19 }
  0x14   :  { %213 = vmatpush1.bf16.msra.mxu0 %v184_v62  ;;  %v339_v29 = vld [vmem:[%s2976_s5 + $0xf8] sm:$0xff]  ;;  %v35_v31 = vcombine.high %v33_v24, %v2116_v30  ;;  %v42_v32 = vrot.slane %v33_v24, %v2317_v14  ;;  %v125_v37 = vld [vmem:[%s2977_s1 + $0xc0] sm:$0xff]  ;;  %v127_v38 = vld [vmem:[%s2977_s1 + $0xd0] sm:$0xff]  ;;  %v352_v45 = vpack.c.bf16 %v334_v27, %v332_v23 }
  0x15   :  { %214 = vmatprep.subr.bf16.mxu0 %v187_v1  ;;  %377 = vmatpush1.bf16.msra.mxu1 %v348_v5  ;;  %v64_v40 = vrot.slane %v50_v33, %v2317_v14  ;;  %v130_v43 = vld [vmem:[%s2977_s1 + $0xe8] sm:$0xff]  ;;  %v132_v44 = vld [vmem:[%s2977_s1 + $0xf8] sm:$0xff]  ;;  %v355_v46 = vpack.c.bf16 %v339_v29, %v337_v28  ;;  %v336_v47 = vld [vmem:[%s2976_s5 + $0xe0] sm:$0xff]  ;;  %v190_v55 = vpack.c.bf16 %v127_v38, %v125_v37 }
  0x16   :  { %378 = vmatprep.subr.bf16.mxu1 %v351_v10  ;;  %v49_v39 = vrot.slane %v35_v31, %v2317_v14  ;;  %v65_v41 = vcombine.low %v42_v32, %v57_v34  ;;  %v66_v42 = vcombine.high %v42_v32, %v57_v34  ;;  %v338_v48 = vld [vmem:[%s2976_s5 + $0xf0] sm:$0xff]  ;;  %v484_v53 = vld [vmem:[%s2979_s6 + $0x8] sm:$0xff]  ;;  %v486_v54 = vld [vmem:[%s2979_s6 + $0x18] sm:$0xff]  ;;  %v193_v56 = vpack.c.bf16 %v132_v44, %v130_v43 }
  0x17   :  { %v129_v57 = vld [vmem:[%s2977_s1 + $0xe0] sm:$0xff]  ;;  %v131_v63 = vld [vmem:[%s2977_s1 + $0xf0] sm:$0xff]  ;;  %v468_v0 = vld [vmem:[%s2980_s2 + $0x8] sm:$0xff]  ;;  %v354_v2 = vpack.c.bf16 %v338_v48, %v336_v47  ;;  %v2396_v4 = vpack.c.bf16 %v486_v54, %v484_v53 }
  0x18   :  { %215 = vmatpush1.bf16.msra.mxu0 %v186_v15  ;;  %v73_v49 = vrot.slane %v65_v41, %v2341_v26  ;;  %v80_v50 = vrot.slane %v66_v42, %v2341_v26  ;;  %v81_v51 = vcombine.low %v49_v39, %v64_v40  ;;  %v82_v52 = vcombine.high %v49_v39, %v64_v40  ;;  %v470_v1 = vld [vmem:[%s2980_s2 + $0x18] sm:$0xff]  ;;  %v483_v16 = vld [vmem:[%s2979_s6] sm:$0xff]  ;;  %v469_v23 = vld [vmem:[%s2980_s2 + $0x10] sm:$0xff] }
  0x19   :  { %216 = vmatprep.subr.bf16.mxu0 %v189_v17  ;;  %379 = vmatpush1.bf16.msra.mxu1 %v350_v21  ;;  %v192_v9 = vpack.c.bf16 %v131_v63, %v129_v57  ;;  %v2398_v10 = vpack.c.bf16 %v470_v1, %v468_v0  ;;  %v485_v17 = vld [vmem:[%s2979_s6 + $0x10] sm:$0xff]  ;;  %v488_v21 = vld [vmem:[%s2979_s6 + $0x28] sm:$0xff]  ;;  %v490_v24 = vld [vmem:[%s2979_s6 + $0x38] sm:$0xff]  ;;  %v2557_v1 = vsub.s32 0, %v2284_v61 }
  0x1a   :  { %380 = vmatprep.subr.bf16.mxu1 %v353_v22  ;;  %v89_v58 = vrot.slane %v81_v51, %v2341_v26  ;;  %v96_v59 = vrot.slane %v82_v52, %v2341_v26  ;;  %v97_v60 = vcombine.high %v73_v49, %v2116_v30  ;;  %v98_v62 = vcombine.high %v80_v50, %v2116_v30  ;;  %v467_v22 = vld [vmem:[%s2980_s2] sm:$0xff]  ;;  %v472_v25 = vld [vmem:[%s2980_s2 + $0x28] sm:$0xff]  ;;  %v474_v27 = vld [vmem:[%s2980_s2 + $0x38] sm:$0xff] }
  0x1b   :  { %v2430_v29 = vpack.c.bf16 %v485_v17, %v483_v16  ;;  %v489_v31 = vld [vmem:[%s2979_s6 + $0x30] sm:$0xff]  ;;  %v2438_v32 = vpack.c.bf16 %v469_v23, %v467_v22  ;;  %v2440_v34 = vpack.c.bf16 %v490_v24, %v488_v21  ;;  %v471_v37 = vld [vmem:[%s2980_s2 + $0x20] sm:$0xff]  ;;  %v494_v39 = vld [vmem:[%s2979_s6 + $0x58] sm:$0xff] }
  0x1c   :  { %217 = vmatpush1.bf16.msra.mxu0 %v188_v35  ;;  %v99_v5 = vcombine.high %v89_v58, %v2116_v30  ;;  %v100_v6 = vcombine.high %v96_v59, %v2116_v30  ;;  %v141_v7 = vcombine.low %v73_v49, %v97_v60  ;;  %v142_v8 = vcombine.low %v80_v50, %v98_v62  ;;  %v487_v30 = vld [vmem:[%s2979_s6 + $0x20] sm:$0xff]  ;;  %v492_v35 = vld [vmem:[%s2979_s6 + $0x48] sm:$0xff]  ;;  %v473_v38 = vld [vmem:[%s2980_s2 + $0x30] sm:$0xff] }
  0x1d   :  { %218 = vmatprep.subr.bf16.mxu0 %v191_v36  ;;  %381 = vmatpush1.bf16.msra.mxu1 %v352_v45  ;;  %v2445_v36 = vpack.c.bf16 %v474_v27, %v472_v25  ;;  %v476_v40 = vld [vmem:[%s2980_s2 + $0x48] sm:$0xff]  ;;  %v478_v41 = vld [vmem:[%s2980_s2 + $0x58] sm:$0xff]  ;;  %v2463_v42 = vpack.c.bf16 %v489_v31, %v487_v30  ;;  %v491_v43 = vld [vmem:[%s2979_s6 + $0x40] sm:$0xff]  ;;  %v2472_v45 = vpack.c.bf16 %v473_v38, %v471_v37 }
  0x1e   :  { %382 = vmatprep.subr.bf16.mxu1 %v355_v46  ;;  %v149_v11 = vrot.slane %v141_v7, %v2317_v14  ;;  %v156_v12 = vrot.slane %v142_v8, %v2317_v14  ;;  %v158_v13 = vcombine.low %v89_v58, %v99_v5  ;;  %v159_v15 = vcombine.low %v96_v59, %v100_v6  ;;  %v493_v44 = vld [vmem:[%s2979_s6 + $0x50] sm:$0xff]  ;;  %v496_v47 = vld [vmem:[%s2979_s6 + $0x68] sm:$0xff]  ;;  %v475_v49 = vld [vmem:[%s2980_s2 + $0x40] sm:$0xff] }
  0x1f   :  { %v2475_v46 = vpack.c.bf16 %v494_v39, %v492_v35  ;;  %v2481_v48 = vpack.c.bf16 %v478_v41, %v476_v40  ;;  %v477_v50 = vld [vmem:[%s2980_s2 + $0x50] sm:$0xff]  ;;  %v498_v51 = vld [vmem:[%s2979_s6 + $0x78] sm:$0xff]  ;;  %v480_v52 = vld [vmem:[%s2980_s2 + $0x68] sm:$0xff]  ;;  %v2501_v54 = vpack.c.bf16 %v493_v44, %v491_v43  ;;  %v2563_v5 = vsub.s32 1, %v2284_v61 }
  0x20   :  { %219 = vmatpush1.bf16.msra.mxu0 %v190_v55  ;;  %v157_v18 = vcombine.low %v149_v11, %v156_v12  ;;  %v166_v19 = vrot.slane %v158_v13, %v2317_v14  ;;  %v173_v20 = vrot.slane %v159_v15, %v2317_v14  ;;  %v482_v53 = vld [vmem:[%s2980_s2 + $0x78] sm:$0xff]  ;;  %v495_v55 = vld [vmem:[%s2979_s6 + $0x60] sm:$0xff]  ;;  %v2510_v57 = vpack.c.bf16 %v498_v51, %v496_v47  ;;  %v497_v58 = vld [vmem:[%s2979_s6 + $0x70] sm:$0xff] }
  0x21   :  { %220 = vmatprep.subr.bf16.mxu0 %v193_v56  ;;  %383 = vmatpush1.bf16.msra.mxu1 %v354_v2  ;;  %v2507_v56 = vpack.c.bf16 %v477_v50, %v475_v49  ;;  %v2516_v59 = vpack.c.bf16 %v482_v53, %v480_v52  ;;  %v479_v60 = vld [vmem:[%s2980_s2 + $0x60] sm:$0xff]  ;;  %v481_v62 = vld [vmem:[%s2980_s2 + $0x70] sm:$0xff]  ;;  %v2525_v63 = vpack.c.bf16 %v497_v58, %v495_v55  ;;  %vm2572_vm2 = vmor %vm298_vm1, %vm297_vm0 }
  0x22   :  { %608 = vmatprep.subr.bf16.mxu1 %v2396_v4  ;;  %v174_v28 = vcombine.low %v166_v19, %v173_v20  ;;  %v2528_v0 = vpack.c.bf16 %v481_v62, %v479_v60  ;;  %v356_v2 = vld [vmem:[%s2981_s7] sm:$0x3] }
  0x23   :  { %v194_v6 = vld [vmem:[%s2982_s3] sm:$0x3]  ;;  %v361_v7 = vrot.slane %v356_v2, %v2557_v1 }
  0x24   :  { %221 = vmatpush1.bf16.msra.mxu0 %v192_v9  ;;  %v177_v33 = vpack.c.bf16 %v174_v28, %v157_v18  ;;  %v199_v8 = vrot.slane %v194_v6, %v2557_v1  ;;  %v365_v9 = vrot.slane %v356_v2, %v2563_v5  ;;  %v203_v11 = vrot.slane %v194_v6, %v2563_v5  ;;  %v499_v2 = vld [vmem:[%s2983_s4] sm:$0x3]  ;;  %s2117_s4 = smov 64  }
  0x25   :  { %525 = vmatprep.subr.bf16.mxu0 %v2398_v10  ;;  %v500_v6 = vld [vmem:[%s2984_s8] sm:$0x3] }
  0x26   :  { %401 = vmatmul.mubr.bf16.vlgmr.msra.gmra.mrb[0].mxu1 %v177_v33 }
  0x27   :  { %239 = vmatmul.mubr.bf16.vlgmr.msra.gmra.mrb[0].mxu0 %v177_v33  ;;  %609 = vmatpush1.bf16.msra.mxu1 %v2430_v29 }
  0x28   :  { %526 = vmatpush1.bf16.msra.mxu0 %v2438_v32  ;;  %610 = vmatprep.subr.bf16.mxu1 %v2440_v34 }
  0x29   :  { %527 = vmatprep.subr.bf16.mxu0 %v2445_v36  ;;  %640 = vmatprep.mubr.bf16.mxu1 %v2113_v3 }
  0x2a   :  { %557 = vmatprep.mubr.bf16.mxu0 %v2113_v3 }
  0x2b   :  { %611 = vmatpush1.bf16.msra.mxu1 %v2463_v42 }
  0x2c   :  { %528 = vmatpush1.bf16.msra.mxu0 %v2472_v45  ;;  %612 = vmatprep.subr.bf16.mxu1 %v2475_v46 }
  0x2d   :  { %529 = vmatprep.subr.bf16.mxu0 %v2481_v48 }
  0x2f   :  { %613 = vmatpush1.bf16.msra.mxu1 %v2501_v54 }
  0x30   :  { %530 = vmatpush1.bf16.msra.mxu0 %v2507_v56  ;;  %614 = vmatprep.subr.bf16.mxu1 %v2510_v57 }
  0x31   :  { %531 = vmatprep.subr.bf16.mxu0 %v2516_v59 }
  0x33   :  { %615 = vmatpush1.bf16.msra.mxu1 %v2525_v63 }
  0x34   :  { %532 = vmatpush1.bf16.msra.mxu0 %v2528_v0  ;;  %776 = vmatprep.subr.bf16.mxu1 %v2396_v4 }
  0x35   :  { %705 = vmatprep.subr.bf16.mxu0 %v2398_v10 }
  0x36   :  { %641 = vmatmul.mubr.bf16.vlgmr.msra.gmra.mrb[4].mxu1 %v2113_v3 }
  0x37   :  { %558 = vmatmul.mubr.bf16.vlgmr.msra.gmra.mrb[4].mxu0 %v2113_v3  ;;  %777 = vmatpush1.bf16.msra.mxu1 %v2430_v29 }
  0x38   :  { %706 = vmatpush1.bf16.msra.mxu0 %v2438_v32  ;;  %778 = vmatprep.subr.bf16.mxu1 %v2440_v34 }
  0x39   :  { %707 = vmatprep.subr.bf16.mxu0 %v2445_v36  ;;  %808 = vmatprep.mubr.bf16.mxu1 %v2113_v3 }
  0x3a   :  { %737 = vmatprep.mubr.bf16.mxu0 %v2113_v3 }
  0x3b   :  { %779 = vmatpush1.bf16.msra.mxu1 %v2463_v42 }
  0x3c   :  { %708 = vmatpush1.bf16.msra.mxu0 %v2472_v45  ;;  %780 = vmatprep.subr.bf16.mxu1 %v2475_v46 }
  0x3d   :  { %709 = vmatprep.subr.bf16.mxu0 %v2481_v48 }
  0x3f   :  { %781 = vmatpush1.bf16.msra.mxu1 %v2501_v54 }
  0x40   :  { %710 = vmatpush1.bf16.msra.mxu0 %v2507_v56  ;;  %782 = vmatprep.subr.bf16.mxu1 %v2510_v57 }
  0x41   :  { %711 = vmatprep.subr.bf16.mxu0 %v2516_v59 }
  0x43   :  { %783 = vmatpush1.bf16.msra.mxu1 %v2525_v63 }
  0x44   :  { %712 = vmatpush1.bf16.msra.mxu0 %v2528_v0  ;;  %944 = vmatprep.subr.bf16.mxu1 %v2396_v4 }
  0x45   :  { %873 = vmatprep.subr.bf16.mxu0 %v2398_v10 }
  0xf9   :  { %v402_v12 = vpop.f32.mrb[0].mxu1 }
  0xfa   :  { %v240_v13 = vpop.f32.mrb[0].mxu0  ;;  %v403_v15 = vadd.f32 %v402_v12, %v361_v7  ;;  %v404_v16 = vpop.f32.mrb[1].mxu1  ;;  %v2619_v12 = vrot.slane %v499_v2, %v2557_v1 }
  0xfb   :  { %v241_v17 = vadd.f32 %v240_v13, %v199_v8  ;;  %v242_v18 = vpop.f32.mrb[1].mxu0  ;;  %v405_v61 = vadd.f32 %v404_v16, %v365_v9  ;;  %v406_v19 = vpop.f32.mrb[2].mxu1  ;;  %v2622_v13 = vrot.slane %v500_v6, %v2557_v1 }
  0xfc   :  { %v243_v20 = vadd.f32 %v242_v18, %v203_v11  ;;  %v244_v21 = vpop.f32.mrb[2].mxu0  ;;  %v407_v22 = vadd.f32 %v406_v19, %v361_v7  ;;  %v408_v23 = vpop.f32.mrb[3].mxu1 }
  0xfd   :  { %v245_v24 = vadd.f32 %v244_v21, %v199_v8  ;;  %v246_v25 = vpop.f32.mrb[3].mxu0  ;;  %v415_v27 = vcombine.low %v403_v15, %v405_v61  ;;  %v416_v28 = vcombine.high %v403_v15, %v405_v61  ;;  %v409_v30 = vadd.f32 %v408_v23, %v365_v9 }
  0xfe   :  { %v253_v31 = vcombine.low %v241_v17, %v243_v20  ;;  %v254_v35 = vcombine.high %v241_v17, %v243_v20  ;;  %v247_v37 = vadd.f32 %v246_v25, %v203_v11 }
  0xff   :  { %v423_v38 = vrot.slane %v415_v27, %v2317_v14  ;;  %v430_v39 = vrot.slane %v416_v28, %v2317_v14  ;;  %v433_v40 = vcombine.low %v407_v22, %v409_v30  ;;  %v434_v41 = vcombine.high %v407_v22, %v409_v30 }
 0x100   :  { %v261_v43 = vrot.slane %v253_v31, %v2317_v14  ;;  %v268_v44 = vrot.slane %v254_v35, %v2317_v14  ;;  %v271_v47 = vcombine.low %v245_v24, %v247_v37  ;;  %v272_v49 = vcombine.high %v245_v24, %v247_v37 }
 0x101   :  { %v431_v50 = vcombine.high %v423_v38, %v423_v38  ;;  %v432_v51 = vcombine.high %v430_v39, %v430_v39  ;;  %459 = vst.msk [vmem:[#allocation3] sm:$0xf] %vm2572_vm2, %v423_v38  ;;  %461 = vst.msk [vmem:[#allocation3 + $0x8] sm:$0xf] %vm2572_vm2, %v430_v39  ;;  %v441_v52 = vrot.slane %v433_v40, %v2317_v14 }
 0x102   :  { %v448_v53 = vrot.slane %v434_v41, %v2317_v14  ;;  %v269_v55 = vcombine.high %v261_v43, %v261_v43  ;;  %v270_v58 = vcombine.high %v268_v44, %v268_v44  ;;  %300 = vst.msk [vmem:[#allocation2] sm:$0xf] %vm2572_vm2, %v261_v43  ;;  %302 = vst.msk [vmem:[#allocation2 + $0x8] sm:$0xf] %vm2572_vm2, %v268_v44 }
 0x103   :  { %v279_v60 = vrot.slane %v271_v47, %v2317_v14  ;;  %v286_v62 = vrot.slane %v272_v49, %v2317_v14  ;;  %460 = vst.msk [vmem:[#allocation3 + $0x4] sm:$0xf] %vm2572_vm2, %v431_v50  ;;  %462 = vst.msk [vmem:[#allocation3 + $0xc] sm:$0xf] %vm2572_vm2, %v432_v51  ;;  %v449_v7 = vcombine.high %v441_v52, %v441_v52 }
 0x104   :  { %v450_v8 = vcombine.high %v448_v53, %v448_v53  ;;  %463 = vst.msk [vmem:[#allocation3 + $0x10] sm:$0xf] %vm2572_vm2, %v441_v52  ;;  %465 = vst.msk [vmem:[#allocation3 + $0x18] sm:$0xf] %vm2572_vm2, %v448_v53  ;;  %v2631_v38 = vrot.slane %v499_v2, %v2563_v5  ;;  %v2634_v39 = vrot.slane %v500_v6, %v2563_v5 }
 0x105   :  { %301 = vst.msk [vmem:[#allocation2 + $0x4] sm:$0xf] %vm2572_vm2, %v269_v55  ;;  %303 = vst.msk [vmem:[#allocation2 + $0xc] sm:$0xf] %vm2572_vm2, %v270_v58  ;;  %v287_v9 = vcombine.high %v279_v60, %v279_v60  ;;  %v288_v11 = vcombine.high %v286_v62, %v286_v62 }
 0x106   :  { %304 = vst.msk [vmem:[#allocation2 + $0x10] sm:$0xf] %vm2572_vm2, %v279_v60  ;;  %306 = vst.msk [vmem:[#allocation2 + $0x18] sm:$0xf] %vm2572_vm2, %v286_v62 }
 0x107   :  { %464 = vst.msk [vmem:[#allocation3 + $0x14] sm:$0xf] %vm2572_vm2, %v449_v7  ;;  %466 = vst.msk [vmem:[#allocation3 + $0x1c] sm:$0xf] %vm2572_vm2, %v450_v8 }
 0x108   :  { %305 = vst.msk [vmem:[#allocation2 + $0x14] sm:$0xf] %vm2572_vm2, %v287_v9  ;;  %307 = vst.msk [vmem:[#allocation2 + $0x1c] sm:$0xf] %vm2572_vm2, %v288_v11 }
 0x109   :  { %v642_v15 = vpop.f32.mrb[4].mxu1  ;;  %v501_v16 = vld [vmem:[#allocation2] sm:$0xf] }
 0x10a   :  { %v559_v17 = vpop.f32.mrb[4].mxu0  ;;  %v643_v18 = vadd.f32 %v642_v15, %v2622_v13  ;;  %v644_v61 = vpop.f32.mrb[5].mxu1  ;;  %v575_v44 = vrot.slane %v501_v16, 2 }
 0x10b   :  { %v560_v19 = vadd.f32 %v559_v17, %v2619_v12  ;;  %v561_v20 = vpop.f32.mrb[5].mxu0  ;;  %v646_v21 = vpop.f32.mrb[6].mxu1  ;;  %v645_v43 = vadd.f32 %v644_v61, %v2634_v39 }
 0x10c   :  { %v563_v22 = vpop.f32.mrb[6].mxu0  ;;  %v647_v1 = vpop.f32.mrb[7].mxu1  ;;  %v562_v40 = vadd.f32 %v561_v20, %v2631_v38 }
 0x10d   :  { %v566_v24 = vadd.f32 %v560_v19, %v501_v16  ;;  %v564_v25 = vpop.f32.mrb[7].mxu0  ;;  %v768_v22 = vld [vmem:[#allocation3 + $0x18] sm:$0xf] }
 0x10e   :  { %v588_v23 = vld [vmem:[#allocation3 + $0x1c] sm:$0xf] }
 0x10f   :  { %v649_v27 = vadd.f32 %v643_v18, %v588_v23  ;;  %v1982_v28 = vmul.f32 -1.442695, %v566_v24  ;;  %v658_v50 = vrot.slane %v588_v23, 2 }
 0x111   :  { %v1983_v30 = vmul.f32 -1.442695, %v649_v27  ;;  %2017 = vpow2.f32 %v1982_v28 }
 0x113   :  { %2019 = vpow2.f32 %v1983_v30 }
 0x11b   :  { %v2018_v31 = vpop.eup %2017 }
 0x11c   :  { %v570_v35 = vadd.f32 1.0, %v2018_v31  ;;  %v697_v31 = vld [vmem:[#allocation2 + $0x4] sm:$0xf] }
 0x11d   :  { %v2020_v33 = vpop.eup %2019 }
 0x11e   :  { %v653_v37 = vadd.f32 1.0, %v2020_v33  ;;  %2021 = vrcp.f32 %v570_v35 }
 0x120   :  { %2023 = vrcp.f32 %v653_v37 }
 0x128   :  { %v2022_v41 = vpop.eup %2021 }
 0x129   :  { %v573_v49 = vmul.f32 %v2022_v41, %v562_v40  ;;  %v579_v7 = vsub.f32 1.0, %v2022_v41  ;;  %v585_v9 = vmul.f32 0.0, %v2022_v41 }
 0x12a   :  { %v2024_v47 = vpop.eup %2023 }
 0x12b   :  { %v656_v51 = vmul.f32 %v2024_v47, %v645_v43  ;;  %v577_v53 = vadd.f32 %v575_v44, %v573_v49  ;;  %v662_v58 = vsub.f32 1.0, %v2024_v47  ;;  %v668_v62 = vmul.f32 0.0, %v2024_v47 }
 0x12d   :  { %v660_v52 = vadd.f32 %v658_v50, %v656_v51  ;;  %v826_v51 = vrot.slane %v768_v22, 2 }
 0x12f   :  { %2025 = vtanh.f32 %v660_v52 }
 0x130   :  { %2027 = vtanh.f32 %v577_v53 }
 0x139   :  { %v2026_v55 = vpop.eup %2025 }
 0x13a   :  { %664 = vrot.lane.b32.xlu0 %v2026_v55, %s2117_s4  ;;  %v2028_v5 = vpop.eup %2027 }
 0x13e   :  { %581 = vrot.lane.b32.xlu0 %v2028_v5, %s2117_s4 }
 0x1ac   :  { %v665_v60 = vpop.permute.xlu0 %664 }
 0x1ad   :  { %v667_v2 = vmul.f32 %v665_v60, %v662_v58  ;;  %v755_v58 = vrot.slane %v697_v31, 2 }
 0x1af   :  { %v2640_v6 = vadd.f32 %v668_v62, %v667_v2 }
 0x1b0   :  { %v582_v8 = vpop.permute.xlu0 %581 }
 0x1b1   :  { %v584_v11 = vmul.f32 %v582_v8, %v579_v7  ;;  %v769_v15 = vpack.c.bf16 %v2640_v6, %v2640_v6 }
 0x1b3   :  { %v2644_v16 = vadd.f32 %v585_v9, %v584_v11  ;;  %771 = vrot.lane.b32.xlu1 %v769_v15, %s2117_s4 }
 0x1b5   :  { %v698_v17 = vpack.c.bf16 %v2644_v16, %v2644_v16 }
 0x1b7   :  { %700 = vrot.lane.b32.xlu1 %v698_v17, %s2117_s4 }
 0x225   :  { %v772_v18 = vpop.permute.xlu1 %771 }
 0x226   :  { %1986 = vmatmul.mubr.msk.bf16.vlgmr.msra.gmra.mrb[8].mxu1 %vm521_vm3, %v772_v18 }
 0x227   :  { %945 = vmatpush1.bf16.msra.mxu1 %v2430_v29  ;;  %976 = vmatprep.mubr.bf16.mxu1 %v2113_v3 }
 0x228   :  { %946 = vmatprep.subr.bf16.mxu1 %v2440_v34 }
 0x229   :  { %v701_v61 = vpop.permute.xlu1 %700 }
 0x22a   :  { %1984 = vmatmul.mubr.msk.bf16.vlgmr.msra.gmra.mrb[8].mxu0 %vm521_vm3, %v701_v61 }
 0x22b   :  { %874 = vmatpush1.bf16.msra.mxu0 %v2438_v32  ;;  %947 = vmatpush1.bf16.msra.mxu1 %v2463_v42 }
 0x22c   :  { %875 = vmatprep.subr.bf16.mxu0 %v2445_v36  ;;  %948 = vmatprep.subr.bf16.mxu1 %v2475_v46 }
 0x22d   :  { %905 = vmatprep.mubr.bf16.mxu0 %v2113_v3 }
 0x22f   :  { %876 = vmatpush1.bf16.msra.mxu0 %v2472_v45  ;;  %949 = vmatpush1.bf16.msra.mxu1 %v2501_v54 }
 0x230   :  { %877 = vmatprep.subr.bf16.mxu0 %v2481_v48  ;;  %950 = vmatprep.subr.bf16.mxu1 %v2510_v57 }
 0x233   :  { %878 = vmatpush1.bf16.msra.mxu0 %v2507_v56  ;;  %951 = vmatpush1.bf16.msra.mxu1 %v2525_v63 }
 0x234   :  { %879 = vmatprep.subr.bf16.mxu0 %v2516_v59  ;;  %1112 = vmatprep.subr.bf16.mxu1 %v2396_v4 }
 0x237   :  { %880 = vmatpush1.bf16.msra.mxu0 %v2528_v0 }
 0x238   :  { %1041 = vmatprep.subr.bf16.mxu0 %v2398_v10 }
 0x2f9   :  { %v810_v19 = vpop.f32.mrb[8].mxu1 }
 0x2fa   :  { %v811_v20 = vadd.f32 %v810_v19, %v2622_v13  ;;  %v812_v21 = vpop.f32.mrb[9].mxu1 }
 0x2fb   :  { %v814_v23 = vpop.f32.mrb[10].mxu1  ;;  %v813_v49 = vadd.f32 %v812_v21, %v2634_v39 }
 0x2fc   :  { %v817_v1 = vadd.f32 %v811_v20, %v768_v22  ;;  %v815_v24 = vpop.f32.mrb[11].mxu1 }
 0x2fd   :  { %v739_v25 = vpop.f32.mrb[8].mxu0 }
 0x2fe   :  { %v1987_v27 = vmul.f32 -1.442695, %v817_v1  ;;  %v740_v28 = vadd.f32 %v739_v25, %v2619_v12  ;;  %v741_v30 = vpop.f32.mrb[9].mxu0 }
 0x2ff   :  { %v743_v33 = vpop.f32.mrb[10].mxu0  ;;  %v742_v55 = vadd.f32 %v741_v30, %v2631_v38  ;;  %v936_v30 = vld [vmem:[#allocation3 + $0x14] sm:$0xf] }
 0x300   :  { %2029 = vpow2.f32 %v1987_v27  ;;  %v746_v35 = vadd.f32 %v740_v28, %v697_v31  ;;  %v744_v37 = vpop.f32.mrb[11].mxu0 }
 0x302   :  { %v1985_v40 = vmul.f32 -1.442695, %v746_v35 }
 0x304   :  { %2031 = vpow2.f32 %v1985_v40 }
 0x30a   :  { %v2030_v41 = vpop.eup %2029 }
 0x30b   :  { %v821_v43 = vadd.f32 1.0, %v2030_v41 }
 0x30d   :  { %2033 = vrcp.f32 %v821_v43 }
 0x30e   :  { %v2032_v44 = vpop.eup %2031 }
 0x30f   :  { %v750_v47 = vadd.f32 1.0, %v2032_v44  ;;  %v865_v44 = vld [vmem:[#allocation2 + $0x8] sm:$0xf] }
 0x311   :  { %2035 = vrcp.f32 %v750_v47 }
 0x317   :  { %v2034_v50 = vpop.eup %2033 }
 0x318   :  { %v824_v52 = vmul.f32 %v2034_v50, %v813_v49  ;;  %v830_v8 = vsub.f32 1.0, %v2034_v50  ;;  %v836_v11 = vmul.f32 %v2034_v50, %v2640_v6 }
 0x31a   :  { %v828_v53 = vadd.f32 %v826_v51, %v824_v52 }
 0x31b   :  { %v2036_v5 = vpop.eup %2035 }
 0x31c   :  { %2037 = vtanh.f32 %v828_v53  ;;  %v753_v60 = vmul.f32 %v2036_v5, %v742_v55  ;;  %v759_v18 = vsub.f32 1.0, %v2036_v5  ;;  %v765_v19 = vmul.f32 %v2036_v5, %v2644_v16 }
 0x31e   :  { %v757_v62 = vadd.f32 %v755_v58, %v753_v60 }
 0x320   :  { %2039 = vtanh.f32 %v757_v62  ;;  %v994_v62 = vrot.slane %v936_v30, 2 }
 0x326   :  { %v2038_v2 = vpop.eup %2037 }
 0x327   :  { %832 = vrot.lane.b32.xlu0 %v2038_v2, %s2117_s4 }
 0x32a   :  { %v2040_v7 = vpop.eup %2039 }
 0x32b   :  { %761 = vrot.lane.b32.xlu1 %v2040_v7, %s2117_s4 }
 0x399   :  { %v833_v9 = vpop.permute.xlu0 %832 }
 0x39a   :  { %v835_v15 = vmul.f32 %v833_v9, %v830_v8 }
 0x39c   :  { %v2677_v17 = vadd.f32 %v836_v11, %v835_v15  ;;  %v923_v11 = vrot.slane %v865_v44, 2 }
 0x39d   :  { %v762_v61 = vpop.permute.xlu1 %761 }
 0x39e   :  { %v764_v20 = vmul.f32 %v762_v61, %v759_v18  ;;  %v937_v21 = vpack.c.bf16 %v2677_v17, %v2677_v17 }
 0x3a0   :  { %v2682_v22 = vadd.f32 %v765_v19, %v764_v20  ;;  %939 = vrot.lane.b32.xlu0 %v937_v21, %s2117_s4 }
 0x3a2   :  { %v866_v23 = vpack.c.bf16 %v2682_v22, %v2682_v22 }
 0x3a4   :  { %868 = vrot.lane.b32.xlu1 %v866_v23, %s2117_s4 }
 0x412   :  { %v940_v1 = vpop.permute.xlu0 %939 }
 0x413   :  { %1990 = vmatmul.mubr.msk.bf16.vlgmr.msra.gmra.mrb[12].mxu1 %vm521_vm3, %v940_v1 }
 0x414   :  { %1113 = vmatpush1.bf16.msra.mxu1 %v2430_v29  ;;  %1144 = vmatprep.mubr.bf16.mxu1 %v2113_v3 }
 0x415   :  { %1114 = vmatprep.subr.bf16.mxu1 %v2440_v34 }
 0x416   :  { %v869_v24 = vpop.permute.xlu1 %868 }
 0x417   :  { %1988 = vmatmul.mubr.msk.bf16.vlgmr.msra.gmra.mrb[12].mxu0 %vm521_vm3, %v869_v24 }
 0x418   :  { %1042 = vmatpush1.bf16.msra.mxu0 %v2438_v32  ;;  %1115 = vmatpush1.bf16.msra.mxu1 %v2463_v42 }
 0x419   :  { %1043 = vmatprep.subr.bf16.mxu0 %v2445_v36  ;;  %1116 = vmatprep.subr.bf16.mxu1 %v2475_v46 }
 0x41a   :  { %1073 = vmatprep.mubr.bf16.mxu0 %v2113_v3 }
 0x41c   :  { %1044 = vmatpush1.bf16.msra.mxu0 %v2472_v45  ;;  %1117 = vmatpush1.bf16.msra.mxu1 %v2501_v54 }
 0x41d   :  { %1045 = vmatprep.subr.bf16.mxu0 %v2481_v48  ;;  %1118 = vmatprep.subr.bf16.mxu1 %v2510_v57 }
 0x420   :  { %1046 = vmatpush1.bf16.msra.mxu0 %v2507_v56  ;;  %1119 = vmatpush1.bf16.msra.mxu1 %v2525_v63 }
 0x421   :  { %1047 = vmatprep.subr.bf16.mxu0 %v2516_v59  ;;  %1280 = vmatprep.subr.bf16.mxu1 %v2396_v4 }
 0x424   :  { %1048 = vmatpush1.bf16.msra.mxu0 %v2528_v0 }
 0x425   :  { %1209 = vmatprep.subr.bf16.mxu0 %v2398_v10 }
 0x4e6   :  { %v978_v25 = vpop.f32.mrb[12].mxu1 }
 0x4e7   :  { %v979_v27 = vadd.f32 %v978_v25, %v2622_v13  ;;  %v980_v28 = vpop.f32.mrb[13].mxu1 }
 0x4e8   :  { %v982_v31 = vpop.f32.mrb[14].mxu1  ;;  %v981_v58 = vadd.f32 %v980_v28, %v2634_v39 }
 0x4e9   :  { %v985_v33 = vadd.f32 %v979_v27, %v936_v30  ;;  %v983_v35 = vpop.f32.mrb[15].mxu1 }
 0x4ea   :  { %v907_v37 = vpop.f32.mrb[12].mxu0 }
 0x4eb   :  { %v1991_v40 = vmul.f32 -1.442695, %v985_v33  ;;  %v908_v41 = vadd.f32 %v907_v37, %v2619_v12  ;;  %v909_v43 = vpop.f32.mrb[13].mxu0 }
 0x4ec   :  { %v911_v47 = vpop.f32.mrb[14].mxu0  ;;  %v910_v8 = vadd.f32 %v909_v43, %v2631_v38 }
 0x4ed   :  { %2041 = vpow2.f32 %v1991_v40  ;;  %v914_v49 = vadd.f32 %v908_v41, %v865_v44  ;;  %v912_v50 = vpop.f32.mrb[15].mxu0  ;;  %v1104_v47 = vld [vmem:[#allocation3 + $0x10] sm:$0xf] }
 0x4ef   :  { %v1989_v51 = vmul.f32 -1.442695, %v914_v49 }
 0x4f1   :  { %2043 = vpow2.f32 %v1989_v51 }
 0x4f7   :  { %v2042_v52 = vpop.eup %2041 }
 0x4f8   :  { %v989_v53 = vadd.f32 1.0, %v2042_v52 }
 0x4fa   :  { %2045 = vrcp.f32 %v989_v53 }
 0x4fb   :  { %v2044_v55 = vpop.eup %2043 }
 0x4fc   :  { %v918_v5 = vadd.f32 1.0, %v2044_v55 }
 0x4fe   :  { %2047 = vrcp.f32 %v918_v5 }
 0x504   :  { %v2046_v60 = vpop.eup %2045 }
 0x505   :  { %v992_v2 = vmul.f32 %v2046_v60, %v981_v58  ;;  %v998_v20 = vsub.f32 1.0, %v2046_v60  ;;  %v1004_v23 = vmul.f32 %v2046_v60, %v2677_v17  ;;  %v1033_v58 = vld [vmem:[#allocation2 + $0xc] sm:$0xf] }
 0x507   :  { %v996_v7 = vadd.f32 %v994_v62, %v992_v2 }
 0x508   :  { %v2048_v9 = vpop.eup %2047 }
 0x509   :  { %2049 = vtanh.f32 %v996_v7  ;;  %v921_v15 = vmul.f32 %v2048_v9, %v910_v8  ;;  %v927_v25 = vsub.f32 1.0, %v2048_v9  ;;  %v933_v28 = vmul.f32 %v2048_v9, %v2682_v22 }
 0x50b   :  { %v925_v18 = vadd.f32 %v923_v11, %v921_v15 }
 0x50d   :  { %2051 = vtanh.f32 %v925_v18 }
 0x513   :  { %v2050_v61 = vpop.eup %2049 }
 0x514   :  { %1000 = vrot.lane.b32.xlu0 %v2050_v61, %s2117_s4 }
 0x517   :  { %v2052_v19 = vpop.eup %2051 }
 0x518   :  { %929 = vrot.lane.b32.xlu1 %v2052_v19, %s2117_s4  ;;  %v1162_v19 = vrot.slane %v1104_v47, 2 }
 0x586   :  { %v1001_v21 = vpop.permute.xlu0 %1000 }
 0x587   :  { %v1003_v1 = vmul.f32 %v1001_v21, %v998_v20 }
 0x589   :  { %v2715_v24 = vadd.f32 %v1004_v23, %v1003_v1 }
 0x58a   :  { %v930_v27 = vpop.permute.xlu1 %929 }
 0x58b   :  { %v932_v30 = vmul.f32 %v930_v27, %v927_v25  ;;  %v1105_v31 = vpack.c.bf16 %v2715_v24, %v2715_v24  ;;  %v1091_v25 = vrot.slane %v1033_v58, 2 }
 0x58d   :  { %v2720_v33 = vadd.f32 %v933_v28, %v932_v30  ;;  %1107 = vrot.lane.b32.xlu0 %v1105_v31, %s2117_s4 }
 0x58f   :  { %v1034_v35 = vpack.c.bf16 %v2720_v33, %v2720_v33 }
 0x591   :  { %1036 = vrot.lane.b32.xlu1 %v1034_v35, %s2117_s4 }
 0x5ff   :  { %v1108_v37 = vpop.permute.xlu0 %1107 }
 0x600   :  { %1994 = vmatmul.mubr.msk.bf16.vlgmr.msra.gmra.mrb[16].mxu1 %vm521_vm3, %v1108_v37 }
 0x601   :  { %1281 = vmatpush1.bf16.msra.mxu1 %v2430_v29  ;;  %1312 = vmatprep.mubr.bf16.mxu1 %v2113_v3 }
 0x602   :  { %1282 = vmatprep.subr.bf16.mxu1 %v2440_v34 }
 0x603   :  { %v1037_v40 = vpop.permute.xlu1 %1036 }
 0x604   :  { %1992 = vmatmul.mubr.msk.bf16.vlgmr.msra.gmra.mrb[16].mxu0 %vm521_vm3, %v1037_v40 }
 0x605   :  { %1210 = vmatpush1.bf16.msra.mxu0 %v2438_v32  ;;  %1283 = vmatpush1.bf16.msra.mxu1 %v2463_v42 }
 0x606   :  { %1211 = vmatprep.subr.bf16.mxu0 %v2445_v36  ;;  %1284 = vmatprep.subr.bf16.mxu1 %v2475_v46 }
 0x607   :  { %1241 = vmatprep.mubr.bf16.mxu0 %v2113_v3 }
 0x609   :  { %1212 = vmatpush1.bf16.msra.mxu0 %v2472_v45  ;;  %1285 = vmatpush1.bf16.msra.mxu1 %v2501_v54 }
 0x60a   :  { %1213 = vmatprep.subr.bf16.mxu0 %v2481_v48  ;;  %1286 = vmatprep.subr.bf16.mxu1 %v2510_v57 }
 0x60d   :  { %1214 = vmatpush1.bf16.msra.mxu0 %v2507_v56  ;;  %1287 = vmatpush1.bf16.msra.mxu1 %v2525_v63 }
 0x60e   :  { %1215 = vmatprep.subr.bf16.mxu0 %v2516_v59  ;;  %1448 = vmatprep.subr.bf16.mxu1 %v2396_v4 }
 0x611   :  { %1216 = vmatpush1.bf16.msra.mxu0 %v2528_v0 }
 0x612   :  { %1377 = vmatprep.subr.bf16.mxu0 %v2398_v10 }
 0x6d3   :  { %v1146_v41 = vpop.f32.mrb[16].mxu1 }
 0x6d4   :  { %v1147_v43 = vadd.f32 %v1146_v41, %v2622_v13  ;;  %v1148_v44 = vpop.f32.mrb[17].mxu1 }
 0x6d5   :  { %v1150_v49 = vpop.f32.mrb[18].mxu1  ;;  %v1149_v18 = vadd.f32 %v1148_v44, %v2634_v39 }
 0x6d6   :  { %v1153_v50 = vadd.f32 %v1147_v43, %v1104_v47  ;;  %v1151_v51 = vpop.f32.mrb[19].mxu1 }
 0x6d7   :  { %v1075_v52 = vpop.f32.mrb[16].mxu0 }
 0x6d8   :  { %v1995_v53 = vmul.f32 -1.442695, %v1153_v50  ;;  %v1076_v55 = vadd.f32 %v1075_v52, %v2619_v12  ;;  %v1077_v5 = vpop.f32.mrb[17].mxu0 }
 0x6d9   :  { %v1079_v60 = vpop.f32.mrb[18].mxu0  ;;  %v1078_v23 = vadd.f32 %v1077_v5, %v2631_v38 }
 0x6da   :  { %2053 = vpow2.f32 %v1995_v53  ;;  %v1082_v62 = vadd.f32 %v1076_v55, %v1033_v58  ;;  %v1080_v2 = vpop.f32.mrb[19].mxu0 }
 0x6db   :  { %v1272_v2 = vld [vmem:[#allocation3 + $0xc] sm:$0xf] }
 0x6dc   :  { %v1993_v7 = vmul.f32 -1.442695, %v1082_v62 }
 0x6de   :  { %2055 = vpow2.f32 %v1993_v7 }
 0x6e4   :  { %v2054_v8 = vpop.eup %2053 }
 0x6e5   :  { %v1157_v9 = vadd.f32 1.0, %v2054_v8 }
 0x6e7   :  { %2057 = vrcp.f32 %v1157_v9 }
 0x6e8   :  { %v2056_v11 = vpop.eup %2055 }
 0x6e9   :  { %v1086_v15 = vadd.f32 1.0, %v2056_v11 }
 0x6eb   :  { %2059 = vrcp.f32 %v1086_v15 }
 0x6f1   :  { %v2058_v61 = vpop.eup %2057 }
 0x6f2   :  { %v1160_v20 = vmul.f32 %v2058_v61, %v1149_v18  ;;  %v1166_v35 = vsub.f32 1.0, %v2058_v61  ;;  %v1172_v40 = vmul.f32 %v2058_v61, %v2715_v24 }
 0x6f4   :  { %v1164_v21 = vadd.f32 %v1162_v19, %v1160_v20  ;;  %v1201_v19 = vld [vmem:[#allocation2 + $0x10] sm:$0xf] }
 0x6f5   :  { %v2060_v1 = vpop.eup %2059 }
 0x6f6   :  { %2061 = vtanh.f32 %v1164_v21  ;;  %v1089_v27 = vmul.f32 %v2060_v1, %v1078_v23  ;;  %v1095_v44 = vsub.f32 1.0, %v2060_v1  ;;  %v1101_v49 = vmul.f32 %v2060_v1, %v2720_v33 }
 0x6f8   :  { %v1093_v28 = vadd.f32 %v1091_v25, %v1089_v27 }
 0x6fa   :  { %2063 = vtanh.f32 %v1093_v28 }
 0x700   :  { %v2062_v30 = vpop.eup %2061 }
 0x701   :  { %1168 = vrot.lane.b32.xlu0 %v2062_v30, %s2117_s4 }
 0x704   :  { %v2064_v31 = vpop.eup %2063 }
 0x705   :  { %1097 = vrot.lane.b32.xlu1 %v2064_v31, %s2117_s4 }
 0x773   :  { %v1169_v37 = vpop.permute.xlu0 %1168 }
 0x774   :  { %v1171_v41 = vmul.f32 %v1169_v37, %v1166_v35  ;;  %v1330_v37 = vrot.slane %v1272_v2, 2 }
 0x776   :  { %v2753_v43 = vadd.f32 %v1172_v40, %v1171_v41 }
 0x777   :  { %v1098_v47 = vpop.permute.xlu1 %1097 }
 0x778   :  { %v1100_v50 = vmul.f32 %v1098_v47, %v1095_v44  ;;  %v1273_v51 = vpack.c.bf16 %v2753_v43, %v2753_v43 }
 0x77a   :  { %v2758_v52 = vadd.f32 %v1101_v49, %v1100_v50  ;;  %1275 = vrot.lane.b32.xlu0 %v1273_v51, %s2117_s4  ;;  %v1259_v49 = vrot.slane %v1201_v19, 2 }
 0x77c   :  { %v1202_v53 = vpack.c.bf16 %v2758_v52, %v2758_v52 }
 0x77e   :  { %1204 = vrot.lane.b32.xlu1 %v1202_v53, %s2117_s4 }
 0x7ec   :  { %v1276_v55 = vpop.permute.xlu0 %1275 }
 0x7ed   :  { %1998 = vmatmul.mubr.msk.bf16.vlgmr.msra.gmra.mrb[20].mxu1 %vm521_vm3, %v1276_v55 }
 0x7ee   :  { %1449 = vmatpush1.bf16.msra.mxu1 %v2430_v29  ;;  %1480 = vmatprep.mubr.bf16.mxu1 %v2113_v3 }
 0x7ef   :  { %1450 = vmatprep.subr.bf16.mxu1 %v2440_v34 }
 0x7f0   :  { %v1205_v5 = vpop.permute.xlu1 %1204 }
 0x7f1   :  { %1996 = vmatmul.mubr.msk.bf16.vlgmr.msra.gmra.mrb[20].mxu0 %vm521_vm3, %v1205_v5 }
 0x7f2   :  { %1378 = vmatpush1.bf16.msra.mxu0 %v2438_v32  ;;  %1451 = vmatpush1.bf16.msra.mxu1 %v2463_v42 }
 0x7f3   :  { %1379 = vmatprep.subr.bf16.mxu0 %v2445_v36  ;;  %1452 = vmatprep.subr.bf16.mxu1 %v2475_v46 }
 0x7f4   :  { %1409 = vmatprep.mubr.bf16.mxu0 %v2113_v3 }
 0x7f6   :  { %1380 = vmatpush1.bf16.msra.mxu0 %v2472_v45  ;;  %1453 = vmatpush1.bf16.msra.mxu1 %v2501_v54 }
 0x7f7   :  { %1381 = vmatprep.subr.bf16.mxu0 %v2481_v48  ;;  %1454 = vmatprep.subr.bf16.mxu1 %v2510_v57 }
 0x7fa   :  { %1382 = vmatpush1.bf16.msra.mxu0 %v2507_v56  ;;  %1455 = vmatpush1.bf16.msra.mxu1 %v2525_v63 }
 0x7fb   :  { %1383 = vmatprep.subr.bf16.mxu0 %v2516_v59  ;;  %1616 = vmatprep.subr.bf16.mxu1 %v2396_v4 }
 0x7fe   :  { %1384 = vmatpush1.bf16.msra.mxu0 %v2528_v0 }
 0x7ff   :  { %1545 = vmatprep.subr.bf16.mxu0 %v2398_v10 }
 0x8c0   :  { %v1314_v58 = vpop.f32.mrb[20].mxu1 }
 0x8c1   :  { %v1315_v60 = vadd.f32 %v1314_v58, %v2622_v13  ;;  %v1316_v62 = vpop.f32.mrb[21].mxu1 }
 0x8c2   :  { %v1318_v7 = vpop.f32.mrb[22].mxu1  ;;  %v1317_v31 = vadd.f32 %v1316_v62, %v2634_v39 }
 0x8c3   :  { %v1321_v8 = vadd.f32 %v1315_v60, %v1272_v2  ;;  %v1319_v9 = vpop.f32.mrb[23].mxu1 }
 0x8c4   :  { %v1243_v11 = vpop.f32.mrb[20].mxu0 }
 0x8c5   :  { %v1999_v15 = vmul.f32 -1.442695, %v1321_v8  ;;  %v1244_v18 = vadd.f32 %v1243_v11, %v2619_v12  ;;  %v1245_v61 = vpop.f32.mrb[21].mxu0 }
 0x8c6   :  { %v1247_v20 = vpop.f32.mrb[22].mxu0  ;;  %v1246_v44 = vadd.f32 %v1245_v61, %v2631_v38 }
 0x8c7   :  { %2065 = vpow2.f32 %v1999_v15  ;;  %v1250_v21 = vadd.f32 %v1244_v18, %v1201_v19  ;;  %v1248_v23 = vpop.f32.mrb[23].mxu0 }
 0x8c9   :  { %v1997_v1 = vmul.f32 -1.442695, %v1250_v21 }
 0x8cb   :  { %2067 = vpow2.f32 %v1997_v1 }
 0x8d1   :  { %v2066_v25 = vpop.eup %2065 }
 0x8d2   :  { %v1325_v27 = vadd.f32 1.0, %v2066_v25  ;;  %v1440_v25 = vld [vmem:[#allocation3 + $0x8] sm:$0xf] }
 0x8d4   :  { %2069 = vrcp.f32 %v1325_v27 }
 0x8d5   :  { %v2068_v28 = vpop.eup %2067 }
 0x8d6   :  { %v1254_v30 = vadd.f32 1.0, %v2068_v28 }
 0x8d8   :  { %2071 = vrcp.f32 %v1254_v30 }
 0x8de   :  { %v2070_v35 = vpop.eup %2069 }
 0x8df   :  { %v1328_v40 = vmul.f32 %v2070_v35, %v1317_v31  ;;  %v1334_v5 = vsub.f32 1.0, %v2070_v35  ;;  %v1340_v60 = vmul.f32 %v2070_v35, %v2753_v43 }
 0x8e1   :  { %v1332_v41 = vadd.f32 %v1330_v37, %v1328_v40 }
 0x8e2   :  { %v2072_v47 = vpop.eup %2071 }
 0x8e3   :  { %2073 = vtanh.f32 %v1332_v41  ;;  %v1257_v50 = vmul.f32 %v2072_v47, %v1246_v44  ;;  %v1263_v7 = vsub.f32 1.0, %v2072_v47  ;;  %v1269_v9 = vmul.f32 %v2072_v47, %v2758_v52  ;;  %v1369_v41 = vld [vmem:[#allocation2 + $0x14] sm:$0xf] }
 0x8e5   :  { %v1261_v51 = vadd.f32 %v1259_v49, %v1257_v50 }
 0x8e7   :  { %2075 = vtanh.f32 %v1261_v51 }
 0x8ed   :  { %v2074_v53 = vpop.eup %2073 }
 0x8ee   :  { %1336 = vrot.lane.b32.xlu0 %v2074_v53, %s2117_s4 }
 0x8f1   :  { %v2076_v55 = vpop.eup %2075 }
 0x8f2   :  { %1265 = vrot.lane.b32.xlu1 %v2076_v55, %s2117_s4 }
 0x960   :  { %v1337_v58 = vpop.permute.xlu0 %1336 }
 0x961   :  { %v1339_v62 = vmul.f32 %v1337_v58, %v1334_v5  ;;  %v1498_v58 = vrot.slane %v1440_v25, 2 }
 0x963   :  { %v2791_v2 = vadd.f32 %v1340_v60, %v1339_v62 }
 0x964   :  { %v1266_v8 = vpop.permute.xlu1 %1265 }
 0x965   :  { %v1268_v11 = vmul.f32 %v1266_v8, %v1263_v7  ;;  %v1441_v15 = vpack.c.bf16 %v2791_v2, %v2791_v2 }
 0x967   :  { %v2796_v18 = vadd.f32 %v1269_v9, %v1268_v11  ;;  %1443 = vrot.lane.b32.xlu0 %v1441_v15, %s2117_s4  ;;  %v1427_v9 = vrot.slane %v1369_v41, 2 }
 0x969   :  { %v1370_v61 = vpack.c.bf16 %v2796_v18, %v2796_v18 }
 0x96b   :  { %1372 = vrot.lane.b32.xlu1 %v1370_v61, %s2117_s4 }
 0x9d9   :  { %v1444_v19 = vpop.permute.xlu0 %1443 }
 0x9da   :  { %2002 = vmatmul.mubr.msk.bf16.vlgmr.msra.gmra.mrb[24].mxu1 %vm521_vm3, %v1444_v19 }
 0x9db   :  { %1617 = vmatpush1.bf16.msra.mxu1 %v2430_v29  ;;  %1648 = vmatprep.mubr.bf16.mxu1 %v2113_v3 }
 0x9dc   :  { %1618 = vmatprep.subr.bf16.mxu1 %v2440_v34 }
 0x9dd   :  { %v1373_v20 = vpop.permute.xlu1 %1372 }
 0x9de   :  { %2000 = vmatmul.mubr.msk.bf16.vlgmr.msra.gmra.mrb[24].mxu0 %vm521_vm3, %v1373_v20 }
 0x9df   :  { %1546 = vmatpush1.bf16.msra.mxu0 %v2438_v32  ;;  %1619 = vmatpush1.bf16.msra.mxu1 %v2463_v42 }
 0x9e0   :  { %1547 = vmatprep.subr.bf16.mxu0 %v2445_v36  ;;  %1620 = vmatprep.subr.bf16.mxu1 %v2475_v46 }
 0x9e1   :  { %1577 = vmatprep.mubr.bf16.mxu0 %v2113_v3 }
 0x9e3   :  { %1548 = vmatpush1.bf16.msra.mxu0 %v2472_v45  ;;  %1621 = vmatpush1.bf16.msra.mxu1 %v2501_v54 }
 0x9e4   :  { %1549 = vmatprep.subr.bf16.mxu0 %v2481_v48  ;;  %1622 = vmatprep.subr.bf16.mxu1 %v2510_v57 }
 0x9e7   :  { %1550 = vmatpush1.bf16.msra.mxu0 %v2507_v56  ;;  %1623 = vmatpush1.bf16.msra.mxu1 %v2525_v63 }
 0x9e8   :  { %1551 = vmatprep.subr.bf16.mxu0 %v2516_v59  ;;  %1783 = vmatprep.subr.bf16.mxu1 %v2396_v4 }
 0x9eb   :  { %1552 = vmatpush1.bf16.msra.mxu0 %v2528_v0 }
 0x9ec   :  { %1713 = vmatprep.subr.bf16.mxu0 %v2398_v10 }
 0xaad   :  { %v1482_v21 = vpop.f32.mrb[24].mxu1 }
 0xaae   :  { %v1483_v23 = vadd.f32 %v1482_v21, %v2622_v13  ;;  %v1484_v1 = vpop.f32.mrb[25].mxu1 }
 0xaaf   :  { %v1486_v27 = vpop.f32.mrb[26].mxu1  ;;  %v1485_v55 = vadd.f32 %v1484_v1, %v2634_v39 }
 0xab0   :  { %v1489_v28 = vadd.f32 %v1483_v23, %v1440_v25  ;;  %v1487_v30 = vpop.f32.mrb[27].mxu1 }
 0xab1   :  { %v1411_v31 = vpop.f32.mrb[24].mxu0 }
 0xab2   :  { %v2003_v35 = vmul.f32 -1.442695, %v1489_v28  ;;  %v1412_v37 = vadd.f32 %v1411_v31, %v2619_v12  ;;  %v1413_v40 = vpop.f32.mrb[25].mxu0 }
 0xab3   :  { %v1415_v44 = vpop.f32.mrb[26].mxu0  ;;  %v1414_v7 = vadd.f32 %v1413_v40, %v2631_v38 }
 0xab4   :  { %2077 = vpow2.f32 %v2003_v35  ;;  %v1418_v4 = vadd.f32 %v1412_v37, %v1369_v41  ;;  %v1416_v47 = vpop.f32.mrb[27].mxu0 }
 0xab6   :  { %v2001_v49 = vmul.f32 -1.442695, %v1418_v4 }
 0xab8   :  { %2079 = vpow2.f32 %v2001_v49 }
 0xabe   :  { %v2078_v10 = vpop.eup %2077 }
 0xabf   :  { %v1493_v50 = vadd.f32 1.0, %v2078_v10 }
 0xac1   :  { %2081 = vrcp.f32 %v1493_v50 }
 0xac2   :  { %v2080_v51 = vpop.eup %2079 }
 0xac3   :  { %v1422_v53 = vadd.f32 1.0, %v2080_v51 }
 0xac5   :  { %2083 = vrcp.f32 %v1422_v53 }
 0xacb   :  { %v2082_v5 = vpop.eup %2081 }
 0xacc   :  { %v1496_v60 = vmul.f32 %v2082_v5, %v1485_v55  ;;  %v1502_v20 = vsub.f32 1.0, %v2082_v5  ;;  %v1508_v23 = vmul.f32 %v2082_v5, %v2791_v2 }
 0xace   :  { %v1500_v62 = vadd.f32 %v1498_v58, %v1496_v60 }
 0xacf   :  { %v2084_v8 = vpop.eup %2083 }
 0xad0   :  { %2085 = vtanh.f32 %v1500_v62  ;;  %v1425_v11 = vmul.f32 %v2084_v8, %v1414_v7  ;;  %v1431_v27 = vsub.f32 1.0, %v2084_v8  ;;  %v1437_v30 = vmul.f32 %v2084_v8, %v2796_v18 }
 0xad2   :  { %v1429_v15 = vadd.f32 %v1427_v9, %v1425_v11 }
 0xad4   :  { %2087 = vtanh.f32 %v1429_v15 }
 0xada   :  { %v2086_v61 = vpop.eup %2085 }
 0xadb   :  { %1504 = vrot.lane.b32.xlu0 %v2086_v61, %s2117_s4 }
 0xade   :  { %v2088_v19 = vpop.eup %2087 }
 0xadf   :  { %1433 = vrot.lane.b32.xlu1 %v2088_v19, %s2117_s4 }
 0xb4d   :  { %v1505_v21 = vpop.permute.xlu0 %1504 }
 0xb4e   :  { %v1507_v1 = vmul.f32 %v1505_v21, %v1502_v20 }
 0xb50   :  { %v2829_v25 = vadd.f32 %v1508_v23, %v1507_v1 }
 0xb51   :  { %v1434_v28 = vpop.permute.xlu1 %1433 }
 0xb52   :  { %v1436_v31 = vmul.f32 %v1434_v28, %v1431_v27  ;;  %v1609_v35 = vpack.c.bf16 %v2829_v25, %v2829_v25 }
 0xb54   :  { %v2834_v37 = vadd.f32 %v1437_v30, %v1436_v31  ;;  %1611 = vrot.lane.b32.xlu0 %v1609_v35, %s2117_s4 }
 0xb56   :  { %v1538_v40 = vpack.c.bf16 %v2834_v37, %v2834_v37 }
 0xb58   :  { %1540 = vrot.lane.b32.xlu1 %v1538_v40, %s2117_s4 }
 0xbc6   :  { %v1612_v41 = vpop.permute.xlu0 %1611 }
 0xbc7   :  { %2006 = vmatmul.mubr.msk.bf16.vlgmr.msra.gmra.mrb[28].mxu1 %vm521_vm3, %v1612_v41 }
 0xbc8   :  { %1784 = vmatpush1.bf16.msra.mxu1 %v2430_v29  ;;  %1815 = vmatprep.mubr.bf16.mxu1 %v2113_v3 }
 0xbc9   :  { %1785 = vmatprep.subr.bf16.mxu1 %v2440_v34  ;;  %v1608_v34 = vld [vmem:[#allocation3 + $0x4] sm:$0xf] }
 0xbca   :  { %v1541_v44 = vpop.permute.xlu1 %1540  ;;  %v1666_v55 = vrot.slane %v1608_v34, 2 }
 0xbcb   :  { %2004 = vmatmul.mubr.msk.bf16.vlgmr.msra.gmra.mrb[28].mxu0 %vm521_vm3, %v1541_v44 }
 0xbcc   :  { %1714 = vmatpush1.bf16.msra.mxu0 %v2438_v32  ;;  %1786 = vmatpush1.bf16.msra.mxu1 %v2463_v42 }
 0xbcd   :  { %1715 = vmatprep.subr.bf16.mxu0 %v2445_v36  ;;  %1787 = vmatprep.subr.bf16.mxu1 %v2475_v46 }
 0xbce   :  { %1745 = vmatprep.mubr.bf16.mxu0 %v2113_v3 }
 0xbd0   :  { %1716 = vmatpush1.bf16.msra.mxu0 %v2472_v45  ;;  %1788 = vmatpush1.bf16.msra.mxu1 %v2501_v54 }
 0xbd1   :  { %1717 = vmatprep.subr.bf16.mxu0 %v2481_v48  ;;  %1789 = vmatprep.subr.bf16.mxu1 %v2510_v57 }
 0xbd4   :  { %1718 = vmatpush1.bf16.msra.mxu0 %v2507_v56  ;;  %1790 = vmatpush1.bf16.msra.mxu1 %v2525_v63  ;;  %v1537_v56 = vld [vmem:[#allocation2 + $0x18] sm:$0xf] }
 0xbd5   :  { %1719 = vmatprep.subr.bf16.mxu0 %v2516_v59  ;;  %v1595_v7 = vrot.slane %v1537_v56, 2 }
 0xbd8   :  { %1720 = vmatpush1.bf16.msra.mxu0 %v2528_v0 }
 0xc9a   :  { %v1650_v29 = vpop.f32.mrb[28].mxu1 }
 0xc9b   :  { %v1651_v32 = vadd.f32 %v1650_v29, %v2622_v13  ;;  %v1652_v3 = vpop.f32.mrb[29].mxu1 }
 0xc9c   :  { %v1654_v36 = vpop.f32.mrb[30].mxu1  ;;  %v1653_v51 = vadd.f32 %v1652_v3, %v2634_v39 }
 0xc9d   :  { %v1657_v42 = vadd.f32 %v1651_v32, %v1608_v34  ;;  %v1655_v45 = vpop.f32.mrb[31].mxu1  ;;  %v1775_v34 = vld [vmem:[#allocation3] sm:$0xf] }
 0xc9e   :  { %v1579_v46 = vpop.f32.mrb[28].mxu0 }
 0xc9f   :  { %v2007_v48 = vmul.f32 -1.442695, %v1657_v42  ;;  %v1580_v54 = vadd.f32 %v1579_v46, %v2619_v12  ;;  %v1581_v57 = vpop.f32.mrb[29].mxu0 }
 0xca0   :  { %v1583_v4 = vpop.f32.mrb[30].mxu0  ;;  %v1582_v60 = vadd.f32 %v1581_v57, %v2631_v38 }
 0xca1   :  { %2089 = vpow2.f32 %v2007_v48  ;;  %v1586_v63 = vadd.f32 %v1580_v54, %v1537_v56  ;;  %v1584_v59 = vpop.f32.mrb[31].mxu0  ;;  %v1705_v56 = vld [vmem:[#allocation2 + $0x1c] sm:$0xf] }
 0xca3   :  { %v2005_v47 = vmul.f32 -1.442695, %v1586_v63 }
 0xca5   :  { %2091 = vpow2.f32 %v2005_v47 }
 0xcab   :  { %v2090_v0 = vpop.eup %2089 }
 0xcac   :  { %v1661_v49 = vadd.f32 1.0, %v2090_v0 }
 0xcae   :  { %2093 = vrcp.f32 %v1661_v49 }
 0xcaf   :  { %v2092_v10 = vpop.eup %2091 }
 0xcb0   :  { %v1590_v50 = vadd.f32 1.0, %v2092_v10 }
 0xcb2   :  { %2095 = vrcp.f32 %v1590_v50 }
 0xcb8   :  { %v2094_v53 = vpop.eup %2093 }
 0xcb9   :  { %v1664_v5 = vmul.f32 %v2094_v53, %v1653_v51  ;;  %v1670_v61 = vsub.f32 1.0, %v2094_v53  ;;  %v1676_v20 = vmul.f32 %v2094_v53, %v2829_v25  ;;  %v1833_v53 = vrot.slane %v1775_v34, 2 }
 0xcbb   :  { %v1668_v58 = vadd.f32 %v1666_v55, %v1664_v5 }
 0xcbc   :  { %v2096_v62 = vpop.eup %2095 }
 0xcbd   :  { %2097 = vtanh.f32 %v1668_v58  ;;  %v1593_v8 = vmul.f32 %v2096_v62, %v1582_v60  ;;  %v1599_v1 = vsub.f32 1.0, %v2096_v62  ;;  %v1605_v28 = vmul.f32 %v2096_v62, %v2834_v37 }
 0xcbe   :  { %v1763_v60 = vrot.slane %v1705_v56, 2 }
 0xcbf   :  { %v1597_v9 = vadd.f32 %v1595_v7, %v1593_v8 }
 0xcc1   :  { %2099 = vtanh.f32 %v1597_v9  ;;  %v690_v9 = vrot.slane %v2640_v6, %v2317_v14  ;;  %v1194_v6 = vrot.slane %v2753_v43, %v2317_v14  ;;  %v1013_v43 = vrot.slane %v2720_v33, %v2317_v14 }
 0xcc7   :  { %v2098_v11 = vpop.eup %2097 }
 0xcc8   :  { %1672 = vrot.lane.b32.xlu0 %v2098_v11, %s2117_s4 }
 0xccb   :  { %v2100_v15 = vpop.eup %2099 }
 0xccc   :  { %1601 = vrot.lane.b32.xlu1 %v2100_v15, %s2117_s4  ;;  %v1362_v15 = vrot.slane %v2791_v2, %v2317_v14  ;;  %v677_v2 = vrot.slane %v2644_v16, %v2317_v14 }
 0xd3a   :  { %v1673_v19 = vpop.permute.xlu0 %1672 }
 0xd3b   :  { %v1675_v21 = vmul.f32 %v1673_v19, %v1670_v61  ;;  %v1349_v61 = vrot.slane %v2796_v18, %v2317_v14 }
 0xd3d   :  { %v2865_v23 = vadd.f32 %v1676_v20, %v1675_v21 }
 0xd3e   :  { %v1602_v27 = vpop.permute.xlu1 %1601 }
 0xd3f   :  { %v1604_v30 = vmul.f32 %v1602_v27, %v1599_v1  ;;  %v1776_v31 = vpack.c.bf16 %v2865_v23, %v2865_v23 }
 0xd41   :  { %v2870_v35 = vadd.f32 %v1605_v28, %v1604_v30  ;;  %1778 = vrot.lane.b32.xlu0 %v1776_v31, %s2117_s4 }
 0xd43   :  { %v1706_v40 = vpack.c.bf16 %v2870_v35, %v2870_v35 }
 0xd45   :  { %1708 = vrot.lane.b32.xlu1 %v1706_v40, %s2117_s4 }
 0xdb3   :  { %v1779_v41 = vpop.permute.xlu0 %1778 }
 0xdb4   :  { %2010 = vmatmul.mubr.msk.bf16.vlgmr.msra.gmra.mrb[32].mxu1 %vm521_vm3, %v1779_v41 }
 0xdb7   :  { %v1709_v44 = vpop.permute.xlu1 %1708 }
 0xdb8   :  { %2008 = vmatmul.mubr.msk.bf16.vlgmr.msra.gmra.mrb[32].mxu0 %vm521_vm3, %v1709_v44 }
 0xe87   :  { %v1817_v29 = vpop.f32.mrb[32].mxu1 }
 0xe88   :  { %v1818_v32 = vadd.f32 %v1817_v29, %v2622_v13  ;;  %v1819_v3 = vpop.f32.mrb[33].mxu1  ;;  %v1181_v29 = vrot.slane %v2758_v52, %v2317_v14 }
 0xe89   :  { %v1821_v36 = vpop.f32.mrb[34].mxu1  ;;  %v1820_v50 = vadd.f32 %v1819_v3, %v2634_v39  ;;  %v858_v39 = vrot.slane %v2677_v17, %v2317_v14  ;;  %v1530_v17 = vrot.slane %v2829_v25, %v2317_v14  ;;  %v1685_v25 = vrot.slane %v2870_v35, %v2317_v14 }
 0xe8a   :  { %v1824_v42 = vadd.f32 %v1818_v32, %v1775_v34  ;;  %v1822_v45 = vpop.f32.mrb[35].mxu1  ;;  %v1517_v36 = vrot.slane %v2834_v37, %v2317_v14 }
 0xe8b   :  { %v1747_v46 = vpop.f32.mrb[32].mxu0 }
 0xe8c   :  { %v2011_v48 = vmul.f32 -1.442695, %v1824_v42  ;;  %v1748_v54 = vadd.f32 %v1747_v46, %v2619_v12  ;;  %v1749_v57 = vpop.f32.mrb[33].mxu0 }
 0xe8d   :  { %v1751_v4 = vpop.f32.mrb[34].mxu0  ;;  %v1750_v5 = vadd.f32 %v1749_v57, %v2631_v38  ;;  %v1026_v38 = vrot.slane %v2715_v24, %v2317_v14  ;;  %v1698_v24 = vrot.slane %v2865_v23, %v2317_v14 }
 0xe8e   :  { %2101 = vpow2.f32 %v2011_v48  ;;  %v1754_v63 = vadd.f32 %v1748_v54, %v1705_v56  ;;  %v1752_v59 = vpop.f32.mrb[35].mxu0 }
 0xe90   :  { %v2009_v47 = vmul.f32 -1.442695, %v1754_v63 }
 0xe92   :  { %2103 = vpow2.f32 %v2009_v47 }
 0xe98   :  { %v2102_v0 = vpop.eup %2101 }
 0xe99   :  { %v1828_v49 = vadd.f32 1.0, %v2102_v0 }
 0xe9b   :  { %2105 = vrcp.f32 %v1828_v49 }
 0xe9c   :  { %v2104_v13 = vpop.eup %2103 }
 0xe9d   :  { %v1758_v10 = vadd.f32 1.0, %v2104_v13 }
 0xe9f   :  { %2107 = vrcp.f32 %v1758_v10 }
 0xea5   :  { %v2106_v51 = vpop.eup %2105 }
 0xea6   :  { %v1831_v55 = vmul.f32 %v2106_v51, %v1820_v50  ;;  %v1837_v19 = vsub.f32 1.0, %v2106_v51  ;;  %v1843_v16 = vmul.f32 %v2106_v51, %v2865_v23  ;;  %v845_v23 = vrot.slane %v2682_v22, %v2317_v14 }
 0xea8   :  { %v1835_v12 = vadd.f32 %v1833_v53, %v1831_v55 }
 0xea9   :  { %v2108_v58 = vpop.eup %2107 }
 0xeaa   :  { %2109 = vtanh.f32 %v1835_v12  ;;  %v1761_v62 = vmul.f32 %v2108_v58, %v1750_v5  ;;  %v1767_v31 = vsub.f32 1.0, %v2108_v58  ;;  %v1773_v32 = vmul.f32 %v2108_v58, %v2870_v35 }
 0xeac   :  { %v1765_v7 = vadd.f32 %v1763_v60, %v1761_v62 }
 0xeae   :  { %2111 = vtanh.f32 %v1765_v7 }
 0xeb4   :  { %v2110_v8 = vpop.eup %2109 }
 0xeb5   :  { %1839 = vrot.lane.b32.xlu0 %v2110_v8, %s2117_s4 }
 0xeb8   :  { %v2112_v11 = vpop.eup %2111 }
 0xeb9   :  { %691 = vrot.lane.b32.xlu0 %v690_v9, %s2117_s4  ;;  %1769 = vrot.lane.b32.xlu1 %v2112_v11, %s2117_s4 }
 0xebd   :  { %1027 = vrot.lane.b32.xlu0 %v1026_v38, %s2117_s4  ;;  %859 = vrot.lane.b32.xlu1 %v858_v39, %s2117_s4 }
 0xec1   :  { %1363 = vrot.lane.b32.xlu0 %v1362_v15, %s2117_s4  ;;  %1195 = vrot.lane.b32.xlu1 %v1194_v6, %s2117_s4 }
 0xec5   :  { %1699 = vrot.lane.b32.xlu0 %v1698_v24, %s2117_s4  ;;  %1531 = vrot.lane.b32.xlu1 %v1530_v17, %s2117_s4 }
 0xec9   :  { %678 = vrot.lane.b32.xlu0 %v677_v2, %s2117_s4 }
 0xecd   :  { %1014 = vrot.lane.b32.xlu0 %v1013_v43, %s2117_s4 }
 0xed1   :  { %1350 = vrot.lane.b32.xlu0 %v1349_v61, %s2117_s4 }
 0xed5   :  { %1686 = vrot.lane.b32.xlu0 %v1685_v25, %s2117_s4 }
 0xf27   :  { %v1840_v20 = vpop.permute.xlu0 %1839 }
 0xf28   :  { %v1842_v21 = vmul.f32 %v1840_v20, %v1837_v19 }
 0xf2a   :  { %v1844_v1 = vadd.f32 %v1843_v16, %v1842_v21 }
 0xf2b   :  { %v692_v33 = vpop.permute.xlu0 %691  ;;  %v1770_v27 = vpop.permute.xlu1 %1769 }
 0xf2c   :  { %695 = vst.msk [vmem:[#allocation5 + $0xe] sm:$0x3] %vm681_vm4, %v692_v33  ;;  %v1865_v18 = vrot.slane %v1844_v1, %v2317_v14  ;;  %v1772_v44 = vmul.f32 %v1770_v27, %v1767_v31 }
 0xf2e   :  { %1866 = vrot.lane.b32.xlu1 %v1865_v18, %s2117_s4  ;;  %v1774_v22 = vadd.f32 %v1773_v32, %v1772_v44 }
 0xf2f   :  { %v1028_v28 = vpop.permute.xlu0 %1027  ;;  %v860_v30 = vpop.permute.xlu1 %859 }
 0xf30   :  { %1031 = vst.msk [vmem:[#allocation5 + $0xa] sm:$0x3] %vm681_vm4, %v1028_v28  ;;  %863 = vst.msk [vmem:[#allocation5 + $0xc] sm:$0x3] %vm681_vm4, %v860_v30  ;;  %v1852_v52 = vrot.slane %v1774_v22, %v2317_v14 }
 0xf32   :  { %846 = vrot.lane.b32.xlu1 %v845_v23, %s2117_s4 }
 0xf33   :  { %v1364_v40 = vpop.permute.xlu0 %1363  ;;  %v1196_v41 = vpop.permute.xlu1 %1195  ;;  %v1885_v4 = vld [vmem:[#allocation5 + $0xe] sm:$0x3] }
 0xf34   :  { %1367 = vst.msk [vmem:[#allocation5 + $0x6] sm:$0x3] %vm681_vm4, %v1364_v40  ;;  %1199 = vst.msk [vmem:[#allocation5 + $0x8] sm:$0x3] %vm681_vm4, %v1196_v41 }
 0xf36   :  { %1182 = vrot.lane.b32.xlu1 %v1181_v29, %s2117_s4 }
 0xf37   :  { %v1700_v3 = vpop.permute.xlu0 %1699  ;;  %v1532_v34 = vpop.permute.xlu1 %1531  ;;  %v1883_v56 = vld [vmem:[#allocation5 + $0xa] sm:$0x3]  ;;  %v1884_v13 = vld [vmem:[#allocation5 + $0xc] sm:$0x3] }
 0xf38   :  { %1703 = vst.msk [vmem:[#allocation5 + $0x2] sm:$0x3] %vm681_vm4, %v1700_v3  ;;  %1535 = vst.msk [vmem:[#allocation5 + $0x4] sm:$0x3] %vm681_vm4, %v1532_v34 }
 0xf3a   :  { %1518 = vrot.lane.b32.xlu1 %v1517_v36, %s2117_s4 }
 0xf3b   :  { %v679_v42 = vpop.permute.xlu0 %678  ;;  %v1882_v37 = vld [vmem:[#allocation5 + $0x8] sm:$0x3]  ;;  %v1881_v54 = vld [vmem:[#allocation5 + $0x6] sm:$0x3] }
 0xf3c   :  { %682 = vst.msk [vmem:[#allocation4] sm:$0x3] %vm681_vm4, %v679_v42 }
 0xf3e   :  { %1853 = vrot.lane.b32.xlu1 %v1852_v52, %s2117_s4 }
 0xf3f   :  { %v1015_v35 = vpop.permute.xlu0 %1014  ;;  %v1880_v45 = vld [vmem:[#allocation5 + $0x4] sm:$0x3]  ;;  %v1879_v46 = vld [vmem:[#allocation5 + $0x2] sm:$0x3] }
 0xf40   :  { %1018 = vst.msk [vmem:[#allocation4 + $0x4] sm:$0x3] %vm681_vm4, %v1015_v35  ;;  %1898 = vrot.lane.b32.xlu0 %v1880_v45, %s2117_s4 }
 0xf42   :  { %1896 = vrot.lane.b32.xlu1 %v1879_v46, %s2117_s4 }
 0xf43   :  { %v1351_v48 = vpop.permute.xlu0 %1350  ;;  %v1870_v62 = vld [vmem:[#allocation4] sm:$0x3] }
 0xf44   :  { %1354 = vst.msk [vmem:[#allocation4 + $0x8] sm:$0x3] %vm681_vm4, %v1351_v48  ;;  %1902 = vrot.lane.b32.xlu0 %v1882_v37, %s2117_s4 }
 0xf46   :  { %1900 = vrot.lane.b32.xlu1 %v1881_v54, %s2117_s4 }
 0xf47   :  { %v1687_v57 = vpop.permute.xlu0 %1686  ;;  %v1872_v7 = vld [vmem:[#allocation4 + $0x4] sm:$0x3] }
 0xf48   :  { %1690 = vst.msk [vmem:[#allocation4 + $0xc] sm:$0x3] %vm681_vm4, %v1687_v57 }
 0xf4a   :  { %1904 = vrot.lane.b32.xlu1 %v1883_v56, %s2117_s4 }
 0xf4b   :  { %v1874_v61 = vld [vmem:[#allocation4 + $0x8] sm:$0x3] }
 0xf4e   :  { %1908 = vrot.lane.b32.xlu1 %v1885_v4, %s2117_s4 }
 0xf4f   :  { %v1876_v20 = vld [vmem:[#allocation4 + $0xc] sm:$0x3] }
 0xfa0   :  { %v1867_v63 = vpop.permute.xlu1 %1866 }
 0xfa1   :  { %1869 = vst.msk [vmem:[#allocation5] sm:$0x3] %vm681_vm4, %v1867_v63 }
 0xfa4   :  { %v847_v59 = vpop.permute.xlu1 %846 }
 0xfa5   :  { %850 = vst.msk [vmem:[#allocation4 + $0x2] sm:$0x3] %vm681_vm4, %v847_v59 }
 0xfa8   :  { %v1183_v47 = vpop.permute.xlu1 %1182  ;;  %v1878_v0 = vld [vmem:[#allocation5] sm:$0x3] }
 0xfa9   :  { %1186 = vst.msk [vmem:[#allocation4 + $0x6] sm:$0x3] %vm681_vm4, %v1183_v47  ;;  %1894 = vrot.lane.b32.xlu0 %v1878_v0, %s2117_s4 }
 0xfac   :  { %v1519_v49 = vpop.permute.xlu1 %1518  ;;  %v1871_v8 = vld [vmem:[#allocation4 + $0x2] sm:$0x3] }
 0xfad   :  { %1522 = vst.msk [vmem:[#allocation4 + $0xa] sm:$0x3] %vm681_vm4, %v1519_v49  ;;  %1906 = vrot.lane.b32.xlu0 %v1884_v13, %s2117_s4 }
 0xfb0   :  { %v1854_v10 = vpop.permute.xlu1 %1853  ;;  %v1873_v5 = vld [vmem:[#allocation4 + $0x6] sm:$0x3] }
 0xfb1   :  { %1857 = vst.msk [vmem:[#allocation4 + $0xe] sm:$0x3] %vm681_vm4, %v1854_v10 }
 0xfb2   :  { %v1899_v53 = vpop.permute.xlu0 %1898 }
 0xfb3   :  { %v1920_v38 = vsel %vm521_vm3, %v1872_v7, %v1899_v53 }
 0xfb4   :  { %v1897_v50 = vpop.permute.xlu1 %1896  ;;  %v1875_v17 = vld [vmem:[#allocation4 + $0xa] sm:$0x3] }
 0xfb5   :  { %v1919_v39 = vsel %vm521_vm3, %v1871_v8, %v1897_v50 }
 0xfb6   :  { %v1903_v12 = vpop.permute.xlu0 %1902 }
 0xfb7   :  { %v1922_v21 = vsel %vm521_vm3, %v1874_v61, %v1903_v12 }
 0xfb8   :  { %v1901_v51 = vpop.permute.xlu1 %1900  ;;  %v1877_v9 = vld [vmem:[#allocation4 + $0xe] sm:$0x3] }
 0xfb9   :  { %v1921_v60 = vsel %vm521_vm3, %v1873_v5, %v1901_v51 }
 0xfba   :  { %v1934_v24 = vcombine.low %v1919_v39, %v1921_v60 }
 0xfbc   :  { %v1905_v55 = vpop.permute.xlu1 %1904  ;;  %v1941_v33 = vrot.slane %v1934_v24, %v2317_v14 }
 0xfbd   :  { %v1923_v43 = vsel %vm521_vm3, %v1875_v17, %v1905_v55 }
 0xfc0   :  { %v1909_v58 = vpop.permute.xlu1 %1908 }
 0xfc1   :  { %v1925_v15 = vsel %vm521_vm3, %v1877_v9, %v1909_v58 }
 0xfc2   :  { %v1950_v25 = vcombine.low %v1923_v43, %v1925_v15 }
 0xfc4   :  { %v1957_v18 = vrot.slane %v1950_v25, %v2317_v14 }
0x101b   :  { %v1895_v11 = vpop.permute.xlu0 %1894 }
0x101c   :  { %v1918_v6 = vsel %vm521_vm3, %v1870_v62, %v1895_v11 }
0x101d   :  { %v1926_v2 = vcombine.low %v1918_v6, %v1920_v38 }
0x101f   :  { %v1933_v19 = vrot.slane %v1926_v2, %v2317_v14  ;;  %v1907_v16 = vpop.permute.xlu0 %1906 }
0x1020   :  { %v1924_v1 = vsel %vm521_vm3, %v1876_v20, %v1907_v16 }
0x1021   :  { %v1942_v27 = vcombine.low %v1922_v21, %v1924_v1  ;;  %v1958_v28 = vcombine.low %v1933_v19, %v1941_v33 }
0x1023   :  { %v1949_v30 = vrot.slane %v1942_v27, %v2317_v14  ;;  %v1965_v31 = vrot.slane %v1958_v28, %v2341_v26 }
0x1025   :  { %v1966_v23 = vcombine.low %v1949_v30, %v1957_v18 }
0x1027   :  { %v1973_v40 = vrot.slane %v1966_v23, %v2341_v26 }
0x1029   :  { %v1974_v41 = vcombine.low %v1965_v31, %v1973_v40  ;;  %v1975_v44 = vcombine.high %v1965_v31, %v1973_v40 }
0x102b   :  { %1976 = vst [vmem:[%s2985_s9] sm:$0xff] %v1974_v41  ;;  %1977 = vst [vmem:[%s2985_s9 + $0x8] sm:$0xff] %v1975_v44 }

// kernel: rnn_linear_bert_forward.6
= control target key start
LH: loop header
LB: loop body
LE: loop exit
PB: predicated region body
PF: predicated region fallthrough
CT: control target
= control target key end

     0   :  { %v39_v0 = vlaneseq  ;;  %v2047_v4 = vmov 0   ;;  %v2048_v5 = vmov 1983009808   ;;  %v2049_v12 = vmov 1934713408   ;;  %s2766_s5 = inlined_call_operand.vmem [shape: f32[32,192], index: 5, kind: input, shape index: {}]   ;;  %s2767_s1 = inlined_call_operand.vmem [shape: f32[32,192], index: 1, kind: input, shape index: {}]   ;;  %s2768_s6 = inlined_call_operand.vmem [shape: f32[64,192], index: 6, kind: input, shape index: {}]   ;;  %s2769_s0 = inlined_call_operand.vmem [shape: f32[2,8,32], index: 0, kind: input, shape index: {}]   ;;  %s2770_s2 = inlined_call_operand.vmem [shape: f32[64,192], index: 2, kind: input, shape index: {}]   ;;  %s2771_s7 = inlined_call_operand.vmem [shape: f32[1,192], index: 7, kind: input, shape index: {}]   ;;  %s2772_s3 = inlined_call_operand.vmem [shape: f32[1,192], index: 3, kind: input, shape index: {}]   ;;  %s2773_s4 = inlined_call_operand.vmem [shape: f32[1,192], index: 4, kind: input, shape index: {}]   ;;  %s2774_s8 = inlined_call_operand.vmem [shape: f32[1,192], index: 8, kind: input, shape index: {}]   ;;  %s2775_s9 = inlined_call_operand.vmem [shape: f32[2,8,128], index: 9, kind: output, shape index: {}]  }
   0x1   :  { %v277_v1 = vld [vmem:[%s2766_s5 + $0x8] sm:$0xff]  ;;  %v279_v2 = vld [vmem:[%s2766_s5 + $0x18] sm:$0xff]  ;;  %v276_v3 = vld [vmem:[%s2766_s5] sm:$0xff]  ;;  %332 = vmatprep.mubr.bf16.mxu1 %v2047_v4  ;;  %v37_v6 = vunpack.c.l.s4 %v2048_v5  ;;  %206 = vmatprep.mubr.bf16.mxu0 %v2047_v4  ;;  %v68_v13 = vunpack.c.l.s4 %v2049_v12  ;;  %v2050_v33 = vmov 0.0   ;;  %vm170_vm0 = vcmask 261120  }
   0x2   :  { %v285_v7 = vpack.c.bf16 %v279_v2, %v277_v1  ;;  %v278_v8 = vld [vmem:[%s2766_s5 + $0x10] sm:$0xff]  ;;  %v281_v9 = vld [vmem:[%s2766_s5 + $0x28] sm:$0xff]  ;;  %v283_v10 = vld [vmem:[%s2766_s5 + $0x38] sm:$0xff]  ;;  %v2122_v11 = vshrl.u32 %v39_v0, 7  ;;  %vm265_vm1 = vcmask 1041408   ;;  %vm266_vm2 = vcmask 519170  }
   0x3   :  { %v284_v14 = vpack.c.bf16 %v278_v8, %v276_v3  ;;  %v287_v15 = vpack.c.bf16 %v283_v10, %v281_v9  ;;  %v280_v16 = vld [vmem:[%s2766_s5 + $0x20] sm:$0xff]  ;;  %v282_v17 = vld [vmem:[%s2766_s5 + $0x30] sm:$0xff]  ;;  %v102_v18 = vld [vmem:[%s2767_s1 + $0x8] sm:$0xff]  ;;  %v38_v19 = vunpack.c.0.s8 %v37_v6  ;;  %v69_v23 = vunpack.c.0.s8 %v68_v13 }
   0x4   :  { %300 = vmatprep.subr.bf16.mxu1 %v285_v7  ;;  %v104_v20 = vld [vmem:[%s2767_s1 + $0x18] sm:$0xff]  ;;  %v101_v21 = vld [vmem:[%s2767_s1] sm:$0xff]  ;;  %v103_v22 = vld [vmem:[%s2767_s1 + $0x10] sm:$0xff]  ;;  %v286_v24 = vpack.c.bf16 %v282_v17, %v280_v16  ;;  %vm453_vm4 = vcmask 523264   ;;  %vm613_vm5 = vcmask 517120  }
   0x5   :  { %301 = vmatpush1.bf16.msra.mxu1 %v284_v14  ;;  %v155_v25 = vpack.c.bf16 %v104_v20, %v102_v18  ;;  %v154_v26 = vpack.c.bf16 %v103_v22, %v101_v21  ;;  %v416_v27 = vld [vmem:[%s2768_s6 + $0x8] sm:$0xff]  ;;  %v418_v28 = vld [vmem:[%s2768_s6 + $0x18] sm:$0xff]  ;;  %v33_v29 = vld [vmem:[%s2769_s0] sm:$0xff]  ;;  %v2152_v30 = vsub.s32 %v38_v19, %v2122_v11  ;;  %v2162_v38 = vsub.s32 %v69_v23, %v2122_v11 }
   0x6   :  { %302 = vmatprep.subr.bf16.mxu1 %v287_v15  ;;  %v2154_v31 = vpack.c.bf16 %v418_v28, %v416_v27  ;;  %v34_v32 = vld [vmem:[%s2769_s0 + $0x8] sm:$0xff]  ;;  %v35_v34 = vcombine.high %v33_v29, %v2050_v33  ;;  %v108_v40 = vld [vmem:[%s2767_s1 + $0x38] sm:$0xff]  ;;  %v105_v41 = vld [vmem:[%s2767_s1 + $0x20] sm:$0xff] }
   0x7   :  { %174 = vmatprep.subr.bf16.mxu0 %v155_v25  ;;  %v42_v35 = vrot.slane %v33_v29, %v2152_v30  ;;  %v50_v36 = vcombine.high %v34_v32, %v2050_v33  ;;  %v57_v37 = vrot.slane %v34_v32, %v2152_v30  ;;  %v106_v39 = vld [vmem:[%s2767_s1 + $0x28] sm:$0xff]  ;;  %v107_v44 = vld [vmem:[%s2767_s1 + $0x30] sm:$0xff]  ;;  %v402_v50 = vld [vmem:[%s2770_s2 + $0x18] sm:$0xff] }
   0x8   :  { %175 = vmatpush1.bf16.msra.mxu0 %v154_v26  ;;  %v49_v42 = vrot.slane %v35_v34, %v2152_v30  ;;  %v157_v43 = vpack.c.bf16 %v108_v40, %v106_v39  ;;  %v156_v48 = vpack.c.bf16 %v107_v44, %v105_v41  ;;  %v400_v49 = vld [vmem:[%s2770_s2 + $0x8] sm:$0xff]  ;;  %v415_v5 = vld [vmem:[%s2768_s6] sm:$0xff]  ;;  %v417_v6 = vld [vmem:[%s2768_s6 + $0x10] sm:$0xff] }
   0x9   :  { %303 = vmatpush1.bf16.msra.mxu1 %v286_v24  ;;  %v64_v45 = vrot.slane %v50_v36, %v2152_v30  ;;  %v65_v46 = vcombine.low %v42_v35, %v57_v37  ;;  %v66_v47 = vcombine.high %v42_v35, %v57_v37  ;;  %v2187_v55 = vpack.c.bf16 %v402_v50, %v400_v49  ;;  %v420_v10 = vld [vmem:[%s2768_s6 + $0x28] sm:$0xff]  ;;  %v399_v12 = vld [vmem:[%s2770_s2] sm:$0xff]  ;;  %v401_v13 = vld [vmem:[%s2770_s2 + $0x10] sm:$0xff] }
   0xa   :  { %540 = vmatprep.subr.bf16.mxu1 %v2154_v31  ;;  %176 = vmatprep.subr.bf16.mxu0 %v157_v43  ;;  %v422_v14 = vld [vmem:[%s2768_s6 + $0x38] sm:$0xff]  ;;  %v404_v15 = vld [vmem:[%s2770_s2 + $0x28] sm:$0xff]  ;;  %v2220_v18 = vpack.c.bf16 %v417_v6, %v415_v5  ;;  %v419_v19 = vld [vmem:[%s2768_s6 + $0x20] sm:$0xff]  ;;  %v2228_v21 = vpack.c.bf16 %v401_v13, %v399_v12 }
   0xb   :  { %v73_v51 = vrot.slane %v65_v46, %v2162_v38  ;;  %v80_v52 = vrot.slane %v66_v47, %v2162_v38  ;;  %v81_v53 = vcombine.low %v49_v42, %v64_v45  ;;  %v82_v54 = vcombine.high %v49_v42, %v64_v45  ;;  %v406_v16 = vld [vmem:[%s2770_s2 + $0x38] sm:$0xff]  ;;  %v421_v20 = vld [vmem:[%s2768_s6 + $0x30] sm:$0xff]  ;;  %v424_v24 = vld [vmem:[%s2768_s6 + $0x48] sm:$0xff] }
   0xc   :  { %177 = vmatpush1.bf16.msra.mxu0 %v156_v48  ;;  %v2230_v23 = vpack.c.bf16 %v422_v14, %v420_v10  ;;  %v2235_v25 = vpack.c.bf16 %v406_v16, %v404_v15  ;;  %v403_v26 = vld [vmem:[%s2770_s2 + $0x20] sm:$0xff]  ;;  %v405_v27 = vld [vmem:[%s2770_s2 + $0x30] sm:$0xff]  ;;  %v426_v28 = vld [vmem:[%s2768_s6 + $0x58] sm:$0xff] }
   0xd   :  { %v89_v56 = vrot.slane %v81_v53, %v2162_v38  ;;  %v96_v57 = vrot.slane %v82_v54, %v2162_v38  ;;  %v97_v58 = vcombine.high %v73_v51, %v2050_v33  ;;  %v98_v59 = vcombine.high %v80_v52, %v2050_v33  ;;  %457 = vmatprep.subr.bf16.mxu0 %v2187_v55  ;;  %v408_v29 = vld [vmem:[%s2770_s2 + $0x48] sm:$0xff]  ;;  %v410_v32 = vld [vmem:[%s2770_s2 + $0x58] sm:$0xff]  ;;  %v423_v34 = vld [vmem:[%s2768_s6 + $0x40] sm:$0xff] }
   0xe   :  { %v425_v35 = vld [vmem:[%s2768_s6 + $0x50] sm:$0xff]  ;;  %v2262_v36 = vpack.c.bf16 %v405_v27, %v403_v26  ;;  %v2265_v37 = vpack.c.bf16 %v426_v28, %v424_v24  ;;  %v428_v39 = vld [vmem:[%s2768_s6 + $0x68] sm:$0xff]  ;;  %v2271_v40 = vpack.c.bf16 %v410_v32, %v408_v29  ;;  %v407_v41 = vld [vmem:[%s2770_s2 + $0x40] sm:$0xff] }
   0xf   :  { %v99_v60 = vcombine.high %v89_v56, %v2050_v33  ;;  %v100_v61 = vcombine.high %v96_v57, %v2050_v33  ;;  %v117_v62 = vcombine.low %v73_v51, %v97_v58  ;;  %v118_v63 = vcombine.low %v80_v52, %v98_v59  ;;  %v409_v42 = vld [vmem:[%s2770_s2 + $0x50] sm:$0xff]  ;;  %v430_v43 = vld [vmem:[%s2768_s6 + $0x78] sm:$0xff]  ;;  %v412_v44 = vld [vmem:[%s2770_s2 + $0x68] sm:$0xff] }
  0x10   :  { %v2253_v33 = vpack.c.bf16 %v421_v20, %v419_v19  ;;  %v414_v45 = vld [vmem:[%s2770_s2 + $0x78] sm:$0xff]  ;;  %v2291_v46 = vpack.c.bf16 %v425_v35, %v423_v34  ;;  %v427_v47 = vld [vmem:[%s2768_s6 + $0x60] sm:$0xff]  ;;  %v2297_v48 = vpack.c.bf16 %v409_v42, %v407_v41  ;;  %v2300_v49 = vpack.c.bf16 %v430_v43, %v428_v39  ;;  %v429_v50 = vld [vmem:[%s2768_s6 + $0x70] sm:$0xff] }
  0x11   :  { %v125_v0 = vrot.slane %v117_v62, %v2152_v30  ;;  %v132_v1 = vrot.slane %v118_v63, %v2152_v30  ;;  %v134_v2 = vcombine.low %v89_v56, %v99_v60  ;;  %v135_v3 = vcombine.low %v96_v57, %v100_v61  ;;  %v411_v52 = vld [vmem:[%s2770_s2 + $0x60] sm:$0xff]  ;;  %v413_v53 = vld [vmem:[%s2770_s2 + $0x70] sm:$0xff]  ;;  %vm2362_vm3 = vmor %vm266_vm2, %vm265_vm1 }
  0x12   :  { %v2306_v51 = vpack.c.bf16 %v414_v45, %v412_v44  ;;  %v2315_v54 = vpack.c.bf16 %v429_v50, %v427_v47  ;;  %v2318_v56 = vpack.c.bf16 %v413_v53, %v411_v52  ;;  %v2347_v57 = vsub.s32 0, %v2122_v11  ;;  %v288_v58 = vld [vmem:[%s2771_s7] sm:$0x3] }
  0x13   :  { %v133_v7 = vcombine.low %v125_v0, %v132_v1  ;;  %v142_v8 = vrot.slane %v134_v2, %v2152_v30  ;;  %v149_v9 = vrot.slane %v135_v3, %v2152_v30  ;;  %v2353_v59 = vsub.s32 1, %v2122_v11  ;;  %v158_v60 = vld [vmem:[%s2772_s3] sm:$0x3] }
  0x14   :  { %v293_v61 = vrot.slane %v288_v58, %v2347_v57  ;;  %v163_v62 = vrot.slane %v158_v60, %v2347_v57 }
  0x15   :  { %v150_v17 = vcombine.low %v142_v8, %v149_v9  ;;  %v297_v63 = vrot.slane %v288_v58, %v2353_v59  ;;  %v167_v0 = vrot.slane %v158_v60, %v2353_v59  ;;  %v431_v58 = vld [vmem:[%s2773_s4] sm:$0x3]  ;;  %s2051_s4 = smov 64  }
  0x16   :  { %v432_v60 = vld [vmem:[%s2774_s8] sm:$0x3] }
  0x17   :  { %v153_v22 = vpack.c.bf16 %v150_v17, %v133_v7 }
  0x19   :  { %1915 = vmatmul.mubr.msk.bf16.vlgmr.msra.gmra.mrb[0].mxu1 %vm170_vm0, %v153_v22  ;;  %1914 = vmatmul.mubr.msk.bf16.vlgmr.msra.gmra.mrb[0].mxu0 %vm170_vm0, %v153_v22 }
  0x1a   :  { %541 = vmatpush1.bf16.msra.mxu1 %v2220_v18  ;;  %458 = vmatpush1.bf16.msra.mxu0 %v2228_v21 }
  0x1b   :  { %542 = vmatprep.subr.bf16.mxu1 %v2230_v23  ;;  %459 = vmatprep.subr.bf16.mxu0 %v2235_v25 }
  0x1c   :  { %572 = vmatprep.mubr.bf16.mxu1 %v2047_v4  ;;  %489 = vmatprep.mubr.bf16.mxu0 %v2047_v4 }
  0x1e   :  { %543 = vmatpush1.bf16.msra.mxu1 %v2253_v33  ;;  %460 = vmatpush1.bf16.msra.mxu0 %v2262_v36 }
  0x1f   :  { %544 = vmatprep.subr.bf16.mxu1 %v2265_v37  ;;  %461 = vmatprep.subr.bf16.mxu0 %v2271_v40 }
  0x22   :  { %545 = vmatpush1.bf16.msra.mxu1 %v2291_v46  ;;  %462 = vmatpush1.bf16.msra.mxu0 %v2297_v48 }
  0x23   :  { %546 = vmatprep.subr.bf16.mxu1 %v2300_v49  ;;  %463 = vmatprep.subr.bf16.mxu0 %v2306_v51 }
  0x26   :  { %547 = vmatpush1.bf16.msra.mxu1 %v2315_v54  ;;  %464 = vmatpush1.bf16.msra.mxu0 %v2318_v56 }
  0x27   :  { %708 = vmatprep.subr.bf16.mxu1 %v2154_v31  ;;  %637 = vmatprep.subr.bf16.mxu0 %v2187_v55 }
  0x29   :  { %573 = vmatmul.mubr.bf16.vlgmr.msra.gmra.mrb[4].mxu1 %v2047_v4  ;;  %490 = vmatmul.mubr.bf16.vlgmr.msra.gmra.mrb[4].mxu0 %v2047_v4 }
  0x2a   :  { %709 = vmatpush1.bf16.msra.mxu1 %v2220_v18  ;;  %638 = vmatpush1.bf16.msra.mxu0 %v2228_v21 }
  0x2b   :  { %710 = vmatprep.subr.bf16.mxu1 %v2230_v23  ;;  %639 = vmatprep.subr.bf16.mxu0 %v2235_v25 }
  0x2c   :  { %740 = vmatprep.mubr.bf16.mxu1 %v2047_v4  ;;  %669 = vmatprep.mubr.bf16.mxu0 %v2047_v4 }
  0x2e   :  { %711 = vmatpush1.bf16.msra.mxu1 %v2253_v33  ;;  %640 = vmatpush1.bf16.msra.mxu0 %v2262_v36 }
  0x2f   :  { %712 = vmatprep.subr.bf16.mxu1 %v2265_v37  ;;  %641 = vmatprep.subr.bf16.mxu0 %v2271_v40 }
  0x32   :  { %713 = vmatpush1.bf16.msra.mxu1 %v2291_v46  ;;  %642 = vmatpush1.bf16.msra.mxu0 %v2297_v48 }
  0x33   :  { %714 = vmatprep.subr.bf16.mxu1 %v2300_v49  ;;  %643 = vmatprep.subr.bf16.mxu0 %v2306_v51 }
  0x36   :  { %715 = vmatpush1.bf16.msra.mxu1 %v2315_v54  ;;  %644 = vmatpush1.bf16.msra.mxu0 %v2318_v56 }
  0x37   :  { %876 = vmatprep.subr.bf16.mxu1 %v2154_v31  ;;  %805 = vmatprep.subr.bf16.mxu0 %v2187_v55 }
  0xec   :  { %v334_v1 = vpop.f32.mrb[0].mxu1  ;;  %v208_v2 = vpop.f32.mrb[0].mxu0 }
  0xed   :  { %v335_v3 = vadd.f32 %v334_v1, %v293_v61  ;;  %v336_v5 = vpop.f32.mrb[1].mxu1  ;;  %v209_v6 = vadd.f32 %v208_v2, %v163_v62  ;;  %v210_v7 = vpop.f32.mrb[1].mxu0  ;;  %v2409_v1 = vrot.slane %v431_v58, %v2347_v57  ;;  %v2412_v2 = vrot.slane %v432_v60, %v2347_v57 }
  0xee   :  { %v337_v11 = vadd.f32 %v336_v5, %v297_v63  ;;  %v338_v8 = vpop.f32.mrb[2].mxu1  ;;  %v211_v9 = vadd.f32 %v210_v7, %v167_v0  ;;  %v212_v10 = vpop.f32.mrb[2].mxu0 }
  0xef   :  { %v339_v12 = vadd.f32 %v338_v8, %v293_v61  ;;  %v340_v13 = vpop.f32.mrb[3].mxu1  ;;  %v213_v14 = vadd.f32 %v212_v10, %v163_v62  ;;  %v214_v15 = vpop.f32.mrb[3].mxu0 }
  0xf0   :  { %v347_v16 = vcombine.low %v335_v3, %v337_v11  ;;  %v348_v17 = vcombine.high %v335_v3, %v337_v11  ;;  %v341_v19 = vadd.f32 %v340_v13, %v297_v63  ;;  %v221_v20 = vcombine.low %v209_v6, %v211_v9 }
  0xf1   :  { %v222_v24 = vcombine.high %v209_v6, %v211_v9  ;;  %v215_v26 = vadd.f32 %v214_v15, %v167_v0 }
  0xf2   :  { %v355_v27 = vrot.slane %v347_v16, %v2152_v30  ;;  %v362_v28 = vrot.slane %v348_v17, %v2152_v30  ;;  %v365_v29 = vcombine.low %v339_v12, %v341_v19  ;;  %v366_v32 = vcombine.high %v339_v12, %v341_v19 }
  0xf3   :  { %v229_v34 = vrot.slane %v221_v20, %v2152_v30  ;;  %v236_v35 = vrot.slane %v222_v24, %v2152_v30  ;;  %v239_v39 = vcombine.low %v213_v14, %v215_v26  ;;  %v240_v41 = vcombine.high %v213_v14, %v215_v26 }
  0xf4   :  { %v363_v42 = vcombine.high %v355_v27, %v355_v27  ;;  %v364_v43 = vcombine.high %v362_v28, %v362_v28  ;;  %391 = vst.msk [vmem:[#allocation3] sm:$0xf] %vm2362_vm3, %v355_v27  ;;  %393 = vst.msk [vmem:[#allocation3 + $0x8] sm:$0xf] %vm2362_vm3, %v362_v28  ;;  %v373_v44 = vrot.slane %v365_v29, %v2152_v30 }
  0xf5   :  { %v380_v45 = vrot.slane %v366_v32, %v2152_v30  ;;  %v237_v47 = vcombine.high %v229_v34, %v229_v34  ;;  %v238_v50 = vcombine.high %v236_v35, %v236_v35  ;;  %268 = vst.msk [vmem:[#allocation2] sm:$0xf] %vm2362_vm3, %v229_v34  ;;  %270 = vst.msk [vmem:[#allocation2 + $0x8] sm:$0xf] %vm2362_vm3, %v236_v35 }
  0xf6   :  { %v247_v52 = vrot.slane %v239_v39, %v2152_v30  ;;  %v254_v53 = vrot.slane %v240_v41, %v2152_v30  ;;  %392 = vst.msk [vmem:[#allocation3 + $0x4] sm:$0xf] %vm2362_vm3, %v363_v42  ;;  %394 = vst.msk [vmem:[#allocation3 + $0xc] sm:$0xf] %vm2362_vm3, %v364_v43  ;;  %v381_v61 = vcombine.high %v373_v44, %v373_v44 }
  0xf7   :  { %v382_v62 = vcombine.high %v380_v45, %v380_v45  ;;  %395 = vst.msk [vmem:[#allocation3 + $0x10] sm:$0xf] %vm2362_vm3, %v373_v44  ;;  %397 = vst.msk [vmem:[#allocation3 + $0x18] sm:$0xf] %vm2362_vm3, %v380_v45  ;;  %v2421_v27 = vrot.slane %v431_v58, %v2353_v59  ;;  %v2424_v28 = vrot.slane %v432_v60, %v2353_v59 }
  0xf8   :  { %269 = vst.msk [vmem:[#allocation2 + $0x4] sm:$0xf] %vm2362_vm3, %v237_v47  ;;  %271 = vst.msk [vmem:[#allocation2 + $0xc] sm:$0xf] %vm2362_vm3, %v238_v50  ;;  %v255_v63 = vcombine.high %v247_v52, %v247_v52  ;;  %v256_v0 = vcombine.high %v254_v53, %v254_v53 }
  0xf9   :  { %272 = vst.msk [vmem:[#allocation2 + $0x10] sm:$0xf] %vm2362_vm3, %v247_v52  ;;  %274 = vst.msk [vmem:[#allocation2 + $0x18] sm:$0xf] %vm2362_vm3, %v254_v53 }
  0xfa   :  { %396 = vst.msk [vmem:[#allocation3 + $0x14] sm:$0xf] %vm2362_vm3, %v381_v61  ;;  %398 = vst.msk [vmem:[#allocation3 + $0x1c] sm:$0xf] %vm2362_vm3, %v382_v62 }
  0xfb   :  { %273 = vst.msk [vmem:[#allocation2 + $0x14] sm:$0xf] %vm2362_vm3, %v255_v63  ;;  %275 = vst.msk [vmem:[#allocation2 + $0x1c] sm:$0xf] %vm2362_vm3, %v256_v0 }
  0xfc   :  { %v574_v3 = vpop.f32.mrb[4].mxu1  ;;  %v433_v5 = vld [vmem:[#allocation2] sm:$0xf]  ;;  %v491_v6 = vpop.f32.mrb[4].mxu0 }
  0xfd   :  { %v575_v7 = vadd.f32 %v574_v3, %v2412_v2  ;;  %v576_v11 = vpop.f32.mrb[5].mxu1  ;;  %v492_v8 = vadd.f32 %v491_v6, %v2409_v1  ;;  %v493_v9 = vpop.f32.mrb[5].mxu0  ;;  %v507_v35 = vrot.slane %v433_v5, 2 }
  0xfe   :  { %v578_v10 = vpop.f32.mrb[6].mxu1  ;;  %v495_v12 = vpop.f32.mrb[6].mxu0  ;;  %v494_v29 = vadd.f32 %v493_v9, %v2421_v27  ;;  %v577_v34 = vadd.f32 %v576_v11, %v2424_v28 }
  0xff   :  { %v579_v57 = vpop.f32.mrb[7].mxu1  ;;  %v498_v14 = vadd.f32 %v492_v8, %v433_v5  ;;  %v496_v15 = vpop.f32.mrb[7].mxu0  ;;  %v700_v12 = vld [vmem:[#allocation3 + $0x18] sm:$0xf] }
 0x101   :  { %v520_v13 = vld [vmem:[#allocation3 + $0x1c] sm:$0xf]  ;;  %v1916_v17 = vmul.f32 -1.442695, %v498_v14 }
 0x102   :  { %v581_v16 = vadd.f32 %v575_v7, %v520_v13  ;;  %v590_v42 = vrot.slane %v520_v13, 2 }
 0x103   :  { %1951 = vpow2.f32 %v1916_v17 }
 0x104   :  { %v1917_v19 = vmul.f32 -1.442695, %v581_v16 }
 0x106   :  { %1953 = vpow2.f32 %v1917_v19 }
 0x10d   :  { %v1952_v20 = vpop.eup %1951 }
 0x10e   :  { %v502_v24 = vadd.f32 1.0, %v1952_v20  ;;  %v629_v20 = vld [vmem:[#allocation2 + $0x4] sm:$0xf] }
 0x110   :  { %v1954_v22 = vpop.eup %1953  ;;  %1955 = vrcp.f32 %v502_v24 }
 0x111   :  { %v585_v26 = vadd.f32 1.0, %v1954_v22 }
 0x113   :  { %1957 = vrcp.f32 %v585_v26 }
 0x11a   :  { %v1956_v32 = vpop.eup %1955 }
 0x11b   :  { %v505_v41 = vmul.f32 %v1956_v32, %v494_v29  ;;  %v511_v61 = vsub.f32 1.0, %v1956_v32  ;;  %v517_v63 = vmul.f32 0.0, %v1956_v32 }
 0x11d   :  { %v1958_v39 = vpop.eup %1957  ;;  %v509_v45 = vadd.f32 %v507_v35, %v505_v41 }
 0x11e   :  { %v588_v43 = vmul.f32 %v1958_v39, %v577_v34  ;;  %v594_v50 = vsub.f32 1.0, %v1958_v39  ;;  %v600_v53 = vmul.f32 0.0, %v1958_v39 }
 0x120   :  { %v592_v44 = vadd.f32 %v590_v42, %v588_v43  ;;  %v758_v43 = vrot.slane %v700_v12, 2 }
 0x122   :  { %1959 = vtanh.f32 %v592_v44 }
 0x123   :  { %1961 = vtanh.f32 %v509_v45 }
 0x12c   :  { %v1960_v47 = vpop.eup %1959 }
 0x12d   :  { %596 = vrot.lane.b32.xlu0 %v1960_v47, %s2051_s4  ;;  %v1962_v59 = vpop.eup %1961 }
 0x131   :  { %513 = vrot.lane.b32.xlu0 %v1962_v59, %s2051_s4 }
 0x19f   :  { %v597_v52 = vpop.permute.xlu0 %596 }
 0x1a0   :  { %v599_v58 = vmul.f32 %v597_v52, %v594_v50  ;;  %v687_v50 = vrot.slane %v629_v20, 2 }
 0x1a2   :  { %v2430_v60 = vadd.f32 %v600_v53, %v599_v58 }
 0x1a3   :  { %v514_v62 = vpop.permute.xlu0 %513 }
 0x1a4   :  { %v516_v0 = vmul.f32 %v514_v62, %v511_v61  ;;  %v701_v3 = vpack.c.bf16 %v2430_v60, %v2430_v60 }
 0x1a6   :  { %v2434_v5 = vadd.f32 %v517_v63, %v516_v0  ;;  %703 = vrot.lane.b32.xlu1 %v701_v3, %s2051_s4 }
 0x1a8   :  { %v630_v6 = vpack.c.bf16 %v2434_v5, %v2434_v5 }
 0x1aa   :  { %632 = vrot.lane.b32.xlu1 %v630_v6, %s2051_s4 }
 0x218   :  { %v704_v7 = vpop.permute.xlu1 %703 }
 0x219   :  { %1920 = vmatmul.mubr.msk.bf16.vlgmr.msra.gmra.mrb[8].mxu1 %vm453_vm4, %v704_v7 }
 0x21a   :  { %877 = vmatpush1.bf16.msra.mxu1 %v2220_v18  ;;  %908 = vmatprep.mubr.bf16.mxu1 %v2047_v4 }
 0x21b   :  { %878 = vmatprep.subr.bf16.mxu1 %v2230_v23 }
 0x21c   :  { %v633_v11 = vpop.permute.xlu1 %632 }
 0x21d   :  { %1918 = vmatmul.mubr.msk.bf16.vlgmr.msra.gmra.mrb[8].mxu0 %vm453_vm4, %v633_v11 }
 0x21e   :  { %806 = vmatpush1.bf16.msra.mxu0 %v2228_v21  ;;  %879 = vmatpush1.bf16.msra.mxu1 %v2253_v33 }
 0x21f   :  { %807 = vmatprep.subr.bf16.mxu0 %v2235_v25  ;;  %880 = vmatprep.subr.bf16.mxu1 %v2265_v37 }
 0x220   :  { %837 = vmatprep.mubr.bf16.mxu0 %v2047_v4 }
 0x222   :  { %808 = vmatpush1.bf16.msra.mxu0 %v2262_v36  ;;  %881 = vmatpush1.bf16.msra.mxu1 %v2291_v46 }
 0x223   :  { %809 = vmatprep.subr.bf16.mxu0 %v2271_v40  ;;  %882 = vmatprep.subr.bf16.mxu1 %v2300_v49 }
 0x226   :  { %810 = vmatpush1.bf16.msra.mxu0 %v2297_v48  ;;  %883 = vmatpush1.bf16.msra.mxu1 %v2315_v54 }
 0x227   :  { %811 = vmatprep.subr.bf16.mxu0 %v2306_v51  ;;  %1044 = vmatprep.subr.bf16.mxu1 %v2154_v31 }
 0x22a   :  { %812 = vmatpush1.bf16.msra.mxu0 %v2318_v56 }
 0x22b   :  { %973 = vmatprep.subr.bf16.mxu0 %v2187_v55 }
 0x2ec   :  { %v742_v8 = vpop.f32.mrb[8].mxu1 }
 0x2ed   :  { %v743_v9 = vadd.f32 %v742_v8, %v2412_v2  ;;  %v744_v10 = vpop.f32.mrb[9].mxu1 }
 0x2ee   :  { %v746_v13 = vpop.f32.mrb[10].mxu1  ;;  %v745_v41 = vadd.f32 %v744_v10, %v2424_v28 }
 0x2ef   :  { %v749_v57 = vadd.f32 %v743_v9, %v700_v12  ;;  %v747_v14 = vpop.f32.mrb[11].mxu1 }
 0x2f0   :  { %v671_v15 = vpop.f32.mrb[8].mxu0 }
 0x2f1   :  { %v1921_v16 = vmul.f32 -1.442695, %v749_v57  ;;  %v672_v17 = vadd.f32 %v671_v15, %v2409_v1  ;;  %v673_v19 = vpop.f32.mrb[9].mxu0 }
 0x2f2   :  { %v675_v22 = vpop.f32.mrb[10].mxu0  ;;  %v674_v47 = vadd.f32 %v673_v19, %v2421_v27  ;;  %v868_v19 = vld [vmem:[#allocation3 + $0x14] sm:$0xf] }
 0x2f3   :  { %1963 = vpow2.f32 %v1921_v16  ;;  %v678_v24 = vadd.f32 %v672_v17, %v629_v20  ;;  %v676_v26 = vpop.f32.mrb[11].mxu0 }
 0x2f5   :  { %v1919_v29 = vmul.f32 -1.442695, %v678_v24 }
 0x2f7   :  { %1965 = vpow2.f32 %v1919_v29 }
 0x2fd   :  { %v1964_v32 = vpop.eup %1963 }
 0x2fe   :  { %v753_v34 = vadd.f32 1.0, %v1964_v32 }
 0x300   :  { %1967 = vrcp.f32 %v753_v34 }
 0x301   :  { %v1966_v35 = vpop.eup %1965 }
 0x302   :  { %v682_v39 = vadd.f32 1.0, %v1966_v35  ;;  %v797_v35 = vld [vmem:[#allocation2 + $0x8] sm:$0xf] }
 0x304   :  { %1969 = vrcp.f32 %v682_v39 }
 0x30a   :  { %v1968_v42 = vpop.eup %1967 }
 0x30b   :  { %v756_v44 = vmul.f32 %v1968_v42, %v745_v41  ;;  %v762_v62 = vsub.f32 1.0, %v1968_v42  ;;  %v768_v0 = vmul.f32 %v1968_v42, %v2430_v60 }
 0x30d   :  { %v760_v45 = vadd.f32 %v758_v43, %v756_v44 }
 0x30e   :  { %v1970_v59 = vpop.eup %1969 }
 0x30f   :  { %1971 = vtanh.f32 %v760_v45  ;;  %v685_v52 = vmul.f32 %v1970_v59, %v674_v47  ;;  %v691_v7 = vsub.f32 1.0, %v1970_v59  ;;  %v697_v8 = vmul.f32 %v1970_v59, %v2434_v5 }
 0x311   :  { %v689_v53 = vadd.f32 %v687_v50, %v685_v52 }
 0x313   :  { %1973 = vtanh.f32 %v689_v53  ;;  %v926_v53 = vrot.slane %v868_v19, 2 }
 0x319   :  { %v1972_v58 = vpop.eup %1971 }
 0x31a   :  { %764 = vrot.lane.b32.xlu0 %v1972_v58, %s2051_s4 }
 0x31d   :  { %v1974_v61 = vpop.eup %1973 }
 0x31e   :  { %693 = vrot.lane.b32.xlu1 %v1974_v61, %s2051_s4 }
 0x38c   :  { %v765_v63 = vpop.permute.xlu0 %764 }
 0x38d   :  { %v767_v3 = vmul.f32 %v765_v63, %v762_v62 }
 0x38f   :  { %v2467_v6 = vadd.f32 %v768_v0, %v767_v3  ;;  %v855_v0 = vrot.slane %v797_v35, 2 }
 0x390   :  { %v694_v11 = vpop.permute.xlu1 %693 }
 0x391   :  { %v696_v9 = vmul.f32 %v694_v11, %v691_v7  ;;  %v869_v10 = vpack.c.bf16 %v2467_v6, %v2467_v6 }
 0x393   :  { %v2472_v12 = vadd.f32 %v697_v8, %v696_v9  ;;  %871 = vrot.lane.b32.xlu0 %v869_v10, %s2051_s4 }
 0x395   :  { %v798_v13 = vpack.c.bf16 %v2472_v12, %v2472_v12 }
 0x397   :  { %800 = vrot.lane.b32.xlu1 %v798_v13, %s2051_s4 }
 0x405   :  { %v872_v57 = vpop.permute.xlu0 %871 }
 0x406   :  { %1924 = vmatmul.mubr.msk.bf16.vlgmr.msra.gmra.mrb[12].mxu1 %vm453_vm4, %v872_v57 }
 0x407   :  { %1045 = vmatpush1.bf16.msra.mxu1 %v2220_v18  ;;  %1076 = vmatprep.mubr.bf16.mxu1 %v2047_v4 }
 0x408   :  { %1046 = vmatprep.subr.bf16.mxu1 %v2230_v23 }
 0x409   :  { %v801_v14 = vpop.permute.xlu1 %800 }
 0x40a   :  { %1922 = vmatmul.mubr.msk.bf16.vlgmr.msra.gmra.mrb[12].mxu0 %vm453_vm4, %v801_v14 }
 0x40b   :  { %974 = vmatpush1.bf16.msra.mxu0 %v2228_v21  ;;  %1047 = vmatpush1.bf16.msra.mxu1 %v2253_v33 }
 0x40c   :  { %975 = vmatprep.subr.bf16.mxu0 %v2235_v25  ;;  %1048 = vmatprep.subr.bf16.mxu1 %v2265_v37 }
 0x40d   :  { %1005 = vmatprep.mubr.bf16.mxu0 %v2047_v4 }
 0x40f   :  { %976 = vmatpush1.bf16.msra.mxu0 %v2262_v36  ;;  %1049 = vmatpush1.bf16.msra.mxu1 %v2291_v46 }
 0x410   :  { %977 = vmatprep.subr.bf16.mxu0 %v2271_v40  ;;  %1050 = vmatprep.subr.bf16.mxu1 %v2300_v49 }
 0x413   :  { %978 = vmatpush1.bf16.msra.mxu0 %v2297_v48  ;;  %1051 = vmatpush1.bf16.msra.mxu1 %v2315_v54 }
 0x414   :  { %979 = vmatprep.subr.bf16.mxu0 %v2306_v51  ;;  %1212 = vmatprep.subr.bf16.mxu1 %v2154_v31 }
 0x417   :  { %980 = vmatpush1.bf16.msra.mxu0 %v2318_v56 }
 0x418   :  { %1141 = vmatprep.subr.bf16.mxu0 %v2187_v55 }
 0x4d9   :  { %v910_v15 = vpop.f32.mrb[12].mxu1 }
 0x4da   :  { %v911_v16 = vadd.f32 %v910_v15, %v2412_v2  ;;  %v912_v17 = vpop.f32.mrb[13].mxu1 }
 0x4db   :  { %v914_v20 = vpop.f32.mrb[14].mxu1  ;;  %v913_v50 = vadd.f32 %v912_v17, %v2424_v28 }
 0x4dc   :  { %v917_v22 = vadd.f32 %v911_v16, %v868_v19  ;;  %v915_v24 = vpop.f32.mrb[15].mxu1 }
 0x4dd   :  { %v839_v26 = vpop.f32.mrb[12].mxu0 }
 0x4de   :  { %v1925_v29 = vmul.f32 -1.442695, %v917_v22  ;;  %v840_v32 = vadd.f32 %v839_v26, %v2409_v1  ;;  %v841_v34 = vpop.f32.mrb[13].mxu0 }
 0x4df   :  { %v843_v39 = vpop.f32.mrb[14].mxu0  ;;  %v842_v62 = vadd.f32 %v841_v34, %v2421_v27 }
 0x4e0   :  { %1975 = vpow2.f32 %v1925_v29  ;;  %v846_v41 = vadd.f32 %v840_v32, %v797_v35  ;;  %v844_v42 = vpop.f32.mrb[15].mxu0  ;;  %v1036_v39 = vld [vmem:[#allocation3 + $0x10] sm:$0xf] }
 0x4e2   :  { %v1923_v43 = vmul.f32 -1.442695, %v846_v41 }
 0x4e4   :  { %1977 = vpow2.f32 %v1923_v43 }
 0x4ea   :  { %v1976_v44 = vpop.eup %1975 }
 0x4eb   :  { %v921_v45 = vadd.f32 1.0, %v1976_v44 }
 0x4ed   :  { %1979 = vrcp.f32 %v921_v45 }
 0x4ee   :  { %v1978_v47 = vpop.eup %1977 }
 0x4ef   :  { %v850_v59 = vadd.f32 1.0, %v1978_v47 }
 0x4f1   :  { %1981 = vrcp.f32 %v850_v59 }
 0x4f7   :  { %v1980_v52 = vpop.eup %1979 }
 0x4f8   :  { %v924_v58 = vmul.f32 %v1980_v52, %v913_v50  ;;  %v930_v9 = vsub.f32 1.0, %v1980_v52  ;;  %v936_v13 = vmul.f32 %v1980_v52, %v2467_v6  ;;  %v965_v50 = vld [vmem:[#allocation2 + $0xc] sm:$0xf] }
 0x4fa   :  { %v928_v61 = vadd.f32 %v926_v53, %v924_v58 }
 0x4fb   :  { %v1982_v63 = vpop.eup %1981 }
 0x4fc   :  { %1983 = vtanh.f32 %v928_v61  ;;  %v853_v3 = vmul.f32 %v1982_v63, %v842_v62  ;;  %v859_v15 = vsub.f32 1.0, %v1982_v63  ;;  %v865_v17 = vmul.f32 %v1982_v63, %v2472_v12 }
 0x4fe   :  { %v857_v7 = vadd.f32 %v855_v0, %v853_v3 }
 0x500   :  { %1985 = vtanh.f32 %v857_v7 }
 0x506   :  { %v1984_v11 = vpop.eup %1983 }
 0x507   :  { %932 = vrot.lane.b32.xlu0 %v1984_v11, %s2051_s4 }
 0x50a   :  { %v1986_v8 = vpop.eup %1985 }
 0x50b   :  { %861 = vrot.lane.b32.xlu1 %v1986_v8, %s2051_s4  ;;  %v1094_v8 = vrot.slane %v1036_v39, 2 }
 0x579   :  { %v933_v10 = vpop.permute.xlu0 %932 }
 0x57a   :  { %v935_v57 = vmul.f32 %v933_v10, %v930_v9 }
 0x57c   :  { %v2505_v14 = vadd.f32 %v936_v13, %v935_v57 }
 0x57d   :  { %v862_v16 = vpop.permute.xlu1 %861 }
 0x57e   :  { %v864_v19 = vmul.f32 %v862_v16, %v859_v15  ;;  %v1037_v20 = vpack.c.bf16 %v2505_v14, %v2505_v14  ;;  %v1023_v15 = vrot.slane %v965_v50, 2 }
 0x580   :  { %v2510_v22 = vadd.f32 %v865_v17, %v864_v19  ;;  %1039 = vrot.lane.b32.xlu0 %v1037_v20, %s2051_s4 }
 0x582   :  { %v966_v24 = vpack.c.bf16 %v2510_v22, %v2510_v22 }
 0x584   :  { %968 = vrot.lane.b32.xlu1 %v966_v24, %s2051_s4 }
 0x5f2   :  { %v1040_v26 = vpop.permute.xlu0 %1039 }
 0x5f3   :  { %1928 = vmatmul.mubr.msk.bf16.vlgmr.msra.gmra.mrb[16].mxu1 %vm453_vm4, %v1040_v26 }
 0x5f4   :  { %1213 = vmatpush1.bf16.msra.mxu1 %v2220_v18  ;;  %1244 = vmatprep.mubr.bf16.mxu1 %v2047_v4 }
 0x5f5   :  { %1214 = vmatprep.subr.bf16.mxu1 %v2230_v23 }
 0x5f6   :  { %v969_v29 = vpop.permute.xlu1 %968 }
 0x5f7   :  { %1926 = vmatmul.mubr.msk.bf16.vlgmr.msra.gmra.mrb[16].mxu0 %vm453_vm4, %v969_v29 }
 0x5f8   :  { %1142 = vmatpush1.bf16.msra.mxu0 %v2228_v21  ;;  %1215 = vmatpush1.bf16.msra.mxu1 %v2253_v33 }
 0x5f9   :  { %1143 = vmatprep.subr.bf16.mxu0 %v2235_v25  ;;  %1216 = vmatprep.subr.bf16.mxu1 %v2265_v37 }
 0x5fa   :  { %1173 = vmatprep.mubr.bf16.mxu0 %v2047_v4 }
 0x5fc   :  { %1144 = vmatpush1.bf16.msra.mxu0 %v2262_v36  ;;  %1217 = vmatpush1.bf16.msra.mxu1 %v2291_v46 }
 0x5fd   :  { %1145 = vmatprep.subr.bf16.mxu0 %v2271_v40  ;;  %1218 = vmatprep.subr.bf16.mxu1 %v2300_v49 }
 0x600   :  { %1146 = vmatpush1.bf16.msra.mxu0 %v2297_v48  ;;  %1219 = vmatpush1.bf16.msra.mxu1 %v2315_v54 }
 0x601   :  { %1147 = vmatprep.subr.bf16.mxu0 %v2306_v51  ;;  %1380 = vmatprep.subr.bf16.mxu1 %v2154_v31 }
 0x604   :  { %1148 = vmatpush1.bf16.msra.mxu0 %v2318_v56 }
 0x605   :  { %1309 = vmatprep.subr.bf16.mxu0 %v2187_v55 }
 0x6c6   :  { %v1078_v32 = vpop.f32.mrb[16].mxu1 }
 0x6c7   :  { %v1079_v34 = vadd.f32 %v1078_v32, %v2412_v2  ;;  %v1080_v35 = vpop.f32.mrb[17].mxu1 }
 0x6c8   :  { %v1082_v41 = vpop.f32.mrb[18].mxu1  ;;  %v1081_v7 = vadd.f32 %v1080_v35, %v2424_v28 }
 0x6c9   :  { %v1085_v42 = vadd.f32 %v1079_v34, %v1036_v39  ;;  %v1083_v43 = vpop.f32.mrb[19].mxu1 }
 0x6ca   :  { %v1007_v44 = vpop.f32.mrb[16].mxu0 }
 0x6cb   :  { %v1929_v45 = vmul.f32 -1.442695, %v1085_v42  ;;  %v1008_v47 = vadd.f32 %v1007_v44, %v2409_v1  ;;  %v1009_v59 = vpop.f32.mrb[17].mxu0 }
 0x6cc   :  { %v1011_v52 = vpop.f32.mrb[18].mxu0  ;;  %v1010_v13 = vadd.f32 %v1009_v59, %v2421_v27 }
 0x6cd   :  { %1987 = vpow2.f32 %v1929_v45  ;;  %v1014_v53 = vadd.f32 %v1008_v47, %v965_v50  ;;  %v1012_v58 = vpop.f32.mrb[19].mxu0 }
 0x6ce   :  { %v1204_v58 = vld [vmem:[#allocation3 + $0xc] sm:$0xf] }
 0x6cf   :  { %v1927_v61 = vmul.f32 -1.442695, %v1014_v53 }
 0x6d1   :  { %1989 = vpow2.f32 %v1927_v61 }
 0x6d7   :  { %v1988_v62 = vpop.eup %1987 }
 0x6d8   :  { %v1089_v63 = vadd.f32 1.0, %v1988_v62 }
 0x6da   :  { %1991 = vrcp.f32 %v1089_v63 }
 0x6db   :  { %v1990_v0 = vpop.eup %1989 }
 0x6dc   :  { %v1018_v3 = vadd.f32 1.0, %v1990_v0 }
 0x6de   :  { %1993 = vrcp.f32 %v1018_v3 }
 0x6e4   :  { %v1992_v11 = vpop.eup %1991 }
 0x6e5   :  { %v1092_v9 = vmul.f32 %v1992_v11, %v1081_v7  ;;  %v1098_v24 = vsub.f32 1.0, %v1992_v11  ;;  %v1104_v29 = vmul.f32 %v1992_v11, %v2505_v14 }
 0x6e7   :  { %v1096_v10 = vadd.f32 %v1094_v8, %v1092_v9  ;;  %v1133_v8 = vld [vmem:[#allocation2 + $0x10] sm:$0xf] }
 0x6e8   :  { %v1994_v57 = vpop.eup %1993 }
 0x6e9   :  { %1995 = vtanh.f32 %v1096_v10  ;;  %v1021_v16 = vmul.f32 %v1994_v57, %v1010_v13  ;;  %v1027_v35 = vsub.f32 1.0, %v1994_v57  ;;  %v1033_v41 = vmul.f32 %v1994_v57, %v2510_v22 }
 0x6eb   :  { %v1025_v17 = vadd.f32 %v1023_v15, %v1021_v16 }
 0x6ed   :  { %1997 = vtanh.f32 %v1025_v17 }
 0x6f3   :  { %v1996_v19 = vpop.eup %1995 }
 0x6f4   :  { %1100 = vrot.lane.b32.xlu0 %v1996_v19, %s2051_s4 }
 0x6f7   :  { %v1998_v20 = vpop.eup %1997 }
 0x6f8   :  { %1029 = vrot.lane.b32.xlu1 %v1998_v20, %s2051_s4 }
 0x766   :  { %v1101_v26 = vpop.permute.xlu0 %1100 }
 0x767   :  { %v1103_v32 = vmul.f32 %v1101_v26, %v1098_v24  ;;  %v1262_v26 = vrot.slane %v1204_v58, 2 }
 0x769   :  { %v2543_v34 = vadd.f32 %v1104_v29, %v1103_v32 }
 0x76a   :  { %v1030_v39 = vpop.permute.xlu1 %1029 }
 0x76b   :  { %v1032_v42 = vmul.f32 %v1030_v39, %v1027_v35  ;;  %v1205_v43 = vpack.c.bf16 %v2543_v34, %v2543_v34 }
 0x76d   :  { %v2548_v44 = vadd.f32 %v1033_v41, %v1032_v42  ;;  %1207 = vrot.lane.b32.xlu0 %v1205_v43, %s2051_s4  ;;  %v1191_v41 = vrot.slane %v1133_v8, 2 }
 0x76f   :  { %v1134_v45 = vpack.c.bf16 %v2548_v44, %v2548_v44 }
 0x771   :  { %1136 = vrot.lane.b32.xlu1 %v1134_v45, %s2051_s4 }
 0x7df   :  { %v1208_v47 = vpop.permute.xlu0 %1207 }
 0x7e0   :  { %1932 = vmatmul.mubr.msk.bf16.vlgmr.msra.gmra.mrb[20].mxu1 %vm453_vm4, %v1208_v47 }
 0x7e1   :  { %1381 = vmatpush1.bf16.msra.mxu1 %v2220_v18  ;;  %1412 = vmatprep.mubr.bf16.mxu1 %v2047_v4 }
 0x7e2   :  { %1382 = vmatprep.subr.bf16.mxu1 %v2230_v23 }
 0x7e3   :  { %v1137_v59 = vpop.permute.xlu1 %1136 }
 0x7e4   :  { %1930 = vmatmul.mubr.msk.bf16.vlgmr.msra.gmra.mrb[20].mxu0 %vm453_vm4, %v1137_v59 }
 0x7e5   :  { %1310 = vmatpush1.bf16.msra.mxu0 %v2228_v21  ;;  %1383 = vmatpush1.bf16.msra.mxu1 %v2253_v33 }
 0x7e6   :  { %1311 = vmatprep.subr.bf16.mxu0 %v2235_v25  ;;  %1384 = vmatprep.subr.bf16.mxu1 %v2265_v37 }
 0x7e7   :  { %1341 = vmatprep.mubr.bf16.mxu0 %v2047_v4 }
 0x7e9   :  { %1312 = vmatpush1.bf16.msra.mxu0 %v2262_v36  ;;  %1385 = vmatpush1.bf16.msra.mxu1 %v2291_v46 }
 0x7ea   :  { %1313 = vmatprep.subr.bf16.mxu0 %v2271_v40  ;;  %1386 = vmatprep.subr.bf16.mxu1 %v2300_v49 }
 0x7ed   :  { %1314 = vmatpush1.bf16.msra.mxu0 %v2297_v48  ;;  %1387 = vmatpush1.bf16.msra.mxu1 %v2315_v54 }
 0x7ee   :  { %1315 = vmatprep.subr.bf16.mxu0 %v2306_v51  ;;  %1548 = vmatprep.subr.bf16.mxu1 %v2154_v31 }
 0x7f1   :  { %1316 = vmatpush1.bf16.msra.mxu0 %v2318_v56 }
 0x7f2   :  { %1477 = vmatprep.subr.bf16.mxu0 %v2187_v55 }
 0x8b3   :  { %v1246_v50 = vpop.f32.mrb[20].mxu1 }
 0x8b4   :  { %v1247_v52 = vadd.f32 %v1246_v50, %v2412_v2  ;;  %v1248_v53 = vpop.f32.mrb[21].mxu1 }
 0x8b5   :  { %v1250_v61 = vpop.f32.mrb[22].mxu1  ;;  %v1249_v20 = vadd.f32 %v1248_v53, %v2424_v28 }
 0x8b6   :  { %v1253_v62 = vadd.f32 %v1247_v52, %v1204_v58  ;;  %v1251_v63 = vpop.f32.mrb[23].mxu1 }
 0x8b7   :  { %v1175_v0 = vpop.f32.mrb[20].mxu0 }
 0x8b8   :  { %v1933_v3 = vmul.f32 -1.442695, %v1253_v62  ;;  %v1176_v7 = vadd.f32 %v1175_v0, %v2409_v1  ;;  %v1177_v11 = vpop.f32.mrb[21].mxu0 }
 0x8b9   :  { %v1179_v9 = vpop.f32.mrb[22].mxu0  ;;  %v1178_v35 = vadd.f32 %v1177_v11, %v2421_v27 }
 0x8ba   :  { %1999 = vpow2.f32 %v1933_v3  ;;  %v1182_v10 = vadd.f32 %v1176_v7, %v1133_v8  ;;  %v1180_v13 = vpop.f32.mrb[23].mxu0 }
 0x8bc   :  { %v1931_v57 = vmul.f32 -1.442695, %v1182_v10 }
 0x8be   :  { %2001 = vpow2.f32 %v1931_v57 }
 0x8c4   :  { %v2000_v15 = vpop.eup %1999 }
 0x8c5   :  { %v1257_v16 = vadd.f32 1.0, %v2000_v15  ;;  %v1372_v15 = vld [vmem:[#allocation3 + $0x8] sm:$0xf] }
 0x8c7   :  { %2003 = vrcp.f32 %v1257_v16 }
 0x8c8   :  { %v2002_v17 = vpop.eup %2001 }
 0x8c9   :  { %v1186_v19 = vadd.f32 1.0, %v2002_v17 }
 0x8cb   :  { %2005 = vrcp.f32 %v1186_v19 }
 0x8d1   :  { %v2004_v24 = vpop.eup %2003 }
 0x8d2   :  { %v1260_v29 = vmul.f32 %v2004_v24, %v1249_v20  ;;  %v1266_v59 = vsub.f32 1.0, %v2004_v24  ;;  %v1272_v52 = vmul.f32 %v2004_v24, %v2543_v34 }
 0x8d4   :  { %v1264_v32 = vadd.f32 %v1262_v26, %v1260_v29 }
 0x8d5   :  { %v2006_v39 = vpop.eup %2005 }
 0x8d6   :  { %2007 = vtanh.f32 %v1264_v32  ;;  %v1189_v42 = vmul.f32 %v2006_v39, %v1178_v35  ;;  %v1195_v61 = vsub.f32 1.0, %v2006_v39  ;;  %v1201_v63 = vmul.f32 %v2006_v39, %v2548_v44  ;;  %v1301_v32 = vld [vmem:[#allocation2 + $0x14] sm:$0xf] }
 0x8d8   :  { %v1193_v43 = vadd.f32 %v1191_v41, %v1189_v42 }
 0x8da   :  { %2009 = vtanh.f32 %v1193_v43 }
 0x8e0   :  { %v2008_v45 = vpop.eup %2007 }
 0x8e1   :  { %1268 = vrot.lane.b32.xlu0 %v2008_v45, %s2051_s4 }
 0x8e4   :  { %v2010_v47 = vpop.eup %2009 }
 0x8e5   :  { %1197 = vrot.lane.b32.xlu1 %v2010_v47, %s2051_s4 }
 0x953   :  { %v1269_v50 = vpop.permute.xlu0 %1268 }
 0x954   :  { %v1271_v53 = vmul.f32 %v1269_v50, %v1266_v59  ;;  %v1430_v50 = vrot.slane %v1372_v15, 2 }
 0x956   :  { %v2581_v58 = vadd.f32 %v1272_v52, %v1271_v53 }
 0x957   :  { %v1198_v62 = vpop.permute.xlu1 %1197 }
 0x958   :  { %v1200_v0 = vmul.f32 %v1198_v62, %v1195_v61  ;;  %v1373_v3 = vpack.c.bf16 %v2581_v58, %v2581_v58 }
 0x95a   :  { %v2586_v7 = vadd.f32 %v1201_v63, %v1200_v0  ;;  %1375 = vrot.lane.b32.xlu0 %v1373_v3, %s2051_s4  ;;  %v1359_v63 = vrot.slane %v1301_v32, 2 }
 0x95c   :  { %v1302_v11 = vpack.c.bf16 %v2586_v7, %v2586_v7 }
 0x95e   :  { %1304 = vrot.lane.b32.xlu1 %v1302_v11, %s2051_s4 }
 0x9cc   :  { %v1376_v8 = vpop.permute.xlu0 %1375 }
 0x9cd   :  { %1936 = vmatmul.mubr.msk.bf16.vlgmr.msra.gmra.mrb[24].mxu1 %vm453_vm4, %v1376_v8 }
 0x9ce   :  { %1549 = vmatpush1.bf16.msra.mxu1 %v2220_v18  ;;  %1580 = vmatprep.mubr.bf16.mxu1 %v2047_v4 }
 0x9cf   :  { %1550 = vmatprep.subr.bf16.mxu1 %v2230_v23 }
 0x9d0   :  { %v1305_v9 = vpop.permute.xlu1 %1304 }
 0x9d1   :  { %1934 = vmatmul.mubr.msk.bf16.vlgmr.msra.gmra.mrb[24].mxu0 %vm453_vm4, %v1305_v9 }
 0x9d2   :  { %1478 = vmatpush1.bf16.msra.mxu0 %v2228_v21  ;;  %1551 = vmatpush1.bf16.msra.mxu1 %v2253_v33 }
 0x9d3   :  { %1479 = vmatprep.subr.bf16.mxu0 %v2235_v25  ;;  %1552 = vmatprep.subr.bf16.mxu1 %v2265_v37 }
 0x9d4   :  { %1509 = vmatprep.mubr.bf16.mxu0 %v2047_v4 }
 0x9d6   :  { %1480 = vmatpush1.bf16.msra.mxu0 %v2262_v36  ;;  %1553 = vmatpush1.bf16.msra.mxu1 %v2291_v46 }
 0x9d7   :  { %1481 = vmatprep.subr.bf16.mxu0 %v2271_v40  ;;  %1554 = vmatprep.subr.bf16.mxu1 %v2300_v49 }
 0x9da   :  { %1482 = vmatpush1.bf16.msra.mxu0 %v2297_v48  ;;  %1555 = vmatpush1.bf16.msra.mxu1 %v2315_v54 }
 0x9db   :  { %1483 = vmatprep.subr.bf16.mxu0 %v2306_v51  ;;  %1715 = vmatprep.subr.bf16.mxu1 %v2154_v31 }
 0x9de   :  { %1484 = vmatpush1.bf16.msra.mxu0 %v2318_v56 }
 0x9df   :  { %1645 = vmatprep.subr.bf16.mxu0 %v2187_v55 }
 0xaa0   :  { %v1414_v10 = vpop.f32.mrb[24].mxu1 }
 0xaa1   :  { %v1415_v13 = vadd.f32 %v1414_v10, %v2412_v2  ;;  %v1416_v57 = vpop.f32.mrb[25].mxu1 }
 0xaa2   :  { %v1418_v16 = vpop.f32.mrb[26].mxu1  ;;  %v1417_v47 = vadd.f32 %v1416_v57, %v2424_v28 }
 0xaa3   :  { %v1421_v17 = vadd.f32 %v1415_v13, %v1372_v15  ;;  %v1419_v19 = vpop.f32.mrb[27].mxu1 }
 0xaa4   :  { %v1343_v20 = vpop.f32.mrb[24].mxu0 }
 0xaa5   :  { %v1937_v24 = vmul.f32 -1.442695, %v1421_v17  ;;  %v1344_v26 = vadd.f32 %v1343_v20, %v2409_v1  ;;  %v1345_v29 = vpop.f32.mrb[25].mxu0 }
 0xaa6   :  { %v1347_v35 = vpop.f32.mrb[26].mxu0  ;;  %v1346_v61 = vadd.f32 %v1345_v29, %v2421_v27 }
 0xaa7   :  { %2011 = vpow2.f32 %v1937_v24  ;;  %v1350_v31 = vadd.f32 %v1344_v26, %v1301_v32  ;;  %v1348_v39 = vpop.f32.mrb[27].mxu0 }
 0xaa9   :  { %v1935_v41 = vmul.f32 -1.442695, %v1350_v31 }
 0xaab   :  { %2013 = vpow2.f32 %v1935_v41 }
 0xab1   :  { %v2012_v55 = vpop.eup %2011 }
 0xab2   :  { %v1425_v42 = vadd.f32 1.0, %v2012_v55 }
 0xab4   :  { %2015 = vrcp.f32 %v1425_v42 }
 0xab5   :  { %v2014_v43 = vpop.eup %2013 }
 0xab6   :  { %v1354_v45 = vadd.f32 1.0, %v2014_v43 }
 0xab8   :  { %2017 = vrcp.f32 %v1354_v45 }
 0xabe   :  { %v2016_v59 = vpop.eup %2015 }
 0xabf   :  { %v1428_v52 = vmul.f32 %v2016_v59, %v1417_v47  ;;  %v1434_v9 = vsub.f32 1.0, %v2016_v59  ;;  %v1440_v13 = vmul.f32 %v2016_v59, %v2581_v58 }
 0xac1   :  { %v1432_v53 = vadd.f32 %v1430_v50, %v1428_v52 }
 0xac2   :  { %v2018_v62 = vpop.eup %2017 }
 0xac3   :  { %2019 = vtanh.f32 %v1432_v53  ;;  %v1357_v0 = vmul.f32 %v2018_v62, %v1346_v61  ;;  %v1363_v16 = vsub.f32 1.0, %v2018_v62  ;;  %v1369_v19 = vmul.f32 %v2018_v62, %v2586_v7 }
 0xac5   :  { %v1361_v3 = vadd.f32 %v1359_v63, %v1357_v0 }
 0xac7   :  { %2021 = vtanh.f32 %v1361_v3 }
 0xacd   :  { %v2020_v11 = vpop.eup %2019 }
 0xace   :  { %1436 = vrot.lane.b32.xlu0 %v2020_v11, %s2051_s4 }
 0xad1   :  { %v2022_v8 = vpop.eup %2021 }
 0xad2   :  { %1365 = vrot.lane.b32.xlu1 %v2022_v8, %s2051_s4 }
 0xb40   :  { %v1437_v10 = vpop.permute.xlu0 %1436 }
 0xb41   :  { %v1439_v57 = vmul.f32 %v1437_v10, %v1434_v9 }
 0xb43   :  { %v2619_v15 = vadd.f32 %v1440_v13, %v1439_v57 }
 0xb44   :  { %v1366_v17 = vpop.permute.xlu1 %1365 }
 0xb45   :  { %v1368_v20 = vmul.f32 %v1366_v17, %v1363_v16  ;;  %v1541_v24 = vpack.c.bf16 %v2619_v15, %v2619_v15 }
 0xb47   :  { %v2624_v26 = vadd.f32 %v1369_v19, %v1368_v20  ;;  %1543 = vrot.lane.b32.xlu0 %v1541_v24, %s2051_s4 }
 0xb49   :  { %v1470_v29 = vpack.c.bf16 %v2624_v26, %v2624_v26 }
 0xb4b   :  { %1472 = vrot.lane.b32.xlu1 %v1470_v29, %s2051_s4 }
 0xbb9   :  { %v1544_v32 = vpop.permute.xlu0 %1543 }
 0xbba   :  { %1940 = vmatmul.mubr.msk.bf16.vlgmr.msra.gmra.mrb[28].mxu1 %vm453_vm4, %v1544_v32 }
 0xbbb   :  { %1716 = vmatpush1.bf16.msra.mxu1 %v2220_v18  ;;  %1747 = vmatprep.mubr.bf16.mxu1 %v2047_v4 }
 0xbbc   :  { %1717 = vmatprep.subr.bf16.mxu1 %v2230_v23  ;;  %v1540_v23 = vld [vmem:[#allocation3 + $0x4] sm:$0xf] }
 0xbbd   :  { %v1473_v35 = vpop.permute.xlu1 %1472  ;;  %v1598_v47 = vrot.slane %v1540_v23, 2 }
 0xbbe   :  { %1938 = vmatmul.mubr.msk.bf16.vlgmr.msra.gmra.mrb[28].mxu0 %vm453_vm4, %v1473_v35 }
 0xbbf   :  { %1646 = vmatpush1.bf16.msra.mxu0 %v2228_v21  ;;  %1718 = vmatpush1.bf16.msra.mxu1 %v2253_v33 }
 0xbc0   :  { %1647 = vmatprep.subr.bf16.mxu0 %v2235_v25  ;;  %1719 = vmatprep.subr.bf16.mxu1 %v2265_v37 }
 0xbc1   :  { %1677 = vmatprep.mubr.bf16.mxu0 %v2047_v4 }
 0xbc3   :  { %1648 = vmatpush1.bf16.msra.mxu0 %v2262_v36  ;;  %1720 = vmatpush1.bf16.msra.mxu1 %v2291_v46 }
 0xbc4   :  { %1649 = vmatprep.subr.bf16.mxu0 %v2271_v40  ;;  %1721 = vmatprep.subr.bf16.mxu1 %v2300_v49 }
 0xbc7   :  { %1650 = vmatpush1.bf16.msra.mxu0 %v2297_v48  ;;  %1722 = vmatpush1.bf16.msra.mxu1 %v2315_v54  ;;  %v1469_v48 = vld [vmem:[#allocation2 + $0x18] sm:$0xf] }
 0xbc8   :  { %1651 = vmatprep.subr.bf16.mxu0 %v2306_v51  ;;  %v1527_v61 = vrot.slane %v1469_v48, 2 }
 0xbcb   :  { %1652 = vmatpush1.bf16.msra.mxu0 %v2318_v56 }
 0xc8d   :  { %v1582_v18 = vpop.f32.mrb[28].mxu1 }
 0xc8e   :  { %v1583_v21 = vadd.f32 %v1582_v18, %v2412_v2  ;;  %v1584_v4 = vpop.f32.mrb[29].mxu1 }
 0xc8f   :  { %v1586_v25 = vpop.f32.mrb[30].mxu1  ;;  %v1585_v43 = vadd.f32 %v1584_v4, %v2424_v28 }
 0xc90   :  { %v1589_v33 = vadd.f32 %v1583_v21, %v1540_v23  ;;  %v1587_v36 = vpop.f32.mrb[31].mxu1  ;;  %v1707_v23 = vld [vmem:[#allocation3] sm:$0xf] }
 0xc91   :  { %v1511_v37 = vpop.f32.mrb[28].mxu0 }
 0xc92   :  { %v1941_v40 = vmul.f32 -1.442695, %v1589_v33  ;;  %v1512_v46 = vadd.f32 %v1511_v37, %v2409_v1  ;;  %v1513_v49 = vpop.f32.mrb[29].mxu0 }
 0xc93   :  { %v1515_v31 = vpop.f32.mrb[30].mxu0  ;;  %v1514_v52 = vadd.f32 %v1513_v49, %v2421_v27 }
 0xc94   :  { %2023 = vpow2.f32 %v1941_v40  ;;  %v1518_v54 = vadd.f32 %v1512_v46, %v1469_v48  ;;  %v1516_v51 = vpop.f32.mrb[31].mxu0  ;;  %v1637_v48 = vld [vmem:[#allocation2 + $0x1c] sm:$0xf] }
 0xc96   :  { %v1939_v39 = vmul.f32 -1.442695, %v1518_v54 }
 0xc98   :  { %2025 = vpow2.f32 %v1939_v39 }
 0xc9e   :  { %v2024_v56 = vpop.eup %2023 }
 0xc9f   :  { %v1593_v41 = vadd.f32 1.0, %v2024_v56 }
 0xca1   :  { %2027 = vrcp.f32 %v1593_v41 }
 0xca2   :  { %v2026_v55 = vpop.eup %2025 }
 0xca3   :  { %v1522_v42 = vadd.f32 1.0, %v2026_v55 }
 0xca5   :  { %2029 = vrcp.f32 %v1522_v42 }
 0xcab   :  { %v2028_v45 = vpop.eup %2027 }
 0xcac   :  { %v1596_v59 = vmul.f32 %v2028_v45, %v1585_v43  ;;  %v1602_v11 = vsub.f32 1.0, %v2028_v45  ;;  %v1608_v9 = vmul.f32 %v2028_v45, %v2619_v15  ;;  %v1765_v45 = vrot.slane %v1707_v23, 2 }
 0xcae   :  { %v1600_v50 = vadd.f32 %v1598_v47, %v1596_v59 }
 0xcaf   :  { %v2030_v53 = vpop.eup %2029 }
 0xcb0   :  { %2031 = vtanh.f32 %v1600_v50  ;;  %v1525_v62 = vmul.f32 %v2030_v53, %v1514_v52  ;;  %v1531_v57 = vsub.f32 1.0, %v2030_v53  ;;  %v1537_v17 = vmul.f32 %v2030_v53, %v2624_v26 }
 0xcb1   :  { %v1695_v52 = vrot.slane %v1637_v48, 2 }
 0xcb2   :  { %v1529_v63 = vadd.f32 %v1527_v61, %v1525_v62 }
 0xcb4   :  { %2033 = vtanh.f32 %v1529_v63  ;;  %v622_v63 = vrot.slane %v2430_v60, %v2152_v30  ;;  %v1126_v60 = vrot.slane %v2543_v34, %v2152_v30  ;;  %v945_v34 = vrot.slane %v2510_v22, %v2152_v30 }
 0xcba   :  { %v2032_v0 = vpop.eup %2031 }
 0xcbb   :  { %1604 = vrot.lane.b32.xlu0 %v2032_v0, %s2051_s4 }
 0xcbe   :  { %v2034_v3 = vpop.eup %2033 }
 0xcbf   :  { %1533 = vrot.lane.b32.xlu1 %v2034_v3, %s2051_s4  ;;  %v1294_v3 = vrot.slane %v2581_v58, %v2152_v30  ;;  %v609_v58 = vrot.slane %v2434_v5, %v2152_v30 }
 0xd2d   :  { %v1605_v8 = vpop.permute.xlu0 %1604 }
 0xd2e   :  { %v1607_v10 = vmul.f32 %v1605_v8, %v1602_v11  ;;  %v1281_v11 = vrot.slane %v2586_v7, %v2152_v30 }
 0xd30   :  { %v2655_v13 = vadd.f32 %v1608_v9, %v1607_v10 }
 0xd31   :  { %v1534_v16 = vpop.permute.xlu1 %1533 }
 0xd32   :  { %v1536_v19 = vmul.f32 %v1534_v16, %v1531_v57  ;;  %v1708_v20 = vpack.c.bf16 %v2655_v13, %v2655_v13 }
 0xd34   :  { %v2660_v24 = vadd.f32 %v1537_v17, %v1536_v19  ;;  %1710 = vrot.lane.b32.xlu0 %v1708_v20, %s2051_s4 }
 0xd36   :  { %v1638_v29 = vpack.c.bf16 %v2660_v24, %v2660_v24 }
 0xd38   :  { %1640 = vrot.lane.b32.xlu1 %v1638_v29, %s2051_s4 }
 0xda6   :  { %v1711_v32 = vpop.permute.xlu0 %1710 }
 0xda7   :  { %1944 = vmatmul.mubr.msk.bf16.vlgmr.msra.gmra.mrb[32].mxu1 %vm453_vm4, %v1711_v32 }
 0xdaa   :  { %v1641_v35 = vpop.permute.xlu1 %1640 }
 0xdab   :  { %1942 = vmatmul.mubr.msk.bf16.vlgmr.msra.gmra.mrb[32].mxu0 %vm453_vm4, %v1641_v35 }
 0xe7a   :  { %v1749_v18 = vpop.f32.mrb[32].mxu1 }
 0xe7b   :  { %v1750_v21 = vadd.f32 %v1749_v18, %v2412_v2  ;;  %v1751_v4 = vpop.f32.mrb[33].mxu1  ;;  %v1113_v18 = vrot.slane %v2548_v44, %v2152_v30 }
 0xe7c   :  { %v1753_v25 = vpop.f32.mrb[34].mxu1  ;;  %v1752_v42 = vadd.f32 %v1751_v4, %v2424_v28  ;;  %v790_v28 = vrot.slane %v2467_v6, %v2152_v30  ;;  %v1462_v6 = vrot.slane %v2619_v15, %v2152_v30  ;;  %v1617_v15 = vrot.slane %v2660_v24, %v2152_v30 }
 0xe7d   :  { %v1756_v33 = vadd.f32 %v1750_v21, %v1707_v23  ;;  %v1754_v36 = vpop.f32.mrb[35].mxu1  ;;  %v1449_v25 = vrot.slane %v2624_v26, %v2152_v30 }
 0xe7e   :  { %v1679_v37 = vpop.f32.mrb[32].mxu0 }
 0xe7f   :  { %v1945_v40 = vmul.f32 -1.442695, %v1756_v33  ;;  %v1680_v46 = vadd.f32 %v1679_v37, %v2409_v1  ;;  %v1681_v49 = vpop.f32.mrb[33].mxu0 }
 0xe80   :  { %v1683_v31 = vpop.f32.mrb[34].mxu0  ;;  %v1682_v59 = vadd.f32 %v1681_v49, %v2421_v27  ;;  %v958_v27 = vrot.slane %v2505_v14, %v2152_v30  ;;  %v1630_v14 = vrot.slane %v2655_v13, %v2152_v30 }
 0xe81   :  { %2035 = vpow2.f32 %v1945_v40  ;;  %v1686_v54 = vadd.f32 %v1680_v46, %v1637_v48  ;;  %v1684_v51 = vpop.f32.mrb[35].mxu0 }
 0xe83   :  { %v1943_v39 = vmul.f32 -1.442695, %v1686_v54 }
 0xe85   :  { %2037 = vpow2.f32 %v1943_v39 }
 0xe8b   :  { %v2036_v56 = vpop.eup %2035 }
 0xe8c   :  { %v1760_v41 = vadd.f32 1.0, %v2036_v56 }
 0xe8e   :  { %2039 = vrcp.f32 %v1760_v41 }
 0xe8f   :  { %v2038_v2 = vpop.eup %2037 }
 0xe90   :  { %v1690_v55 = vadd.f32 1.0, %v2038_v2 }
 0xe92   :  { %2041 = vrcp.f32 %v1690_v55 }
 0xe98   :  { %v2040_v43 = vpop.eup %2039 }
 0xe99   :  { %v1763_v47 = vmul.f32 %v2040_v43, %v1752_v42  ;;  %v1769_v8 = vsub.f32 1.0, %v2040_v43  ;;  %v1775_v5 = vmul.f32 %v2040_v43, %v2655_v13  ;;  %v777_v13 = vrot.slane %v2472_v12, %v2152_v30 }
 0xe9b   :  { %v1767_v1 = vadd.f32 %v1765_v45, %v1763_v47 }
 0xe9c   :  { %v2042_v50 = vpop.eup %2041 }
 0xe9d   :  { %2043 = vtanh.f32 %v1767_v1  ;;  %v1693_v53 = vmul.f32 %v2042_v50, %v1682_v59  ;;  %v1699_v20 = vsub.f32 1.0, %v2042_v50  ;;  %v1705_v21 = vmul.f32 %v2042_v50, %v2660_v24 }
 0xe9f   :  { %v1697_v61 = vadd.f32 %v1695_v52, %v1693_v53 }
 0xea1   :  { %2045 = vtanh.f32 %v1697_v61 }
 0xea7   :  { %v2044_v62 = vpop.eup %2043 }
 0xea8   :  { %1771 = vrot.lane.b32.xlu0 %v2044_v62, %s2051_s4 }
 0xeab   :  { %v2046_v0 = vpop.eup %2045 }
 0xeac   :  { %623 = vrot.lane.b32.xlu0 %v622_v63, %s2051_s4  ;;  %1701 = vrot.lane.b32.xlu1 %v2046_v0, %s2051_s4 }
 0xeb0   :  { %959 = vrot.lane.b32.xlu0 %v958_v27, %s2051_s4  ;;  %791 = vrot.lane.b32.xlu1 %v790_v28, %s2051_s4 }
 0xeb4   :  { %1295 = vrot.lane.b32.xlu0 %v1294_v3, %s2051_s4  ;;  %1127 = vrot.lane.b32.xlu1 %v1126_v60, %s2051_s4 }
 0xeb8   :  { %1631 = vrot.lane.b32.xlu0 %v1630_v14, %s2051_s4  ;;  %1463 = vrot.lane.b32.xlu1 %v1462_v6, %s2051_s4 }
 0xebc   :  { %610 = vrot.lane.b32.xlu0 %v609_v58, %s2051_s4 }
 0xec0   :  { %946 = vrot.lane.b32.xlu0 %v945_v34, %s2051_s4 }
 0xec4   :  { %1282 = vrot.lane.b32.xlu0 %v1281_v11, %s2051_s4 }
 0xec8   :  { %1618 = vrot.lane.b32.xlu0 %v1617_v15, %s2051_s4 }
 0xf1a   :  { %v1772_v9 = vpop.permute.xlu0 %1771 }
 0xf1b   :  { %v1774_v10 = vmul.f32 %v1772_v9, %v1769_v8 }
 0xf1d   :  { %v1776_v57 = vadd.f32 %v1775_v5, %v1774_v10 }
 0xf1e   :  { %v624_v22 = vpop.permute.xlu0 %623  ;;  %v1702_v16 = vpop.permute.xlu1 %1701 }
 0xf1f   :  { %627 = vst.msk [vmem:[#allocation5 + $0xe] sm:$0x3] %vm613_vm5, %v624_v22  ;;  %v1797_v7 = vrot.slane %v1776_v57, %v2152_v30  ;;  %v1704_v35 = vmul.f32 %v1702_v16, %v1699_v20 }
 0xf21   :  { %1798 = vrot.lane.b32.xlu1 %v1797_v7, %s2051_s4  ;;  %v1706_v12 = vadd.f32 %v1705_v21, %v1704_v35 }
 0xf22   :  { %v960_v17 = vpop.permute.xlu0 %959  ;;  %v792_v19 = vpop.permute.xlu1 %791 }
 0xf23   :  { %963 = vst.msk [vmem:[#allocation5 + $0xa] sm:$0x3] %vm613_vm5, %v960_v17  ;;  %795 = vst.msk [vmem:[#allocation5 + $0xc] sm:$0x3] %vm613_vm5, %v792_v19  ;;  %v1784_v44 = vrot.slane %v1706_v12, %v2152_v30 }
 0xf25   :  { %778 = vrot.lane.b32.xlu1 %v777_v13, %s2051_s4 }
 0xf26   :  { %v1296_v29 = vpop.permute.xlu0 %1295  ;;  %v1128_v32 = vpop.permute.xlu1 %1127  ;;  %v1817_v31 = vld [vmem:[#allocation5 + $0xe] sm:$0x3] }
 0xf27   :  { %1299 = vst.msk [vmem:[#allocation5 + $0x6] sm:$0x3] %vm613_vm5, %v1296_v29  ;;  %1131 = vst.msk [vmem:[#allocation5 + $0x8] sm:$0x3] %vm613_vm5, %v1128_v32 }
 0xf29   :  { %1114 = vrot.lane.b32.xlu1 %v1113_v18, %s2051_s4 }
 0xf2a   :  { %v1632_v4 = vpop.permute.xlu0 %1631  ;;  %v1464_v23 = vpop.permute.xlu1 %1463  ;;  %v1815_v48 = vld [vmem:[#allocation5 + $0xa] sm:$0x3]  ;;  %v1816_v2 = vld [vmem:[#allocation5 + $0xc] sm:$0x3] }
 0xf2b   :  { %1635 = vst.msk [vmem:[#allocation5 + $0x2] sm:$0x3] %vm613_vm5, %v1632_v4  ;;  %1467 = vst.msk [vmem:[#allocation5 + $0x4] sm:$0x3] %vm613_vm5, %v1464_v23 }
 0xf2d   :  { %1450 = vrot.lane.b32.xlu1 %v1449_v25, %s2051_s4 }
 0xf2e   :  { %v611_v33 = vpop.permute.xlu0 %610  ;;  %v1814_v26 = vld [vmem:[#allocation5 + $0x8] sm:$0x3]  ;;  %v1813_v46 = vld [vmem:[#allocation5 + $0x6] sm:$0x3] }
 0xf2f   :  { %614 = vst.msk [vmem:[#allocation4] sm:$0x3] %vm613_vm5, %v611_v33 }
 0xf31   :  { %1785 = vrot.lane.b32.xlu1 %v1784_v44, %s2051_s4 }
 0xf32   :  { %v947_v24 = vpop.permute.xlu0 %946  ;;  %v1812_v36 = vld [vmem:[#allocation5 + $0x4] sm:$0x3]  ;;  %v1811_v37 = vld [vmem:[#allocation5 + $0x2] sm:$0x3] }
 0xf33   :  { %950 = vst.msk [vmem:[#allocation4 + $0x4] sm:$0x3] %vm613_vm5, %v947_v24  ;;  %1830 = vrot.lane.b32.xlu0 %v1812_v36, %s2051_s4 }
 0xf35   :  { %1828 = vrot.lane.b32.xlu1 %v1811_v37, %s2051_s4 }
 0xf36   :  { %v1283_v40 = vpop.permute.xlu0 %1282  ;;  %v1802_v53 = vld [vmem:[#allocation4] sm:$0x3] }
 0xf37   :  { %1286 = vst.msk [vmem:[#allocation4 + $0x8] sm:$0x3] %vm613_vm5, %v1283_v40  ;;  %1834 = vrot.lane.b32.xlu0 %v1814_v26, %s2051_s4 }
 0xf39   :  { %1832 = vrot.lane.b32.xlu1 %v1813_v46, %s2051_s4 }
 0xf3a   :  { %v1619_v49 = vpop.permute.xlu0 %1618  ;;  %v1804_v61 = vld [vmem:[#allocation4 + $0x4] sm:$0x3] }
 0xf3b   :  { %1622 = vst.msk [vmem:[#allocation4 + $0xc] sm:$0x3] %vm613_vm5, %v1619_v49 }
 0xf3d   :  { %1836 = vrot.lane.b32.xlu1 %v1815_v48, %s2051_s4 }
 0xf3e   :  { %v1806_v11 = vld [vmem:[#allocation4 + $0x8] sm:$0x3] }
 0xf41   :  { %1840 = vrot.lane.b32.xlu1 %v1817_v31, %s2051_s4 }
 0xf42   :  { %v1808_v9 = vld [vmem:[#allocation4 + $0xc] sm:$0x3] }
 0xf93   :  { %v1799_v54 = vpop.permute.xlu1 %1798 }
 0xf94   :  { %1801 = vst.msk [vmem:[#allocation5] sm:$0x3] %vm613_vm5, %v1799_v54 }
 0xf97   :  { %v779_v51 = vpop.permute.xlu1 %778 }
 0xf98   :  { %782 = vst.msk [vmem:[#allocation4 + $0x2] sm:$0x3] %vm613_vm5, %v779_v51 }
 0xf9b   :  { %v1115_v39 = vpop.permute.xlu1 %1114  ;;  %v1810_v56 = vld [vmem:[#allocation5] sm:$0x3] }
 0xf9c   :  { %1118 = vst.msk [vmem:[#allocation4 + $0x6] sm:$0x3] %vm613_vm5, %v1115_v39  ;;  %1826 = vrot.lane.b32.xlu0 %v1810_v56, %s2051_s4 }
 0xf9f   :  { %v1451_v41 = vpop.permute.xlu1 %1450  ;;  %v1803_v62 = vld [vmem:[#allocation4 + $0x2] sm:$0x3] }
 0xfa0   :  { %1454 = vst.msk [vmem:[#allocation4 + $0xa] sm:$0x3] %vm613_vm5, %v1451_v41  ;;  %1838 = vrot.lane.b32.xlu0 %v1816_v2, %s2051_s4 }
 0xfa3   :  { %v1786_v55 = vpop.permute.xlu1 %1785  ;;  %v1805_v59 = vld [vmem:[#allocation4 + $0x6] sm:$0x3] }
 0xfa4   :  { %1789 = vst.msk [vmem:[#allocation4 + $0xe] sm:$0x3] %vm613_vm5, %v1786_v55 }
 0xfa5   :  { %v1831_v45 = vpop.permute.xlu0 %1830 }
 0xfa6   :  { %v1852_v27 = vsel %vm453_vm4, %v1804_v61, %v1831_v45 }
 0xfa7   :  { %v1829_v42 = vpop.permute.xlu1 %1828  ;;  %v1807_v6 = vld [vmem:[#allocation4 + $0xa] sm:$0x3] }
 0xfa8   :  { %v1851_v28 = vsel %vm453_vm4, %v1803_v62, %v1829_v42 }
 0xfa9   :  { %v1835_v1 = vpop.permute.xlu0 %1834 }
 0xfaa   :  { %v1854_v10 = vsel %vm453_vm4, %v1806_v11, %v1835_v1 }
 0xfab   :  { %v1833_v43 = vpop.permute.xlu1 %1832  ;;  %v1809_v63 = vld [vmem:[#allocation4 + $0xe] sm:$0x3] }
 0xfac   :  { %v1853_v52 = vsel %vm453_vm4, %v1805_v59, %v1833_v43 }
 0xfad   :  { %v1866_v14 = vcombine.low %v1851_v28, %v1853_v52 }
 0xfaf   :  { %v1837_v47 = vpop.permute.xlu1 %1836  ;;  %v1873_v22 = vrot.slane %v1866_v14, %v2152_v30 }
 0xfb0   :  { %v1855_v34 = vsel %vm453_vm4, %v1807_v6, %v1837_v47 }
 0xfb3   :  { %v1841_v50 = vpop.permute.xlu1 %1840 }
 0xfb4   :  { %v1857_v3 = vsel %vm453_vm4, %v1809_v63, %v1841_v50 }
 0xfb5   :  { %v1882_v15 = vcombine.low %v1855_v34, %v1857_v3 }
 0xfb7   :  { %v1889_v7 = vrot.slane %v1882_v15, %v2152_v30 }
0x100e   :  { %v1827_v0 = vpop.permute.xlu0 %1826 }
0x100f   :  { %v1850_v60 = vsel %vm453_vm4, %v1802_v53, %v1827_v0 }
0x1010   :  { %v1858_v58 = vcombine.low %v1850_v60, %v1852_v27 }
0x1012   :  { %v1865_v8 = vrot.slane %v1858_v58, %v2152_v30  ;;  %v1839_v5 = vpop.permute.xlu0 %1838 }
0x1013   :  { %v1856_v57 = vsel %vm453_vm4, %v1808_v9, %v1839_v5 }
0x1014   :  { %v1874_v16 = vcombine.low %v1854_v10, %v1856_v57  ;;  %v1890_v17 = vcombine.low %v1865_v8, %v1873_v22 }
0x1016   :  { %v1881_v19 = vrot.slane %v1874_v16, %v2152_v30  ;;  %v1897_v20 = vrot.slane %v1890_v17, %v2162_v38 }
0x1018   :  { %v1898_v13 = vcombine.low %v1881_v19, %v1889_v7 }
0x101a   :  { %v1905_v29 = vrot.slane %v1898_v13, %v2162_v38 }
0x101c   :  { %v1906_v32 = vcombine.low %v1897_v20, %v1905_v29  ;;  %v1907_v35 = vcombine.high %v1897_v20, %v1905_v29 }
0x101e   :  { %1908 = vst [vmem:[%s2775_s9] sm:$0xff] %v1906_v32  ;;  %1909 = vst [vmem:[%s2775_s9 + $0x8] sm:$0xff] %v1907_v35 }

</bundles_post_ra>
